<compile_context>
chip_gen: v7x
topology: tpu7x:2x2x1
jax: 0.10.0
libtpu: 0.0.40
codegen_flags: <defaults>
</compile_context>

<pallas_src>
import numpy as np
import jax
import jax.numpy as jnp
from jax.experimental import pallas as pl
from jax.experimental.pallas import tpu as pltpu

FEATURES = 4      # input node feature dim (`features = 4` in the module)
HIDDEN = 32       # NNConv output channels
EDGE_DIM = 2      # edge_attr dim (Linear(2, 16))
EDGE_HID = 16
LANE = 128        # channel dims padded to one full vreg lane width


# ----------------------------------------------------------------------------
# Fused Pallas kernel: 3x NNConv(mean)+ReLU, then fc2(relu(fc1(x)))
# ----------------------------------------------------------------------------
def fused_net_mp_kernel(x0_ref, ea_ref, gat_ref, sct_ref,
                        c1_w1, c1_b1, c1_w2, c1_b2, c1_root, c1_bias,
                        c2_w1, c2_b1, c2_w2, c2_b2, c2_root, c2_bias,
                        c3_w1, c3_b1, c3_w2, c3_b2, c3_root, c3_bias,
                        f1_w, f1_b, f2_w, f2_b,
                        o_ref):
    ea = ea_ref[...]          # [E_pad, 2]
    G = gat_ref[...]          # [E_pad, N_pad]  one-hot of src (zero rows for pad edges)
    S = sct_ref[...]          # [N_pad, E_pad]  1/deg at (dst[e], e) (mean aggregation)
    x = x0_ref[...]           # [N_pad, 128]    lane-padded node features

    def nnconv(x, cin, w1_ref, b1_ref, w2_ref, b2_ref, root_ref, bias_ref):
        # edge-conditioned weights: [E,2] -> [E,16] -> [E, cin*128]  (cout padded 32->128)
        h = jnp.maximum(
            jnp.dot(ea, w1_ref[...], preferred_element_type=jnp.float32) + b1_ref[...],
            0.0)
        wflat = jnp.dot(h, w2_ref[...], preferred_element_type=jnp.float32) + b2_ref[...]

        # gather x[src[e]] as one MXU matmul (no dynamic sublane copies)
        xs = jnp.dot(G, x, preferred_element_type=jnp.float32)        # [E_pad, 128]

        # per-edge x_j @ W_e: each wflat chunk is a whole aligned 128-lane vreg
        msg = xs[:, 0:1] * wflat[:, 0:LANE]
        for c in range(1, cin):
            msg = msg + xs[:, c:c + 1] * wflat[:, c * LANE:(c + 1) * LANE]

        # mean aggregation at destination nodes as one MXU matmul (1/deg baked into S)
        agg = jnp.dot(S, msg, preferred_element_type=jnp.float32)     # [N_pad, 128]

        out = (agg
               + jnp.dot(x, root_ref[...], preferred_element_type=jnp.float32)
               + bias_ref[...])
        return jnp.maximum(out, 0.0)                                  # F.relu after each conv

    x = nnconv(x, FEATURES, c1_w1, c1_b1, c1_w2, c1_b2, c1_root, c1_bias)
    x = nnconv(x, HIDDEN, c2_w1, c2_b1, c2_w2, c2_b2, c2_root, c2_bias)
    x = nnconv(x, HIDDEN, c3_w1, c3_b1, c3_w2, c3_b2, c3_root, c3_bias)

    # head: fc2(relu(fc1(x))); padded columns stay exactly zero through the stack
    hh = jnp.maximum(
        jnp.dot(x, f1_w[...], preferred_element_type=jnp.float32) + f1_b[...], 0.0)
    o_ref[...] = jnp.dot(hh, f2_w[...], preferred_element_type=jnp.float32) + f2_b[...]


# ----------------------------------------------------------------------------
# Wrapper: parameter padding (cout -> 128 lanes), gather/scatter matrices,
#          single pallas_call
# ----------------------------------------------------------------------------
def _prep_conv(p, cin):
    cout = p["root"].shape[1]                              # 32
    w2p = jnp.pad(p["w2"].reshape(EDGE_HID, cin, cout),
                  ((0, 0), (0, 0), (0, LANE - cout))).reshape(EDGE_HID, cin * LANE)
    b2p = jnp.pad(p["b2"].reshape(1, cin, cout),
                  ((0, 0), (0, 0), (0, LANE - cout))).reshape(1, cin * LANE)
    rootp = jnp.pad(p["root"], ((0, LANE - cin), (0, LANE - cout)))     # [128,128]
    biasp = jnp.pad(p["bias"], ((0, 0), (0, LANE - cout)))              # [1,128]
    return (p["w1"], p["b1"], w2p, b2p, rootp, biasp)


def _prep_head(p):
    w1p = jnp.pad(p["w1"], ((0, LANE - p["w1"].shape[0]), (0, LANE - p["w1"].shape[1])))
    b1p = jnp.pad(p["b1"], ((0, 0), (0, LANE - p["b1"].shape[1])))
    w2p = jnp.pad(p["w2"], ((0, LANE - p["w2"].shape[0]), (0, LANE - p["w2"].shape[1])))
    b2p = jnp.pad(p["b2"], ((0, 0), (0, LANE - p["b2"].shape[1])))
    return (w1p, b1p, w2p, b2p)


@jax.jit
def net_mp_forward(params, x, edge_index, edge_attr):
    n, fin = x.shape
    n_edges = edge_attr.shape[0]
    n_pad = max(8, ((n + 7) // 8) * 8)
    e_pad = max(8, ((n_edges + 7) // 8) * 8)
    out_dim = params["head"]["w2"].shape[1]

    src = edge_index[0].astype(jnp.int32)
    dst = edge_index[1].astype(jnp.int32)

    # glue: pad input features into a lane-dense slab
    x0 = jnp.zeros((n_pad, LANE), jnp.float32).at[:n, :fin].set(x)
    ea = jnp.zeros((e_pad, EDGE_DIM), jnp.float32).at[:n_edges].set(
        edge_attr.astype(jnp.float32))

    # one-hot gather matrix and mean-scatter matrix (1/deg folded in).
    deg = jnp.zeros((n,), jnp.float32).at[dst].add(1.0)
    inv = 1.0 / jnp.maximum(deg, 1.0)
    eidx = jnp.arange(n_edges, dtype=jnp.int32)
    gat = jnp.zeros((e_pad, n_pad), jnp.float32).at[eidx, src].set(1.0)
    sct = jnp.zeros((n_pad, e_pad), jnp.float32).at[dst, eidx].set(inv[dst])

    c1 = _prep_conv(params["conv1"], FEATURES)
    c2 = _prep_conv(params["conv2"], HIDDEN)
    c3 = _prep_conv(params["conv3"], HIDDEN)
    hd = _prep_head(params["head"])

    inputs = (x0, ea, gat, sct, *c1, *c2, *c3, *hd)

    vmem = pl.BlockSpec(memory_space=pltpu.MemorySpace.VMEM)
    in_specs = [vmem] * len(inputs)

    # advisory cost estimate so XLA schedules the tiny fused call tightly
    flops = 0
    for cin in (FEATURES, HIDDEN, HIDDEN):
        flops += 2 * e_pad * (EDGE_DIM * EDGE_HID + EDGE_HID * cin * LANE)  # edge MLP
        flops += 2 * e_pad * n_pad * LANE                                   # gather matmul
        flops += 2 * e_pad * cin * LANE                                     # per-edge weighting
        flops += 2 * n_pad * e_pad * LANE                                   # mean-scatter matmul
        flops += 2 * n_pad * LANE * LANE                                    # root linear
    flops += 2 * 2 * n_pad * LANE * LANE                                    # fc1 + fc2
    bytes_accessed = sum(int(np.prod(a.shape)) * a.dtype.itemsize for a in inputs)
    bytes_accessed += n_pad * LANE * 4

    out_full = pl.pallas_call(
        fused_net_mp_kernel,
        out_shape=jax.ShapeDtypeStruct((n_pad, LANE), jnp.float32),
        in_specs=in_specs,
        out_specs=vmem,
        cost_estimate=pl.CostEstimate(flops=int(flops), transcendentals=0,
                                      bytes_accessed=int(bytes_accessed)),
    )(*inputs)

    return out_full[:n, :out_dim]


# ----------------------------------------------------------------------------
# Pure-JAX reference (same math, no Pallas) for correctness check
# ----------------------------------------------------------------------------
def nnconv_ref(x, edge_index, edge_attr, p):
    src, dst = edge_index[0], edge_index[1]
    cin = x.shape[1]
    cout = p["root"].shape[1]
    h = jax.nn.relu(edge_attr @ p["w1"] + p["b1"])
    wflat = h @ p["w2"] + p["b2"]
    W = wflat.reshape(-1, cin, cout)
    msg = jnp.einsum("ec,eco->eo", x[src], W)
    n = x.shape[0]
    agg = jnp.zeros((n, cout)).at[dst].add(msg)
    deg = jnp.zeros((n,)).at[dst].add(1.0)
    agg = agg / jnp.maximum(deg, 1.0)[:, None]
    return jax.nn.relu(agg + x @ p["root"] + p["bias"])


def net_mp_ref(params, x, edge_index, edge_attr):
    x = nnconv_ref(x, edge_index, edge_attr, params["conv1"])
    x = nnconv_ref(x, edge_index, edge_attr, params["conv2"])
    x = nnconv_ref(x, edge_index, edge_attr, params["conv3"])
    x = jax.nn.relu(x @ params["head"]["w1"] + params["head"]["b1"])
    return x @ params["head"]["w2"] + params["head"]["b2"]


# ----------------------------------------------------------------------------
# Deterministic parameter init (shapes from Net_MP.__init__)
# ----------------------------------------------------------------------------
def init_params(key):
    def lin(k, fan_in, fan_out):
        kw, kb = jax.random.split(k)
        scale = 1.0 / np.sqrt(fan_in)
        w = jax.random.uniform(kw, (fan_in, fan_out), jnp.float32, -scale, scale)
        b = jax.random.uniform(kb, (1, fan_out), jnp.float32, -scale, scale)
        return w, b

    keys = jax.random.split(key, 16)

    def conv_params(ks, cin, cout):
        w1, b1 = lin(ks[0], EDGE_DIM, EDGE_HID)
        w2, b2 = lin(ks[1], EDGE_HID, cin * cout)
        root, bias = lin(ks[2], cin, cout)
        return dict(w1=w1, b1=b1, w2=w2, b2=b2, root=root, bias=bias)

    conv1 = conv_params(keys[0:3], FEATURES, HIDDEN)   # nn1 -> 4*32 = 128
    conv2 = conv_params(keys[3:6], HIDDEN, HIDDEN)     # nn2 -> 1024
    conv3 = conv_params(keys[6:9], HIDDEN, HIDDEN)     # nn3 -> 1024
    fw1, fb1 = lin(keys[9], HIDDEN, 32)                # fc1: 32 -> 32
    fw2, fb2 = lin(keys[10], 32, 3)                    # fc2: 32 -> 3
    head = dict(w1=fw1, b1=fb1, w2=fw2, b2=fb2)
    return dict(conv1=conv1, conv2=conv2, conv3=conv3, head=head)


# ----------------------------------------------------------------------------
if __name__ == "__main__":
    key = jax.random.PRNGKey(0)
    k_param, k_x, k_ei, k_ea = jax.random.split(key, 4)

    N_NODES, N_EDGES = 16, 32
    params = init_params(k_param)

    x = jax.random.normal(k_x, (N_NODES, FEATURES), dtype=jnp.float32)
    edge_index = jax.random.randint(k_ei, (2, N_EDGES), 0, N_NODES, dtype=jnp.int32)
    edge_attr = jax.random.normal(k_ea, (N_EDGES, EDGE_DIM), dtype=jnp.float32)

    out = jax.block_until_ready(net_mp_forward(params, x, edge_index, edge_attr))
    ref = jax.block_until_ready(net_mp_ref(params, x, edge_index, edge_attr))

    assert out.shape == (N_NODES, 3), out.shape
    np.testing.assert_allclose(np.asarray(out), np.asarray(ref), rtol=2e-2, atol=2e-2)

    print("KERNEL_OK")
</pallas_src>

<mosaic_0001>
module attributes {stable_mosaic.version = 11 : i64} {
  func.func private @main(%arg0: i32) attributes {dimension_semantics = [#tpu.dimension_semantics<core_parallel>], iteration_bounds = array<i64: 2>, tpu.core_type = #tpu.core_type<sc_scalar_subcore>, window_params = []} {
    return
  }
}

module attributes {stable_mosaic.version = 11 : i64} {
  func.func private @main(%arg0: i32) attributes {dimension_semantics = [#tpu.dimension_semantics<core_parallel>], iteration_bounds = array<i64: 2>, tpu.core_type = #tpu.core_type<sc_scalar_subcore>, window_params = []} {
    return
  }
}

module attributes {stable_mosaic.version = 11 : i64} {
  func.func @fused_net_mp_kernel(%arg0: memref<16x128xf32, #tpu.memory_space<vmem>>, %arg1: memref<32x2xf32, #tpu.memory_space<vmem>>, %arg2: memref<32x16xf32, #tpu.memory_space<vmem>>, %arg3: memref<16x32xf32, #tpu.memory_space<vmem>>, %arg4: memref<2x16xf32, #tpu.memory_space<vmem>>, %arg5: memref<1x16xf32, #tpu.memory_space<vmem>>, %arg6: memref<16x512xf32, #tpu.memory_space<vmem>>, %arg7: memref<1x512xf32, #tpu.memory_space<vmem>>, %arg8: memref<128x128xf32, #tpu.memory_space<vmem>>, %arg9: memref<1x128xf32, #tpu.memory_space<vmem>>, %arg10: memref<2x16xf32, #tpu.memory_space<vmem>>, %arg11: memref<1x16xf32, #tpu.memory_space<vmem>>, %arg12: memref<16x4096xf32, #tpu.memory_space<vmem>>, %arg13: memref<1x4096xf32, #tpu.memory_space<vmem>>, %arg14: memref<128x128xf32, #tpu.memory_space<vmem>>, %arg15: memref<1x128xf32, #tpu.memory_space<vmem>>, %arg16: memref<2x16xf32, #tpu.memory_space<vmem>>, %arg17: memref<1x16xf32, #tpu.memory_space<vmem>>, %arg18: memref<16x4096xf32, #tpu.memory_space<vmem>>, %arg19: memref<1x4096xf32, #tpu.memory_space<vmem>>, %arg20: memref<128x128xf32, #tpu.memory_space<vmem>>, %arg21: memref<1x128xf32, #tpu.memory_space<vmem>>, %arg22: memref<128x128xf32, #tpu.memory_space<vmem>>, %arg23: memref<1x128xf32, #tpu.memory_space<vmem>>, %arg24: memref<128x128xf32, #tpu.memory_space<vmem>>, %arg25: memref<1x128xf32, #tpu.memory_space<vmem>>, %arg26: memref<16x128xf32, #tpu.memory_space<vmem>>) attributes {dimension_semantics = [], scalar_prefetch = 0 : i64, scratch_operands = 0 : i64, tpu.core_type = #tpu.core_type<tc>} {
    %c0 = arith.constant 0 : index
    %c0_0 = arith.constant 0 : index
    %0 = vector.load %arg1[%c0, %c0_0] : memref<32x2xf32, #tpu.memory_space<vmem>>, vector<32x2xf32>
    %c0_1 = arith.constant 0 : index
    %c0_2 = arith.constant 0 : index
    %1 = vector.load %arg2[%c0_1, %c0_2] : memref<32x16xf32, #tpu.memory_space<vmem>>, vector<32x16xf32>
    %c0_3 = arith.constant 0 : index
    %c0_4 = arith.constant 0 : index
    %2 = vector.load %arg3[%c0_3, %c0_4] : memref<16x32xf32, #tpu.memory_space<vmem>>, vector<16x32xf32>
    %c0_5 = arith.constant 0 : index
    %c0_6 = arith.constant 0 : index
    %3 = vector.load %arg0[%c0_5, %c0_6] : memref<16x128xf32, #tpu.memory_space<vmem>>, vector<16x128xf32>
    %c0_7 = arith.constant 0 : index
    %c0_8 = arith.constant 0 : index
    %4 = vector.load %arg4[%c0_7, %c0_8] : memref<2x16xf32, #tpu.memory_space<vmem>>, vector<2x16xf32>
    %cst = arith.constant dense<0.000000e+00> : vector<32x16xf32>
    %5 = tpu.matmul %0, %4, %cst {dimension_numbers = #tpu.dot_dimension_numbers<[1], [0], [0], [1], [0, 0, 1, 1], [], []>} : vector<32x2xf32>, vector<2x16xf32>, vector<32x16xf32> -> vector<32x16xf32>
    %c0_9 = arith.constant 0 : index
    %c0_10 = arith.constant 0 : index
    %6 = vector.load %arg5[%c0_9, %c0_10] : memref<1x16xf32, #tpu.memory_space<vmem>>, vector<1x16xf32>
    %7 = vector.broadcast %6 : vector<1x16xf32> to vector<32x16xf32>
    %8 = arith.addf %5, %7 : vector<32x16xf32>
    %cst_11 = arith.constant 0.000000e+00 : f32
    %9 = vector.broadcast %cst_11 : f32 to vector<32x16xf32>
    %10 = arith.maximumf %8, %9 : vector<32x16xf32>
    %c0_12 = arith.constant 0 : index
    %c0_13 = arith.constant 0 : index
    %11 = vector.load %arg6[%c0_12, %c0_13] : memref<16x512xf32, #tpu.memory_space<vmem>>, vector<16x512xf32>
    %cst_14 = arith.constant dense<0.000000e+00> : vector<32x512xf32>
    %12 = tpu.matmul %10, %11, %cst_14 {dimension_numbers = #tpu.dot_dimension_numbers<[1], [0], [0], [1], [0, 0, 1, 1], [], []>} : vector<32x16xf32>, vector<16x512xf32>, vector<32x512xf32> -> vector<32x512xf32>
    %c0_15 = arith.constant 0 : index
    %c0_16 = arith.constant 0 : index
    %13 = vector.load %arg7[%c0_15, %c0_16] : memref<1x512xf32, #tpu.memory_space<vmem>>, vector<1x512xf32>
    %14 = vector.broadcast %13 : vector<1x512xf32> to vector<32x512xf32>
    %15 = arith.addf %12, %14 : vector<32x512xf32>
    %cst_17 = arith.constant dense<0.000000e+00> : vector<32x128xf32>
    %16 = tpu.matmul %1, %3, %cst_17 {dimension_numbers = #tpu.dot_dimension_numbers<[1], [0], [0], [1], [0, 0, 1, 1], [], []>} : vector<32x16xf32>, vector<16x128xf32>, vector<32x128xf32> -> vector<32x128xf32>
    %17 = vector.extract_strided_slice %16 {offsets = [0, 0], sizes = [32, 1], strides = [1, 1]} : vector<32x128xf32> to vector<32x1xf32>
    %18 = vector.extract_strided_slice %15 {offsets = [0, 0], sizes = [32, 128], strides = [1, 1]} : vector<32x512xf32> to vector<32x128xf32>
    %19 = vector.broadcast %17 : vector<32x1xf32> to vector<32x128xf32>
    %20 = arith.mulf %19, %18 : vector<32x128xf32>
    %21 = vector.extract_strided_slice %16 {offsets = [0, 1], sizes = [32, 1], strides = [1, 1]} : vector<32x128xf32> to vector<32x1xf32>
    %22 = vector.extract_strided_slice %15 {offsets = [0, 128], sizes = [32, 128], strides = [1, 1]} : vector<32x512xf32> to vector<32x128xf32>
    %23 = vector.broadcast %21 : vector<32x1xf32> to vector<32x128xf32>
    %24 = arith.mulf %23, %22 : vector<32x128xf32>
    %25 = arith.addf %20, %24 : vector<32x128xf32>
    %26 = vector.extract_strided_slice %16 {offsets = [0, 2], sizes = [32, 1], strides = [1, 1]} : vector<32x128xf32> to vector<32x1xf32>
    %27 = vector.extract_strided_slice %15 {offsets = [0, 256], sizes = [32, 128], strides = [1, 1]} : vector<32x512xf32> to vector<32x128xf32>
    %28 = vector.broadcast %26 : vector<32x1xf32> to vector<32x128xf32>
    %29 = arith.mulf %28, %27 : vector<32x128xf32>
    %30 = arith.addf %25, %29 : vector<32x128xf32>
    %31 = vector.extract_strided_slice %16 {offsets = [0, 3], sizes = [32, 1], strides = [1, 1]} : vector<32x128xf32> to vector<32x1xf32>
    %32 = vector.extract_strided_slice %15 {offsets = [0, 384], sizes = [32, 128], strides = [1, 1]} : vector<32x512xf32> to vector<32x128xf32>
    %33 = vector.broadcast %31 : vector<32x1xf32> to vector<32x128xf32>
    %34 = arith.mulf %33, %32 : vector<32x128xf32>
    %35 = arith.addf %30, %34 : vector<32x128xf32>
    %cst_18 = arith.constant dense<0.000000e+00> : vector<16x128xf32>
    %36 = tpu.matmul %2, %35, %cst_18 {dimension_numbers = #tpu.dot_dimension_numbers<[1], [0], [0], [1], [0, 0, 1, 1], [], []>} : vector<16x32xf32>, vector<32x128xf32>, vector<16x128xf32> -> vector<16x128xf32>
    %c0_19 = arith.constant 0 : index
    %c0_20 = arith.constant 0 : index
    %37 = vector.load %arg8[%c0_19, %c0_20] : memref<128x128xf32, #tpu.memory_space<vmem>>, vector<128x128xf32>
    %cst_21 = arith.constant dense<0.000000e+00> : vector<16x128xf32>
    %38 = tpu.matmul %3, %37, %cst_21 {dimension_numbers = #tpu.dot_dimension_numbers<[1], [0], [0], [1], [0, 0, 1, 1], [], []>} : vector<16x128xf32>, vector<128x128xf32>, vector<16x128xf32> -> vector<16x128xf32>
    %39 = arith.addf %36, %38 : vector<16x128xf32>
    %c0_22 = arith.constant 0 : index
    %c0_23 = arith.constant 0 : index
    %40 = vector.load %arg9[%c0_22, %c0_23] : memref<1x128xf32, #tpu.memory_space<vmem>>, vector<1x128xf32>
    %41 = vector.broadcast %40 : vector<1x128xf32> to vector<16x128xf32>
    %42 = arith.addf %39, %41 : vector<16x128xf32>
    %cst_24 = arith.constant 0.000000e+00 : f32
    %43 = vector.broadcast %cst_24 : f32 to vector<16x128xf32>
    %44 = arith.maximumf %42, %43 : vector<16x128xf32>
    %c0_25 = arith.constant 0 : index
    %c0_26 = arith.constant 0 : index
    %45 = vector.load %arg10[%c0_25, %c0_26] : memref<2x16xf32, #tpu.memory_space<vmem>>, vector<2x16xf32>
    %cst_27 = arith.constant dense<0.000000e+00> : vector<32x16xf32>
    %46 = tpu.matmul %0, %45, %cst_27 {dimension_numbers = #tpu.dot_dimension_numbers<[1], [0], [0], [1], [0, 0, 1, 1], [], []>} : vector<32x2xf32>, vector<2x16xf32>, vector<32x16xf32> -> vector<32x16xf32>
    %c0_28 = arith.constant 0 : index
    %c0_29 = arith.constant 0 : index
    %47 = vector.load %arg11[%c0_28, %c0_29] : memref<1x16xf32, #tpu.memory_space<vmem>>, vector<1x16xf32>
    %48 = vector.broadcast %47 : vector<1x16xf32> to vector<32x16xf32>
    %49 = arith.addf %46, %48 : vector<32x16xf32>
    %cst_30 = arith.constant 0.000000e+00 : f32
    %50 = vector.broadcast %cst_30 : f32 to vector<32x16xf32>
    %51 = arith.maximumf %49, %50 : vector<32x16xf32>
    %c0_31 = arith.constant 0 : index
    %c0_32 = arith.constant 0 : index
    %52 = vector.load %arg12[%c0_31, %c0_32] : memref<16x4096xf32, #tpu.memory_space<vmem>>, vector<16x4096xf32>
    %cst_33 = arith.constant dense<0.000000e+00> : vector<32x4096xf32>
    %53 = tpu.matmul %51, %52, %cst_33 {dimension_numbers = #tpu.dot_dimension_numbers<[1], [0], [0], [1], [0, 0, 1, 1], [], []>} : vector<32x16xf32>, vector<16x4096xf32>, vector<32x4096xf32> -> vector<32x4096xf32>
    %c0_34 = arith.constant 0 : index
    %c0_35 = arith.constant 0 : index
    %54 = vector.load %arg13[%c0_34, %c0_35] : memref<1x4096xf32, #tpu.memory_space<vmem>>, vector<1x4096xf32>
    %55 = vector.broadcast %54 : vector<1x4096xf32> to vector<32x4096xf32>
    %56 = arith.addf %53, %55 : vector<32x4096xf32>
    %cst_36 = arith.constant dense<0.000000e+00> : vector<32x128xf32>
    %57 = tpu.matmul %1, %44, %cst_36 {dimension_numbers = #tpu.dot_dimension_numbers<[1], [0], [0], [1], [0, 0, 1, 1], [], []>} : vector<32x16xf32>, vector<16x128xf32>, vector<32x128xf32> -> vector<32x128xf32>
    %58 = vector.extract_strided_slice %57 {offsets = [0, 0], sizes = [32, 1], strides = [1, 1]} : vector<32x128xf32> to vector<32x1xf32>
    %59 = vector.extract_strided_slice %56 {offsets = [0, 0], sizes = [32, 128], strides = [1, 1]} : vector<32x4096xf32> to vector<32x128xf32>
    %60 = vector.broadcast %58 : vector<32x1xf32> to vector<32x128xf32>
    %61 = arith.mulf %60, %59 : vector<32x128xf32>
    %62 = vector.extract_strided_slice %57 {offsets = [0, 1], sizes = [32, 1], strides = [1, 1]} : vector<32x128xf32> to vector<32x1xf32>
    %63 = vector.extract_strided_slice %56 {offsets = [0, 128], sizes = [32, 128], strides = [1, 1]} : vector<32x4096xf32> to vector<32x128xf32>
    %64 = vector.broadcast %62 : vector<32x1xf32> to vector<32x128xf32>
    %65 = arith.mulf %64, %63 : vector<32x128xf32>
    %66 = arith.addf %61, %65 : vector<32x128xf32>
    %67 = vector.extract_strided_slice %57 {offsets = [0, 2], sizes = [32, 1], strides = [1, 1]} : vector<32x128xf32> to vector<32x1xf32>
    %68 = vector.extract_strided_slice %56 {offsets = [0, 256], sizes = [32, 128], strides = [1, 1]} : vector<32x4096xf32> to vector<32x128xf32>
    %69 = vector.broadcast %67 : vector<32x1xf32> to vector<32x128xf32>
    %70 = arith.mulf %69, %68 : vector<32x128xf32>
    %71 = arith.addf %66, %70 : vector<32x128xf32>
    %72 = vector.extract_strided_slice %57 {offsets = [0, 3], sizes = [32, 1], strides = [1, 1]} : vector<32x128xf32> to vector<32x1xf32>
    %73 = vector.extract_strided_slice %56 {offsets = [0, 384], sizes = [32, 128], strides = [1, 1]} : vector<32x4096xf32> to vector<32x128xf32>
    %74 = vector.broadcast %72 : vector<32x1xf32> to vector<32x128xf32>
    %75 = arith.mulf %74, %73 : vector<32x128xf32>
    %76 = arith.addf %71, %75 : vector<32x128xf32>
    %77 = vector.extract_strided_slice %57 {offsets = [0, 4], sizes = [32, 1], strides = [1, 1]} : vector<32x128xf32> to vector<32x1xf32>
    %78 = vector.extract_strided_slice %56 {offsets = [0, 512], sizes = [32, 128], strides = [1, 1]} : vector<32x4096xf32> to vector<32x128xf32>
    %79 = vector.broadcast %77 : vector<32x1xf32> to vector<32x128xf32>
    %80 = arith.mulf %79, %78 : vector<32x128xf32>
    %81 = arith.addf %76, %80 : vector<32x128xf32>
    %82 = vector.extract_strided_slice %57 {offsets = [0, 5], sizes = [32, 1], strides = [1, 1]} : vector<32x128xf32> to vector<32x1xf32>
    %83 = vector.extract_strided_slice %56 {offsets = [0, 640], sizes = [32, 128], strides = [1, 1]} : vector<32x4096xf32> to vector<32x128xf32>
    %84 = vector.broadcast %82 : vector<32x1xf32> to vector<32x128xf32>
    %85 = arith.mulf %84, %83 : vector<32x128xf32>
    %86 = arith.addf %81, %85 : vector<32x128xf32>
    %87 = vector.extract_strided_slice %57 {offsets = [0, 6], sizes = [32, 1], strides = [1, 1]} : vector<32x128xf32> to vector<32x1xf32>
    %88 = vector.extract_strided_slice %56 {offsets = [0, 768], sizes = [32, 128], strides = [1, 1]} : vector<32x4096xf32> to vector<32x128xf32>
    %89 = vector.broadcast %87 : vector<32x1xf32> to vector<32x128xf32>
    %90 = arith.mulf %89, %88 : vector<32x128xf32>
    %91 = arith.addf %86, %90 : vector<32x128xf32>
    %92 = vector.extract_strided_slice %57 {offsets = [0, 7], sizes = [32, 1], strides = [1, 1]} : vector<32x128xf32> to vector<32x1xf32>
    %93 = vector.extract_strided_slice %56 {offsets = [0, 896], sizes = [32, 128], strides = [1, 1]} : vector<32x4096xf32> to vector<32x128xf32>
    %94 = vector.broadcast %92 : vector<32x1xf32> to vector<32x128xf32>
    %95 = arith.mulf %94, %93 : vector<32x128xf32>
    %96 = arith.addf %91, %95 : vector<32x128xf32>
    %97 = vector.extract_strided_slice %57 {offsets = [0, 8], sizes = [32, 1], strides = [1, 1]} : vector<32x128xf32> to vector<32x1xf32>
    %98 = vector.extract_strided_slice %56 {offsets = [0, 1024], sizes = [32, 128], strides = [1, 1]} : vector<32x4096xf32> to vector<32x128xf32>
    %99 = vector.broadcast %97 : vector<32x1xf32> to vector<32x128xf32>
    %100 = arith.mulf %99, %98 : vector<32x128xf32>
    %101 = arith.addf %96, %100 : vector<32x128xf32>
    %102 = vector.extract_strided_slice %57 {offsets = [0, 9], sizes = [32, 1], strides = [1, 1]} : vector<32x128xf32> to vector<32x1xf32>
    %103 = vector.extract_strided_slice %56 {offsets = [0, 1152], sizes = [32, 128], strides = [1, 1]} : vector<32x4096xf32> to vector<32x128xf32>
    %104 = vector.broadcast %102 : vector<32x1xf32> to vector<32x128xf32>
    %105 = arith.mulf %104, %103 : vector<32x128xf32>
    %106 = arith.addf %101, %105 : vector<32x128xf32>
    %107 = vector.extract_strided_slice %57 {offsets = [0, 10], sizes = [32, 1], strides = [1, 1]} : vector<32x128xf32> to vector<32x1xf32>
    %108 = vector.extract_strided_slice %56 {offsets = [0, 1280], sizes = [32, 128], strides = [1, 1]} : vector<32x4096xf32> to vector<32x128xf32>
    %109 = vector.broadcast %107 : vector<32x1xf32> to vector<32x128xf32>
    %110 = arith.mulf %109, %108 : vector<32x128xf32>
    %111 = arith.addf %106, %110 : vector<32x128xf32>
    %112 = vector.extract_strided_slice %57 {offsets = [0, 11], sizes = [32, 1], strides = [1, 1]} : vector<32x128xf32> to vector<32x1xf32>
    %113 = vector.extract_strided_slice %56 {offsets = [0, 1408], sizes = [32, 128], strides = [1, 1]} : vector<32x4096xf32> to vector<32x128xf32>
    %114 = vector.broadcast %112 : vector<32x1xf32> to vector<32x128xf32>
    %115 = arith.mulf %114, %113 : vector<32x128xf32>
    %116 = arith.addf %111, %115 : vector<32x128xf32>
    %117 = vector.extract_strided_slice %57 {offsets = [0, 12], sizes = [32, 1], strides = [1, 1]} : vector<32x128xf32> to vector<32x1xf32>
    %118 = vector.extract_strided_slice %56 {offsets = [0, 1536], sizes = [32, 128], strides = [1, 1]} : vector<32x4096xf32> to vector<32x128xf32>
    %119 = vector.broadcast %117 : vector<32x1xf32> to vector<32x128xf32>
    %120 = arith.mulf %119, %118 : vector<32x128xf32>
    %121 = arith.addf %116, %120 : vector<32x128xf32>
    %122 = vector.extract_strided_slice %57 {offsets = [0, 13], sizes = [32, 1], strides = [1, 1]} : vector<32x128xf32> to vector<32x1xf32>
    %123 = vector.extract_strided_slice %56 {offsets = [0, 1664], sizes = [32, 128], strides = [1, 1]} : vector<32x4096xf32> to vector<32x128xf32>
    %124 = vector.broadcast %122 : vector<32x1xf32> to vector<32x128xf32>
    %125 = arith.mulf %124, %123 : vector<32x128xf32>
    %126 = arith.addf %121, %125 : vector<32x128xf32>
    %127 = vector.extract_strided_slice %57 {offsets = [0, 14], sizes = [32, 1], strides = [1, 1]} : vector<32x128xf32> to vector<32x1xf32>
    %128 = vector.extract_strided_slice %56 {offsets = [0, 1792], sizes = [32, 128], strides = [1, 1]} : vector<32x4096xf32> to vector<32x128xf32>
    %129 = vector.broadcast %127 : vector<32x1xf32> to vector<32x128xf32>
    %130 = arith.mulf %129, %128 : vector<32x128xf32>
    %131 = arith.addf %126, %130 : vector<32x128xf32>
    %132 = vector.extract_strided_slice %57 {offsets = [0, 15], sizes = [32, 1], strides = [1, 1]} : vector<32x128xf32> to vector<32x1xf32>
    %133 = vector.extract_strided_slice %56 {offsets = [0, 1920], sizes = [32, 128], strides = [1, 1]} : vector<32x4096xf32> to vector<32x128xf32>
    %134 = vector.broadcast %132 : vector<32x1xf32> to vector<32x128xf32>
    %135 = arith.mulf %134, %133 : vector<32x128xf32>
    %136 = arith.addf %131, %135 : vector<32x128xf32>
    %137 = vector.extract_strided_slice %57 {offsets = [0, 16], sizes = [32, 1], strides = [1, 1]} : vector<32x128xf32> to vector<32x1xf32>
    %138 = vector.extract_strided_slice %56 {offsets = [0, 2048], sizes = [32, 128], strides = [1, 1]} : vector<32x4096xf32> to vector<32x128xf32>
    %139 = vector.broadcast %137 : vector<32x1xf32> to vector<32x128xf32>
    %140 = arith.mulf %139, %138 : vector<32x128xf32>
    %141 = arith.addf %136, %140 : vector<32x128xf32>
    %142 = vector.extract_strided_slice %57 {offsets = [0, 17], sizes = [32, 1], strides = [1, 1]} : vector<32x128xf32> to vector<32x1xf32>
    %143 = vector.extract_strided_slice %56 {offsets = [0, 2176], sizes = [32, 128], strides = [1, 1]} : vector<32x4096xf32> to vector<32x128xf32>
    %144 = vector.broadcast %142 : vector<32x1xf32> to vector<32x128xf32>
    %145 = arith.mulf %144, %143 : vector<32x128xf32>
    %146 = arith.addf %141, %145 : vector<32x128xf32>
    %147 = vector.extract_strided_slice %57 {offsets = [0, 18], sizes = [32, 1], strides = [1, 1]} : vector<32x128xf32> to vector<32x1xf32>
    %148 = vector.extract_strided_slice %56 {offsets = [0, 2304], sizes = [32, 128], strides = [1, 1]} : vector<32x4096xf32> to vector<32x128xf32>
    %149 = vector.broadcast %147 : vector<32x1xf32> to vector<32x128xf32>
    %150 = arith.mulf %149, %148 : vector<32x128xf32>
    %151 = arith.addf %146, %150 : vector<32x128xf32>
    %152 = vector.extract_strided_slice %57 {offsets = [0, 19], sizes = [32, 1], strides = [1, 1]} : vector<32x128xf32> to vector<32x1xf32>
    %153 = vector.extract_strided_slice %56 {offsets = [0, 2432], sizes = [32, 128], strides = [1, 1]} : vector<32x4096xf32> to vector<32x128xf32>
    %154 = vector.broadcast %152 : vector<32x1xf32> to vector<32x128xf32>
    %155 = arith.mulf %154, %153 : vector<32x128xf32>
    %156 = arith.addf %151, %155 : vector<32x128xf32>
    %157 = vector.extract_strided_slice %57 {offsets = [0, 20], sizes = [32, 1], strides = [1, 1]} : vector<32x128xf32> to vector<32x1xf32>
    %158 = vector.extract_strided_slice %56 {offsets = [0, 2560], sizes = [32, 128], strides = [1, 1]} : vector<32x4096xf32> to vector<32x128xf32>
    %159 = vector.broadcast %157 : vector<32x1xf32> to vector<32x128xf32>
    %160 = arith.mulf %159, %158 : vector<32x128xf32>
    %161 = arith.addf %156, %160 : vector<32x128xf32>
    %162 = vector.extract_strided_slice %57 {offsets = [0, 21], sizes = [32, 1], strides = [1, 1]} : vector<32x128xf32> to vector<32x1xf32>
    %163 = vector.extract_strided_slice %56 {offsets = [0, 2688], sizes = [32, 128], strides = [1, 1]} : vector<32x4096xf32> to vector<32x128xf32>
    %164 = vector.broadcast %162 : vector<32x1xf32> to vector<32x128xf32>
    %165 = arith.mulf %164, %163 : vector<32x128xf32>
    %166 = arith.addf %161, %165 : vector<32x128xf32>
    %167 = vector.extract_strided_slice %57 {offsets = [0, 22], sizes = [32, 1], strides = [1, 1]} : vector<32x128xf32> to vector<32x1xf32>
    %168 = vector.extract_strided_slice %56 {offsets = [0, 2816], sizes = [32, 128], strides = [1, 1]} : vector<32x4096xf32> to vector<32x128xf32>
    %169 = vector.broadcast %167 : vector<32x1xf32> to vector<32x128xf32>
    %170 = arith.mulf %169, %168 : vector<32x128xf32>
    %171 = arith.addf %166, %170 : vector<32x128xf32>
    %172 = vector.extract_strided_slice %57 {offsets = [0, 23], sizes = [32, 1], strides = [1, 1]} : vector<32x128xf32> to vector<32x1xf32>
    %173 = vector.extract_strided_slice %56 {offsets = [0, 2944], sizes = [32, 128], strides = [1, 1]} : vector<32x4096xf32> to vector<32x128xf32>
    %174 = vector.broadcast %172 : vector<32x1xf32> to vector<32x128xf32>
    %175 = arith.mulf %174, %173 : vector<32x128xf32>
    %176 = arith.addf %171, %175 : vector<32x128xf32>
    %177 = vector.extract_strided_slice %57 {offsets = [0, 24], sizes = [32, 1], strides = [1, 1]} : vector<32x128xf32> to vector<32x1xf32>
    %178 = vector.extract_strided_slice %56 {offsets = [0, 3072], sizes = [32, 128], strides = [1, 1]} : vector<32x4096xf32> to vector<32x128xf32>
    %179 = vector.broadcast %177 : vector<32x1xf32> to vector<32x128xf32>
    %180 = arith.mulf %179, %178 : vector<32x128xf32>
    %181 = arith.addf %176, %180 : vector<32x128xf32>
    %182 = vector.extract_strided_slice %57 {offsets = [0, 25], sizes = [32, 1], strides = [1, 1]} : vector<32x128xf32> to vector<32x1xf32>
    %183 = vector.extract_strided_slice %56 {offsets = [0, 3200], sizes = [32, 128], strides = [1, 1]} : vector<32x4096xf32> to vector<32x128xf32>
    %184 = vector.broadcast %182 : vector<32x1xf32> to vector<32x128xf32>
    %185 = arith.mulf %184, %183 : vector<32x128xf32>
    %186 = arith.addf %181, %185 : vector<32x128xf32>
    %187 = vector.extract_strided_slice %57 {offsets = [0, 26], sizes = [32, 1], strides = [1, 1]} : vector<32x128xf32> to vector<32x1xf32>
    %188 = vector.extract_strided_slice %56 {offsets = [0, 3328], sizes = [32, 128], strides = [1, 1]} : vector<32x4096xf32> to vector<32x128xf32>
    %189 = vector.broadcast %187 : vector<32x1xf32> to vector<32x128xf32>
    %190 = arith.mulf %189, %188 : vector<32x128xf32>
    %191 = arith.addf %186, %190 : vector<32x128xf32>
    %192 = vector.extract_strided_slice %57 {offsets = [0, 27], sizes = [32, 1], strides = [1, 1]} : vector<32x128xf32> to vector<32x1xf32>
    %193 = vector.extract_strided_slice %56 {offsets = [0, 3456], sizes = [32, 128], strides = [1, 1]} : vector<32x4096xf32> to vector<32x128xf32>
    %194 = vector.broadcast %192 : vector<32x1xf32> to vector<32x128xf32>
    %195 = arith.mulf %194, %193 : vector<32x128xf32>
    %196 = arith.addf %191, %195 : vector<32x128xf32>
    %197 = vector.extract_strided_slice %57 {offsets = [0, 28], sizes = [32, 1], strides = [1, 1]} : vector<32x128xf32> to vector<32x1xf32>
    %198 = vector.extract_strided_slice %56 {offsets = [0, 3584], sizes = [32, 128], strides = [1, 1]} : vector<32x4096xf32> to vector<32x128xf32>
    %199 = vector.broadcast %197 : vector<32x1xf32> to vector<32x128xf32>
    %200 = arith.mulf %199, %198 : vector<32x128xf32>
    %201 = arith.addf %196, %200 : vector<32x128xf32>
    %202 = vector.extract_strided_slice %57 {offsets = [0, 29], sizes = [32, 1], strides = [1, 1]} : vector<32x128xf32> to vector<32x1xf32>
    %203 = vector.extract_strided_slice %56 {offsets = [0, 3712], sizes = [32, 128], strides = [1, 1]} : vector<32x4096xf32> to vector<32x128xf32>
    %204 = vector.broadcast %202 : vector<32x1xf32> to vector<32x128xf32>
    %205 = arith.mulf %204, %203 : vector<32x128xf32>
    %206 = arith.addf %201, %205 : vector<32x128xf32>
    %207 = vector.extract_strided_slice %57 {offsets = [0, 30], sizes = [32, 1], strides = [1, 1]} : vector<32x128xf32> to vector<32x1xf32>
    %208 = vector.extract_strided_slice %56 {offsets = [0, 3840], sizes = [32, 128], strides = [1, 1]} : vector<32x4096xf32> to vector<32x128xf32>
    %209 = vector.broadcast %207 : vector<32x1xf32> to vector<32x128xf32>
    %210 = arith.mulf %209, %208 : vector<32x128xf32>
    %211 = arith.addf %206, %210 : vector<32x128xf32>
    %212 = vector.extract_strided_slice %57 {offsets = [0, 31], sizes = [32, 1], strides = [1, 1]} : vector<32x128xf32> to vector<32x1xf32>
    %213 = vector.extract_strided_slice %56 {offsets = [0, 3968], sizes = [32, 128], strides = [1, 1]} : vector<32x4096xf32> to vector<32x128xf32>
    %214 = vector.broadcast %212 : vector<32x1xf32> to vector<32x128xf32>
    %215 = arith.mulf %214, %213 : vector<32x128xf32>
    %216 = arith.addf %211, %215 : vector<32x128xf32>
    %cst_37 = arith.constant dense<0.000000e+00> : vector<16x128xf32>
    %217 = tpu.matmul %2, %216, %cst_37 {dimension_numbers = #tpu.dot_dimension_numbers<[1], [0], [0], [1], [0, 0, 1, 1], [], []>} : vector<16x32xf32>, vector<32x128xf32>, vector<16x128xf32> -> vector<16x128xf32>
    %c0_38 = arith.constant 0 : index
    %c0_39 = arith.constant 0 : index
    %218 = vector.load %arg14[%c0_38, %c0_39] : memref<128x128xf32, #tpu.memory_space<vmem>>, vector<128x128xf32>
    %cst_40 = arith.constant dense<0.000000e+00> : vector<16x128xf32>
    %219 = tpu.matmul %44, %218, %cst_40 {dimension_numbers = #tpu.dot_dimension_numbers<[1], [0], [0], [1], [0, 0, 1, 1], [], []>} : vector<16x128xf32>, vector<128x128xf32>, vector<16x128xf32> -> vector<16x128xf32>
    %220 = arith.addf %217, %219 : vector<16x128xf32>
    %c0_41 = arith.constant 0 : index
    %c0_42 = arith.constant 0 : index
    %221 = vector.load %arg15[%c0_41, %c0_42] : memref<1x128xf32, #tpu.memory_space<vmem>>, vector<1x128xf32>
    %222 = vector.broadcast %221 : vector<1x128xf32> to vector<16x128xf32>
    %223 = arith.addf %220, %222 : vector<16x128xf32>
    %cst_43 = arith.constant 0.000000e+00 : f32
    %224 = vector.broadcast %cst_43 : f32 to vector<16x128xf32>
    %225 = arith.maximumf %223, %224 : vector<16x128xf32>
    %c0_44 = arith.constant 0 : index
    %c0_45 = arith.constant 0 : index
    %226 = vector.load %arg16[%c0_44, %c0_45] : memref<2x16xf32, #tpu.memory_space<vmem>>, vector<2x16xf32>
    %cst_46 = arith.constant dense<0.000000e+00> : vector<32x16xf32>
    %227 = tpu.matmul %0, %226, %cst_46 {dimension_numbers = #tpu.dot_dimension_numbers<[1], [0], [0], [1], [0, 0, 1, 1], [], []>} : vector<32x2xf32>, vector<2x16xf32>, vector<32x16xf32> -> vector<32x16xf32>
    %c0_47 = arith.constant 0 : index
    %c0_48 = arith.constant 0 : index
    %228 = vector.load %arg17[%c0_47, %c0_48] : memref<1x16xf32, #tpu.memory_space<vmem>>, vector<1x16xf32>
    %229 = vector.broadcast %228 : vector<1x16xf32> to vector<32x16xf32>
    %230 = arith.addf %227, %229 : vector<32x16xf32>
    %cst_49 = arith.constant 0.000000e+00 : f32
    %231 = vector.broadcast %cst_49 : f32 to vector<32x16xf32>
    %232 = arith.maximumf %230, %231 : vector<32x16xf32>
    %c0_50 = arith.constant 0 : index
    %c0_51 = arith.constant 0 : index
    %233 = vector.load %arg18[%c0_50, %c0_51] : memref<16x4096xf32, #tpu.memory_space<vmem>>, vector<16x4096xf32>
    %cst_52 = arith.constant dense<0.000000e+00> : vector<32x4096xf32>
    %234 = tpu.matmul %232, %233, %cst_52 {dimension_numbers = #tpu.dot_dimension_numbers<[1], [0], [0], [1], [0, 0, 1, 1], [], []>} : vector<32x16xf32>, vector<16x4096xf32>, vector<32x4096xf32> -> vector<32x4096xf32>
    %c0_53 = arith.constant 0 : index
    %c0_54 = arith.constant 0 : index
    %235 = vector.load %arg19[%c0_53, %c0_54] : memref<1x4096xf32, #tpu.memory_space<vmem>>, vector<1x4096xf32>
    %236 = vector.broadcast %235 : vector<1x4096xf32> to vector<32x4096xf32>
    %237 = arith.addf %234, %236 : vector<32x4096xf32>
    %cst_55 = arith.constant dense<0.000000e+00> : vector<32x128xf32>
    %238 = tpu.matmul %1, %225, %cst_55 {dimension_numbers = #tpu.dot_dimension_numbers<[1], [0], [0], [1], [0, 0, 1, 1], [], []>} : vector<32x16xf32>, vector<16x128xf32>, vector<32x128xf32> -> vector<32x128xf32>
    %239 = vector.extract_strided_slice %238 {offsets = [0, 0], sizes = [32, 1], strides = [1, 1]} : vector<32x128xf32> to vector<32x1xf32>
    %240 = vector.extract_strided_slice %237 {offsets = [0, 0], sizes = [32, 128], strides = [1, 1]} : vector<32x4096xf32> to vector<32x128xf32>
    %241 = vector.broadcast %239 : vector<32x1xf32> to vector<32x128xf32>
    %242 = arith.mulf %241, %240 : vector<32x128xf32>
    %243 = vector.extract_strided_slice %238 {offsets = [0, 1], sizes = [32, 1], strides = [1, 1]} : vector<32x128xf32> to vector<32x1xf32>
    %244 = vector.extract_strided_slice %237 {offsets = [0, 128], sizes = [32, 128], strides = [1, 1]} : vector<32x4096xf32> to vector<32x128xf32>
    %245 = vector.broadcast %243 : vector<32x1xf32> to vector<32x128xf32>
    %246 = arith.mulf %245, %244 : vector<32x128xf32>
    %247 = arith.addf %242, %246 : vector<32x128xf32>
    %248 = vector.extract_strided_slice %238 {offsets = [0, 2], sizes = [32, 1], strides = [1, 1]} : vector<32x128xf32> to vector<32x1xf32>
    %249 = vector.extract_strided_slice %237 {offsets = [0, 256], sizes = [32, 128], strides = [1, 1]} : vector<32x4096xf32> to vector<32x128xf32>
    %250 = vector.broadcast %248 : vector<32x1xf32> to vector<32x128xf32>
    %251 = arith.mulf %250, %249 : vector<32x128xf32>
    %252 = arith.addf %247, %251 : vector<32x128xf32>
    %253 = vector.extract_strided_slice %238 {offsets = [0, 3], sizes = [32, 1], strides = [1, 1]} : vector<32x128xf32> to vector<32x1xf32>
    %254 = vector.extract_strided_slice %237 {offsets = [0, 384], sizes = [32, 128], strides = [1, 1]} : vector<32x4096xf32> to vector<32x128xf32>
    %255 = vector.broadcast %253 : vector<32x1xf32> to vector<32x128xf32>
    %256 = arith.mulf %255, %254 : vector<32x128xf32>
    %257 = arith.addf %252, %256 : vector<32x128xf32>
    %258 = vector.extract_strided_slice %238 {offsets = [0, 4], sizes = [32, 1], strides = [1, 1]} : vector<32x128xf32> to vector<32x1xf32>
    %259 = vector.extract_strided_slice %237 {offsets = [0, 512], sizes = [32, 128], strides = [1, 1]} : vector<32x4096xf32> to vector<32x128xf32>
    %260 = vector.broadcast %258 : vector<32x1xf32> to vector<32x128xf32>
    %261 = arith.mulf %260, %259 : vector<32x128xf32>
    %262 = arith.addf %257, %261 : vector<32x128xf32>
    %263 = vector.extract_strided_slice %238 {offsets = [0, 5], sizes = [32, 1], strides = [1, 1]} : vector<32x128xf32> to vector<32x1xf32>
    %264 = vector.extract_strided_slice %237 {offsets = [0, 640], sizes = [32, 128], strides = [1, 1]} : vector<32x4096xf32> to vector<32x128xf32>
    %265 = vector.broadcast %263 : vector<32x1xf32> to vector<32x128xf32>
    %266 = arith.mulf %265, %264 : vector<32x128xf32>
    %267 = arith.addf %262, %266 : vector<32x128xf32>
    %268 = vector.extract_strided_slice %238 {offsets = [0, 6], sizes = [32, 1], strides = [1, 1]} : vector<32x128xf32> to vector<32x1xf32>
    %269 = vector.extract_strided_slice %237 {offsets = [0, 768], sizes = [32, 128], strides = [1, 1]} : vector<32x4096xf32> to vector<32x128xf32>
    %270 = vector.broadcast %268 : vector<32x1xf32> to vector<32x128xf32>
    %271 = arith.mulf %270, %269 : vector<32x128xf32>
    %272 = arith.addf %267, %271 : vector<32x128xf32>
    %273 = vector.extract_strided_slice %238 {offsets = [0, 7], sizes = [32, 1], strides = [1, 1]} : vector<32x128xf32> to vector<32x1xf32>
    %274 = vector.extract_strided_slice %237 {offsets = [0, 896], sizes = [32, 128], strides = [1, 1]} : vector<32x4096xf32> to vector<32x128xf32>
    %275 = vector.broadcast %273 : vector<32x1xf32> to vector<32x128xf32>
    %276 = arith.mulf %275, %274 : vector<32x128xf32>
    %277 = arith.addf %272, %276 : vector<32x128xf32>
    %278 = vector.extract_strided_slice %238 {offsets = [0, 8], sizes = [32, 1], strides = [1, 1]} : vector<32x128xf32> to vector<32x1xf32>
    %279 = vector.extract_strided_slice %237 {offsets = [0, 1024], sizes = [32, 128], strides = [1, 1]} : vector<32x4096xf32> to vector<32x128xf32>
    %280 = vector.broadcast %278 : vector<32x1xf32> to vector<32x128xf32>
    %281 = arith.mulf %280, %279 : vector<32x128xf32>
    %282 = arith.addf %277, %281 : vector<32x128xf32>
    %283 = vector.extract_strided_slice %238 {offsets = [0, 9], sizes = [32, 1], strides = [1, 1]} : vector<32x128xf32> to vector<32x1xf32>
    %284 = vector.extract_strided_slice %237 {offsets = [0, 1152], sizes = [32, 128], strides = [1, 1]} : vector<32x4096xf32> to vector<32x128xf32>
    %285 = vector.broadcast %283 : vector<32x1xf32> to vector<32x128xf32>
    %286 = arith.mulf %285, %284 : vector<32x128xf32>
    %287 = arith.addf %282, %286 : vector<32x128xf32>
    %288 = vector.extract_strided_slice %238 {offsets = [0, 10], sizes = [32, 1], strides = [1, 1]} : vector<32x128xf32> to vector<32x1xf32>
    %289 = vector.extract_strided_slice %237 {offsets = [0, 1280], sizes = [32, 128], strides = [1, 1]} : vector<32x4096xf32> to vector<32x128xf32>
    %290 = vector.broadcast %288 : vector<32x1xf32> to vector<32x128xf32>
    %291 = arith.mulf %290, %289 : vector<32x128xf32>
    %292 = arith.addf %287, %291 : vector<32x128xf32>
    %293 = vector.extract_strided_slice %238 {offsets = [0, 11], sizes = [32, 1], strides = [1, 1]} : vector<32x128xf32> to vector<32x1xf32>
    %294 = vector.extract_strided_slice %237 {offsets = [0, 1408], sizes = [32, 128], strides = [1, 1]} : vector<32x4096xf32> to vector<32x128xf32>
    %295 = vector.broadcast %293 : vector<32x1xf32> to vector<32x128xf32>
    %296 = arith.mulf %295, %294 : vector<32x128xf32>
    %297 = arith.addf %292, %296 : vector<32x128xf32>
    %298 = vector.extract_strided_slice %238 {offsets = [0, 12], sizes = [32, 1], strides = [1, 1]} : vector<32x128xf32> to vector<32x1xf32>
    %299 = vector.extract_strided_slice %237 {offsets = [0, 1536], sizes = [32, 128], strides = [1, 1]} : vector<32x4096xf32> to vector<32x128xf32>
    %300 = vector.broadcast %298 : vector<32x1xf32> to vector<32x128xf32>
    %301 = arith.mulf %300, %299 : vector<32x128xf32>
    %302 = arith.addf %297, %301 : vector<32x128xf32>
    %303 = vector.extract_strided_slice %238 {offsets = [0, 13], sizes = [32, 1], strides = [1, 1]} : vector<32x128xf32> to vector<32x1xf32>
    %304 = vector.extract_strided_slice %237 {offsets = [0, 1664], sizes = [32, 128], strides = [1, 1]} : vector<32x4096xf32> to vector<32x128xf32>
    %305 = vector.broadcast %303 : vector<32x1xf32> to vector<32x128xf32>
    %306 = arith.mulf %305, %304 : vector<32x128xf32>
    %307 = arith.addf %302, %306 : vector<32x128xf32>
    %308 = vector.extract_strided_slice %238 {offsets = [0, 14], sizes = [32, 1], strides = [1, 1]} : vector<32x128xf32> to vector<32x1xf32>
    %309 = vector.extract_strided_slice %237 {offsets = [0, 1792], sizes = [32, 128], strides = [1, 1]} : vector<32x4096xf32> to vector<32x128xf32>
    %310 = vector.broadcast %308 : vector<32x1xf32> to vector<32x128xf32>
    %311 = arith.mulf %310, %309 : vector<32x128xf32>
    %312 = arith.addf %307, %311 : vector<32x128xf32>
    %313 = vector.extract_strided_slice %238 {offsets = [0, 15], sizes = [32, 1], strides = [1, 1]} : vector<32x128xf32> to vector<32x1xf32>
    %314 = vector.extract_strided_slice %237 {offsets = [0, 1920], sizes = [32, 128], strides = [1, 1]} : vector<32x4096xf32> to vector<32x128xf32>
    %315 = vector.broadcast %313 : vector<32x1xf32> to vector<32x128xf32>
    %316 = arith.mulf %315, %314 : vector<32x128xf32>
    %317 = arith.addf %312, %316 : vector<32x128xf32>
    %318 = vector.extract_strided_slice %238 {offsets = [0, 16], sizes = [32, 1], strides = [1, 1]} : vector<32x128xf32> to vector<32x1xf32>
    %319 = vector.extract_strided_slice %237 {offsets = [0, 2048], sizes = [32, 128], strides = [1, 1]} : vector<32x4096xf32> to vector<32x128xf32>
    %320 = vector.broadcast %318 : vector<32x1xf32> to vector<32x128xf32>
    %321 = arith.mulf %320, %319 : vector<32x128xf32>
    %322 = arith.addf %317, %321 : vector<32x128xf32>
    %323 = vector.extract_strided_slice %238 {offsets = [0, 17], sizes = [32, 1], strides = [1, 1]} : vector<32x128xf32> to vector<32x1xf32>
    %324 = vector.extract_strided_slice %237 {offsets = [0, 2176], sizes = [32, 128], strides = [1, 1]} : vector<32x4096xf32> to vector<32x128xf32>
    %325 = vector.broadcast %323 : vector<32x1xf32> to vector<32x128xf32>
    %326 = arith.mulf %325, %324 : vector<32x128xf32>
    %327 = arith.addf %322, %326 : vector<32x128xf32>
    %328 = vector.extract_strided_slice %238 {offsets = [0, 18], sizes = [32, 1], strides = [1, 1]} : vector<32x128xf32> to vector<32x1xf32>
    %329 = vector.extract_strided_slice %237 {offsets = [0, 2304], sizes = [32, 128], strides = [1, 1]} : vector<32x4096xf32> to vector<32x128xf32>
    %330 = vector.broadcast %328 : vector<32x1xf32> to vector<32x128xf32>
    %331 = arith.mulf %330, %329 : vector<32x128xf32>
    %332 = arith.addf %327, %331 : vector<32x128xf32>
    %333 = vector.extract_strided_slice %238 {offsets = [0, 19], sizes = [32, 1], strides = [1, 1]} : vector<32x128xf32> to vector<32x1xf32>
    %334 = vector.extract_strided_slice %237 {offsets = [0, 2432], sizes = [32, 128], strides = [1, 1]} : vector<32x4096xf32> to vector<32x128xf32>
    %335 = vector.broadcast %333 : vector<32x1xf32> to vector<32x128xf32>
    %336 = arith.mulf %335, %334 : vector<32x128xf32>
    %337 = arith.addf %332, %336 : vector<32x128xf32>
    %338 = vector.extract_strided_slice %238 {offsets = [0, 20], sizes = [32, 1], strides = [1, 1]} : vector<32x128xf32> to vector<32x1xf32>
    %339 = vector.extract_strided_slice %237 {offsets = [0, 2560], sizes = [32, 128], strides = [1, 1]} : vector<32x4096xf32> to vector<32x128xf32>
    %340 = vector.broadcast %338 : vector<32x1xf32> to vector<32x128xf32>
    %341 = arith.mulf %340, %339 : vector<32x128xf32>
    %342 = arith.addf %337, %341 : vector<32x128xf32>
    %343 = vector.extract_strided_slice %238 {offsets = [0, 21], sizes = [32, 1], strides = [1, 1]} : vector<32x128xf32> to vector<32x1xf32>
    %344 = vector.extract_strided_slice %237 {offsets = [0, 2688], sizes = [32, 128], strides = [1, 1]} : vector<32x4096xf32> to vector<32x128xf32>
    %345 = vector.broadcast %343 : vector<32x1xf32> to vector<32x128xf32>
    %346 = arith.mulf %345, %344 : vector<32x128xf32>
    %347 = arith.addf %342, %346 : vector<32x128xf32>
    %348 = vector.extract_strided_slice %238 {offsets = [0, 22], sizes = [32, 1], strides = [1, 1]} : vector<32x128xf32> to vector<32x1xf32>
    %349 = vector.extract_strided_slice %237 {offsets = [0, 2816], sizes = [32, 128], strides = [1, 1]} : vector<32x4096xf32> to vector<32x128xf32>
    %350 = vector.broadcast %348 : vector<32x1xf32> to vector<32x128xf32>
    %351 = arith.mulf %350, %349 : vector<32x128xf32>
    %352 = arith.addf %347, %351 : vector<32x128xf32>
    %353 = vector.extract_strided_slice %238 {offsets = [0, 23], sizes = [32, 1], strides = [1, 1]} : vector<32x128xf32> to vector<32x1xf32>
    %354 = vector.extract_strided_slice %237 {offsets = [0, 2944], sizes = [32, 128], strides = [1, 1]} : vector<32x4096xf32> to vector<32x128xf32>
    %355 = vector.broadcast %353 : vector<32x1xf32> to vector<32x128xf32>
    %356 = arith.mulf %355, %354 : vector<32x128xf32>
    %357 = arith.addf %352, %356 : vector<32x128xf32>
    %358 = vector.extract_strided_slice %238 {offsets = [0, 24], sizes = [32, 1], strides = [1, 1]} : vector<32x128xf32> to vector<32x1xf32>
    %359 = vector.extract_strided_slice %237 {offsets = [0, 3072], sizes = [32, 128], strides = [1, 1]} : vector<32x4096xf32> to vector<32x128xf32>
    %360 = vector.broadcast %358 : vector<32x1xf32> to vector<32x128xf32>
    %361 = arith.mulf %360, %359 : vector<32x128xf32>
    %362 = arith.addf %357, %361 : vector<32x128xf32>
    %363 = vector.extract_strided_slice %238 {offsets = [0, 25], sizes = [32, 1], strides = [1, 1]} : vector<32x128xf32> to vector<32x1xf32>
    %364 = vector.extract_strided_slice %237 {offsets = [0, 3200], sizes = [32, 128], strides = [1, 1]} : vector<32x4096xf32> to vector<32x128xf32>
    %365 = vector.broadcast %363 : vector<32x1xf32> to vector<32x128xf32>
    %366 = arith.mulf %365, %364 : vector<32x128xf32>
    %367 = arith.addf %362, %366 : vector<32x128xf32>
    %368 = vector.extract_strided_slice %238 {offsets = [0, 26], sizes = [32, 1], strides = [1, 1]} : vector<32x128xf32> to vector<32x1xf32>
    %369 = vector.extract_strided_slice %237 {offsets = [0, 3328], sizes = [32, 128], strides = [1, 1]} : vector<32x4096xf32> to vector<32x128xf32>
    %370 = vector.broadcast %368 : vector<32x1xf32> to vector<32x128xf32>
    %371 = arith.mulf %370, %369 : vector<32x128xf32>
    %372 = arith.addf %367, %371 : vector<32x128xf32>
    %373 = vector.extract_strided_slice %238 {offsets = [0, 27], sizes = [32, 1], strides = [1, 1]} : vector<32x128xf32> to vector<32x1xf32>
    %374 = vector.extract_strided_slice %237 {offsets = [0, 3456], sizes = [32, 128], strides = [1, 1]} : vector<32x4096xf32> to vector<32x128xf32>
    %375 = vector.broadcast %373 : vector<32x1xf32> to vector<32x128xf32>
    %376 = arith.mulf %375, %374 : vector<32x128xf32>
    %377 = arith.addf %372, %376 : vector<32x128xf32>
    %378 = vector.extract_strided_slice %238 {offsets = [0, 28], sizes = [32, 1], strides = [1, 1]} : vector<32x128xf32> to vector<32x1xf32>
    %379 = vector.extract_strided_slice %237 {offsets = [0, 3584], sizes = [32, 128], strides = [1, 1]} : vector<32x4096xf32> to vector<32x128xf32>
    %380 = vector.broadcast %378 : vector<32x1xf32> to vector<32x128xf32>
    %381 = arith.mulf %380, %379 : vector<32x128xf32>
    %382 = arith.addf %377, %381 : vector<32x128xf32>
    %383 = vector.extract_strided_slice %238 {offsets = [0, 29], sizes = [32, 1], strides = [1, 1]} : vector<32x128xf32> to vector<32x1xf32>
    %384 = vector.extract_strided_slice %237 {offsets = [0, 3712], sizes = [32, 128], strides = [1, 1]} : vector<32x4096xf32> to vector<32x128xf32>
    %385 = vector.broadcast %383 : vector<32x1xf32> to vector<32x128xf32>
    %386 = arith.mulf %385, %384 : vector<32x128xf32>
    %387 = arith.addf %382, %386 : vector<32x128xf32>
    %388 = vector.extract_strided_slice %238 {offsets = [0, 30], sizes = [32, 1], strides = [1, 1]} : vector<32x128xf32> to vector<32x1xf32>
    %389 = vector.extract_strided_slice %237 {offsets = [0, 3840], sizes = [32, 128], strides = [1, 1]} : vector<32x4096xf32> to vector<32x128xf32>
    %390 = vector.broadcast %388 : vector<32x1xf32> to vector<32x128xf32>
    %391 = arith.mulf %390, %389 : vector<32x128xf32>
    %392 = arith.addf %387, %391 : vector<32x128xf32>
    %393 = vector.extract_strided_slice %238 {offsets = [0, 31], sizes = [32, 1], strides = [1, 1]} : vector<32x128xf32> to vector<32x1xf32>
    %394 = vector.extract_strided_slice %237 {offsets = [0, 3968], sizes = [32, 128], strides = [1, 1]} : vector<32x4096xf32> to vector<32x128xf32>
    %395 = vector.broadcast %393 : vector<32x1xf32> to vector<32x128xf32>
    %396 = arith.mulf %395, %394 : vector<32x128xf32>
    %397 = arith.addf %392, %396 : vector<32x128xf32>
    %cst_56 = arith.constant dense<0.000000e+00> : vector<16x128xf32>
    %398 = tpu.matmul %2, %397, %cst_56 {dimension_numbers = #tpu.dot_dimension_numbers<[1], [0], [0], [1], [0, 0, 1, 1], [], []>} : vector<16x32xf32>, vector<32x128xf32>, vector<16x128xf32> -> vector<16x128xf32>
    %c0_57 = arith.constant 0 : index
    %c0_58 = arith.constant 0 : index
    %399 = vector.load %arg20[%c0_57, %c0_58] : memref<128x128xf32, #tpu.memory_space<vmem>>, vector<128x128xf32>
    %cst_59 = arith.constant dense<0.000000e+00> : vector<16x128xf32>
    %400 = tpu.matmul %225, %399, %cst_59 {dimension_numbers = #tpu.dot_dimension_numbers<[1], [0], [0], [1], [0, 0, 1, 1], [], []>} : vector<16x128xf32>, vector<128x128xf32>, vector<16x128xf32> -> vector<16x128xf32>
    %401 = arith.addf %398, %400 : vector<16x128xf32>
    %c0_60 = arith.constant 0 : index
    %c0_61 = arith.constant 0 : index
    %402 = vector.load %arg21[%c0_60, %c0_61] : memref<1x128xf32, #tpu.memory_space<vmem>>, vector<1x128xf32>
    %403 = vector.broadcast %402 : vector<1x128xf32> to vector<16x128xf32>
    %404 = arith.addf %401, %403 : vector<16x128xf32>
    %cst_62 = arith.constant 0.000000e+00 : f32
    %405 = vector.broadcast %cst_62 : f32 to vector<16x128xf32>
    %406 = arith.maximumf %404, %405 : vector<16x128xf32>
    %c0_63 = arith.constant 0 : index
    %c0_64 = arith.constant 0 : index
    %407 = vector.load %arg22[%c0_63, %c0_64] : memref<128x128xf32, #tpu.memory_space<vmem>>, vector<128x128xf32>
    %cst_65 = arith.constant dense<0.000000e+00> : vector<16x128xf32>
    %408 = tpu.matmul %406, %407, %cst_65 {dimension_numbers = #tpu.dot_dimension_numbers<[1], [0], [0], [1], [0, 0, 1, 1], [], []>} : vector<16x128xf32>, vector<128x128xf32>, vector<16x128xf32> -> vector<16x128xf32>
    %c0_66 = arith.constant 0 : index
    %c0_67 = arith.constant 0 : index
    %409 = vector.load %arg23[%c0_66, %c0_67] : memref<1x128xf32, #tpu.memory_space<vmem>>, vector<1x128xf32>
    %410 = vector.broadcast %409 : vector<1x128xf32> to vector<16x128xf32>
    %411 = arith.addf %408, %410 : vector<16x128xf32>
    %cst_68 = arith.constant 0.000000e+00 : f32
    %412 = vector.broadcast %cst_68 : f32 to vector<16x128xf32>
    %413 = arith.maximumf %411, %412 : vector<16x128xf32>
    %c0_69 = arith.constant 0 : index
    %c0_70 = arith.constant 0 : index
    %414 = vector.load %arg24[%c0_69, %c0_70] : memref<128x128xf32, #tpu.memory_space<vmem>>, vector<128x128xf32>
    %cst_71 = arith.constant dense<0.000000e+00> : vector<16x128xf32>
    %415 = tpu.matmul %413, %414, %cst_71 {dimension_numbers = #tpu.dot_dimension_numbers<[1], [0], [0], [1], [0, 0, 1, 1], [], []>} : vector<16x128xf32>, vector<128x128xf32>, vector<16x128xf32> -> vector<16x128xf32>
    %c0_72 = arith.constant 0 : index
    %c0_73 = arith.constant 0 : index
    %416 = vector.load %arg25[%c0_72, %c0_73] : memref<1x128xf32, #tpu.memory_space<vmem>>, vector<1x128xf32>
    %417 = vector.broadcast %416 : vector<1x128xf32> to vector<16x128xf32>
    %418 = arith.addf %415, %417 : vector<16x128xf32>
    %c0_74 = arith.constant 0 : index
    %c0_75 = arith.constant 0 : index
    %419 = vector.load %arg26[%c0_74, %c0_75] : memref<16x128xf32, #tpu.memory_space<vmem>>, vector<16x128xf32>
    tpu.vector_store %arg26[%c0_74, %c0_75], %418 {strides = array<i32>} : memref<16x128xf32, #tpu.memory_space<vmem>>, vector<16x128xf32>,
    return
  }
}

</mosaic_0001>

<bundles_post_ra>
// kernel: net_mp_forward.1
= control target key start
LH: loop header
LB: loop body
LE: loop exit
PB: predicated region body
PF: predicated region fallthrough
CT: control target
= control target key end

     0   :  { %vm116_vm0 = vcmask 1041408   ;;  %vm103_vm1 = vcmask 15360   ;;  %v11283_v17 = vmov 0.0   ;;  %vm239_vm2 = vcmask 130048   ;;  %s11249_s4 = inlined_call_operand.vmem [shape: f32[2,16], index: 4, kind: input, shape index: {}]   ;;  %s11250_s1 = inlined_call_operand.vmem [shape: f32[32,2], index: 1, kind: input, shape index: {}]   ;;  %s11251_s6 = inlined_call_operand.vmem [shape: f32[16,512], index: 6, kind: input, shape index: {}]   ;;  %s11252_s0 = inlined_call_operand.vmem [shape: f32[16,128], index: 0, kind: input, shape index: {}]   ;;  %s11253_s5 = inlined_call_operand.vmem [shape: f32[1,16], index: 5, kind: input, shape index: {}]   ;;  %s11254_s10 = inlined_call_operand.vmem [shape: f32[2,16], index: 10, kind: input, shape index: {}]   ;;  %s11255_s2 = inlined_call_operand.vmem [shape: f32[32,16], index: 2, kind: input, shape index: {}]   ;;  %s11256_s8 = inlined_call_operand.vmem [shape: f32[128,128], index: 8, kind: input, shape index: {}]   ;;  %s11257_s12 = inlined_call_operand.vmem [shape: f32[16,4096], index: 12, kind: input, shape index: {}]   ;;  %s11258_s11 = inlined_call_operand.vmem [shape: f32[1,16], index: 11, kind: input, shape index: {}]   ;;  %s11259_s3 = inlined_call_operand.vmem [shape: f32[16,32], index: 3, kind: input, shape index: {}]   ;;  %s11260_s7 = inlined_call_operand.vmem [shape: f32[1,512], index: 7, kind: input, shape index: {}]   ;;  %s11261_s14 = inlined_call_operand.vmem [shape: f32[128,128], index: 14, kind: input, shape index: {}]   ;;  %s11262_s13 = inlined_call_operand.vmem [shape: f32[1,4096], index: 13, kind: input, shape index: {}]   ;;  %s11263_s9 = inlined_call_operand.vmem [shape: f32[1,128], index: 9, kind: input, shape index: {}]   ;;  %s11264_s16 = inlined_call_operand.vmem [shape: f32[2,16], index: 16, kind: input, shape index: {}]   ;;  %s11265_s18 = inlined_call_operand.vmem [shape: f32[16,4096], index: 18, kind: input, shape index: {}]   ;;  %s11266_s17 = inlined_call_operand.vmem [shape: f32[1,16], index: 17, kind: input, shape index: {}]   ;;  %s11267_s20 = inlined_call_operand.vmem [shape: f32[128,128], index: 20, kind: input, shape index: {}]   ;;  %s11268_s19 = inlined_call_operand.vmem [shape: f32[1,4096], index: 19, kind: input, shape index: {}]   ;;  %s11269_s15 = inlined_call_operand.vmem [shape: f32[1,128], index: 15, kind: input, shape index: {}]   ;;  %s11270_s22 = inlined_call_operand.vmem [shape: f32[128,128], index: 22, kind: input, shape index: {}]   ;;  %s11271_s24 = inlined_call_operand.vmem [shape: f32[128,128], index: 24, kind: input, shape index: {}]   ;;  %s11272_s21 = inlined_call_operand.vmem [shape: f32[1,128], index: 21, kind: input, shape index: {}]   ;;  %s11273_s23 = inlined_call_operand.vmem [shape: f32[1,128], index: 23, kind: input, shape index: {}]   ;;  %s11274_s25 = inlined_call_operand.vmem [shape: f32[1,128], index: 25, kind: input, shape index: {}]   ;;  %s11275_s26 = inlined_call_operand.vmem [shape: f32[16,128], index: 26, kind: output, shape index: {}]  }
   0x1   :  { %11453 = sst [smem:[#allocation141_spill]] %s11249_s4  ;;  %316 = vmatprep.mubr.f32.mxu1 %v11283_v17  ;;  %v11285_v39 = vmov 1   ;;  %v11287_v40 = vmov 0   ;;  %vm714_vm3 = vcmask 261120  }
   0x2   :  { %11454 = sst [smem:[#allocation142_spill]] %s11250_s1  ;;  %7559 = vset.pattern.permute.xlu1 %v11285_v39  ;;  %7558 = vset.pattern.permute.xlu0 %v11287_v40 }
   0x3   :  { %11455 = sst [smem:[#allocation143_spill]] %s11251_s6 }
   0x4   :  { %11456 = sst [smem:[#allocation144_spill]] %s11252_s0  ;;  %s11466_s0 = sld [smem:[#allocation143_spill]] }
   0x5   :  { %11457 = sst [smem:[#allocation145_spill]] %s11253_s5  ;;  %s11465_s5 = sld [smem:[#allocation142_spill]] }
   0x6   :  { %11458 = sst [smem:[#allocation146_spill]] %s11254_s10  ;;  %s11467_s28 = sld [smem:[#allocation144_spill]] }
   0x7   :  { %11459 = sst [smem:[#allocation147_spill]] %s11255_s2  ;;  %s11469_s10 = sld [smem:[#allocation146_spill]] }
   0x8   :  { %11460 = sst [smem:[#allocation148_spill]] %s11256_s8  ;;  %s11464_s8 = sld [smem:[#allocation141_spill]] }
   0x9   :  { %11461 = sst [smem:[#allocation149_spill]] %s11257_s12  ;;  %s11470_s27 = sld [smem:[#allocation147_spill]] }
   0xa   :  { %11462 = sst [smem:[#allocation150_spill]] %s11258_s11  ;;  %v210_v5 = vld [vmem:[%s11466_s0 + $0x8] sm:$0xff]  ;;  %v212_v7 = vld [vmem:[%s11466_s0 + $0x18] sm:$0xff]  ;;  %v209_v10 = vld [vmem:[%s11466_s0] sm:$0xff]  ;;  %s11468_s11 = sld [smem:[#allocation145_spill]] }
   0xb   :  { %11463 = sst [smem:[#allocation151_spill]] %s11259_s3  ;;  %v8017_v1 = vld [vmem:[%s11465_s5] sm:$0xff]  ;;  %v8022_v2 = vld [vmem:[%s11465_s5 + $0x8] sm:$0xff]  ;;  %v8030_v3 = vld [vmem:[%s11465_s5 + $0x10] sm:$0xff]  ;;  %s11471_s30 = sld [smem:[#allocation148_spill]] }
   0xc   :  { %6927 = vmatprep.mubr.msk.f32.mxu0 %vm103_vm1, %v8017_v1  ;;  %v8040_v4 = vld [vmem:[%s11465_s5 + $0x18] sm:$0xff]  ;;  %v214_v6 = vld [vmem:[%s11466_s0 + $0x28] sm:$0xff]  ;;  %v213_v12 = vld [vmem:[%s11466_s0 + $0x20] sm:$0xff]  ;;  %s11472_s29 = sld [smem:[#allocation149_spill]]  ;;  %s11473_s1 = sld [smem:[#allocation150_spill]] }
   0xd   :  { %v7187_v8 = vpack.c.bf16 %v214_v6, %v210_v5  ;;  %v216_v9 = vld [vmem:[%s11466_s0 + $0x38] sm:$0xff]  ;;  %v211_v13 = vld [vmem:[%s11466_s0 + $0x10] sm:$0xff]  ;;  %v7189_v15 = vpack.c.bf16 %v213_v12, %v209_v10  ;;  %v93_v18 = vld [vmem:[%s11467_s28] sm:$0xff]  ;;  %s11474_s2 = sld [smem:[#allocation151_spill]] }
   0xe   :  { %v95_v0 = vld [vmem:[%s11464_s8] sm:$0x3]  ;;  %v7191_v11 = vpack.c.bf16 %v216_v9, %v212_v7  ;;  %v215_v14 = vld [vmem:[%s11466_s0 + $0x30] sm:$0xff]  ;;  %v8076_v19 = vld [vmem:[%s11467_s28 + $0x8] sm:$0xff] }
   0xf   :  { %6925 = vmatprep.subr.msk.mxu0 %vm116_vm0, %v95_v0  ;;  %7188 = vmatprep.subr.bf16.mxu1 %v7187_v8  ;;  %v7193_v16 = vpack.c.bf16 %v215_v14, %v211_v13  ;;  %v7195_v20 = vpack.c.bf16 %v8076_v19, %v93_v18  ;;  %v807_v30 = vld [vmem:[%s11469_s10] sm:$0x3]  ;;  %v88_v36 = vld [vmem:[%s11470_s27 + $0x8] sm:$0xff]  ;;  %v89_v37 = vld [vmem:[%s11470_s27 + $0x10] sm:$0xff]  ;;  %v11291_v8 = vmov 2   ;;  %v11289_v13 = vmov 3  }
  0x10   :  { %6926 = vmatpush3.msk.msra.mxu0 %vm116_vm0, %v95_v0  ;;  %7190 = vmatpush1.bf16.msra.mxu1 %v7189_v15  ;;  %v6607_v21 = vld [vmem:[%s11468_s11] ss:$0 sm:$0xff]  ;;  %v90_v38 = vld [vmem:[%s11470_s27 + $0x18] sm:$0xff] }
  0x11   :  { %6928 = vmatmul.mubr.msk.f32.vlgmr.msra.gmra.mrb[0].mxu0 %vm103_vm1, %v8022_v2  ;;  %7192 = vmatprep.subr.bf16.mxu0 %v7191_v11  ;;  %v87_v35 = vld [vmem:[%s11470_s27] sm:$0xff]  ;;  %v624_v42 = vld [vmem:[%s11471_s30 + $0x8] sm:$0xff]  ;;  %v625_v43 = vld [vmem:[%s11471_s30 + $0x10] sm:$0xff] }
  0x12   :  { %6930 = vmatprep.mubr.msk.f32.mxu0 %vm103_vm1, %v8030_v3  ;;  %7194 = vmatpush1.bf16.msra.mxu0 %v7193_v16  ;;  %v623_v41 = vld [vmem:[%s11471_s30] sm:$0xff]  ;;  %v626_v45 = vld [vmem:[%s11471_s30 + $0x18] sm:$0xff]  ;;  %v628_v0 = vld [vmem:[%s11471_s30 + $0x28] sm:$0xff] }
  0x13   :  { %7196 = vmatprep.subr.bf16.mxu1 %v7195_v20  ;;  %v7199_v44 = vpack.c.bf16 %v624_v42, %v623_v41  ;;  %v7203_v46 = vpack.c.bf16 %v626_v45, %v625_v43  ;;  %v627_v63 = vld [vmem:[%s11471_s30 + $0x20] sm:$0xff]  ;;  %v630_v5 = vld [vmem:[%s11471_s30 + $0x38] sm:$0xff]  ;;  %v632_v11 = vld [vmem:[%s11471_s30 + $0x48] sm:$0xff] }
  0x14   :  { %v631_v10 = vld [vmem:[%s11471_s30 + $0x40] sm:$0xff]  ;;  %v633_v14 = vld [vmem:[%s11471_s30 + $0x50] sm:$0xff]  ;;  %v634_v15 = vld [vmem:[%s11471_s30 + $0x58] sm:$0xff] }
  0x15   :  { %6931 = vmatmul.mubr.msk.f32.gmra.mrb[2].mxu0 %vm103_vm1, %v8040_v4  ;;  %7200 = vmatprep.subr.bf16.mxu0 %v7199_v44  ;;  %v7215_v12 = vpack.c.bf16 %v632_v11, %v631_v10  ;;  %v7219_v16 = vpack.c.bf16 %v634_v15, %v633_v14  ;;  %v910_v45 = vld [vmem:[%s11472_s29 + $0x18] sm:$0xff]  ;;  %v913_v15 = vld [vmem:[%s11472_s29 + $0x30] sm:$0xff] }
  0x16   :  { %405 = vmatprep.mubr.f32.mxu0 %v11283_v17  ;;  %v914_v10 = vld [vmem:[%s11472_s29 + $0x38] sm:$0xff] }
  0x17   :  { %v946_v11 = vld [vmem:[%s11472_s29 + $0x138] sm:$0xff] }
  0x18   :  { %v7251_v14 = vpack.c.bf16 %v946_v11, %v914_v10 }
  0xe4   :  { %v6929_v22 = vpop.f32.mrb[0].mxu0 }
  0xe5   :  { %v186_v23 = vpop.f32.mrb[1].mxu0  ;;  %v192_v25 = vadd.f32 %v6929_v22, %v6607_v21  ;;  %v637_v22 = vld [vmem:[%s11471_s30 + $0x70] sm:$0xff] }
  0xe6   :  { %v187_v24 = vadd.f32 %v6607_v21, %v186_v23  ;;  %v638_v23 = vld [vmem:[%s11471_s30 + $0x78] sm:$0xff] }
  0xe7   :  { %v206_v31 = vmax.f32 %v192_v25, 0.0  ;;  %v908_v25 = vld [vmem:[%s11472_s29 + $0x8] sm:$0xff] }
  0xe8   :  { %v205_v26 = vmax.f32 %v187_v24, 0.0  ;;  %v6932_v27 = vpop.f32.mrb[2].mxu0  ;;  %v7227_v24 = vpack.c.bf16 %v638_v23, %v637_v22  ;;  %v917_v23 = vld [vmem:[%s11472_s29 + $0x50] sm:$0xff] }
  0xe9   :  { %v196_v28 = vpop.f32.mrb[3].mxu0  ;;  %v202_v33 = vadd.f32 %v6932_v27, %v6607_v21 }
  0xea   :  { %6613 = vmatmul.mubr.msk.f32.vlgmr.msra.gmra.mrb[0].mxu1 %vm239_vm2, %v205_v26  ;;  %6617 = vmatmul.mubr.msk.f32.vlgmr.msra.gmra.mrb[4].mxu0 %vm239_vm2, %v205_v26  ;;  %v197_v29 = vadd.f32 %v6607_v21, %v196_v28  ;;  %v940_v26 = vld [vmem:[%s11472_s29 + $0x108] sm:$0xff] }
  0xeb   :  { %322 = vmatprep.mubr.f32.mxu1 %v11283_v17  ;;  %411 = vmatprep.mubr.f32.mxu0 %v11283_v17  ;;  %v208_v34 = vmax.f32 %v202_v33, 0.0  ;;  %v7239_v28 = vpack.c.bf16 %v940_v26, %v908_v25  ;;  %v922_v25 = vld [vmem:[%s11472_s29 + $0x78] sm:$0xff] }
  0xec   :  { %7198 = vmatpush3.bf16.msra.mxu1 %v7195_v20  ;;  %v207_v32 = vmax.f32 %v197_v29, 0.0  ;;  %7202 = vmatpush3.bf16.msra.mxu0 %v7199_v44  ;;  %v636_v20 = vld [vmem:[%s11471_s30 + $0x68] sm:$0xff]  ;;  %v907_v29 = vld [vmem:[%s11472_s29] sm:$0xff]  ;;  %v954_v26 = vld [vmem:[%s11472_s29 + $0x178] sm:$0xff] }
  0xed   :  { %6989 = vmatprep.subr.msk.mxu1 %vm116_vm0, %v807_v30  ;;  %7204 = vmatprep.subr.bf16.mxu0 %v7203_v46 }
  0xee   :  { %6614 = vmatmul.mubr.msk.f32.gmra.mrb[2].mxu1 %vm239_vm2, %v206_v31  ;;  %6618 = vmatmul.mubr.msk.f32.gmra.mrb[6].mxu0 %vm239_vm2, %v206_v31  ;;  %v6628_v31 = vld [vmem:[%s11473_s1] ss:$0 sm:$0xff] }
  0xef   :  { %328 = vmatprep.mubr.f32.mxu1 %v11283_v17  ;;  %417 = vmatprep.mubr.f32.mxu0 %v11283_v17 }
  0xf0   :  { %7206 = vmatpush3.bf16.msra.mxu0 %v7203_v46  ;;  %v942_v46 = vld [vmem:[%s11472_s29 + $0x118] sm:$0xff] }
  0xf2   :  { %6615 = vmatmul.mubr.msk.f32.gmra.mrb[4].mxu1 %vm239_vm2, %v207_v32  ;;  %6619 = vmatmul.mubr.msk.f32.gmra.mrb[8].mxu0 %vm239_vm2, %v207_v32 }
  0xf3   :  { %334 = vmatprep.mubr.f32.mxu1 %v11283_v17  ;;  %423 = vmatprep.mubr.f32.mxu0 %v11283_v17 }
  0xf6   :  { %6616 = vmatmul.mubr.msk.f32.gmra.mrb[6].mxu1 %vm239_vm2, %v208_v34  ;;  %6620 = vmatmul.mubr.msk.f32.gmra.mrb[10].mxu0 %vm239_vm2, %v208_v34 }
  0xf7   :  { %6937 = vmatprep.mubr.msk.f32.mxu1 %vm239_vm2, %v87_v35  ;;  %6975 = vmatprep.mubr.f32.mxu0 %v93_v18  ;;  %v635_v18 = vld [vmem:[%s11471_s30 + $0x60] sm:$0xff] }
  0xf8   :  { %v7223_v21 = vpack.c.bf16 %v636_v20, %v635_v18  ;;  %v918_v18 = vld [vmem:[%s11472_s29 + $0x58] sm:$0xff] }
  0xf9   :  { %v950_v20 = vld [vmem:[%s11472_s29 + $0x158] sm:$0xff] }
  0xfa   :  { %6938 = vmatmul.mubr.msk.f32.vlgmr.msra.gmra.mrb[8].mxu1 %vm239_vm2, %v88_v36  ;;  %v7259_v22 = vpack.c.bf16 %v950_v20, %v918_v18 }
  0xfb   :  { %6940 = vmatprep.mubr.msk.f32.mxu1 %vm239_vm2, %v89_v37  ;;  %6990 = vmatpush3.msk.msra.mxu1 %vm116_vm0, %v807_v30  ;;  %v939_v30 = vld [vmem:[%s11472_s29 + $0x100] sm:$0xff] }
  0xfc   :  { %v7241_v33 = vpack.c.bf16 %v939_v30, %v907_v29  ;;  %7240 = vmatprep.subr.bf16.mxu1 %v7239_v28  ;;  %v7267_v28 = vpack.c.bf16 %v954_v26, %v922_v25  ;;  %v921_v29 = vld [vmem:[%s11472_s29 + $0x70] sm:$0xff] }
  0xfd   :  { %v953_v30 = vld [vmem:[%s11472_s29 + $0x170] sm:$0xff] }
  0xfe   :  { %6941 = vmatmul.mubr.msk.f32.gmra.mrb[10].mxu1 %vm239_vm2, %v90_v38 }
  0xff   :  { %6991 = vmatprep.mubr.msk.f32.mxu1 %vm103_vm1, %v8017_v1 }
 0x102   :  { %6992 = vmatmul.mubr.msk.f32.vlgmr.msra.gmra.mrb[12].mxu1 %vm103_vm1, %v8022_v2  ;;  %v7207_v2 = vpack.c.bf16 %v628_v0, %v627_v63  ;;  %v7243_v63 = vpack.c.bf16 %v942_v46, %v910_v45  ;;  %v909_v0 = vld [vmem:[%s11472_s29 + $0x10] sm:$0xff]  ;;  %v219_v46 = vlaneseq }
 0x103   :  { %6994 = vmatprep.mubr.msk.f32.mxu1 %vm103_vm1, %v8030_v3  ;;  %7242 = vmatpush1.bf16.msra.mxu1 %v7241_v33  ;;  %v7269_v33 = vpack.c.bf16 %v953_v30, %v921_v29 }
 0x104   :  { %7208 = vmatprep.subr.bf16.mxu0 %v7207_v2  ;;  %7244 = vmatprep.subr.bf16.mxu1 %v7243_v63  ;;  %v8405_v63 = vshrl.u32 %v219_v46, 7 }
 0x105   :  { %7210 = vmatpush3.bf16.msra.mxu0 %v7207_v2 }
 0x106   :  { %6995 = vmatmul.mubr.msk.f32.gmra.mrb[14].mxu1 %vm103_vm1, %v8040_v4  ;;  %v629_v4 = vld [vmem:[%s11471_s30 + $0x30] sm:$0xff] }
 0x107   :  { %1215 = vmatprep.mubr.f32.mxu1 %v11283_v17  ;;  %v7211_v7 = vpack.c.bf16 %v630_v5, %v629_v4  ;;  %v912_v4 = vld [vmem:[%s11472_s29 + $0x28] sm:$0xff] }
 0x108   :  { %v944_v5 = vld [vmem:[%s11472_s29 + $0x128] sm:$0xff] }
 0x109   :  { %7212 = vmatprep.subr.bf16.mxu0 %v7211_v7 }
 0x10a   :  { %7214 = vmatpush3.bf16.msra.mxu0 %v7211_v7  ;;  %v7247_v7 = vpack.c.bf16 %v944_v5, %v912_v4  ;;  %v217_v4 = vld [vmem:[%s11260_s7] sm:$0xf]  ;;  %v934_v5 = vld [vmem:[%s11472_s29 + $0xd8] sm:$0xff] }
 0x10b   :  { %7216 = vmatprep.subr.bf16.mxu0 %v7215_v12 }
 0x10e   :  { %7218 = vmatpush3.bf16.msra.mxu0 %v7215_v12 }
 0x10f   :  { %7220 = vmatprep.subr.bf16.mxu0 %v7219_v16 }
 0x112   :  { %7222 = vmatpush3.bf16.msra.mxu0 %v7219_v16  ;;  %v945_v16 = vld [vmem:[%s11472_s29 + $0x130] sm:$0xff] }
 0x113   :  { %7224 = vmatprep.subr.bf16.mxu0 %v7223_v21 }
 0x116   :  { %7226 = vmatpush3.bf16.msra.mxu0 %v7223_v21  ;;  %v7253_v21 = vpack.c.bf16 %v945_v16, %v913_v15 }
 0x117   :  { %7228 = vmatprep.subr.bf16.mxu0 %v7227_v24 }
 0x11a   :  { %7230 = vmatpush3.bf16.msra.mxu0 %v7227_v24  ;;  %v949_v24 = vld [vmem:[%s11472_s29 + $0x150] sm:$0xff] }
 0x11d   :  { %6976 = vmatmul.mubr.f32.vlgmr.msra.gmra.mrb[12].mxu0 %v8076_v19 }
 0x1bd   :  { %v8140_v47 = vpop.f32.mrb[0].mxu1  ;;  %v8142_v48 = vpop.f32.mrb[4].mxu0 }
 0x1be   :  { %v8144_v49 = vpop.f32.mrb[1].mxu1  ;;  %v8146_v50 = vpop.f32.mrb[5].mxu0 }
 0x1c1   :  { %v8148_v51 = vpop.f32.mrb[2].mxu1  ;;  %v8150_v52 = vpop.f32.mrb[6].mxu0 }
 0x1c2   :  { %v8152_v53 = vpop.f32.mrb[3].mxu1  ;;  %v8154_v54 = vpop.f32.mrb[7].mxu0 }
 0x1c5   :  { %v8156_v55 = vpop.f32.mrb[4].mxu1  ;;  %v8158_v56 = vpop.f32.mrb[8].mxu0 }
 0x1c6   :  { %v8160_v57 = vpop.f32.mrb[5].mxu1  ;;  %v8162_v58 = vpop.f32.mrb[9].mxu0 }
 0x1c9   :  { %v8164_v59 = vpop.f32.mrb[6].mxu1  ;;  %v8166_v60 = vpop.f32.mrb[10].mxu0 }
 0x1ca   :  { %v8168_v61 = vpop.f32.mrb[7].mxu1  ;;  %v8170_v62 = vpop.f32.mrb[11].mxu0 }
 0x1cd   :  { %v6939_v1 = vpop.f32.mrb[8].mxu1 }
 0x1ce   :  { %556 = vperm.xlu1 %7559, %v6939_v1   ;;  %534 = vperm.xlu0 %7558, %v6939_v1   ;;  %v508_v3 = vpop.f32.mrb[9].mxu1 }
 0x1d1   :  { %v8184_v6 = vpop.f32.mrb[10].mxu1 }
 0x1d2   :  { %7560 = vset.pattern.permute.xlu1 %v11291_v8  ;;  %529 = vperm.xlu0 %7558, %v508_v3   ;;  %v8187_v9 = vpop.f32.mrb[11].mxu1 }
 0x1d3   :  { %580 = vperm.xlu1 %7560, %v6939_v1  }
 0x1d5   :  { %v6993_v27 = vpop.f32.mrb[12].mxu1 }
 0x1d6   :  { %7563 = vset.pattern.permute.xlu0 %v11291_v8  ;;  %v884_v32 = vpop.f32.mrb[13].mxu1  ;;  %v890_v34 = vadd.f32 %v6993_v27, %v6628_v31  ;;  %v7261_v27 = vpack.c.bf16 %v949_v24, %v917_v23  ;;  %v8454_v23 = vsub.s32 3, %v8405_v63 }
 0x1d7   :  { %7561 = vset.pattern.permute.xlu1 %v11289_v13  ;;  %576 = vperm.xlu0 %7563, %v508_v3   ;;  %v885_v35 = vadd.f32 %v6628_v31, %v884_v32  ;;  %v958_v32 = vld [vmem:[%s11472_s29 + $0x198] sm:$0xff] }
 0x1d8   :  { %604 = vperm.xlu1 %7561, %v6939_v1   ;;  %v8245_v37 = vmax.f32 %v890_v34, 0.0  ;;  %v941_v1 = vld [vmem:[%s11472_s29 + $0x110] sm:$0xff]  ;;  %11478 = vst [vmem:[#allocation5_spill] sm:$0xff] %v8454_v23 }
 0x1d9   :  { %v8240_v36 = vmax.f32 %v885_v35, 0.0  ;;  %v6996_v38 = vpop.f32.mrb[14].mxu1  ;;  %v7245_v2 = vpack.c.bf16 %v941_v1, %v909_v0  ;;  %v925_v35 = vld [vmem:[%s11472_s29 + $0x90] sm:$0xff]  ;;  %v8411_v0 = vsub.s32 0, %v8405_v63  ;;  %v8414_v1 = vsub.s32 1, %v8405_v63 }
 0x1da   :  { %v894_v41 = vpop.f32.mrb[15].mxu1  ;;  %v900_v42 = vadd.f32 %v6996_v38, %v6628_v31  ;;  %v957_v38 = vld [vmem:[%s11472_s29 + $0x190] sm:$0xff] }
 0x1db   :  { %7564 = vset.pattern.permute.xlu0 %v11289_v13  ;;  %6634 = vmatmul.mubr.msk.f32.vlgmr.msra.gmra.mrb[16].mxu1 %vm239_vm2, %v8240_v36  ;;  %v895_v43 = vadd.f32 %v6628_v31, %v894_v41  ;;  %v926_v31 = vld [vmem:[%s11472_s29 + $0x98] sm:$0xff]  ;;  %11475 = vst [vmem:[#allocation2_spill] sm:$0xff] %v8411_v0  ;;  %11476 = vst [vmem:[#allocation3_spill] sm:$0xff] %v8414_v1  ;;  %v8438_v10 = vrot.slane %v217_v4, %v8414_v1 }
 0x1dc   :  { %7562 = vset.pattern.permute.xlu1 %v11285_v39  ;;  %600 = vperm.xlu0 %7564, %v508_v3   ;;  %v8258_v44 = vmax.f32 %v900_v42, 0.0  ;;  %v7275_v34 = vpack.c.bf16 %v958_v32, %v926_v31  ;;  %v930_v41 = vld [vmem:[%s11472_s29 + $0xb8] sm:$0xff]  ;;  %v965_v31 = vld [vmem:[%s11472_s29 + $0x1d0] sm:$0xff] }
 0x1dd   :  { %552 = vperm.xlu1 %7562, %v508_v3   ;;  %1221 = vmatprep.mubr.f32.mxu1 %v11283_v17  ;;  %v8255_v19 = vmax.f32 %v895_v43, 0.0  ;;  %v91_v3 = vld [vmem:[%s11474_s2] sm:$0xff]  ;;  %v962_v42 = vld [vmem:[%s11472_s29 + $0x1b8] sm:$0xff]  ;;  %v7277_v43 = vpack.c.bf16 %v957_v38, %v925_v35  ;;  %v327_v15 = vadd.f32 %v8152_v53, %v8438_v10 }
 0x1de   :  { %7246 = vmatpush1.bf16.msra.mxu1 %v7245_v2  ;;  %6986 = vmatprep.mubr.msk.f32.mxu0 %vm714_vm3, %v91_v3  ;;  %v7283_v45 = vpack.c.bf16 %v962_v42, %v930_v41  ;;  %v929_v2 = vld [vmem:[%s11472_s29 + $0xb0] sm:$0xff] }
 0x1df   :  { %6635 = vmatmul.mubr.msk.f32.gmra.mrb[18].mxu1 %vm239_vm2, %v8245_v37  ;;  %7248 = vmatprep.subr.bf16.mxu1 %v7247_v7  ;;  %v961_v3 = vld [vmem:[%s11472_s29 + $0x1b0] sm:$0xff] }
 0x1e0   :  { %7565 = vset.pattern.permute.xlu0 %v11287_v40  ;;  %1227 = vmatprep.mubr.f32.mxu1 %v11283_v17  ;;  %v7285_v7 = vpack.c.bf16 %v961_v3, %v929_v2 }
 0x1e1   :  { %564 = vperm.xlu1 %7562, %v8184_v6   ;;  %544 = vperm.xlu0 %7565, %v8184_v6  }
 0x1e3   :  { %6636 = vmatmul.mubr.msk.f32.gmra.mrb[20].mxu1 %vm239_vm2, %v8255_v19 }
 0x1e4   :  { %1233 = vmatprep.mubr.f32.mxu1 %v11283_v17 }
 0x1e5   :  { %7567 = vset.pattern.permute.xlu1 %v11287_v40  ;;  %7566 = vset.pattern.permute.xlu0 %v11291_v8 }
 0x1e6   :  { %588 = vperm.xlu0 %7566, %v8184_v6   ;;  %539 = vperm.xlu1 %7567, %v8187_v9  }
 0x1e7   :  { %6637 = vmatmul.mubr.msk.f32.gmra.mrb[22].mxu1 %vm239_vm2, %v8258_v44 }
 0x1e8   :  { %1304 = vmatprep.mubr.f32.mxu1 %v11283_v17 }
 0x1ea   :  { %7568 = vset.pattern.permute.xlu1 %v11285_v39  ;;  %7572 = vset.pattern.permute.xlu0 %v11285_v39 }
 0x1eb   :  { %560 = vperm.xlu1 %7568, %v8187_v9   ;;  %6638 = vmatmul.mubr.msk.f32.vlgmr.msra.gmra.mrb[24].mxu1 %vm239_vm2, %v8240_v36 }
 0x1ec   :  { %1310 = vmatprep.mubr.f32.mxu1 %v11283_v17 }
 0x1ef   :  { %7569 = vset.pattern.permute.xlu1 %v11291_v8  ;;  %6639 = vmatmul.mubr.msk.f32.gmra.mrb[26].mxu1 %vm239_vm2, %v8245_v37 }
 0x1f0   :  { %584 = vperm.xlu1 %7569, %v8187_v9   ;;  %1316 = vmatprep.mubr.f32.mxu1 %v11283_v17 }
 0x1f3   :  { %6640 = vmatmul.mubr.msk.f32.gmra.mrb[28].mxu1 %vm239_vm2, %v8255_v19 }
 0x1f4   :  { %7570 = vset.pattern.permute.xlu1 %v11289_v13  ;;  %1322 = vmatprep.mubr.f32.mxu1 %v11283_v17 }
 0x1f5   :  { %608 = vperm.xlu1 %7570, %v8187_v9   ;;  %v943_v9 = vld [vmem:[%s11472_s29 + $0x120] sm:$0xff] }
 0x1f7   :  { %6641 = vmatmul.mubr.msk.f32.gmra.mrb[30].mxu1 %vm239_vm2, %v8258_v44 }
 0x1f8   :  { %1393 = vmatprep.mubr.f32.mxu1 %v11283_v17 }
 0x1f9   :  { %612 = vperm.xlu1 %7570, %v8184_v6   ;;  %v911_v6 = vld [vmem:[%s11472_s29 + $0x20] sm:$0xff] }
 0x1fa   :  { %v7249_v12 = vpack.c.bf16 %v943_v9, %v911_v6  ;;  %v966_v6 = vld [vmem:[%s11472_s29 + $0x1d8] sm:$0xff]  ;;  %v8435_v9 = vrot.slane %v217_v4, %v8411_v0 }
 0x1fb   :  { %v7291_v11 = vpack.c.bf16 %v966_v6, %v934_v5 }
 0x1fc   :  { %7250 = vmatpush1.bf16.msra.mxu1 %v7249_v12  ;;  %v8441_v12 = vsub.s32 2, %v8405_v63  ;;  %v319_v42 = vadd.f32 %v8140_v47, %v8435_v9  ;;  %v337_v47 = vadd.f32 %v8164_v59, %v8435_v9 }
 0x1fd   :  { %7571 = vset.pattern.permute.xlu1 %v11287_v40  ;;  %7252 = vmatprep.subr.bf16.mxu1 %v7251_v14  ;;  %v325_v14 = vadd.f32 %v8148_v51, %v8435_v9 }
 0x1fe   :  { %11477 = vst [vmem:[#allocation4_spill] sm:$0xff] %v8441_v12 }
 0x1ff   :  { %6642 = vmatmul.mubr.msk.f32.vlgmr.msra.gmra.mrb[32].mxu1 %vm239_vm2, %v8240_v36 }
 0x200   :  { %1399 = vmatprep.mubr.f32.mxu1 %v11283_v17  ;;  %7254 = vmatpush1.bf16.msra.mxu1 %v7253_v21 }
 0x201   :  { %7260 = vmatprep.subr.bf16.mxu1 %v7259_v22  ;;  %v8451_v22 = vrot.slane %v217_v4, %v8441_v12 }
 0x203   :  { %6643 = vmatmul.mubr.msk.f32.gmra.mrb[34].mxu1 %vm239_vm2, %v8245_v37  ;;  %v414_v53 = vadd.f32 %v8150_v52, %v8451_v22  ;;  %v933_v52 = vld [vmem:[%s11472_s29 + $0xd0] sm:$0xff]  ;;  %v408_v2 = vadd.f32 %v8142_v48, %v8451_v22  ;;  %v426_v59 = vadd.f32 %v8166_v60, %v8451_v22  ;;  %v3428_v60 = vld [vmem:[%s11261_s14] sm:$0xff] }
 0x204   :  { %1405 = vmatprep.mubr.f32.mxu1 %v11283_v17 }
 0x207   :  { %6644 = vmatmul.mubr.msk.f32.gmra.mrb[36].mxu1 %vm239_vm2, %v8255_v19 }
 0x208   :  { %1411 = vmatprep.mubr.f32.mxu1 %v11283_v17 }
 0x20b   :  { %6645 = vmatmul.mubr.msk.f32.gmra.mrb[38].mxu1 %vm239_vm2, %v8258_v44 }
 0x20c   :  { %1482 = vmatprep.mubr.f32.mxu1 %v11283_v17 }
 0x20f   :  { %6646 = vmatmul.mubr.msk.f32.vlgmr.msra.gmra.mrb[40].mxu1 %vm239_vm2, %v8240_v36 }
 0x210   :  { %1488 = vmatprep.mubr.f32.mxu1 %v11283_v17  ;;  %7262 = vmatpush1.bf16.msra.mxu1 %v7261_v27  ;;  %v8462_v27 = vrot.slane %v217_v4, %v8454_v23 }
 0x211   :  { %7268 = vmatprep.subr.bf16.mxu1 %v7267_v28 }
 0x212   :  { %v416_v29 = vadd.f32 %v8154_v54, %v8462_v27  ;;  %v7293_v54 = vpack.c.bf16 %v965_v31, %v933_v52  ;;  %v410_v5 = vadd.f32 %v8146_v50, %v8462_v27 }
 0x213   :  { %6647 = vmatmul.mubr.msk.f32.gmra.mrb[42].mxu1 %vm239_vm2, %v8245_v37 }
 0x214   :  { %1494 = vmatprep.mubr.f32.mxu1 %v11283_v17 }
 0x217   :  { %6648 = vmatmul.mubr.msk.f32.gmra.mrb[44].mxu1 %vm239_vm2, %v8255_v19 }
 0x218   :  { %1500 = vmatprep.mubr.f32.mxu1 %v11283_v17 }
 0x21b   :  { %6649 = vmatmul.mubr.msk.f32.gmra.mrb[46].mxu1 %vm239_vm2, %v8258_v44 }
 0x21c   :  { %1660 = vmatprep.mubr.f32.mxu1 %v11283_v17 }
 0x21f   :  { %6654 = vmatmul.mubr.msk.f32.vlgmr.msra.gmra.mrb[48].mxu1 %vm239_vm2, %v8240_v36 }
 0x220   :  { %1666 = vmatprep.mubr.f32.mxu1 %v11283_v17  ;;  %7270 = vmatpush1.bf16.msra.mxu1 %v7269_v33  ;;  %v938_v33 = vld [vmem:[%s11472_s29 + $0xf8] sm:$0xff] }
 0x221   :  { %7276 = vmatprep.subr.bf16.mxu1 %v7275_v34  ;;  %v970_v34 = vld [vmem:[%s11472_s29 + $0x1f8] sm:$0xff] }
 0x222   :  { %v7299_v41 = vpack.c.bf16 %v970_v34, %v938_v33 }
 0x223   :  { %6655 = vmatmul.mubr.msk.f32.gmra.mrb[50].mxu1 %vm239_vm2, %v8245_v37 }
 0x224   :  { %1672 = vmatprep.mubr.f32.mxu1 %v11283_v17 }
 0x227   :  { %6656 = vmatmul.mubr.msk.f32.gmra.mrb[52].mxu1 %vm239_vm2, %v8255_v19 }
 0x228   :  { %1678 = vmatprep.mubr.f32.mxu1 %v11283_v17 }
 0x22b   :  { %6657 = vmatmul.mubr.msk.f32.gmra.mrb[54].mxu1 %vm239_vm2, %v8258_v44 }
 0x22c   :  { %1838 = vmatprep.mubr.f32.mxu1 %v11283_v17 }
 0x22f   :  { %6662 = vmatmul.mubr.msk.f32.vlgmr.msra.gmra.mrb[56].mxu1 %vm239_vm2, %v8240_v36 }
 0x230   :  { %1844 = vmatprep.mubr.f32.mxu1 %v11283_v17  ;;  %7278 = vmatpush1.bf16.msra.mxu1 %v7277_v43  ;;  %v321_v43 = vadd.f32 %v8144_v49, %v8438_v10  ;;  %v339_v49 = vadd.f32 %v8168_v61, %v8438_v10 }
 0x231   :  { %7284 = vmatprep.subr.bf16.mxu1 %v7283_v45 }
 0x233   :  { %6663 = vmatmul.mubr.msk.f32.gmra.mrb[58].mxu1 %vm239_vm2, %v8245_v37 }
 0x234   :  { %1850 = vmatprep.mubr.f32.mxu1 %v11283_v17 }
 0x237   :  { %6664 = vmatmul.mubr.msk.f32.gmra.mrb[60].mxu1 %vm239_vm2, %v8255_v19 }
 0x238   :  { %1856 = vmatprep.mubr.f32.mxu1 %v11283_v17 }
 0x23b   :  { %6665 = vmatmul.mubr.msk.f32.gmra.mrb[62].mxu1 %vm239_vm2, %v8258_v44 }
 0x23c   :  { %2016 = vmatprep.mubr.f32.mxu1 %v11283_v17 }
 0x23f   :  { %6670 = vmatmul.mubr.msk.f32.vlgmr.msra.gmra.mrb[64].mxu1 %vm239_vm2, %v8240_v36 }
 0x240   :  { %2022 = vmatprep.mubr.f32.mxu1 %v11283_v17  ;;  %7286 = vmatpush1.bf16.msra.mxu1 %v7285_v7 }
 0x241   :  { %7292 = vmatprep.subr.bf16.mxu1 %v7291_v11 }
 0x243   :  { %6671 = vmatmul.mubr.msk.f32.gmra.mrb[66].mxu1 %vm239_vm2, %v8245_v37 }
 0x244   :  { %2028 = vmatprep.mubr.f32.mxu1 %v11283_v17 }
 0x247   :  { %6672 = vmatmul.mubr.msk.f32.gmra.mrb[68].mxu1 %vm239_vm2, %v8255_v19 }
 0x248   :  { %2034 = vmatprep.mubr.f32.mxu1 %v11283_v17 }
 0x24b   :  { %6673 = vmatmul.mubr.msk.f32.gmra.mrb[70].mxu1 %vm239_vm2, %v8258_v44 }
 0x24c   :  { %2194 = vmatprep.mubr.f32.mxu1 %v11283_v17 }
 0x24d   :  { %v557_v16 = vpop.permute.xlu1 %556  ;;  %v535_v18 = vpop.permute.xlu0 %534 }
 0x24e   :  { %v568_v20 = vmul.f32 %v557_v16, %v327_v15  ;;  %v548_v21 = vmul.f32 %v535_v18, %v325_v14 }
 0x24f   :  { %6678 = vmatmul.mubr.msk.f32.vlgmr.msra.gmra.mrb[72].mxu1 %vm239_vm2, %v8240_v36 }
 0x250   :  { %v572_v51 = vadd.f32 %v568_v20, %v548_v21  ;;  %2200 = vmatprep.mubr.f32.mxu1 %v11283_v17  ;;  %7294 = vmatpush1.bf16.msra.mxu1 %v7293_v54  ;;  %v422_v54 = vadd.f32 %v8162_v58, %v8462_v27 }
 0x251   :  { %v530_v24 = vpop.permute.xlu0 %529  ;;  %7300 = vmatprep.subr.bf16.mxu1 %v7299_v41 }
 0x252   :  { %v581_v25 = vpop.permute.xlu1 %580  ;;  %v547_v3 = vmul.f32 %v530_v24, %v319_v42  ;;  %v937_v24 = vld [vmem:[%s11472_s29 + $0xf0] sm:$0xff] }
 0x253   :  { %v592_v26 = vmul.f32 %v581_v25, %v414_v53  ;;  %6679 = vmatmul.mubr.msk.f32.gmra.mrb[74].mxu1 %vm239_vm2, %v8245_v37  ;;  %v969_v25 = vld [vmem:[%s11472_s29 + $0x1f0] sm:$0xff] }
 0x254   :  { %2206 = vmatprep.mubr.f32.mxu1 %v11283_v17  ;;  %v7301_v52 = vpack.c.bf16 %v969_v25, %v937_v24  ;;  %v3430_v42 = vld [vmem:[%s11261_s14 + $0x10] sm:$0xff]  ;;  %v3436_v24 = vld [vmem:[%s11261_s14 + $0x40] sm:$0xff]  ;;  %v3437_v25 = vld [vmem:[%s11261_s14 + $0x48] sm:$0xff] }
 0x255   :  { %v596_v28 = vadd.f32 %v592_v26, %v572_v51  ;;  %v3429_v26 = vld [vmem:[%s11261_s14 + $0x8] sm:$0xff] }
 0x256   :  { %v577_v30 = vpop.permute.xlu0 %576 }
 0x257   :  { %v605_v32 = vpop.permute.xlu1 %604  ;;  %v591_v6 = vmul.f32 %v577_v30, %v408_v2  ;;  %6680 = vmatmul.mubr.msk.f32.gmra.mrb[76].mxu1 %vm239_vm2, %v8255_v19  ;;  %v333_v30 = vadd.f32 %v8160_v57, %v8438_v10 }
 0x258   :  { %v616_v35 = vmul.f32 %v605_v32, %v416_v29  ;;  %2212 = vmatprep.mubr.f32.mxu1 %v11283_v17  ;;  %v331_v29 = vadd.f32 %v8156_v55, %v8435_v9  ;;  %v7307_v32 = vpack.c.bf16 %v3429_v26, %v3428_v60  ;;  %v420_v55 = vadd.f32 %v8158_v56, %v8451_v22 }
 0x259   :  { %v428_v56 = vadd.f32 %v8170_v62, %v8462_v27  ;;  %v916_v62 = vld [vmem:[%s11472_s29 + $0x48] sm:$0xff]  ;;  %v7323_v26 = vpack.c.bf16 %v3437_v25, %v3436_v24 }
 0x25a   :  { %v620_v38 = vadd.f32 %v616_v35, %v596_v28  ;;  %v948_v27 = vld [vmem:[%s11472_s29 + $0x148] sm:$0xff] }
 0x25b   :  { %v601_v45 = vpop.permute.xlu0 %600  ;;  %6681 = vmatmul.mubr.msk.f32.gmra.mrb[78].mxu1 %vm239_vm2, %v8258_v44 }
 0x25c   :  { %v553_v46 = vpop.permute.xlu1 %552  ;;  %v615_v48 = vmul.f32 %v601_v45, %v410_v5  ;;  %2372 = vmatprep.mubr.f32.mxu1 %v11283_v17 }
 0x25d   :  { %v567_v4 = vmul.f32 %v553_v46, %v321_v43  ;;  %v3431_v43 = vld [vmem:[%s11261_s14 + $0x18] sm:$0xff] }
 0x25e   :  { %v7311_v46 = vpack.c.bf16 %v3431_v43, %v3430_v42  ;;  %v931_v42 = vld [vmem:[%s11472_s29 + $0xc0] sm:$0xff] }
 0x25f   :  { %v571_v7 = vadd.f32 %v567_v4, %v547_v3  ;;  %6686 = vmatmul.mubr.msk.f32.vlgmr.msra.gmra.mrb[80].mxu1 %vm239_vm2, %v8240_v36  ;;  %v3432_v3 = vld [vmem:[%s11261_s14 + $0x20] sm:$0xff]  ;;  %v3433_v4 = vld [vmem:[%s11261_s14 + $0x28] sm:$0xff] }
 0x260   :  { %v565_v11 = vpop.permute.xlu1 %564  ;;  %v545_v14 = vpop.permute.xlu0 %544  ;;  %2378 = vmatprep.mubr.f32.mxu1 %v11283_v17  ;;  %7302 = vmatpush1.bf16.msra.mxu1 %v7301_v52  ;;  %v3440_v52 = vld [vmem:[%s11261_s14 + $0x60] sm:$0xff] }
 0x261   :  { %v595_v15 = vadd.f32 %v591_v6, %v571_v7  ;;  %v570_v16 = vmul.f32 %v565_v11, %v339_v49  ;;  %v550_v18 = vmul.f32 %v545_v14, %v337_v47  ;;  %7308 = vmatprep.subr.bf16.mxu1 %v7307_v32  ;;  %v7255_v47 = vpack.c.bf16 %v948_v27, %v916_v62  ;;  %v915_v49 = vld [vmem:[%s11472_s29 + $0x40] sm:$0xff]  ;;  %v920_v7 = vld [vmem:[%s11472_s29 + $0x68] sm:$0xff] }
 0x262   :  { %v947_v6 = vld [vmem:[%s11472_s29 + $0x140] sm:$0xff]  ;;  %v952_v11 = vld [vmem:[%s11472_s29 + $0x168] sm:$0xff]  ;;  %v7315_v14 = vpack.c.bf16 %v3433_v4, %v3432_v3  ;;  %v3442_v4 = vld [vmem:[%s11261_s14 + $0x70] sm:$0xff] }
 0x263   :  { %v574_v50 = vadd.f32 %v570_v16, %v550_v18  ;;  %v619_v20 = vadd.f32 %v615_v48, %v595_v15  ;;  %6687 = vmatmul.mubr.msk.f32.gmra.mrb[82].mxu1 %vm239_vm2, %v8245_v37  ;;  %v92_v48 = vld [vmem:[%s11474_s2 + $0x8] sm:$0xff]  ;;  %v7257_v15 = vpack.c.bf16 %v947_v6, %v915_v49  ;;  %v3434_v16 = vld [vmem:[%s11261_s14 + $0x30] sm:$0xff]  ;;  %v3435_v18 = vld [vmem:[%s11261_s14 + $0x38] sm:$0xff] }
 0x264   :  { %2384 = vmatprep.mubr.f32.mxu1 %v11283_v17  ;;  %v963_v43 = vld [vmem:[%s11472_s29 + $0x1c0] sm:$0xff] }
 0x265   :  { %v589_v61 = vpop.permute.xlu0 %588  ;;  %v540_v21 = vpop.permute.xlu1 %539  ;;  %v7231_v51 = vpack.c.bf16 %v620_v38, %v619_v20  ;;  %v919_v20 = vld [vmem:[%s11472_s29 + $0x60] sm:$0xff]  ;;  %v7289_v62 = vpack.c.bf16 %v963_v43, %v931_v42 }
 0x266   :  { %v594_v53 = vmul.f32 %v589_v61, %v426_v59  ;;  %v549_v33 = vmul.f32 %v540_v21, %v331_v29  ;;  %v951_v59 = vld [vmem:[%s11472_s29 + $0x160] sm:$0xff]  ;;  %v924_v61 = vld [vmem:[%s11472_s29 + $0x88] sm:$0xff]  ;;  %v3439_v29 = vld [vmem:[%s11261_s14 + $0x58] sm:$0xff] }
 0x267   :  { %7232 = vmatprep.subr.bf16.mxu0 %v7231_v51  ;;  %6688 = vmatmul.mubr.msk.f32.gmra.mrb[84].mxu1 %vm239_vm2, %v8255_v19  ;;  %v956_v21 = vld [vmem:[%s11472_s29 + $0x188] sm:$0xff] }
 0x268   :  { %v598_v28 = vadd.f32 %v594_v53, %v574_v50  ;;  %7234 = vmatpush3.bf16.msra.mxu0 %v7231_v51  ;;  %2390 = vmatprep.mubr.f32.mxu1 %v11283_v17  ;;  %v7263_v50 = vpack.c.bf16 %v952_v11, %v920_v7  ;;  %v7319_v51 = vpack.c.bf16 %v3435_v18, %v3434_v16 }
 0x269   :  { %v7265_v53 = vpack.c.bf16 %v951_v59, %v919_v20  ;;  %v7271_v60 = vpack.c.bf16 %v956_v21, %v924_v61 }
 0x26a   :  { %v561_v31 = vpop.permute.xlu1 %560 }
 0x26b   :  { %v569_v34 = vmul.f32 %v561_v31, %v333_v30  ;;  %6689 = vmatmul.mubr.msk.f32.gmra.mrb[86].mxu1 %vm239_vm2, %v8258_v44  ;;  %v3441_v31 = vld [vmem:[%s11261_s14 + $0x68] sm:$0xff] }
 0x26c   :  { %2550 = vmatprep.mubr.f32.mxu1 %v11283_v17 }
 0x26d   :  { %v573_v35 = vadd.f32 %v569_v34, %v549_v33  ;;  %v923_v33 = vld [vmem:[%s11472_s29 + $0x80] sm:$0xff] }
 0x26e   :  { %v955_v34 = vld [vmem:[%s11472_s29 + $0x180] sm:$0xff] }
 0x26f   :  { %v585_v9 = vpop.permute.xlu1 %584  ;;  %6694 = vmatmul.mubr.msk.f32.vlgmr.msra.gmra.mrb[88].mxu1 %vm239_vm2, %v8240_v36 }
 0x270   :  { %v593_v57 = vmul.f32 %v585_v9, %v420_v55  ;;  %2556 = vmatprep.mubr.f32.mxu1 %v11283_v17  ;;  %7310 = vmatpush3.bf16.msra.mxu1 %v7307_v32  ;;  %v7331_v32 = vpack.c.bf16 %v3441_v31, %v3440_v52  ;;  %v960_v55 = vld [vmem:[%s11472_s29 + $0x1a8] sm:$0xff]  ;;  %v7273_v9 = vpack.c.bf16 %v955_v34, %v923_v33 }
 0x271   :  { %7312 = vmatprep.subr.bf16.mxu1 %v7311_v46 }
 0x272   :  { %v597_v10 = vadd.f32 %v593_v57, %v573_v35  ;;  %v928_v35 = vld [vmem:[%s11472_s29 + $0xa8] sm:$0xff] }
 0x273   :  { %6695 = vmatmul.mubr.msk.f32.gmra.mrb[90].mxu1 %vm239_vm2, %v8245_v37  ;;  %v7279_v57 = vpack.c.bf16 %v960_v55, %v928_v35  ;;  %v8810_v35 = vsub.s32 5, %v8405_v63 }
 0x274   :  { %v609_v38 = vpop.permute.xlu1 %608  ;;  %2562 = vmatprep.mubr.f32.mxu1 %v11283_v17  ;;  %7314 = vmatpush3.bf16.msra.mxu1 %v7311_v46  ;;  %v935_v46 = vld [vmem:[%s11472_s29 + $0xe0] sm:$0xff] }
 0x275   :  { %v617_v41 = vmul.f32 %v609_v38, %v422_v54  ;;  %7316 = vmatprep.subr.bf16.mxu1 %v7315_v14  ;;  %v959_v54 = vld [vmem:[%s11472_s29 + $0x1a0] sm:$0xff]  ;;  %v932_v38 = vld [vmem:[%s11472_s29 + $0xc8] sm:$0xff]  ;;  %11494 = vst [vmem:[#allocation21_spill] sm:$0xff] %v8810_v35 }
 0x277   :  { %v621_v22 = vadd.f32 %v617_v41, %v597_v10  ;;  %6696 = vmatmul.mubr.msk.f32.gmra.mrb[92].mxu1 %vm239_vm2, %v8255_v19  ;;  %v927_v10 = vld [vmem:[%s11472_s29 + $0xa0] sm:$0xff]  ;;  %v964_v41 = vld [vmem:[%s11472_s29 + $0x1c8] sm:$0xff] }
 0x278   :  { %v613_v58 = vpop.permute.xlu1 %612  ;;  %2568 = vmatprep.mubr.f32.mxu1 %v11283_v17  ;;  %7318 = vmatpush3.bf16.msra.mxu1 %v7315_v14 }
 0x279   :  { %v618_v45 = vmul.f32 %v613_v58, %v428_v56  ;;  %7320 = vmatprep.subr.bf16.mxu1 %v7319_v51  ;;  %v7281_v56 = vpack.c.bf16 %v959_v54, %v927_v10  ;;  %v936_v58 = vld [vmem:[%s11472_s29 + $0xe8] sm:$0xff] }
 0x27b   :  { %v622_v2 = vadd.f32 %v618_v45, %v598_v28  ;;  %v3438_v28 = vld [vmem:[%s11261_s14 + $0x50] sm:$0xff]  ;;  %6697 = vmatmul.mubr.msk.f32.gmra.mrb[94].mxu1 %vm239_vm2, %v8258_v44  ;;  %v968_v45 = vld [vmem:[%s11472_s29 + $0x1e8] sm:$0xff] }
 0x27c   :  { %7322 = vmatpush3.bf16.msra.mxu1 %v7319_v51  ;;  %v7327_v30 = vpack.c.bf16 %v3439_v29, %v3438_v28  ;;  %v7295_v27 = vpack.c.bf16 %v968_v45, %v936_v58  ;;  %v8834_v45 = vsub.s32 6, %v8405_v63 }
 0x27d   :  { %v7235_v5 = vpack.c.bf16 %v622_v2, %v621_v22  ;;  %7324 = vmatprep.subr.bf16.mxu1 %v7323_v26  ;;  %v7287_v22 = vpack.c.bf16 %v964_v41, %v932_v38  ;;  %v967_v2 = vld [vmem:[%s11472_s29 + $0x1e0] sm:$0xff] }
 0x27e   :  { %v7297_v3 = vpack.c.bf16 %v967_v2, %v935_v46  ;;  %11499 = vst [vmem:[#allocation26_spill] sm:$0xff] %v8834_v45  ;;  %v8842_v46 = vsub.s32 7, %v8405_v63 }
 0x27f   :  { %7236 = vmatprep.subr.bf16.mxu0 %v7235_v5 }
 0x280   :  { %7238 = vmatpush3.bf16.msra.mxu0 %v7235_v5  ;;  %7326 = vmatpush3.bf16.msra.mxu1 %v7323_v26  ;;  %v3443_v5 = vld [vmem:[%s11261_s14 + $0x78] sm:$0xff]  ;;  %11502 = vst [vmem:[#allocation29_spill] sm:$0xff] %v8842_v46 }
 0x281   :  { %7256 = vmatprep.subr.bf16.mxu0 %v7255_v47  ;;  %7328 = vmatprep.subr.bf16.mxu1 %v7327_v30  ;;  %v7335_v47 = vpack.c.bf16 %v3443_v5, %v3442_v4 }
 0x283   :  { %6987 = vmatmul.mubr.msk.f32.vlgmr.msra.gmra.mrb[12].mxu0 %vm714_vm3, %v92_v48 }
 0x284   :  { %7258 = vmatpush1.bf16.msra.mxu0 %v7257_v15  ;;  %1571 = vmatprep.mubr.f32.mxu0 %v11283_v17 }
 0x285   :  { %7264 = vmatprep.subr.bf16.mxu0 %v7263_v50  ;;  %7330 = vmatpush3.bf16.msra.mxu1 %v7327_v30 }
 0x286   :  { %7332 = vmatprep.subr.bf16.mxu1 %v7331_v32 }
 0x287   :  { %6650 = vmatmul.mubr.msk.f32.vlgmr.msra.gmra.mrb[14].mxu0 %vm239_vm2, %v8240_v36 }
 0x288   :  { %1577 = vmatprep.mubr.f32.mxu0 %v11283_v17  ;;  %7266 = vmatpush1.bf16.msra.mxu0 %v7265_v53 }
 0x289   :  { %7272 = vmatprep.subr.bf16.mxu0 %v7271_v60  ;;  %7334 = vmatpush3.bf16.msra.mxu1 %v7331_v32  ;;  %v8802_v32 = vsub.s32 4, %v8405_v63 }
 0x28a   :  { %7336 = vmatprep.subr.bf16.mxu1 %v7335_v47 }
 0x28b   :  { %6651 = vmatmul.mubr.msk.f32.gmra.mrb[16].mxu0 %vm239_vm2, %v8245_v37  ;;  %11491 = vst [vmem:[#allocation18_spill] sm:$0xff] %v8802_v32 }
 0x28c   :  { %1583 = vmatprep.mubr.f32.mxu0 %v11283_v17 }
 0x28d   :  { %7338 = vmatpush3.bf16.msra.mxu1 %v7335_v47 }
 0x28f   :  { %6652 = vmatmul.mubr.msk.f32.gmra.mrb[18].mxu0 %vm239_vm2, %v8255_v19 }
 0x290   :  { %1589 = vmatprep.mubr.f32.mxu0 %v11283_v17 }
 0x293   :  { %6653 = vmatmul.mubr.msk.f32.gmra.mrb[20].mxu0 %vm239_vm2, %v8258_v44 }
 0x294   :  { %1749 = vmatprep.mubr.f32.mxu0 %v11283_v17 }
 0x297   :  { %6658 = vmatmul.mubr.msk.f32.vlgmr.msra.gmra.mrb[22].mxu0 %vm239_vm2, %v8240_v36 }
 0x298   :  { %1755 = vmatprep.mubr.f32.mxu0 %v11283_v17  ;;  %7274 = vmatpush1.bf16.msra.mxu0 %v7273_v9 }
 0x299   :  { %7280 = vmatprep.subr.bf16.mxu0 %v7279_v57 }
 0x29b   :  { %6659 = vmatmul.mubr.msk.f32.gmra.mrb[24].mxu0 %vm239_vm2, %v8245_v37 }
 0x29c   :  { %1761 = vmatprep.mubr.f32.mxu0 %v11283_v17 }
 0x29f   :  { %6660 = vmatmul.mubr.msk.f32.gmra.mrb[26].mxu0 %vm239_vm2, %v8255_v19 }
 0x2a0   :  { %1767 = vmatprep.mubr.f32.mxu0 %v11283_v17 }
 0x2a3   :  { %6661 = vmatmul.mubr.msk.f32.gmra.mrb[28].mxu0 %vm239_vm2, %v8258_v44 }
 0x2a4   :  { %1927 = vmatprep.mubr.f32.mxu0 %v11283_v17 }
 0x2a7   :  { %6666 = vmatmul.mubr.msk.f32.vlgmr.msra.gmra.mrb[30].mxu0 %vm239_vm2, %v8240_v36 }
 0x2a8   :  { %1933 = vmatprep.mubr.f32.mxu0 %v11283_v17  ;;  %7282 = vmatpush1.bf16.msra.mxu0 %v7281_v56 }
 0x2a9   :  { %7288 = vmatprep.subr.bf16.mxu0 %v7287_v22 }
 0x2ab   :  { %6667 = vmatmul.mubr.msk.f32.gmra.mrb[32].mxu0 %vm239_vm2, %v8245_v37 }
 0x2ac   :  { %1939 = vmatprep.mubr.f32.mxu0 %v11283_v17 }
 0x2ae   :  { %v8743_v49 = vpop.f32.mrb[16].mxu1 }
 0x2af   :  { %6668 = vmatmul.mubr.msk.f32.gmra.mrb[34].mxu0 %vm239_vm2, %v8255_v19  ;;  %11479 = vst [vmem:[#allocation6_spill] sm:$0xff] %v8743_v49  ;;  %v8750_v6 = vpop.f32.mrb[17].mxu1 }
 0x2b0   :  { %1945 = vmatprep.mubr.f32.mxu0 %v11283_v17  ;;  %11480 = vst [vmem:[#allocation7_spill] sm:$0xff] %v8750_v6 }
 0x2b3   :  { %6669 = vmatmul.mubr.msk.f32.gmra.mrb[36].mxu0 %vm239_vm2, %v8258_v44 }
 0x2b4   :  { %2105 = vmatprep.mubr.f32.mxu0 %v11283_v17 }
 0x2b7   :  { %6674 = vmatmul.mubr.msk.f32.vlgmr.msra.gmra.mrb[38].mxu0 %vm239_vm2, %v8240_v36 }
 0x2b8   :  { %2111 = vmatprep.mubr.f32.mxu0 %v11283_v17  ;;  %7290 = vmatpush1.bf16.msra.mxu0 %v7289_v62 }
 0x2b9   :  { %7296 = vmatprep.subr.bf16.mxu0 %v7295_v27 }
 0x2bb   :  { %6675 = vmatmul.mubr.msk.f32.gmra.mrb[40].mxu0 %vm239_vm2, %v8245_v37 }
 0x2bc   :  { %2117 = vmatprep.mubr.f32.mxu0 %v11283_v17 }
 0x2bf   :  { %6676 = vmatmul.mubr.msk.f32.gmra.mrb[42].mxu0 %vm239_vm2, %v8255_v19 }
 0x2c0   :  { %2123 = vmatprep.mubr.f32.mxu0 %v11283_v17 }
 0x2c3   :  { %6677 = vmatmul.mubr.msk.f32.gmra.mrb[44].mxu0 %vm239_vm2, %v8258_v44 }
 0x2c4   :  { %2283 = vmatprep.mubr.f32.mxu0 %v11283_v17 }
 0x2c7   :  { %6682 = vmatmul.mubr.msk.f32.vlgmr.msra.gmra.mrb[46].mxu0 %vm239_vm2, %v8240_v36 }
 0x2c8   :  { %2289 = vmatprep.mubr.f32.mxu0 %v11283_v17  ;;  %7298 = vmatpush1.bf16.msra.mxu0 %v7297_v3 }
 0x2cb   :  { %6683 = vmatmul.mubr.msk.f32.gmra.mrb[48].mxu0 %vm239_vm2, %v8245_v37 }
 0x2cc   :  { %2295 = vmatprep.mubr.f32.mxu0 %v11283_v17 }
 0x2cf   :  { %6684 = vmatmul.mubr.msk.f32.gmra.mrb[50].mxu0 %vm239_vm2, %v8255_v19 }
 0x2d0   :  { %2301 = vmatprep.mubr.f32.mxu0 %v11283_v17 }
 0x2d3   :  { %6685 = vmatmul.mubr.msk.f32.gmra.mrb[52].mxu0 %vm239_vm2, %v8258_v44 }
 0x2d4   :  { %2461 = vmatprep.mubr.f32.mxu0 %v11283_v17 }
 0x2d7   :  { %6690 = vmatmul.mubr.msk.f32.vlgmr.msra.gmra.mrb[54].mxu0 %vm239_vm2, %v8240_v36  ;;  %v971_v36 = vld [vmem:[%s11262_s13] sm:$0xff] }
 0x2d8   :  { %2467 = vmatprep.mubr.f32.mxu0 %v11283_v17  ;;  %v8759_v7 = vrot.slane %v971_v36, %v8411_v0  ;;  %v8785_v53 = vrot.slane %v971_v36, %v8441_v12  ;;  %v8790_v25 = vrot.slane %v971_v36, %v8454_v23  ;;  %v8817_v57 = vrot.slane %v971_v36, %v8802_v32 }
 0x2d9   :  { %v8822_v54 = vrot.slane %v971_v36, %v8810_v35  ;;  %v8849_v4 = vrot.slane %v971_v36, %v8834_v45  ;;  %v8854_v47 = vrot.slane %v971_v36, %v8842_v46 }
 0x2da   :  { %11481 = vst [vmem:[#allocation8_spill] sm:$0xff] %v8759_v7 }
 0x2db   :  { %6691 = vmatmul.mubr.msk.f32.gmra.mrb[56].mxu0 %vm239_vm2, %v8245_v37  ;;  %v7827_v37 = vld [vmem:[%s11470_s27] sm:$0xff] }
 0x2dc   :  { %2473 = vmatprep.mubr.f32.mxu0 %v11283_v17 }
 0x2df   :  { %6692 = vmatmul.mubr.msk.f32.gmra.mrb[58].mxu0 %vm239_vm2, %v8255_v19  ;;  %v8756_v19 = vpop.f32.mrb[18].mxu1 }
 0x2e0   :  { %2479 = vmatprep.mubr.f32.mxu0 %v11283_v17  ;;  %v8761_v11 = vpop.f32.mrb[19].mxu1 }
 0x2e1   :  { %v1229_v14 = vpop.f32.mrb[20].mxu1 }
 0x2e2   :  { %v8767_v48 = vadd.f32 %v1229_v14, %v8759_v7  ;;  %v1231_v15 = vpop.f32.mrb[21].mxu1 }
 0x2e3   :  { %6693 = vmatmul.mubr.msk.f32.gmra.mrb[60].mxu0 %vm239_vm2, %v8258_v44  ;;  %v8764_v44 = vrot.slane %v971_v36, %v8414_v1  ;;  %v1235_v18 = vpop.f32.mrb[22].mxu1  ;;  %v8873_v36 = vld [vmem:[%s11262_s13 + $0x8] sm:$0xff] }
 0x2e4   :  { %7001 = vmatprep.mubr.msk.f32.mxu0 %vm239_vm2, %v7827_v37  ;;  %11482 = vst [vmem:[#allocation9_spill] sm:$0xff] %v8767_v48  ;;  %v8773_v50 = vadd.f32 %v1235_v18, %v8759_v7  ;;  %v1237_v20 = vpop.f32.mrb[23].mxu1 }
 0x2e5   :  { %v8770_v16 = vadd.f32 %v1231_v15, %v8764_v44  ;;  %v8776_v59 = vadd.f32 %v1237_v20, %v8764_v44  ;;  %v8778_v61 = vpop.f32.mrb[24].mxu1 }
 0x2e6   :  { %11484 = vst [vmem:[#allocation11_spill] sm:$0xff] %v8773_v50  ;;  %11486 = vst [vmem:[#allocation13_spill] sm:$0xff] %v8778_v61  ;;  %v8780_v21 = vpop.f32.mrb[25].mxu1 }
 0x2e7   :  { %11483 = vst [vmem:[#allocation10_spill] sm:$0xff] %v8770_v16  ;;  %11485 = vst [vmem:[#allocation12_spill] sm:$0xff] %v8776_v59  ;;  %v8782_v51 = vpop.f32.mrb[26].mxu1 }
 0x2e8   :  { %11487 = vst [vmem:[#allocation14_spill] sm:$0xff] %v8780_v21  ;;  %v8787_v24 = vpop.f32.mrb[27].mxu1 }
 0x2e9   :  { %v1318_v60 = vpop.f32.mrb[28].mxu1 }
 0x2ea   :  { %v8793_v26 = vadd.f32 %v1318_v60, %v8785_v53  ;;  %v1320_v28 = vpop.f32.mrb[29].mxu1 }
 0x2eb   :  { %v8796_v29 = vadd.f32 %v1320_v28, %v8790_v25  ;;  %v1324_v30 = vpop.f32.mrb[30].mxu1 }
 0x2ec   :  { %11488 = vst [vmem:[#allocation15_spill] sm:$0xff] %v8793_v26  ;;  %v8799_v52 = vadd.f32 %v1324_v30, %v8785_v53  ;;  %v1326_v31 = vpop.f32.mrb[31].mxu1 }
 0x2ed   :  { %11489 = vst [vmem:[#allocation16_spill] sm:$0xff] %v8796_v29  ;;  %v8805_v33 = vadd.f32 %v1326_v31, %v8790_v25  ;;  %v8807_v34 = vpop.f32.mrb[32].mxu1 }
 0x2ee   :  { %11490 = vst [vmem:[#allocation17_spill] sm:$0xff] %v8799_v52  ;;  %11493 = vst [vmem:[#allocation20_spill] sm:$0xff] %v8807_v34  ;;  %v8812_v55 = vpop.f32.mrb[33].mxu1 }
 0x2ef   :  { %11492 = vst [vmem:[#allocation19_spill] sm:$0xff] %v8805_v33  ;;  %11495 = vst [vmem:[#allocation22_spill] sm:$0xff] %v8812_v55  ;;  %v8814_v9 = vpop.f32.mrb[34].mxu1 }
 0x2f0   :  { %v8819_v10 = vpop.f32.mrb[35].mxu1 }
 0x2f1   :  { %v1407_v38 = vpop.f32.mrb[36].mxu1 }
 0x2f2   :  { %v8825_v41 = vadd.f32 %v1407_v38, %v8817_v57  ;;  %v1409_v56 = vpop.f32.mrb[37].mxu1 }
 0x2f3   :  { %v8828_v22 = vadd.f32 %v1409_v56, %v8822_v54  ;;  %v1413_v42 = vpop.f32.mrb[38].mxu1 }
 0x2f4   :  { %11496 = vst [vmem:[#allocation23_spill] sm:$0xff] %v8825_v41  ;;  %v8831_v43 = vadd.f32 %v1413_v42, %v8817_v57  ;;  %v1415_v58 = vpop.f32.mrb[39].mxu1  ;;  %v8883_v42 = vrot.slane %v8873_v36, %v8441_v12 }
 0x2f5   :  { %11497 = vst [vmem:[#allocation24_spill] sm:$0xff] %v8828_v22  ;;  %v8837_v62 = vadd.f32 %v1415_v58, %v8822_v54  ;;  %v8839_v27 = vpop.f32.mrb[40].mxu1  ;;  %v8887_v58 = vrot.slane %v8873_v36, %v8454_v23 }
 0x2f6   :  { %11498 = vst [vmem:[#allocation25_spill] sm:$0xff] %v8831_v43  ;;  %11501 = vst [vmem:[#allocation28_spill] sm:$0xff] %v8839_v27  ;;  %v8844_v2 = vpop.f32.mrb[41].mxu1 }
 0x2f7   :  { %11500 = vst [vmem:[#allocation27_spill] sm:$0xff] %v8837_v62  ;;  %11503 = vst [vmem:[#allocation30_spill] sm:$0xff] %v8844_v2  ;;  %v8846_v3 = vpop.f32.mrb[42].mxu1 }
 0x2f8   :  { %v8851_v5 = vpop.f32.mrb[43].mxu1 }
 0x2f9   :  { %v1496_v37 = vpop.f32.mrb[44].mxu1 }
 0x2fa   :  { %v8857_v14 = vadd.f32 %v1496_v37, %v8849_v4  ;;  %v1498_v15 = vpop.f32.mrb[45].mxu1 }
 0x2fb   :  { %v8860_v63 = vadd.f32 %v1498_v15, %v8854_v47  ;;  %v1502_v18 = vpop.f32.mrb[46].mxu1 }
 0x2fc   :  { %11504 = vst [vmem:[#allocation31_spill] sm:$0xff] %v8857_v14  ;;  %v8863_v20 = vadd.f32 %v1502_v18, %v8849_v4  ;;  %v1504_v60 = vpop.f32.mrb[47].mxu1 }
 0x2fd   :  { %11505 = vst [vmem:[#allocation32_spill] sm:$0xff] %v8860_v63  ;;  %v8866_v28 = vadd.f32 %v1504_v60, %v8854_v47  ;;  %v8868_v30 = vpop.f32.mrb[48].mxu1 }
 0x2fe   :  { %11506 = vst [vmem:[#allocation33_spill] sm:$0xff] %v8863_v20  ;;  %11508 = vst [vmem:[#allocation35_spill] sm:$0xff] %v8868_v30  ;;  %v8875_v31 = vpop.f32.mrb[49].mxu1 }
 0x2ff   :  { %11507 = vst [vmem:[#allocation34_spill] sm:$0xff] %v8866_v28  ;;  %11509 = vst [vmem:[#allocation36_spill] sm:$0xff] %v8875_v31  ;;  %v8877_v38 = vpop.f32.mrb[50].mxu1 }
 0x300   :  { %v8879_v56 = vpop.f32.mrb[51].mxu1 }
 0x301   :  { %v1674_v37 = vpop.f32.mrb[52].mxu1 }
 0x302   :  { %v8890_v15 = vadd.f32 %v1674_v37, %v8883_v42  ;;  %v1676_v18 = vpop.f32.mrb[53].mxu1 }
 0x303   :  { %v8893_v60 = vadd.f32 %v1676_v18, %v8887_v58  ;;  %v1680_v17 = vpop.f32.mrb[54].mxu1  ;;  %v8911_v18 = vrot.slane %v8873_v36, %v8834_v45 }
 0x304   :  { %11510 = vst [vmem:[#allocation37_spill] sm:$0xff] %v8890_v15  ;;  %v8896_v39 = vadd.f32 %v1680_v17, %v8883_v42  ;;  %v1682_v40 = vpop.f32.mrb[55].mxu1  ;;  %v8915_v17 = vrot.slane %v8873_v36, %v8842_v46 }
 0x305   :  { %11511 = vst [vmem:[#allocation38_spill] sm:$0xff] %v8893_v60  ;;  %v8899_v13 = vadd.f32 %v1682_v40, %v8887_v58  ;;  %v8901_v8 = vpop.f32.mrb[56].mxu1 }
 0x306   :  { %11512 = vst [vmem:[#allocation39_spill] sm:$0xff] %v8896_v39  ;;  %11514 = vst [vmem:[#allocation41_spill] sm:$0xff] %v8901_v8  ;;  %v8903_v63 = vpop.f32.mrb[57].mxu1 }
 0x307   :  { %11513 = vst [vmem:[#allocation40_spill] sm:$0xff] %v8899_v13  ;;  %11515 = vst [vmem:[#allocation42_spill] sm:$0xff] %v8903_v63  ;;  %v8905_v14 = vpop.f32.mrb[58].mxu1 }
 0x308   :  { %v8907_v37 = vpop.f32.mrb[59].mxu1 }
 0x30a   :  { %v1852_v60 = vpop.f32.mrb[60].mxu1 }
 0x30b   :  { %v8918_v40 = vadd.f32 %v1852_v60, %v8911_v18  ;;  %v1854_v15 = vpop.f32.mrb[61].mxu1  ;;  %v8936_v60 = vld [vmem:[%s11262_s13 + $0x10] sm:$0xff] }
 0x30c   :  { %v8921_v22 = vadd.f32 %v1854_v15, %v8915_v17 }
 0x30d   :  { %11516 = vst [vmem:[#allocation43_spill] sm:$0xff] %v8918_v40 }
 0x30e   :  { %11517 = vst [vmem:[#allocation44_spill] sm:$0xff] %v8921_v22  ;;  %v1858_v41 = vpop.f32.mrb[62].mxu1 }
 0x30f   :  { %v8924_v29 = vadd.f32 %v1858_v41, %v8911_v18  ;;  %v1860_v26 = vpop.f32.mrb[63].mxu1  ;;  %v8944_v41 = vrot.slane %v8936_v60, %v8441_v12 }
 0x310   :  { %v8927_v16 = vadd.f32 %v1860_v26, %v8915_v17  ;;  %v8948_v26 = vrot.slane %v8936_v60, %v8454_v23 }
 0x311   :  { %11518 = vst [vmem:[#allocation45_spill] sm:$0xff] %v8924_v29 }
 0x312   :  { %11519 = vst [vmem:[#allocation46_spill] sm:$0xff] %v8927_v16  ;;  %v8929_v48 = vpop.f32.mrb[64].mxu1 }
 0x313   :  { %11520 = vst [vmem:[#allocation47_spill] sm:$0xff] %v8929_v48  ;;  %v8931_v13 = vpop.f32.mrb[65].mxu1 }
 0x314   :  { %11521 = vst [vmem:[#allocation48_spill] sm:$0xff] %v8931_v13 }
 0x316   :  { %v8938_v40 = vpop.f32.mrb[66].mxu1 }
 0x317   :  { %v8940_v15 = vpop.f32.mrb[67].mxu1 }
 0x31a   :  { %v2030_v22 = vpop.f32.mrb[68].mxu1 }
 0x31b   :  { %v8951_v16 = vadd.f32 %v2030_v22, %v8944_v41  ;;  %v2032_v29 = vpop.f32.mrb[69].mxu1 }
 0x31c   :  { %v8954_v39 = vadd.f32 %v2032_v29, %v8948_v26  ;;  %v8972_v29 = vrot.slane %v8936_v60, %v8834_v45 }
 0x31d   :  { %11522 = vst [vmem:[#allocation49_spill] sm:$0xff] %v8951_v16 }
 0x31e   :  { %11523 = vst [vmem:[#allocation50_spill] sm:$0xff] %v8954_v39  ;;  %v2036_v28 = vpop.f32.mrb[70].mxu1  ;;  %11530 = vst [vmem:[#allocation57_spill] sm:$0xff] %v8972_v29 }
 0x31f   :  { %v8957_v20 = vadd.f32 %v2036_v28, %v8944_v41  ;;  %v2038_v62 = vpop.f32.mrb[71].mxu1  ;;  %v8976_v28 = vrot.slane %v8936_v60, %v8842_v46 }
 0x320   :  { %v8960_v43 = vadd.f32 %v2038_v62, %v8948_v26 }
 0x321   :  { %11524 = vst [vmem:[#allocation51_spill] sm:$0xff] %v8957_v20  ;;  %11531 = vst [vmem:[#allocation58_spill] sm:$0xff] %v8976_v28 }
 0x322   :  { %11525 = vst [vmem:[#allocation52_spill] sm:$0xff] %v8960_v43  ;;  %v8962_v33 = vpop.f32.mrb[72].mxu1 }
 0x323   :  { %11526 = vst [vmem:[#allocation53_spill] sm:$0xff] %v8962_v33  ;;  %v8964_v52 = vpop.f32.mrb[73].mxu1 }
 0x324   :  { %11527 = vst [vmem:[#allocation54_spill] sm:$0xff] %v8964_v52 }
 0x326   :  { %v8966_v50 = vpop.f32.mrb[74].mxu1 }
 0x327   :  { %11528 = vst [vmem:[#allocation55_spill] sm:$0xff] %v8966_v50  ;;  %v8968_v22 = vpop.f32.mrb[75].mxu1 }
 0x328   :  { %11529 = vst [vmem:[#allocation56_spill] sm:$0xff] %v8968_v22  ;;  %v11614_v22 = vmov 23  }
 0x32a   :  { %v2208_v39 = vpop.f32.mrb[76].mxu1 }
 0x32b   :  { %v8979_v62 = vadd.f32 %v2208_v39, %v8972_v29  ;;  %v2210_v16 = vpop.f32.mrb[77].mxu1  ;;  %v8997_v39 = vld [vmem:[%s11262_s13 + $0x18] sm:$0xff] }
 0x32c   :  { %v8982_v43 = vadd.f32 %v2210_v16, %v8976_v28 }
 0x32d   :  { %11532 = vst [vmem:[#allocation59_spill] sm:$0xff] %v8979_v62 }
 0x32e   :  { %11533 = vst [vmem:[#allocation60_spill] sm:$0xff] %v8982_v43  ;;  %v2214_v20 = vpop.f32.mrb[78].mxu1 }
 0x32f   :  { %v8985_v59 = vadd.f32 %v2214_v20, %v8972_v29  ;;  %v2216_v52 = vpop.f32.mrb[79].mxu1  ;;  %v9005_v20 = vrot.slane %v8997_v39, %v8441_v12 }
 0x330   :  { %v8988_v33 = vadd.f32 %v2216_v52, %v8976_v28  ;;  %v9009_v52 = vrot.slane %v8997_v39, %v8454_v23  ;;  %v11381_v28 = vmov 30  }
 0x331   :  { %11534 = vst [vmem:[#allocation61_spill] sm:$0xff] %v8985_v59  ;;  %11540 = vst [vmem:[#allocation67_spill] sm:$0xff] %v9005_v20 }
 0x332   :  { %11535 = vst [vmem:[#allocation62_spill] sm:$0xff] %v8988_v33  ;;  %v8990_v13 = vpop.f32.mrb[80].mxu1  ;;  %11541 = vst [vmem:[#allocation68_spill] sm:$0xff] %v9009_v52 }
 0x333   :  { %11536 = vst [vmem:[#allocation63_spill] sm:$0xff] %v8990_v13  ;;  %v8992_v48 = vpop.f32.mrb[81].mxu1 }
 0x334   :  { %11537 = vst [vmem:[#allocation64_spill] sm:$0xff] %v8992_v48 }
 0x336   :  { %v8999_v62 = vpop.f32.mrb[82].mxu1 }
 0x337   :  { %11538 = vst [vmem:[#allocation65_spill] sm:$0xff] %v8999_v62  ;;  %v9001_v16 = vpop.f32.mrb[83].mxu1 }
 0x338   :  { %11539 = vst [vmem:[#allocation66_spill] sm:$0xff] %v9001_v16 }
 0x33a   :  { %v2386_v43 = vpop.f32.mrb[84].mxu1 }
 0x33b   :  { %v9012_v33 = vadd.f32 %v2386_v43, %v9005_v20  ;;  %v2388_v59 = vpop.f32.mrb[85].mxu1  ;;  %v6627_v43 = vld [vmem:[%s11263_s9] ss:$0 sm:$0xff] }
 0x33c   :  { %v9015_v48 = vadd.f32 %v2388_v59, %v9009_v52 }
 0x33d   :  { %11542 = vst [vmem:[#allocation69_spill] sm:$0xff] %v9012_v33 }
 0x33e   :  { %11543 = vst [vmem:[#allocation70_spill] sm:$0xff] %v9015_v48  ;;  %v2392_v13 = vpop.f32.mrb[86].mxu1 }
 0x33f   :  { %v9018_v63 = vadd.f32 %v2392_v13, %v9005_v20  ;;  %v2394_v8 = vpop.f32.mrb[87].mxu1 }
 0x340   :  { %v9021_v12 = vadd.f32 %v2394_v8, %v9009_v52 }
 0x341   :  { %11544 = vst [vmem:[#allocation71_spill] sm:$0xff] %v9018_v63  ;;  %v9036_v63 = vrot.slane %v8997_v39, %v8834_v45 }
 0x342   :  { %11545 = vst [vmem:[#allocation72_spill] sm:$0xff] %v9021_v12  ;;  %v9023_v31 = vpop.f32.mrb[88].mxu1  ;;  %v9040_v12 = vrot.slane %v8997_v39, %v8842_v46 }
 0x343   :  { %11546 = vst [vmem:[#allocation73_spill] sm:$0xff] %v9023_v31  ;;  %v9025_v23 = vpop.f32.mrb[89].mxu1  ;;  %11550 = vst [vmem:[#allocation77_spill] sm:$0xff] %v9036_v63 }
 0x344   :  { %11547 = vst [vmem:[#allocation74_spill] sm:$0xff] %v9025_v23  ;;  %11551 = vst [vmem:[#allocation78_spill] sm:$0xff] %v9040_v12 }
 0x346   :  { %v9027_v30 = vpop.f32.mrb[90].mxu1 }
 0x347   :  { %11548 = vst [vmem:[#allocation75_spill] sm:$0xff] %v9027_v30  ;;  %v9032_v59 = vpop.f32.mrb[91].mxu1 }
 0x348   :  { %11549 = vst [vmem:[#allocation76_spill] sm:$0xff] %v9032_v59 }
 0x34a   :  { %v2564_v23 = vpop.f32.mrb[92].mxu1 }
 0x34b   :  { %v9043_v2 = vadd.f32 %v2564_v23, %v9036_v63  ;;  %v2566_v27 = vpop.f32.mrb[93].mxu1 }
 0x34d   :  { %11552 = vst [vmem:[#allocation79_spill] sm:$0xff] %v9043_v2 }
 0x356   :  { %v6988_v48 = vpop.f32.mrb[12].mxu0 }
 0x357   :  { %v804_v33 = vadd.f32 %v6988_v48, %v6627_v43  ;;  %v787_v13 = vpop.f32.mrb[13].mxu0  ;;  %v9048_v48 = vadd.f32 %v2566_v27, %v9040_v12  ;;  %v7828_v27 = vld [vmem:[%s11474_s2] sm:$0xff] }
 0x358   :  { %v803_v8 = vadd.f32 %v6627_v43, %v787_v13  ;;  %v2570_v43 = vpop.f32.mrb[94].mxu1 }
 0x359   :  { %v806_v31 = vmax.f32 %v804_v33, 0.0  ;;  %11554 = vst [vmem:[#allocation81_spill] sm:$0xff] %v9048_v48  ;;  %v9053_v13 = vadd.f32 %v2570_v43, %v9036_v63  ;;  %v2572_v33 = vpop.f32.mrb[95].mxu1  ;;  %v7829_v43 = vld [vmem:[%s11470_s27 + $0x8] sm:$0xff] }
 0x35a   :  { %v805_v55 = vmax.f32 %v803_v8, 0.0  ;;  %v9045_v34 = vpop.f32.mrb[14].mxu0  ;;  %v9058_v8 = vadd.f32 %v2572_v33, %v9040_v12  ;;  %v9076_v33 = vrot.slane %v8873_v36, %v8414_v1 }
 0x35b   :  { %11553 = vst [vmem:[#allocation80_spill] sm:$0xff] %v9045_v34  ;;  %v9050_v21 = vpop.f32.mrb[15].mxu0  ;;  %11556 = vst [vmem:[#allocation83_spill] sm:$0xff] %v9053_v13  ;;  %v7832_v13 = vld [vmem:[%s11465_s5] sm:$0xff] }
 0x35c   :  { %11555 = vst [vmem:[#allocation82_spill] sm:$0xff] %v9050_v21  ;;  %v7303_v45 = vpack.c.bf16 %v806_v31, %v805_v55  ;;  %7039 = vmatprep.mubr.f32.mxu1 %v805_v55  ;;  %11557 = vst [vmem:[#allocation84_spill] sm:$0xff] %v9058_v8  ;;  %v7830_v8 = vld [vmem:[%s11470_s27 + $0x10] sm:$0xff] }
 0x35d   :  { %7040 = vmatmul.mubr.f32.vlgmr.msra.gmra.mrb[96].mxu1 %v806_v31  ;;  %v9068_v31 = vrot.slane %v8873_v36, %v8411_v0 }
 0x35e   :  { %7304 = vmatprep.subr.bf16.mxu0 %v7303_v45  ;;  %v9055_v23 = vpop.f32.mrb[16].mxu0  ;;  %7050 = vmatprep.mubr.msk.f32.mxu1 %vm714_vm3, %v7828_v27 }
 0x35f   :  { %7306 = vmatpush3.bf16.msra.mxu0 %v7303_v45  ;;  %v9064_v55 = vpop.f32.mrb[17].mxu0 }
 0x362   :  { %7002 = vmatmul.mubr.msk.f32.vlgmr.msra.gmra.mrb[62].mxu0 %vm239_vm2, %v7829_v43  ;;  %v1585_v46 = vpop.f32.mrb[18].mxu0  ;;  %v7831_v43 = vld [vmem:[%s11470_s27 + $0x18] sm:$0xff] }
 0x363   :  { %v9079_v27 = vadd.f32 %v1585_v46, %v9068_v31  ;;  %v1587_v45 = vpop.f32.mrb[19].mxu0  ;;  %7004 = vmatprep.mubr.msk.f32.mxu0 %vm239_vm2, %v7830_v8 }
 0x364   :  { %v9086_v48 = vadd.f32 %v1587_v45, %v9076_v33 }
 0x365   :  { %11558 = vst [vmem:[#allocation85_spill] sm:$0xff] %v9079_v27 }
 0x366   :  { %11559 = vst [vmem:[#allocation86_spill] sm:$0xff] %v9086_v48  ;;  %v1591_v2 = vpop.f32.mrb[20].mxu0  ;;  %7005 = vmatmul.mubr.msk.f32.gmra.mrb[64].mxu0 %vm239_vm2, %v7831_v43 }
 0x367   :  { %v9093_v46 = vadd.f32 %v1591_v2, %v9068_v31  ;;  %v1593_v27 = vpop.f32.mrb[21].mxu0  ;;  %7055 = vmatprep.mubr.msk.f32.mxu0 %vm103_vm1, %v7832_v13  ;;  %v9112_v2 = vrot.slane %v8873_v36, %v8802_v32 }
 0x368   :  { %v9100_v8 = vadd.f32 %v1593_v27, %v9076_v33 }
 0x369   :  { %11560 = vst [vmem:[#allocation87_spill] sm:$0xff] %v9093_v46  ;;  %v9116_v46 = vrot.slane %v8873_v36, %v8810_v35 }
 0x36a   :  { %11561 = vst [vmem:[#allocation88_spill] sm:$0xff] %v9100_v8  ;;  %v9102_v45 = vpop.f32.mrb[22].mxu0 }
 0x36b   :  { %11562 = vst [vmem:[#allocation89_spill] sm:$0xff] %v9102_v45  ;;  %v9104_v48 = vpop.f32.mrb[23].mxu0 }
 0x36c   :  { %11563 = vst [vmem:[#allocation90_spill] sm:$0xff] %v9104_v48 }
 0x36e   :  { %v9106_v21 = vpop.f32.mrb[24].mxu0 }
 0x36f   :  { %v9108_v43 = vpop.f32.mrb[25].mxu0 }
 0x372   :  { %v1763_v13 = vpop.f32.mrb[26].mxu0 }
 0x373   :  { %v9119_v27 = vadd.f32 %v1763_v13, %v9112_v2  ;;  %v1765_v8 = vpop.f32.mrb[27].mxu0 }
 0x374   :  { %v9122_v45 = vadd.f32 %v1765_v8, %v9116_v46  ;;  %v9140_v8 = vrot.slane %v8936_v60, %v8411_v0 }
 0x375   :  { %11564 = vst [vmem:[#allocation91_spill] sm:$0xff] %v9119_v27 }
 0x376   :  { %11565 = vst [vmem:[#allocation92_spill] sm:$0xff] %v9122_v45  ;;  %v1769_v48 = vpop.f32.mrb[28].mxu0 }
 0x377   :  { %v9125_v34 = vadd.f32 %v1769_v48, %v9112_v2  ;;  %v1771_v61 = vpop.f32.mrb[29].mxu0  ;;  %v9144_v48 = vrot.slane %v8936_v60, %v8414_v1 }
 0x378   :  { %v9128_v6 = vadd.f32 %v1771_v61, %v9116_v46 }
 0x379   :  { %11566 = vst [vmem:[#allocation93_spill] sm:$0xff] %v9125_v34 }
 0x37a   :  { %11567 = vst [vmem:[#allocation94_spill] sm:$0xff] %v9128_v6  ;;  %v9130_v49 = vpop.f32.mrb[30].mxu0 }
 0x37b   :  { %11568 = vst [vmem:[#allocation95_spill] sm:$0xff] %v9130_v49  ;;  %v9132_v36 = vpop.f32.mrb[31].mxu0 }
 0x37c   :  { %11569 = vst [vmem:[#allocation96_spill] sm:$0xff] %v9132_v36 }
 0x37e   :  { %v9134_v59 = vpop.f32.mrb[32].mxu0 }
 0x37f   :  { %v9136_v13 = vpop.f32.mrb[33].mxu0 }
 0x382   :  { %v1941_v45 = vpop.f32.mrb[34].mxu0 }
 0x383   :  { %v9147_v61 = vadd.f32 %v1941_v45, %v9140_v8  ;;  %v1943_v27 = vpop.f32.mrb[35].mxu0 }
 0x384   :  { %v9150_v6 = vadd.f32 %v1943_v27, %v9144_v48  ;;  %v9168_v27 = vrot.slane %v8936_v60, %v8802_v32 }
 0x385   :  { %11570 = vst [vmem:[#allocation97_spill] sm:$0xff] %v9147_v61 }
 0x386   :  { %11571 = vst [vmem:[#allocation98_spill] sm:$0xff] %v9150_v6  ;;  %v1947_v34 = vpop.f32.mrb[36].mxu0  ;;  %11578 = vst [vmem:[#allocation105_spill] sm:$0xff] %v9168_v27 }
 0x387   :  { %v9153_v36 = vadd.f32 %v1947_v34, %v9140_v8  ;;  %v1949_v49 = vpop.f32.mrb[37].mxu0  ;;  %v9172_v34 = vrot.slane %v8936_v60, %v8810_v35 }
 0x388   :  { %v9156_v12 = vadd.f32 %v1949_v49, %v9144_v48 }
 0x389   :  { %11572 = vst [vmem:[#allocation99_spill] sm:$0xff] %v9153_v36  ;;  %11579 = vst [vmem:[#allocation106_spill] sm:$0xff] %v9172_v34 }
 0x38a   :  { %11573 = vst [vmem:[#allocation100_spill] sm:$0xff] %v9156_v12  ;;  %v9158_v30 = vpop.f32.mrb[38].mxu0 }
 0x38b   :  { %11574 = vst [vmem:[#allocation101_spill] sm:$0xff] %v9158_v30  ;;  %v9160_v63 = vpop.f32.mrb[39].mxu0 }
 0x38c   :  { %11575 = vst [vmem:[#allocation102_spill] sm:$0xff] %v9160_v63 }
 0x38e   :  { %v9162_v16 = vpop.f32.mrb[40].mxu0 }
 0x38f   :  { %11576 = vst [vmem:[#allocation103_spill] sm:$0xff] %v9162_v16  ;;  %v9164_v45 = vpop.f32.mrb[41].mxu0  ;;  %v1313_v16 = vadd.f32 %v8782_v51, %v8785_v53 }
 0x390   :  { %11577 = vst [vmem:[#allocation104_spill] sm:$0xff] %v9164_v45 }
 0x392   :  { %v2119_v6 = vpop.f32.mrb[42].mxu0 }
 0x393   :  { %v9175_v49 = vadd.f32 %v2119_v6, %v9168_v27  ;;  %v2121_v61 = vpop.f32.mrb[43].mxu0 }
 0x394   :  { %v9178_v12 = vadd.f32 %v2121_v61, %v9172_v34  ;;  %v9196_v61 = vrot.slane %v8997_v39, %v8411_v0 }
 0x395   :  { %11580 = vst [vmem:[#allocation107_spill] sm:$0xff] %v9175_v49 }
 0x396   :  { %11581 = vst [vmem:[#allocation108_spill] sm:$0xff] %v9178_v12  ;;  %v2125_v36 = vpop.f32.mrb[44].mxu0  ;;  %11588 = vst [vmem:[#allocation115_spill] sm:$0xff] %v9196_v61 }
 0x397   :  { %v9181_v63 = vadd.f32 %v2125_v36, %v9168_v27  ;;  %v2127_v30 = vpop.f32.mrb[45].mxu0  ;;  %v9200_v36 = vrot.slane %v8997_v39, %v8414_v1  ;;  %v11622_v27 = vmov 9  }
 0x398   :  { %v9184_v52 = vadd.f32 %v2127_v30, %v9172_v34 }
 0x399   :  { %11582 = vst [vmem:[#allocation109_spill] sm:$0xff] %v9181_v63  ;;  %11589 = vst [vmem:[#allocation116_spill] sm:$0xff] %v9200_v36 }
 0x39a   :  { %11583 = vst [vmem:[#allocation110_spill] sm:$0xff] %v9184_v52  ;;  %v9186_v62 = vpop.f32.mrb[46].mxu0 }
 0x39b   :  { %11584 = vst [vmem:[#allocation111_spill] sm:$0xff] %v9186_v62  ;;  %v9188_v60 = vpop.f32.mrb[47].mxu0 }
 0x39c   :  { %11585 = vst [vmem:[#allocation112_spill] sm:$0xff] %v9188_v60 }
 0x39e   :  { %v9190_v20 = vpop.f32.mrb[48].mxu0 }
 0x39f   :  { %11586 = vst [vmem:[#allocation113_spill] sm:$0xff] %v9190_v20  ;;  %v9192_v6 = vpop.f32.mrb[49].mxu0 }
 0x3a0   :  { %11587 = vst [vmem:[#allocation114_spill] sm:$0xff] %v9192_v6 }
 0x3a2   :  { %v2297_v12 = vpop.f32.mrb[50].mxu0 }
 0x3a3   :  { %v9203_v30 = vadd.f32 %v2297_v12, %v9196_v61  ;;  %v2299_v49 = vpop.f32.mrb[51].mxu0 }
 0x3a4   :  { %v9206_v52 = vadd.f32 %v2299_v49, %v9200_v36  ;;  %v9224_v49 = vrot.slane %v8997_v39, %v8802_v32 }
 0x3a5   :  { %11590 = vst [vmem:[#allocation117_spill] sm:$0xff] %v9203_v30 }
 0x3a6   :  { %11591 = vst [vmem:[#allocation118_spill] sm:$0xff] %v9206_v52  ;;  %v2303_v63 = vpop.f32.mrb[52].mxu0  ;;  %11598 = vst [vmem:[#allocation125_spill] sm:$0xff] %v9224_v49 }
 0x3a7   :  { %v9209_v60 = vadd.f32 %v2303_v63, %v9196_v61  ;;  %v2305_v62 = vpop.f32.mrb[53].mxu0  ;;  %v9228_v63 = vrot.slane %v8997_v39, %v8810_v35  ;;  %v11604_v35 = vmov 2   ;;  %v11613_v61 = vmov 20  }
 0x3a8   :  { %v9212_v0 = vadd.f32 %v2305_v62, %v9200_v36  ;;  %v11612_v36 = vmov 17  }
 0x3a9   :  { %11592 = vst [vmem:[#allocation119_spill] sm:$0xff] %v9209_v60  ;;  %11599 = vst [vmem:[#allocation126_spill] sm:$0xff] %v9228_v63 }
 0x3aa   :  { %11593 = vst [vmem:[#allocation120_spill] sm:$0xff] %v9212_v0  ;;  %v9214_v6 = vpop.f32.mrb[54].mxu0 }
 0x3ab   :  { %11594 = vst [vmem:[#allocation121_spill] sm:$0xff] %v9214_v6  ;;  %v9216_v1 = vpop.f32.mrb[55].mxu0 }
 0x3ac   :  { %11595 = vst [vmem:[#allocation122_spill] sm:$0xff] %v9216_v1 }
 0x3ae   :  { %v9218_v20 = vpop.f32.mrb[56].mxu0 }
 0x3af   :  { %11596 = vst [vmem:[#allocation123_spill] sm:$0xff] %v9218_v20  ;;  %v9220_v12 = vpop.f32.mrb[57].mxu0  ;;  %v11610_v20 = vmov 11  }
 0x3b0   :  { %11597 = vst [vmem:[#allocation124_spill] sm:$0xff] %v9220_v12 }
 0x3b2   :  { %v2475_v52 = vpop.f32.mrb[58].mxu0 }
 0x3b3   :  { %v9231_v62 = vadd.f32 %v2475_v52, %v9224_v49  ;;  %v2477_v30 = vpop.f32.mrb[59].mxu0 }
 0x3b4   :  { %v9234_v0 = vadd.f32 %v2477_v30, %v9228_v63  ;;  %v11317_v30 = vmov 4  }
 0x3b5   :  { %11600 = vst [vmem:[#allocation127_spill] sm:$0xff] %v9231_v62  ;;  %v11323_v62 = vmov 5  }
 0x3b6   :  { %11601 = vst [vmem:[#allocation128_spill] sm:$0xff] %v9234_v0  ;;  %v2481_v60 = vpop.f32.mrb[60].mxu0  ;;  %v11321_v0 = vmov 10  }
 0x3b7   :  { %v9237_v1 = vadd.f32 %v2481_v60, %v9224_v49  ;;  %v2483_v6 = vpop.f32.mrb[61].mxu0  ;;  %v11319_v60 = vmov 7   ;;  %v11611_v49 = vmov 14  }
 0x3b8   :  { %v9240_v32 = vadd.f32 %v2483_v6, %v9228_v63  ;;  %v11605_v6 = vmov 3   ;;  %v11609_v63 = vmov 8  }
 0x3b9   :  { %11602 = vst [vmem:[#allocation129_spill] sm:$0xff] %v9237_v1  ;;  %v11341_v1 = vmov 25  }
 0x3ba   :  { %11603 = vst [vmem:[#allocation130_spill] sm:$0xff] %v9240_v32  ;;  %v11329_v32 = vmov 16  }
 0x435   :  { %v9242_v12 = vpop.f32.mrb[62].mxu0 }
 0x436   :  { %2689 = vperm.xlu0 %7572, %v9242_v12   ;;  %2667 = vperm.xlu1 %7571, %v9242_v12   ;;  %v9246_v39 = vpop.f32.mrb[63].mxu0 }
 0x439   :  { %v9248_v52 = vpop.f32.mrb[64].mxu0 }
 0x43a   :  { %7575 = vset.pattern.permute.xlu0 %v11317_v30  ;;  %7573 = vset.pattern.permute.xlu1 %v11604_v35  ;;  %v11325_v30 = vmov 13  }
 0x43b   :  { %2761 = vperm.xlu0 %7575, %v9242_v12   ;;  %2713 = vperm.xlu1 %7573, %v9242_v12  }
 0x43f   :  { %7578 = vset.pattern.permute.xlu0 %v11319_v60  ;;  %7574 = vset.pattern.permute.xlu1 %v11605_v6  ;;  %v11327_v60 = vmov 6  }
 0x440   :  { %2833 = vperm.xlu0 %7578, %v9242_v12   ;;  %2737 = vperm.xlu1 %7574, %v9242_v12  }
 0x444   :  { %7581 = vset.pattern.permute.xlu0 %v11321_v0  ;;  %7576 = vset.pattern.permute.xlu1 %v11323_v62  ;;  %v11331_v0 = vmov 8   ;;  %v9270_v62 = vpop.f32.mrb[65].mxu0 }
 0x445   :  { %2905 = vperm.xlu0 %7581, %v9242_v12   ;;  %2785 = vperm.xlu1 %7576, %v9242_v12   ;;  %11606 = vst [vmem:[#allocation131_spill] sm:$0xff] %v9270_v62 }
 0x449   :  { %7584 = vset.pattern.permute.xlu0 %v11325_v30  ;;  %7577 = vset.pattern.permute.xlu1 %v11327_v60  ;;  %v11333_v30 = vmov 19   ;;  %v11335_v60 = vmov 9  }
 0x44a   :  { %2977 = vperm.xlu0 %7584, %v9242_v12   ;;  %2809 = vperm.xlu1 %7577, %v9242_v12  }
 0x44e   :  { %7587 = vset.pattern.permute.xlu0 %v11329_v32  ;;  %7579 = vset.pattern.permute.xlu1 %v11331_v0  ;;  %v11337_v32 = vmov 22   ;;  %v11339_v0 = vmov 11  }
 0x44f   :  { %3049 = vperm.xlu0 %7587, %v9242_v12   ;;  %2857 = vperm.xlu1 %7579, %v9242_v12  }
 0x453   :  { %7590 = vset.pattern.permute.xlu0 %v11333_v30  ;;  %7580 = vset.pattern.permute.xlu1 %v11335_v60  ;;  %v11343_v30 = vmov 12   ;;  %v11345_v60 = vmov 28  }
 0x454   :  { %3121 = vperm.xlu0 %7590, %v9242_v12   ;;  %2881 = vperm.xlu1 %7580, %v9242_v12  }
 0x458   :  { %7593 = vset.pattern.permute.xlu0 %v11337_v32  ;;  %7582 = vset.pattern.permute.xlu1 %v11339_v0  ;;  %v11347_v32 = vmov 14   ;;  %v11349_v0 = vmov 31  }
 0x459   :  { %3193 = vperm.xlu0 %7593, %v9242_v12   ;;  %2929 = vperm.xlu1 %7582, %v9242_v12  }
 0x45d   :  { %7596 = vset.pattern.permute.xlu0 %v11341_v1  ;;  %7583 = vset.pattern.permute.xlu1 %v11343_v30  ;;  %v11351_v1 = vmov 15   ;;  %v11607_v30 = vmov 0  }
 0x45e   :  { %3265 = vperm.xlu0 %7596, %v9242_v12   ;;  %2953 = vperm.xlu1 %7583, %v9242_v12  }
 0x462   :  { %7599 = vset.pattern.permute.xlu0 %v11345_v60  ;;  %7585 = vset.pattern.permute.xlu1 %v11347_v32  ;;  %v11355_v60 = vmov 17   ;;  %v11357_v32 = vmov 18  }
 0x463   :  { %3337 = vperm.xlu0 %7599, %v9242_v12   ;;  %3001 = vperm.xlu1 %7585, %v9242_v12  }
 0x467   :  { %7602 = vset.pattern.permute.xlu0 %v11349_v0  ;;  %7586 = vset.pattern.permute.xlu1 %v11351_v1  ;;  %v11608_v0 = vmov 5   ;;  %v11361_v1 = vmov 20  }
 0x468   :  { %3409 = vperm.xlu0 %7602, %v9242_v12   ;;  %3025 = vperm.xlu1 %7586, %v9242_v12  }
 0x46c   :  { %7603 = vset.pattern.permute.xlu0 %v11607_v30  ;;  %7588 = vset.pattern.permute.xlu1 %v11355_v60  ;;  %v11365_v60 = vmov 21  }
 0x46d   :  { %3073 = vperm.xlu1 %7588, %v9242_v12   ;;  %2662 = vperm.xlu0 %7603, %v9246_v39  }
 0x471   :  { %7589 = vset.pattern.permute.xlu1 %v11357_v32  ;;  %7608 = vset.pattern.permute.xlu0 %v11608_v0  ;;  %v11369_v32 = vmov 23  }
 0x472   :  { %3097 = vperm.xlu1 %7589, %v9242_v12   ;;  %2781 = vperm.xlu0 %7608, %v9246_v39  }
 0x476   :  { %7591 = vset.pattern.permute.xlu1 %v11361_v1  ;;  %7611 = vset.pattern.permute.xlu0 %v11609_v63  ;;  %v11371_v1 = vmov 24  }
 0x477   :  { %3145 = vperm.xlu1 %7591, %v9242_v12   ;;  %2853 = vperm.xlu0 %7611, %v9246_v39  }
 0x47b   :  { %7592 = vset.pattern.permute.xlu1 %v11365_v60  ;;  %7614 = vset.pattern.permute.xlu0 %v11610_v20  ;;  %v11377_v60 = vmov 26  }
 0x47c   :  { %3169 = vperm.xlu1 %7592, %v9242_v12   ;;  %2925 = vperm.xlu0 %7614, %v9246_v39  }
 0x480   :  { %7594 = vset.pattern.permute.xlu1 %v11369_v32  ;;  %7617 = vset.pattern.permute.xlu0 %v11611_v49  ;;  %v11375_v32 = vmov 27  }
 0x481   :  { %3217 = vperm.xlu1 %7594, %v9242_v12   ;;  %2997 = vperm.xlu0 %7617, %v9246_v39  }
 0x485   :  { %7595 = vset.pattern.permute.xlu1 %v11371_v1  ;;  %7620 = vset.pattern.permute.xlu0 %v11612_v36  ;;  %v11379_v1 = vmov 29  }
 0x486   :  { %3241 = vperm.xlu1 %7595, %v9242_v12   ;;  %3069 = vperm.xlu0 %7620, %v9246_v39  }
 0x48a   :  { %7597 = vset.pattern.permute.xlu1 %v11377_v60  ;;  %7623 = vset.pattern.permute.xlu0 %v11613_v61 }
 0x48b   :  { %3289 = vperm.xlu1 %7597, %v9242_v12   ;;  %3141 = vperm.xlu0 %7623, %v9246_v39  }
 0x48f   :  { %7598 = vset.pattern.permute.xlu1 %v11375_v32  ;;  %7626 = vset.pattern.permute.xlu0 %v11614_v22  ;;  %v11615_v32 = vmov 1   ;;  %v11621_v22 = vmov 16  }
 0x490   :  { %3313 = vperm.xlu1 %7598, %v9242_v12   ;;  %3213 = vperm.xlu0 %7626, %v9246_v39  }
 0x494   :  { %7600 = vset.pattern.permute.xlu1 %v11379_v1  ;;  %7629 = vset.pattern.permute.xlu0 %v11377_v60  ;;  %v11616_v60 = vmov 4  }
 0x495   :  { %3361 = vperm.xlu1 %7600, %v9242_v12   ;;  %3285 = vperm.xlu0 %7629, %v9246_v39  }
 0x499   :  { %7601 = vset.pattern.permute.xlu1 %v11381_v28  ;;  %7632 = vset.pattern.permute.xlu0 %v11379_v1  ;;  %v11618_v1 = vmov 10   ;;  %v11619_v28 = vmov 6  }
 0x49a   :  { %3385 = vperm.xlu1 %7601, %v9242_v12   ;;  %3357 = vperm.xlu0 %7632, %v9246_v39   ;;  %v11617_v12 = vmov 7  }
 0x49e   :  { %7604 = vset.pattern.permute.xlu1 %v11615_v32  ;;  %7636 = vset.pattern.permute.xlu0 %v11615_v32  ;;  %v11620_v32 = vmov 13  }
 0x49f   :  { %2685 = vperm.xlu1 %7604, %v9246_v39   ;;  %2697 = vperm.xlu0 %7636, %v9248_v52  }
 0x4a3   :  { %7605 = vset.pattern.permute.xlu1 %v11604_v35  ;;  %7639 = vset.pattern.permute.xlu0 %v11616_v60 }
 0x4a4   :  { %2709 = vperm.xlu1 %7605, %v9246_v39   ;;  %2769 = vperm.xlu0 %7639, %v9248_v52  }
 0x4a8   :  { %7606 = vset.pattern.permute.xlu1 %v11605_v6  ;;  %7642 = vset.pattern.permute.xlu0 %v11617_v12  ;;  %v1224_v6 = vadd.f32 %v8756_v19, %v8759_v7 }
 0x4a9   :  { %2733 = vperm.xlu1 %7606, %v9246_v39   ;;  %2841 = vperm.xlu0 %7642, %v9248_v52  }
 0x4ad   :  { %7607 = vset.pattern.permute.xlu1 %v11616_v60  ;;  %7645 = vset.pattern.permute.xlu0 %v11618_v1  ;;  %v1226_v60 = vadd.f32 %v8761_v11, %v8764_v44  ;;  %v11623_v11 = vmov 19  }
 0x4ae   :  { %2757 = vperm.xlu1 %7607, %v9246_v39   ;;  %2913 = vperm.xlu0 %7645, %v9248_v52  }
 0x4b2   :  { %7609 = vset.pattern.permute.xlu1 %v11619_v28  ;;  %7648 = vset.pattern.permute.xlu0 %v11620_v32 }
 0x4b3   :  { %2805 = vperm.xlu1 %7609, %v9246_v39   ;;  %2985 = vperm.xlu0 %7648, %v9248_v52  }
 0x4b5   :  { %v2690_v50 = vpop.permute.xlu0 %2689  ;;  %v2668_v29 = vpop.permute.xlu1 %2667 }
 0x4b6   :  { %v2701_v45 = vmul.f32 %v2690_v50, %v1226_v60  ;;  %v2681_v34 = vmul.f32 %v2668_v29, %v1224_v6  ;;  %v1315_v29 = vadd.f32 %v8787_v24, %v8790_v25  ;;  %v1402_v60 = vadd.f32 %v8814_v9, %v8817_v57 }
 0x4b7   :  { %7610 = vset.pattern.permute.xlu1 %v11617_v12  ;;  %7651 = vset.pattern.permute.xlu0 %v11621_v22  ;;  %v11626_v9 = vmov 25  }
 0x4b8   :  { %v2705_v28 = vadd.f32 %v2701_v45, %v2681_v34  ;;  %2829 = vperm.xlu1 %7610, %v9246_v39   ;;  %3057 = vperm.xlu0 %7651, %v9248_v52  }
 0x4ba   :  { %v2714_v19 = vpop.permute.xlu1 %2713  ;;  %v2762_v45 = vpop.permute.xlu0 %2761 }
 0x4bb   :  { %v2725_v7 = vmul.f32 %v2714_v19, %v1313_v16  ;;  %v11624_v16 = vmov 22   ;;  %v2773_v6 = vmul.f32 %v2762_v45, %v1402_v60 }
 0x4bc   :  { %7612 = vset.pattern.permute.xlu1 %v11622_v27  ;;  %7654 = vset.pattern.permute.xlu0 %v11623_v11  ;;  %v11625_v27 = vmov 12  }
 0x4bd   :  { %v2729_v50 = vadd.f32 %v2725_v7, %v2705_v28  ;;  %2877 = vperm.xlu1 %7612, %v9246_v39   ;;  %3129 = vperm.xlu0 %7654, %v9248_v52   ;;  %v1404_v7 = vadd.f32 %v8819_v10, %v8822_v54  ;;  %v1493_v10 = vadd.f32 %v8851_v5, %v8854_v47 }
 0x4bf   :  { %v2738_v34 = vpop.permute.xlu1 %2737  ;;  %v2834_v45 = vpop.permute.xlu0 %2833 }
 0x4c0   :  { %v2749_v51 = vmul.f32 %v2738_v34, %v1315_v29 }
 0x4c1   :  { %7613 = vset.pattern.permute.xlu1 %v11618_v1  ;;  %7657 = vset.pattern.permute.xlu0 %v11624_v16 }
 0x4c2   :  { %v2753_v19 = vadd.f32 %v2749_v51, %v2729_v50  ;;  %2901 = vperm.xlu1 %7613, %v9246_v39   ;;  %3201 = vperm.xlu0 %7657, %v9248_v52   ;;  %v1491_v50 = vadd.f32 %v8846_v3, %v8849_v4  ;;  %v11627_v51 = vmov 28  }
 0x4c4   :  { %v2786_v24 = vpop.permute.xlu1 %2785  ;;  %v2777_v28 = vadd.f32 %v2773_v6, %v2753_v19  ;;  %v2845_v6 = vmul.f32 %v2834_v45, %v1493_v10 }
 0x4c5   :  { %v2797_v12 = vmul.f32 %v2786_v24, %v1404_v7 }
 0x4c6   :  { %7615 = vset.pattern.permute.xlu1 %v11625_v27  ;;  %7660 = vset.pattern.permute.xlu0 %v11626_v9 }
 0x4c7   :  { %v2801_v29 = vadd.f32 %v2797_v12, %v2777_v28  ;;  %2949 = vperm.xlu1 %7615, %v9246_v39   ;;  %3273 = vperm.xlu0 %7660, %v9248_v52   ;;  %v1580_v12 = vadd.f32 %v9055_v23, %v9068_v31  ;;  %v11628_v28 = vmov 15   ;;  %v1669_v23 = vadd.f32 %v8877_v38, %v8883_v42 }
 0x4c9   :  { %v2810_v34 = vpop.permute.xlu1 %2809 }
 0x4ca   :  { %v2821_v60 = vmul.f32 %v2810_v34, %v1491_v50  ;;  %v2906_v50 = vpop.permute.xlu0 %2905 }
 0x4cb   :  { %7616 = vset.pattern.permute.xlu1 %v11620_v32  ;;  %7663 = vset.pattern.permute.xlu0 %v11627_v51  ;;  %v2917_v10 = vmul.f32 %v2906_v50, %v1669_v23  ;;  %v1847_v23 = vadd.f32 %v8905_v14, %v8911_v18  ;;  %v1936_v14 = vadd.f32 %v9134_v59, %v9140_v8 }
 0x4cc   :  { %v2825_v19 = vadd.f32 %v2821_v60, %v2801_v29  ;;  %2973 = vperm.xlu1 %7616, %v9246_v39   ;;  %3345 = vperm.xlu0 %7663, %v9248_v52   ;;  %v1582_v29 = vadd.f32 %v9064_v55, %v9076_v33 }
 0x4ce   :  { %v2858_v3 = vpop.permute.xlu1 %2857  ;;  %v2849_v7 = vadd.f32 %v2845_v6, %v2825_v19  ;;  %v1671_v6 = vadd.f32 %v8879_v56, %v8887_v58  ;;  %v1760_v56 = vadd.f32 %v9108_v43, %v9116_v46 }
 0x4cf   :  { %v2869_v24 = vmul.f32 %v2858_v3, %v1580_v12  ;;  %v11629_v3 = vmov 18  }
 0x4d0   :  { %7618 = vset.pattern.permute.xlu1 %v11628_v28  ;;  %7666 = vset.pattern.permute.xlu0 %v11607_v30 }
 0x4d1   :  { %v2873_v5 = vadd.f32 %v2869_v24, %v2849_v7  ;;  %3021 = vperm.xlu1 %7618, %v9246_v39   ;;  %2672 = vperm.xlu0 %7666, %v9270_v62   ;;  %v1758_v7 = vadd.f32 %v9106_v21, %v9112_v2  ;;  %v2978_v24 = vpop.permute.xlu0 %2977 }
 0x4d2   :  { %v2989_v50 = vmul.f32 %v2978_v24, %v1760_v56  ;;  %v1938_v24 = vadd.f32 %v9136_v13, %v9144_v48  ;;  %v3605_v13 = vld [vmem:[%s11264_s16] sm:$0x3] }
 0x4d3   :  { %v2882_v45 = vpop.permute.xlu1 %2881  ;;  %7053 = vmatprep.subr.msk.mxu0 %vm116_vm0, %v3605_v13 }
 0x4d4   :  { %v2893_v34 = vmul.f32 %v2882_v45, %v1582_v29  ;;  %7054 = vmatpush3.msk.msra.mxu0 %vm116_vm0, %v3605_v13  ;;  %v11638_v13 = vmov 0.0  }
 0x4d5   :  { %7619 = vset.pattern.permute.xlu1 %v11621_v22  ;;  %7668 = vset.pattern.permute.xlu0 %v11604_v35 }
 0x4d6   :  { %v2897_v60 = vadd.f32 %v2893_v34, %v2873_v5  ;;  %3045 = vperm.xlu1 %7619, %v9246_v39   ;;  %2717 = vperm.xlu0 %7668, %v9270_v62  }
 0x4d8   :  { %v2930_v55 = vpop.permute.xlu1 %2929  ;;  %v2921_v19 = vadd.f32 %v2917_v10, %v2897_v60  ;;  %v11630_v60 = vmov 21  }
 0x4d9   :  { %v2941_v12 = vmul.f32 %v2930_v55, %v1671_v6  ;;  %v1849_v6 = vadd.f32 %v8907_v37, %v8915_v17  ;;  %v3050_v55 = vpop.permute.xlu0 %3049 }
 0x4da   :  { %7621 = vset.pattern.permute.xlu1 %v11629_v3  ;;  %7671 = vset.pattern.permute.xlu0 %v11608_v0 }
 0x4db   :  { %v2945_v38 = vadd.f32 %v2941_v12, %v2921_v19  ;;  %3093 = vperm.xlu1 %7621, %v9246_v39   ;;  %2789 = vperm.xlu0 %7671, %v9270_v62  }
 0x4dd   :  { %v2954_v5 = vpop.permute.xlu1 %2953 }
 0x4de   :  { %v2965_v29 = vmul.f32 %v2954_v5, %v1758_v7 }
 0x4df   :  { %7622 = vset.pattern.permute.xlu1 %v11623_v11  ;;  %7674 = vset.pattern.permute.xlu0 %v11609_v63 }
 0x4e0   :  { %v2969_v45 = vadd.f32 %v2965_v29, %v2945_v38  ;;  %3117 = vperm.xlu1 %7622, %v9246_v39   ;;  %2861 = vperm.xlu0 %7674, %v9270_v62   ;;  %v3061_v38 = vmul.f32 %v3050_v55, %v1936_v14  ;;  %v11631_v29 = vmov 24   ;;  %v7833_v14 = vld [vmem:[%s11465_s5 + $0x8] sm:$0xff] }
 0x4e1   :  { %7056 = vmatmul.mubr.msk.f32.vlgmr.msra.gmra.mrb[66].mxu0 %vm103_vm1, %v7833_v14  ;;  %v11643_v14 = vld [vmem:[#allocation56_spill] sm:$0xff] }
 0x4e2   :  { %v3002_v21 = vpop.permute.xlu1 %3001  ;;  %v2993_v34 = vadd.f32 %v2989_v50, %v2969_v45  ;;  %v2025_v50 = vadd.f32 %v8938_v40, %v8944_v41  ;;  %v3122_v45 = vpop.permute.xlu0 %3121  ;;  %v11632_v40 = vld [vmem:[#allocation105_spill] sm:$0xff] }
 0x4e3   :  { %v3013_v10 = vmul.f32 %v3002_v21, %v1847_v23  ;;  %v2027_v21 = vadd.f32 %v8940_v15, %v8948_v26 }
 0x4e4   :  { %7624 = vset.pattern.permute.xlu1 %v11630_v60  ;;  %7677 = vset.pattern.permute.xlu0 %v11610_v20 }
 0x4e5   :  { %v3017_v43 = vadd.f32 %v3013_v10, %v2993_v34  ;;  %3165 = vperm.xlu1 %7624, %v9246_v39   ;;  %2933 = vperm.xlu0 %7677, %v9270_v62   ;;  %v3133_v10 = vmul.f32 %v3122_v45, %v2027_v21  ;;  %v11639_v21 = vld [vmem:[#allocation57_spill] sm:$0xff] }
 0x4e6   :  { %v3194_v45 = vpop.permute.xlu0 %3193 }
 0x4e7   :  { %v3026_v19 = vpop.permute.xlu1 %3025 }
 0x4e8   :  { %v3037_v12 = vmul.f32 %v3026_v19, %v1849_v6  ;;  %v11633_v6 = vld [vmem:[#allocation103_spill] sm:$0xff] }
 0x4e9   :  { %7625 = vset.pattern.permute.xlu1 %v11624_v16  ;;  %7680 = vset.pattern.permute.xlu0 %v11611_v49  ;;  %v2114_v55 = vadd.f32 %v11633_v6, %v11632_v40  ;;  %v11641_v6 = vmov 26  }
 0x4ea   :  { %v3041_v7 = vadd.f32 %v3037_v12, %v3017_v43  ;;  %3189 = vperm.xlu1 %7625, %v9246_v39   ;;  %3005 = vperm.xlu0 %7680, %v9270_v62  }
 0x4ec   :  { %v3074_v37 = vpop.permute.xlu1 %3073  ;;  %v3065_v5 = vadd.f32 %v3061_v38, %v3041_v7  ;;  %v7834_v38 = vld [vmem:[%s11465_s5 + $0x10] sm:$0xff]  ;;  %v11634_v7 = vmov 27  }
 0x4ed   :  { %v3085_v56 = vmul.f32 %v3074_v37, %v1938_v24  ;;  %7058 = vmatprep.mubr.msk.f32.mxu0 %vm103_vm1, %v7834_v38  ;;  %v11635_v24 = vmov 23  }
 0x4ee   :  { %7627 = vset.pattern.permute.xlu1 %v11631_v29  ;;  %7683 = vset.pattern.permute.xlu0 %v11612_v36 }
 0x4ef   :  { %v3089_v59 = vadd.f32 %v3085_v56, %v3065_v5  ;;  %3237 = vperm.xlu1 %7627, %v9246_v39   ;;  %3077 = vperm.xlu0 %7683, %v9270_v62   ;;  %v11636_v5 = vld [vmem:[#allocation106_spill] sm:$0xff]  ;;  %v11637_v56 = vld [vmem:[#allocation104_spill] sm:$0xff] }
 0x4f1   :  { %v3098_v23 = vpop.permute.xlu1 %3097 }
 0x4f2   :  { %v3109_v34 = vmul.f32 %v3098_v23, %v2025_v50  ;;  %v7835_v50 = vld [vmem:[%s11465_s5 + $0x18] sm:$0xff] }
 0x4f3   :  { %7628 = vset.pattern.permute.xlu1 %v11626_v9  ;;  %7686 = vset.pattern.permute.xlu0 %v11613_v61  ;;  %v11649_v9 = vld [vmem:[#allocation114_spill] sm:$0xff] }
 0x4f4   :  { %v3113_v43 = vadd.f32 %v3109_v34, %v3089_v59  ;;  %3261 = vperm.xlu1 %7628, %v9246_v39   ;;  %3149 = vperm.xlu0 %7686, %v9270_v62   ;;  %v2116_v59 = vadd.f32 %v11637_v56, %v11636_v5  ;;  %v11640_v34 = vld [vmem:[#allocation55_spill] sm:$0xff] }
 0x4f5   :  { %7059 = vmatmul.mubr.msk.f32.gmra.mrb[68].mxu0 %vm103_vm1, %v7835_v50 }
 0x4f6   :  { %v3146_v19 = vpop.permute.xlu1 %3145  ;;  %v3137_v15 = vadd.f32 %v3133_v10, %v3113_v43  ;;  %4013 = vmatprep.mubr.f32.mxu0 %v11638_v13  ;;  %v2203_v10 = vadd.f32 %v11640_v34, %v11639_v21  ;;  %v11644_v13 = vmov 30   ;;  %v11645_v34 = vmov 29  }
 0x4f7   :  { %v3157_v12 = vmul.f32 %v3146_v19, %v2114_v55 }
 0x4f8   :  { %7630 = vset.pattern.permute.xlu1 %v11634_v7  ;;  %7689 = vset.pattern.permute.xlu0 %v11635_v24  ;;  %v3205_v55 = vmul.f32 %v3194_v45, %v2203_v10  ;;  %v11647_v45 = vld [vmem:[#allocation113_spill] sm:$0xff]  ;;  %v3266_v10 = vpop.permute.xlu0 %3265 }
 0x4f9   :  { %v3161_v37 = vadd.f32 %v3157_v12, %v3137_v15  ;;  %3309 = vperm.xlu1 %7630, %v9246_v39   ;;  %3221 = vperm.xlu0 %7689, %v9270_v62   ;;  %v11642_v15 = vld [vmem:[#allocation58_spill] sm:$0xff] }
 0x4fa   :  { %v2205_v12 = vadd.f32 %v11643_v14, %v11642_v15 }
 0x4fb   :  { %v3170_v23 = vpop.permute.xlu1 %3169 }
 0x4fc   :  { %v3181_v43 = vmul.f32 %v3170_v23, %v2116_v59 }
 0x4fd   :  { %7631 = vset.pattern.permute.xlu1 %v11627_v51  ;;  %7692 = vset.pattern.permute.xlu0 %v11641_v6  ;;  %v11648_v51 = vld [vmem:[#allocation116_spill] sm:$0xff] }
 0x4fe   :  { %v3185_v19 = vadd.f32 %v3181_v43, %v3161_v37  ;;  %3333 = vperm.xlu1 %7631, %v9246_v39   ;;  %3293 = vperm.xlu0 %7692, %v9270_v62   ;;  %v11646_v37 = vld [vmem:[#allocation115_spill] sm:$0xff]  ;;  %v2294_v14 = vadd.f32 %v11649_v9, %v11648_v51  ;;  %v11653_v9 = vmov 1  }
 0x4ff   :  { %v2292_v23 = vadd.f32 %v11647_v45, %v11646_v37 }
 0x500   :  { %v3218_v38 = vpop.permute.xlu1 %3217  ;;  %v3209_v56 = vadd.f32 %v3205_v55, %v3185_v19  ;;  %v11650_v55 = vmov 31   ;;  %v3277_v19 = vmul.f32 %v3266_v10, %v2294_v14  ;;  %v11655_v10 = vld [vmem:[#allocation66_spill] sm:$0xff]  ;;  %v11656_v14 = vld [vmem:[#allocation125_spill] sm:$0xff] }
 0x501   :  { %v3229_v50 = vmul.f32 %v3218_v38, %v2205_v12  ;;  %v11651_v38 = vld [vmem:[#allocation67_spill] sm:$0xff] }
 0x502   :  { %7633 = vset.pattern.permute.xlu1 %v11644_v13  ;;  %7695 = vset.pattern.permute.xlu0 %v11645_v34 }
 0x503   :  { %v3233_v59 = vadd.f32 %v3229_v50, %v3209_v56  ;;  %3381 = vperm.xlu1 %7633, %v9246_v39   ;;  %3365 = vperm.xlu0 %7695, %v9270_v62   ;;  %v11652_v56 = vld [vmem:[#allocation65_spill] sm:$0xff] }
 0x504   :  { %v2381_v50 = vadd.f32 %v11652_v56, %v11651_v38  ;;  %v11658_v56 = vld [vmem:[#allocation126_spill] sm:$0xff] }
 0x505   :  { %v3242_v43 = vpop.permute.xlu1 %3241 }
 0x506   :  { %v3253_v16 = vmul.f32 %v3242_v43, %v2292_v23  ;;  %v11654_v43 = vld [vmem:[#allocation68_spill] sm:$0xff] }
 0x507   :  { %7634 = vset.pattern.permute.xlu1 %v11650_v55  ;;  %7697 = vset.pattern.permute.xlu0 %v11650_v55  ;;  %v11657_v55 = vld [vmem:[#allocation123_spill] sm:$0xff] }
 0x508   :  { %v3257_v12 = vadd.f32 %v3253_v16, %v3233_v59  ;;  %3405 = vperm.xlu1 %7634, %v9246_v39   ;;  %3413 = vperm.xlu0 %7697, %v9270_v62   ;;  %v2383_v16 = vadd.f32 %v11655_v10, %v11654_v43  ;;  %v3338_v59 = vpop.permute.xlu0 %3337  ;;  %v2470_v32 = vadd.f32 %v11657_v55, %v11656_v14  ;;  %v11660_v10 = vmov 3   ;;  %v11661_v55 = vld [vmem:[#allocation77_spill] sm:$0xff] }
 0x50a   :  { %v3290_v45 = vpop.permute.xlu1 %3289  ;;  %v3281_v11 = vadd.f32 %v3277_v19, %v3257_v12  ;;  %v3349_v19 = vmul.f32 %v3338_v59, %v2470_v32  ;;  %v11663_v32 = vld [vmem:[#allocation78_spill] sm:$0xff] }
 0x50b   :  { %v3301_v22 = vmul.f32 %v3290_v45, %v2381_v50  ;;  %v11659_v50 = vld [vmem:[#allocation124_spill] sm:$0xff] }
 0x50c   :  { %7635 = vset.pattern.permute.xlu1 %v11607_v30  ;;  %7700 = vset.pattern.permute.xlu0 %v11653_v9  ;;  %v3410_v62 = vpop.permute.xlu0 %3409 }
 0x50d   :  { %v3305_v23 = vadd.f32 %v3301_v22, %v3281_v11  ;;  %2677 = vperm.xlu1 %7635, %v9248_v52   ;;  %v2472_v22 = vadd.f32 %v11659_v50, %v11658_v56 }
 0x50f   :  { %v3314_v39 = vpop.permute.xlu1 %3313 }
 0x510   :  { %v3325_v1 = vmul.f32 %v3314_v39, %v2383_v16  ;;  %v11662_v16 = vld [vmem:[#allocation75_spill] sm:$0xff]  ;;  %v2663_v56 = vpop.permute.xlu0 %2662 }
 0x511   :  { %7637 = vset.pattern.permute.xlu1 %v11604_v35  ;;  %v2559_v39 = vadd.f32 %v11662_v16, %v11661_v55 }
 0x512   :  { %v3329_v12 = vadd.f32 %v3325_v1, %v3305_v23  ;;  %2721 = vperm.xlu1 %7637, %v9248_v52   ;;  %v11664_v1 = vld [vmem:[#allocation76_spill] sm:$0xff] }
 0x513   :  { %v2561_v23 = vadd.f32 %v11664_v1, %v11663_v32  ;;  %v11668_v1 = vmov 6  }
 0x514   :  { %v3362_v11 = vpop.permute.xlu1 %3361  ;;  %v3353_v45 = vadd.f32 %v3349_v19, %v3329_v12  ;;  %v11665_v12 = vld [vmem:[#allocation8_spill] sm:$0xff] }
 0x515   :  { %v3373_v30 = vmul.f32 %v3362_v11, %v2472_v22  ;;  %v3421_v50 = vmul.f32 %v3410_v62, %v2561_v23  ;;  %v11666_v22 = vld [vmem:[#allocation6_spill] sm:$0xff]  ;;  %v11667_v11 = vld [vmem:[#allocation7_spill] sm:$0xff]  ;;  %v11669_v62 = vld [vmem:[#allocation13_spill] sm:$0xff] }
 0x516   :  { %7638 = vset.pattern.permute.xlu1 %v11660_v10 }
 0x517   :  { %v3377_v43 = vadd.f32 %v3373_v30, %v3353_v45  ;;  %2745 = vperm.xlu1 %7638, %v9248_v52   ;;  %v1218_v30 = vadd.f32 %v11666_v22, %v11665_v12  ;;  %v1220_v45 = vadd.f32 %v11667_v11, %v8764_v44  ;;  %v11670_v44 = vld [vmem:[#allocation14_spill] sm:$0xff]  ;;  %v11671_v12 = vmov 9   ;;  %v2782_v22 = vpop.permute.xlu0 %2781 }
 0x518   :  { %v11673_v11 = vld [vmem:[#allocation22_spill] sm:$0xff] }
 0x519   :  { %v3386_v35 = vpop.permute.xlu1 %3385  ;;  %v2680_v55 = vmul.f32 %v2663_v56, %v1218_v30 }
 0x51a   :  { %v3397_v59 = vmul.f32 %v3386_v35, %v2559_v39 }
 0x51b   :  { %7640 = vset.pattern.permute.xlu1 %v11608_v0 }
 0x51c   :  { %v3401_v19 = vadd.f32 %v3397_v59, %v3377_v43  ;;  %2793 = vperm.xlu1 %7640, %v9248_v52   ;;  %v1307_v43 = vadd.f32 %v11669_v62, %v8785_v53  ;;  %v11674_v62 = vld [vmem:[#allocation28_spill] sm:$0xff] }
 0x51e   :  { %v9515_v14 = vadd.f32 %v3421_v50, %v3401_v19  ;;  %v2686_v16 = vpop.permute.xlu1 %2685  ;;  %v1309_v50 = vadd.f32 %v11670_v44, %v8790_v25 }
 0x51f   :  { %v2700_v10 = vmul.f32 %v2686_v16, %v1220_v45  ;;  %v1398_v45 = vadd.f32 %v11673_v11, %v8822_v54  ;;  %v11675_v54 = vld [vmem:[#allocation30_spill] sm:$0xff] }
 0x520   :  { %7641 = vset.pattern.permute.xlu1 %v11668_v1  ;;  %v1487_v44 = vadd.f32 %v11675_v54, %v8854_v47 }
 0x521   :  { %v2704_v35 = vadd.f32 %v2700_v10, %v2680_v55  ;;  %2817 = vperm.xlu1 %7641, %v9248_v52   ;;  %v11672_v55 = vld [vmem:[#allocation20_spill] sm:$0xff] }
 0x522   :  { %v1396_v53 = vadd.f32 %v11672_v55, %v8817_v57 }
 0x523   :  { %v2710_v39 = vpop.permute.xlu1 %2709 }
 0x524   :  { %v2724_v23 = vmul.f32 %v2710_v39, %v1307_v43  ;;  %v1485_v43 = vadd.f32 %v11674_v62, %v8849_v4 }
 0x525   :  { %7643 = vset.pattern.permute.xlu1 %v11609_v63 }
 0x526   :  { %v2728_v59 = vadd.f32 %v2724_v23, %v2704_v35  ;;  %2865 = vperm.xlu1 %7643, %v9248_v52   ;;  %v2796_v35 = vmul.f32 %v2782_v22, %v1398_v45  ;;  %v11677_v22 = vld [vmem:[#allocation82_spill] sm:$0xff] }
 0x528   :  { %v2734_v56 = vpop.permute.xlu1 %2733 }
 0x529   :  { %v2748_v19 = vmul.f32 %v2734_v56, %v1309_v50  ;;  %v2854_v50 = vpop.permute.xlu0 %2853 }
 0x52a   :  { %7644 = vset.pattern.permute.xlu1 %v11671_v12 }
 0x52b   :  { %v2752_v10 = vadd.f32 %v2748_v19, %v2728_v59  ;;  %2889 = vperm.xlu1 %7644, %v9248_v52   ;;  %v11676_v19 = vld [vmem:[#allocation80_spill] sm:$0xff] }
 0x52d   :  { %v2758_v30 = vpop.permute.xlu1 %2757 }
 0x52e   :  { %v2772_v16 = vmul.f32 %v2758_v30, %v1396_v53  ;;  %v1576_v30 = vadd.f32 %v11677_v22, %v9076_v33 }
 0x52f   :  { %7646 = vset.pattern.permute.xlu1 %v11610_v20 }
 0x530   :  { %v2776_v25 = vadd.f32 %v2772_v16, %v2752_v10  ;;  %2937 = vperm.xlu1 %7646, %v9248_v52   ;;  %v1574_v10 = vadd.f32 %v11676_v19, %v9068_v31  ;;  %v11678_v31 = vld [vmem:[#allocation35_spill] sm:$0xff] }
 0x532   :  { %v2806_v39 = vpop.permute.xlu1 %2805  ;;  %v2800_v23 = vadd.f32 %v2796_v35, %v2776_v25  ;;  %v2868_v4 = vmul.f32 %v2854_v50, %v1574_v10  ;;  %v1663_v35 = vadd.f32 %v11678_v31, %v8883_v42  ;;  %v2926_v25 = vpop.permute.xlu0 %2925 }
 0x533   :  { %v2820_v59 = vmul.f32 %v2806_v39, %v1485_v43  ;;  %v11679_v43 = vld [vmem:[#allocation36_spill] sm:$0xff] }
 0x534   :  { %7647 = vset.pattern.permute.xlu1 %v11625_v27  ;;  %v1665_v39 = vadd.f32 %v11679_v43, %v8887_v58  ;;  %v11681_v58 = vld [vmem:[#allocation90_spill] sm:$0xff]  ;;  %v11685_v43 = vld [vmem:[#allocation96_spill] sm:$0xff] }
 0x535   :  { %v2824_v57 = vadd.f32 %v2820_v59, %v2800_v23  ;;  %2961 = vperm.xlu1 %7647, %v9248_v52   ;;  %v1754_v19 = vadd.f32 %v11681_v58, %v9116_v46 }
 0x536   :  { %v2940_v33 = vmul.f32 %v2926_v25, %v1665_v39  ;;  %v2998_v10 = vpop.permute.xlu0 %2997  ;;  %v1932_v39 = vadd.f32 %v11685_v43, %v9144_v48  ;;  %v11687_v48 = vld [vmem:[#allocation48_spill] sm:$0xff] }
 0x537   :  { %v2830_v56 = vpop.permute.xlu1 %2829 }
 0x538   :  { %v2844_v55 = vmul.f32 %v2830_v56, %v1487_v44 }
 0x539   :  { %7649 = vset.pattern.permute.xlu1 %v11611_v49 }
 0x53a   :  { %v2848_v53 = vadd.f32 %v2844_v55, %v2824_v57  ;;  %3009 = vperm.xlu1 %7649, %v9248_v52   ;;  %v11680_v57 = vld [vmem:[#allocation89_spill] sm:$0xff]  ;;  %v3070_v25 = vpop.permute.xlu0 %3069 }
 0x53b   :  { %v1752_v54 = vadd.f32 %v11680_v57, %v9112_v2 }
 0x53c   :  { %v2878_v11 = vpop.permute.xlu1 %2877  ;;  %v2872_v45 = vadd.f32 %v2868_v4, %v2848_v53  ;;  %v11682_v4 = vld [vmem:[#allocation41_spill] sm:$0xff] }
 0x53d   :  { %v2892_v16 = vmul.f32 %v2878_v11, %v1576_v30  ;;  %v1841_v53 = vadd.f32 %v11682_v4, %v8911_v18  ;;  %v11683_v11 = vld [vmem:[#allocation42_spill] sm:$0xff]  ;;  %v11684_v18 = vld [vmem:[#allocation95_spill] sm:$0xff] }
 0x53e   :  { %7650 = vset.pattern.permute.xlu1 %v11628_v28 }
 0x53f   :  { %v2896_v47 = vadd.f32 %v2892_v16, %v2872_v45  ;;  %3033 = vperm.xlu1 %7650, %v9248_v52   ;;  %v3012_v2 = vmul.f32 %v2998_v10, %v1841_v53  ;;  %v1843_v45 = vadd.f32 %v11683_v11, %v8915_v17  ;;  %v3084_v17 = vmul.f32 %v3070_v25, %v1932_v39  ;;  %v11689_v53 = vld [vmem:[#allocation102_spill] sm:$0xff]  ;;  %v11692_v25 = vld [vmem:[#allocation111_spill] sm:$0xff] }
 0x541   :  { %v2902_v62 = vpop.permute.xlu1 %2901 }
 0x542   :  { %v2916_v23 = vmul.f32 %v2902_v62, %v1663_v35  ;;  %v1930_v35 = vadd.f32 %v11684_v18, %v9140_v8 }
 0x543   :  { %7652 = vset.pattern.permute.xlu1 %v11612_v36 }
 0x544   :  { %v2920_v59 = vadd.f32 %v2916_v23, %v2896_v47  ;;  %3081 = vperm.xlu1 %7652, %v9248_v52  }
 0x546   :  { %v2950_v44 = vpop.permute.xlu1 %2949  ;;  %v2944_v50 = vadd.f32 %v2940_v33, %v2920_v59  ;;  %v11686_v59 = vld [vmem:[#allocation47_spill] sm:$0xff] }
 0x547   :  { %v2964_v56 = vmul.f32 %v2950_v44, %v1752_v54  ;;  %v2019_v57 = vadd.f32 %v11686_v59, %v8944_v41 }
 0x548   :  { %7653 = vset.pattern.permute.xlu1 %v11629_v3 }
 0x549   :  { %v2968_v42 = vadd.f32 %v2964_v56, %v2944_v50  ;;  %3105 = vperm.xlu1 %7653, %v9248_v52   ;;  %v2021_v56 = vadd.f32 %v11687_v48, %v8948_v26  ;;  %v11696_v48 = vld [vmem:[#allocation68_spill] sm:$0xff] }
 0x54b   :  { %v2974_v55 = vpop.permute.xlu1 %2973 }
 0x54c   :  { %v2988_v22 = vmul.f32 %v2974_v55, %v1754_v19  ;;  %v11688_v19 = vld [vmem:[#allocation101_spill] sm:$0xff] }
 0x54d   :  { %7655 = vset.pattern.permute.xlu1 %v11613_v61  ;;  %v2108_v10 = vadd.f32 %v11688_v19, %v11632_v40  ;;  %v11690_v40 = vld [vmem:[#allocation53_spill] sm:$0xff] }
 0x54e   :  { %v2992_v30 = vadd.f32 %v2988_v22, %v2968_v42  ;;  %3153 = vperm.xlu1 %7655, %v9248_v52   ;;  %v3142_v42 = vpop.permute.xlu0 %3141  ;;  %v2110_v22 = vadd.f32 %v11689_v53, %v11636_v5 }
 0x54f   :  { %v3156_v41 = vmul.f32 %v3142_v42, %v2108_v10 }
 0x550   :  { %v3022_v16 = vpop.permute.xlu1 %3021  ;;  %v3016_v47 = vadd.f32 %v3012_v2, %v2992_v30 }
 0x551   :  { %v3036_v31 = vmul.f32 %v3022_v16, %v1843_v45  ;;  %v2197_v45 = vadd.f32 %v11690_v40, %v11639_v21  ;;  %v11703_v40 = vmov 4  }
 0x552   :  { %7656 = vset.pattern.permute.xlu1 %v11630_v60  ;;  %v3214_v16 = vpop.permute.xlu0 %3213 }
 0x553   :  { %v3040_v46 = vadd.f32 %v3036_v31, %v3016_v47  ;;  %3177 = vperm.xlu1 %7656, %v9248_v52   ;;  %v11691_v31 = vld [vmem:[#allocation54_spill] sm:$0xff] }
 0x555   :  { %v3046_v62 = vpop.permute.xlu1 %3045 }
 0x556   :  { %v3060_v23 = vmul.f32 %v3046_v62, %v1930_v35  ;;  %v2286_v62 = vadd.f32 %v11692_v25, %v11646_v37 }
 0x557   :  { %7658 = vset.pattern.permute.xlu1 %v11635_v24 }
 0x558   :  { %v3064_v33 = vadd.f32 %v3060_v23, %v3040_v46  ;;  %3225 = vperm.xlu1 %7658, %v9248_v52   ;;  %v2199_v46 = vadd.f32 %v11691_v31, %v11642_v15  ;;  %v11693_v15 = vld [vmem:[#allocation112_spill] sm:$0xff]  ;;  %v11705_v31 = vld [vmem:[#allocation73_spill] sm:$0xff] }
 0x55a   :  { %v3094_v54 = vpop.permute.xlu1 %3093  ;;  %v3088_v44 = vadd.f32 %v3084_v17, %v3064_v33  ;;  %v3228_v5 = vmul.f32 %v3214_v16, %v2199_v46  ;;  %v2288_v17 = vadd.f32 %v11693_v15, %v11648_v51  ;;  %v3286_v33 = vpop.permute.xlu0 %3285 }
 0x55b   :  { %v3108_v50 = vmul.f32 %v3094_v54, %v2019_v57  ;;  %v11694_v57 = vld [vmem:[#allocation63_spill] sm:$0xff] }
 0x55c   :  { %7659 = vset.pattern.permute.xlu1 %v11631_v29  ;;  %v2375_v54 = vadd.f32 %v11694_v57, %v11651_v38  ;;  %v11700_v38 = vld [vmem:[#allocation121_spill] sm:$0xff]  ;;  %v11708_v57 = vld [vmem:[#allocation12_spill] sm:$0xff] }
 0x55d   :  { %v3112_v8 = vadd.f32 %v3108_v50, %v3088_v44  ;;  %3249 = vperm.xlu1 %7659, %v9248_v52  }
 0x55e   :  { %v3300_v37 = vmul.f32 %v3286_v33, %v2375_v54  ;;  %v3358_v53 = vpop.permute.xlu0 %3357 }
 0x55f   :  { %v3118_v58 = vpop.permute.xlu1 %3117 }
 0x560   :  { %v3132_v55 = vmul.f32 %v3118_v58, %v2021_v56  ;;  %v11697_v56 = vld [vmem:[#allocation64_spill] sm:$0xff] }
 0x561   :  { %7661 = vset.pattern.permute.xlu1 %v11641_v6  ;;  %v2377_v42 = vadd.f32 %v11697_v56, %v11696_v48  ;;  %v11710_v48 = vld [vmem:[#allocation17_spill] sm:$0xff] }
 0x562   :  { %v3136_v4 = vadd.f32 %v3132_v55, %v3112_v8  ;;  %3297 = vperm.xlu1 %7661, %v9248_v52   ;;  %v11695_v8 = vld [vmem:[#allocation131_spill] sm:$0xff]  ;;  %v11698_v55 = vmov 3   ;;  %v2698_v15 = vpop.permute.xlu0 %2697 }
 0x563   :  { %v2703_v54 = vmul.f32 %v2698_v15, %v11708_v57  ;;  %v11721_v57 = vld [vmem:[#allocation39_spill] sm:$0xff] }
 0x564   :  { %v3166_v2 = vpop.permute.xlu1 %3165  ;;  %v3160_v30 = vadd.f32 %v3156_v41, %v3136_v4  ;;  %v11699_v41 = vld [vmem:[#allocation125_spill] sm:$0xff] }
 0x565   :  { %v3180_v11 = vmul.f32 %v3166_v2, %v2110_v22  ;;  %v2464_v4 = vadd.f32 %v11700_v38, %v11699_v41  ;;  %v11701_v2 = vld [vmem:[#allocation126_spill] sm:$0xff]  ;;  %v11713_v41 = vld [vmem:[#allocation25_spill] sm:$0xff] }
 0x566   :  { %7662 = vset.pattern.permute.xlu1 %v11634_v7 }
 0x567   :  { %v3184_v26 = vadd.f32 %v3180_v11, %v3160_v30  ;;  %3321 = vperm.xlu1 %7662, %v9248_v52   ;;  %v11702_v30 = vld [vmem:[#allocation122_spill] sm:$0xff] }
 0x568   :  { %v2466_v11 = vadd.f32 %v11702_v30, %v11701_v2  ;;  %v11714_v2 = vld [vmem:[#allocation27_spill] sm:$0xff] }
 0x569   :  { %v3190_v47 = vpop.permute.xlu1 %3189 }
 0x56a   :  { %v3204_v18 = vmul.f32 %v3190_v47, %v2197_v45  ;;  %v3372_v45 = vmul.f32 %v3358_v53, %v2466_v11  ;;  %v11704_v47 = vld [vmem:[#allocation77_spill] sm:$0xff]  ;;  %v11715_v11 = vmov 13  }
 0x56b   :  { %7664 = vset.pattern.permute.xlu1 %v11645_v34  ;;  %v2553_v46 = vadd.f32 %v11705_v31, %v11704_v47  ;;  %v11716_v47 = vld [vmem:[#allocation33_spill] sm:$0xff] }
 0x56c   :  { %v3208_v35 = vadd.f32 %v3204_v18, %v3184_v26  ;;  %3369 = vperm.xlu1 %7664, %v9248_v52  }
 0x56e   :  { %v3238_v43 = vpop.permute.xlu1 %3237  ;;  %v3232_v39 = vadd.f32 %v3228_v5, %v3208_v35 }
 0x56f   :  { %v3252_v23 = vmul.f32 %v3238_v43, %v2286_v62  ;;  %v11706_v62 = vld [vmem:[#allocation74_spill] sm:$0xff] }
 0x570   :  { %7665 = vset.pattern.permute.xlu1 %v11644_v13  ;;  %v2555_v43 = vadd.f32 %v11706_v62, %v11663_v32  ;;  %v11718_v62 = vld [vmem:[#allocation87_spill] sm:$0xff] }
 0x571   :  { %v3256_v21 = vadd.f32 %v3252_v23, %v3232_v39  ;;  %3393 = vperm.xlu1 %7665, %v9248_v52  }
 0x573   :  { %v3262_v59 = vpop.permute.xlu1 %3261 }
 0x574   :  { %v3276_v44 = vmul.f32 %v3262_v59, %v2288_v17 }
 0x575   :  { %7667 = vset.pattern.permute.xlu1 %v11653_v9 }
 0x576   :  { %v3280_v50 = vadd.f32 %v3276_v44, %v3256_v21  ;;  %2693 = vperm.xlu1 %7667, %v11695_v8   ;;  %v11707_v21 = vmov 7   ;;  %v11709_v44 = vld [vmem:[#allocation11_spill] sm:$0xff] }
 0x578   :  { %v3310_v58 = vpop.permute.xlu1 %3309  ;;  %v3304_v19 = vadd.f32 %v3300_v37, %v3280_v50 }
 0x579   :  { %v3324_v10 = vmul.f32 %v3310_v58, %v2377_v42  ;;  %v11711_v42 = vmov 10  }
 0x57a   :  { %7669 = vset.pattern.permute.xlu1 %v11698_v55 }
 0x57b   :  { %v3328_v51 = vadd.f32 %v3324_v10, %v3304_v19  ;;  %2741 = vperm.xlu1 %7669, %v11695_v8   ;;  %v11712_v10 = vld [vmem:[#allocation19_spill] sm:$0xff] }
 0x57d   :  { %v3334_v22 = vpop.permute.xlu1 %3333 }
 0x57e   :  { %v3348_v26 = vmul.f32 %v3334_v22, %v2464_v4 }
 0x57f   :  { %7670 = vset.pattern.permute.xlu1 %v11703_v40 }
 0x580   :  { %v3352_v16 = vadd.f32 %v3348_v26, %v3328_v51  ;;  %2765 = vperm.xlu1 %7670, %v11695_v8  }
 0x582   :  { %v3382_v18 = vpop.permute.xlu1 %3381  ;;  %v3376_v5 = vadd.f32 %v3372_v45, %v3352_v16 }
 0x583   :  { %v3396_v35 = vmul.f32 %v3382_v18, %v2553_v46  ;;  %v11717_v46 = vld [vmem:[#allocation34_spill] sm:$0xff] }
 0x584   :  { %7672 = vset.pattern.permute.xlu1 %v11668_v1 }
 0x585   :  { %v3400_v25 = vadd.f32 %v3396_v35, %v3376_v5  ;;  %2813 = vperm.xlu1 %7672, %v11695_v8  }
 0x587   :  { %v3406_v39 = vpop.permute.xlu1 %3405 }
 0x588   :  { %v3420_v23 = vmul.f32 %v3406_v39, %v2555_v43  ;;  %v11719_v39 = vmov 16  }
 0x589   :  { %7673 = vset.pattern.permute.xlu1 %v11707_v21 }
 0x58a   :  { %v3424_v17 = vadd.f32 %v3420_v23, %v3400_v25  ;;  %2837 = vperm.xlu1 %7673, %v11695_v8  }
 0x58c   :  { %v2678_v33 = vpop.permute.xlu1 %2677  ;;  %v7339_v59 = vpack.c.bf16 %v9515_v14, %v3424_v17  ;;  %v2770_v14 = vpop.permute.xlu0 %2769 }
 0x58d   :  { %v2683_v37 = vmul.f32 %v2678_v33, %v11709_v44  ;;  %v2775_v38 = vmul.f32 %v2770_v14, %v11713_v41  ;;  %v11720_v33 = vld [vmem:[#allocation88_spill] sm:$0xff]  ;;  %v11725_v41 = vld [vmem:[#allocation94_spill] sm:$0xff] }
 0x58e   :  { %7675 = vset.pattern.permute.xlu1 %v11671_v12  ;;  %7340 = vmatprep.subr.bf16.mxu1 %v7339_v59 }
 0x58f   :  { %v2707_v50 = vadd.f32 %v2703_v54, %v2683_v37  ;;  %2885 = vperm.xlu1 %7675, %v11695_v8   ;;  %7342 = vmatpush3.bf16.msra.mxu1 %v7339_v59 }
 0x590   :  { %v2842_v45 = vpop.permute.xlu0 %2841 }
 0x591   :  { %v2722_v32 = vpop.permute.xlu1 %2721  ;;  %v2847_v18 = vmul.f32 %v2842_v45, %v11717_v46 }
 0x592   :  { %v2727_v56 = vmul.f32 %v2722_v32, %v11710_v48  ;;  %v11722_v32 = vld [vmem:[#allocation40_spill] sm:$0xff] }
 0x593   :  { %7676 = vset.pattern.permute.xlu1 %v11711_v42 }
 0x594   :  { %v2731_v58 = vadd.f32 %v2727_v56, %v2707_v50  ;;  %2909 = vperm.xlu1 %7676, %v11695_v8   ;;  %v2914_v15 = vpop.permute.xlu0 %2913  ;;  %v11723_v56 = vmov 19  }
 0x595   :  { %v2919_v54 = vmul.f32 %v2914_v15, %v11721_v57  ;;  %v11731_v15 = vmov 25  }
 0x596   :  { %v2746_v19 = vpop.permute.xlu1 %2745 }
 0x597   :  { %v2751_v51 = vmul.f32 %v2746_v19, %v11712_v10  ;;  %v11724_v10 = vld [vmem:[#allocation93_spill] sm:$0xff] }
 0x598   :  { %7678 = vset.pattern.permute.xlu1 %v11625_v27  ;;  %v2986_v14 = vpop.permute.xlu0 %2985 }
 0x599   :  { %v2755_v4 = vadd.f32 %v2751_v51, %v2731_v58  ;;  %2957 = vperm.xlu1 %7678, %v11695_v8  }
 0x59b   :  { %v2794_v53 = vpop.permute.xlu1 %2793  ;;  %v2779_v22 = vadd.f32 %v2775_v38, %v2755_v4  ;;  %v2991_v38 = vmul.f32 %v2986_v14, %v11725_v41 }
 0x59c   :  { %v2799_v30 = vmul.f32 %v2794_v53, %v11714_v2  ;;  %v11726_v2 = vld [vmem:[#allocation45_spill] sm:$0xff] }
 0x59d   :  { %7679 = vset.pattern.permute.xlu1 %v11715_v11 }
 0x59e   :  { %v2803_v26 = vadd.f32 %v2799_v30, %v2779_v22  ;;  %2981 = vperm.xlu1 %7679, %v11695_v8  }
 0x5a0   :  { %v2818_v16 = vpop.permute.xlu1 %2817 }
 0x5a1   :  { %v2823_v31 = vmul.f32 %v2818_v16, %v11716_v47  ;;  %v3058_v16 = vpop.permute.xlu0 %3057 }
 0x5a2   :  { %7681 = vset.pattern.permute.xlu1 %v11628_v28 }
 0x5a3   :  { %v2827_v5 = vadd.f32 %v2823_v31, %v2803_v26  ;;  %3029 = vperm.xlu1 %7681, %v11695_v8   ;;  %v11727_v26 = vmov 22   ;;  %v11728_v31 = vld [vmem:[#allocation46_spill] sm:$0xff] }
 0x5a5   :  { %v2866_v35 = vpop.permute.xlu1 %2865  ;;  %v2851_v25 = vadd.f32 %v2847_v18, %v2827_v5  ;;  %v11729_v18 = vld [vmem:[#allocation99_spill] sm:$0xff] }
 0x5a6   :  { %v2871_v43 = vmul.f32 %v2866_v35, %v11718_v62  ;;  %v3063_v5 = vmul.f32 %v3058_v16, %v11729_v18 }
 0x5a7   :  { %7682 = vset.pattern.permute.xlu1 %v11719_v39 }
 0x5a8   :  { %v2875_v23 = vadd.f32 %v2871_v43, %v2851_v25  ;;  %3053 = vperm.xlu1 %7682, %v11695_v8   ;;  %v11730_v43 = vld [vmem:[#allocation100_spill] sm:$0xff] }
 0x5aa   :  { %v2890_v17 = vpop.permute.xlu1 %2889 }
 0x5ab   :  { %v2895_v59 = vmul.f32 %v2890_v17, %v11720_v33  ;;  %v3706_v33 = vld [vmem:[%s11265_s18 + $0x8] sm:$0xff] }
 0x5ac   :  { %7684 = vset.pattern.permute.xlu1 %v11629_v3 }
 0x5ad   :  { %v2899_v44 = vadd.f32 %v2895_v59, %v2875_v23  ;;  %3101 = vperm.xlu1 %7684, %v11695_v8   ;;  %v3738_v59 = vld [vmem:[%s11265_s18 + $0x108] sm:$0xff] }
 0x5ae   :  { %v7347_v57 = vpack.c.bf16 %v3738_v59, %v3706_v33  ;;  %v11738_v59 = vld [vmem:[#allocation61_spill] sm:$0xff] }
 0x5af   :  { %v2938_v37 = vpop.permute.xlu1 %2937  ;;  %v2923_v50 = vadd.f32 %v2919_v54, %v2899_v44  ;;  %v3705_v54 = vld [vmem:[%s11265_s18] sm:$0xff] }
 0x5b0   :  { %v2943_v48 = vmul.f32 %v2938_v37, %v11722_v32  ;;  %v3737_v44 = vld [vmem:[%s11265_s18 + $0x100] sm:$0xff]  ;;  %v3130_v37 = vpop.permute.xlu0 %3129  ;;  %7348 = vmatprep.subr.bf16.mxu0 %v7347_v57 }
 0x5b1   :  { %7685 = vset.pattern.permute.xlu1 %v11723_v56  ;;  %v6705_v32 = vld [vmem:[%s11266_s17] ss:$0 sm:$0xff] }
 0x5b2   :  { %v2947_v58 = vadd.f32 %v2943_v48, %v2923_v50  ;;  %3125 = vperm.xlu1 %7685, %v11695_v8   ;;  %v7349_v48 = vpack.c.bf16 %v3737_v44, %v3705_v54 }
 0x5b4   :  { %v2962_v19 = vpop.permute.xlu1 %2961  ;;  %7350 = vmatpush1.bf16.msra.mxu0 %v7349_v48 }
 0x5b5   :  { %v2967_v51 = vmul.f32 %v2962_v19, %v11724_v10  ;;  %v7057_v19 = vpop.f32.mrb[66].mxu0 }
 0x5b6   :  { %7687 = vset.pattern.permute.xlu1 %v11630_v60  ;;  %v3682_v10 = vpop.f32.mrb[67].mxu0 }
 0x5b7   :  { %v2971_v4 = vadd.f32 %v2967_v51, %v2947_v58  ;;  %3173 = vperm.xlu1 %7687, %v11695_v8   ;;  %v11732_v58 = vld [vmem:[#allocation51_spill] sm:$0xff]  ;;  %v11733_v51 = vld [vmem:[#allocation52_spill] sm:$0xff] }
 0x5b8   :  { %v3135_v41 = vmul.f32 %v3130_v37, %v11733_v51  ;;  %v3708_v37 = vld [vmem:[%s11265_s18 + $0x18] sm:$0xff] }
 0x5b9   :  { %v3010_v53 = vpop.permute.xlu1 %3009  ;;  %v2995_v22 = vadd.f32 %v2991_v38, %v2971_v4  ;;  %v3683_v4 = vadd.f32 %v6705_v32, %v3682_v10  ;;  %v11739_v10 = vld [vmem:[#allocation62_spill] sm:$0xff] }
 0x5ba   :  { %v3015_v30 = vmul.f32 %v3010_v53, %v11726_v2  ;;  %v3688_v2 = vadd.f32 %v7057_v19, %v6705_v32 }
 0x5bb   :  { %7688 = vset.pattern.permute.xlu1 %v11727_v26 }
 0x5bc   :  { %v3019_v45 = vadd.f32 %v3015_v30, %v2995_v22  ;;  %3197 = vperm.xlu1 %7688, %v11695_v8   ;;  %v9683_v30 = vmax.f32 %v3683_v4, 0.0 }
 0x5be   :  { %v3034_v47 = vpop.permute.xlu1 %3033  ;;  %6711 = vmatmul.mubr.msk.f32.vlgmr.msra.gmra.mrb[70].mxu0 %vm239_vm2, %v9683_v30 }
 0x5bf   :  { %v3039_v46 = vmul.f32 %v3034_v47, %v11728_v31  ;;  %v11735_v47 = vmov 28   ;;  %v9687_v31 = vmax.f32 %v3688_v2, 0.0  ;;  %v11741_v2 = vld [vmem:[#allocation119_spill] sm:$0xff] }
 0x5c0   :  { %7690 = vset.pattern.permute.xlu1 %v11631_v29 }
 0x5c1   :  { %v3043_v35 = vadd.f32 %v3039_v46, %v3019_v45  ;;  %3245 = vperm.xlu1 %7690, %v11695_v8   ;;  %v11734_v45 = vld [vmem:[#allocation109_spill] sm:$0xff] }
 0x5c3   :  { %v3082_v25 = vpop.permute.xlu1 %3081  ;;  %v3067_v62 = vadd.f32 %v3063_v5, %v3043_v35  ;;  %v11736_v35 = vmov 0.0  }
 0x5c4   :  { %v3087_v23 = vmul.f32 %v3082_v25, %v11730_v43  ;;  %4019 = vmatprep.mubr.f32.mxu0 %v11736_v35 }
 0x5c5   :  { %7691 = vset.pattern.permute.xlu1 %v11731_v15  ;;  %6712 = vmatmul.mubr.msk.f32.gmra.mrb[72].mxu0 %vm239_vm2, %v9687_v31 }
 0x5c6   :  { %v3091_v17 = vadd.f32 %v3087_v23, %v3067_v62  ;;  %3269 = vperm.xlu1 %7691, %v11695_v8   ;;  %v3202_v62 = vpop.permute.xlu0 %3201  ;;  %v11737_v23 = vld [vmem:[#allocation110_spill] sm:$0xff]  ;;  %4025 = vmatprep.mubr.f32.mxu0 %v11736_v35 }
 0x5c7   :  { %v3207_v57 = vmul.f32 %v3202_v62, %v11738_v59  ;;  %v11744_v62 = vld [vmem:[#allocation71_spill] sm:$0xff]  ;;  %v3744_v59 = vld [vmem:[%s11265_s18 + $0x138] sm:$0xff] }
 0x5c8   :  { %v3106_v50 = vpop.permute.xlu1 %3105  ;;  %v7060_v46 = vpop.f32.mrb[68].mxu0 }
 0x5c9   :  { %v3111_v14 = vmul.f32 %v3106_v50, %v11732_v58  ;;  %v3692_v5 = vpop.f32.mrb[69].mxu0  ;;  %v3698_v44 = vadd.f32 %v7060_v46, %v6705_v32  ;;  %v3740_v50 = vld [vmem:[%s11265_s18 + $0x118] sm:$0xff]  ;;  %v11743_v46 = vld [vmem:[#allocation120_spill] sm:$0xff] }
 0x5ca   :  { %7693 = vset.pattern.permute.xlu1 %v11634_v7  ;;  %v3693_v25 = vadd.f32 %v6705_v32, %v3692_v5  ;;  %v7351_v19 = vpack.c.bf16 %v3740_v50, %v3708_v37  ;;  %v3739_v32 = vld [vmem:[%s11265_s18 + $0x110] sm:$0xff] }
 0x5cb   :  { %v3115_v38 = vadd.f32 %v3111_v14, %v3091_v17  ;;  %3317 = vperm.xlu1 %7693, %v11695_v8   ;;  %v9708_v14 = vmax.f32 %v3698_v44, 0.0  ;;  %v3711_v37 = vld [vmem:[%s11265_s18 + $0x30] sm:$0xff] }
 0x5cc   :  { %v9694_v33 = vmax.f32 %v3693_v25, 0.0  ;;  %7352 = vmatprep.subr.bf16.mxu0 %v7351_v19  ;;  %v3743_v50 = vld [vmem:[%s11265_s18 + $0x130] sm:$0xff] }
 0x5cd   :  { %v3154_v53 = vpop.permute.xlu1 %3153  ;;  %v3139_v22 = vadd.f32 %v3135_v41, %v3115_v38  ;;  %v11740_v38 = vmov 31   ;;  %v7361_v19 = vpack.c.bf16 %v3743_v50, %v3711_v37  ;;  %v3747_v37 = vld [vmem:[%s11265_s18 + $0x150] sm:$0xff] }
 0x5ce   :  { %v3159_v16 = vmul.f32 %v3154_v53, %v11734_v45  ;;  %6713 = vmatmul.mubr.msk.f32.gmra.mrb[74].mxu0 %vm239_vm2, %v9694_v33  ;;  %v3274_v53 = vpop.permute.xlu0 %3273 }
 0x5cf   :  { %7694 = vset.pattern.permute.xlu1 %v11735_v47  ;;  %4031 = vmatprep.mubr.f32.mxu0 %v11736_v35 }
 0x5d0   :  { %v3163_v18 = vadd.f32 %v3159_v16, %v3139_v22  ;;  %3341 = vperm.xlu1 %7694, %v11695_v8   ;;  %v11742_v16 = vmov 0  }
 0x5d2   :  { %v3178_v43 = vpop.permute.xlu1 %3177  ;;  %6714 = vmatmul.mubr.msk.f32.gmra.mrb[76].mxu0 %vm239_vm2, %v9708_v14 }
 0x5d3   :  { %v3183_v17 = vmul.f32 %v3178_v43, %v11737_v23  ;;  %4102 = vmatprep.mubr.f32.mxu0 %v11736_v35 }
 0x5d4   :  { %7696 = vset.pattern.permute.xlu1 %v11644_v13 }
 0x5d5   :  { %v3187_v54 = vadd.f32 %v3183_v17, %v3163_v18  ;;  %3389 = vperm.xlu1 %7696, %v11695_v8   ;;  %v3707_v8 = vld [vmem:[%s11265_s18 + $0x10] sm:$0xff]  ;;  %v3279_v18 = vmul.f32 %v3274_v53, %v11743_v46  ;;  %v3712_v17 = vld [vmem:[%s11265_s18 + $0x38] sm:$0xff]  ;;  %v11748_v46 = vld [vmem:[#allocation83_spill] sm:$0xff] }
 0x5d6   :  { %v7353_v41 = vpack.c.bf16 %v3739_v32, %v3707_v8  ;;  %v7359_v44 = vpack.c.bf16 %v3744_v59, %v3712_v17  ;;  %v11746_v8 = vld [vmem:[#allocation129_spill] sm:$0xff]  ;;  %v11750_v59 = vld [vmem:[#allocation10_spill] sm:$0xff] }
 0x5d7   :  { %v3226_v48 = vpop.permute.xlu1 %3225  ;;  %v3211_v58 = vadd.f32 %v3207_v57, %v3187_v54  ;;  %v3346_v57 = vpop.permute.xlu0 %3345 }
 0x5d8   :  { %v3231_v51 = vmul.f32 %v3226_v48, %v11739_v10  ;;  %7354 = vmatpush1.bf16.msra.mxu0 %v7353_v41  ;;  %v11745_v48 = vld [vmem:[#allocation72_spill] sm:$0xff]  ;;  %v3351_v32 = vmul.f32 %v3346_v57, %v11746_v8 }
 0x5d9   :  { %7698 = vset.pattern.permute.xlu1 %v11740_v38  ;;  %7360 = vmatprep.subr.bf16.mxu0 %v7359_v44  ;;  %v3715_v44 = vld [vmem:[%s11265_s18 + $0x50] sm:$0xff] }
 0x5da   :  { %v3235_v4 = vadd.f32 %v3231_v51, %v3211_v58  ;;  %3417 = vperm.xlu1 %7698, %v9248_v52   ;;  %v7369_v50 = vpack.c.bf16 %v3747_v37, %v3715_v44 }
 0x5db   :  { %6715 = vmatmul.mubr.msk.f32.vlgmr.msra.gmra.mrb[78].mxu0 %vm239_vm2, %v9683_v30 }
 0x5dc   :  { %v3250_v22 = vpop.permute.xlu1 %3249  ;;  %4108 = vmatprep.mubr.f32.mxu0 %v11736_v35  ;;  %7362 = vmatpush1.bf16.msra.mxu0 %v7361_v19 }
 0x5dd   :  { %v3255_v45 = vmul.f32 %v3250_v22, %v11741_v2  ;;  %v2673_v2 = vpop.permute.xlu0 %2672 }
 0x5de   :  { %7699 = vset.pattern.permute.xlu1 %v11742_v16 }
 0x5df   :  { %v3259_v5 = vadd.f32 %v3255_v45, %v3235_v4  ;;  %6716 = vmatmul.mubr.msk.f32.gmra.mrb[80].mxu0 %vm239_vm2, %v9687_v31  ;;  %v11747_v4 = vld [vmem:[#allocation130_spill] sm:$0xff] }
 0x5e0   :  { %4114 = vmatprep.mubr.f32.mxu0 %v11736_v35 }
 0x5e1   :  { %v3298_v52 = vpop.permute.xlu1 %3297  ;;  %v3283_v25 = vadd.f32 %v3279_v18, %v3259_v5 }
 0x5e2   :  { %v3303_v43 = vmul.f32 %v3298_v52, %v11744_v62  ;;  %v3716_v52 = vld [vmem:[%s11265_s18 + $0x58] sm:$0xff] }
 0x5e3   :  { %6717 = vmatmul.mubr.msk.f32.gmra.mrb[82].mxu0 %vm239_vm2, %v9694_v33 }
 0x5e4   :  { %v3307_v23 = vadd.f32 %v3303_v43, %v3283_v25  ;;  %4120 = vmatprep.mubr.f32.mxu0 %v11736_v35  ;;  %v2718_v25 = vpop.permute.xlu0 %2717  ;;  %v3748_v43 = vld [vmem:[%s11265_s18 + $0x158] sm:$0xff] }
 0x5e6   :  { %v3322_v54 = vpop.permute.xlu1 %3321 }
 0x5e7   :  { %v3327_v58 = vmul.f32 %v3322_v54, %v11745_v48  ;;  %6718 = vmatmul.mubr.msk.f32.gmra.mrb[84].mxu0 %vm239_vm2, %v9708_v14  ;;  %v7367_v54 = vpack.c.bf16 %v3748_v43, %v3716_v52  ;;  %v11751_v48 = vld [vmem:[#allocation15_spill] sm:$0xff] }
 0x5e8   :  { %4280 = vmatprep.mubr.f32.mxu0 %v11736_v35  ;;  %v11755_v43 = vld [vmem:[#allocation31_spill] sm:$0xff] }
 0x5e9   :  { %v3331_v10 = vadd.f32 %v3327_v58, %v3307_v23  ;;  %v11749_v23 = vld [vmem:[#allocation9_spill] sm:$0xff]  ;;  %v2726_v58 = vmul.f32 %v2718_v25, %v11751_v48  ;;  %7368 = vmatprep.subr.bf16.mxu0 %v7367_v54  ;;  %v3751_v54 = vld [vmem:[%s11265_s18 + $0x170] sm:$0xff] }
 0x5ea   :  { %v2682_v17 = vmul.f32 %v2673_v2, %v11749_v23 }
 0x5eb   :  { %v3370_v51 = vpop.permute.xlu1 %3369  ;;  %v3355_v41 = vadd.f32 %v3351_v32, %v3331_v10  ;;  %6723 = vmatmul.mubr.msk.f32.vlgmr.msra.gmra.mrb[86].mxu0 %vm239_vm2, %v9683_v30  ;;  %v11752_v10 = vld [vmem:[#allocation16_spill] sm:$0xff] }
 0x5ec   :  { %v3375_v53 = vmul.f32 %v3370_v51, %v11747_v4  ;;  %4286 = vmatprep.mubr.f32.mxu0 %v11736_v35  ;;  %7370 = vmatpush1.bf16.msra.mxu0 %v7369_v50  ;;  %v2790_v4 = vpop.permute.xlu0 %2789 }
 0x5ee   :  { %v3379_v22 = vadd.f32 %v3375_v53, %v3355_v41 }
 0x5ef   :  { %6724 = vmatmul.mubr.msk.f32.gmra.mrb[88].mxu0 %vm239_vm2, %v9687_v31 }
 0x5f0   :  { %v3394_v45 = vpop.permute.xlu1 %3393  ;;  %4292 = vmatprep.mubr.f32.mxu0 %v11736_v35  ;;  %v2862_v50 = vpop.permute.xlu0 %2861 }
 0x5f1   :  { %v3399_v18 = vmul.f32 %v3394_v45, %v11748_v46  ;;  %v11754_v45 = vld [vmem:[#allocation24_spill] sm:$0xff] }
 0x5f2   :  { %v2798_v46 = vmul.f32 %v2790_v4, %v11754_v45  ;;  %v11758_v4 = vld [vmem:[#allocation86_spill] sm:$0xff] }
 0x5f3   :  { %v9760_v5 = vadd.f32 %v3399_v18, %v3379_v22  ;;  %6725 = vmatmul.mubr.msk.f32.gmra.mrb[90].mxu0 %vm239_vm2, %v9694_v33  ;;  %v11753_v22 = vld [vmem:[#allocation23_spill] sm:$0xff] }
 0x5f4   :  { %4298 = vmatprep.mubr.f32.mxu0 %v11736_v35 }
 0x5f5   :  { %v2694_v62 = vpop.permute.xlu1 %2693 }
 0x5f6   :  { %v2702_v57 = vmul.f32 %v2694_v62, %v11750_v59  ;;  %v3720_v62 = vld [vmem:[%s11265_s18 + $0x78] sm:$0xff] }
 0x5f7   :  { %6726 = vmatmul.mubr.msk.f32.gmra.mrb[92].mxu0 %vm239_vm2, %v9708_v14 }
 0x5f8   :  { %v2706_v19 = vadd.f32 %v2702_v57, %v2682_v17  ;;  %4458 = vmatprep.mubr.f32.mxu0 %v11736_v35  ;;  %v3752_v17 = vld [vmem:[%s11265_s18 + $0x178] sm:$0xff]  ;;  %v3719_v57 = vld [vmem:[%s11265_s18 + $0x70] sm:$0xff] }
 0x5f9   :  { %v7375_v59 = vpack.c.bf16 %v3752_v17, %v3720_v62  ;;  %v7377_v37 = vpack.c.bf16 %v3751_v54, %v3719_v57  ;;  %v11760_v62 = vld [vmem:[#allocation38_spill] sm:$0xff]  ;;  %v3755_v57 = vld [vmem:[%s11265_s18 + $0x190] sm:$0xff] }
 0x5fa   :  { %v2742_v8 = vpop.permute.xlu1 %2741  ;;  %v2730_v32 = vadd.f32 %v2726_v58, %v2706_v19  ;;  %v11756_v58 = vld [vmem:[#allocation32_spill] sm:$0xff] }
 0x5fb   :  { %v2750_v51 = vmul.f32 %v2742_v8, %v11752_v10  ;;  %6731 = vmatmul.mubr.msk.f32.vlgmr.msra.gmra.mrb[94].mxu0 %vm239_vm2, %v9683_v30  ;;  %7376 = vmatprep.subr.bf16.mxu0 %v7375_v59  ;;  %v11757_v8 = vld [vmem:[#allocation85_spill] sm:$0xff]  ;;  %v3723_v59 = vld [vmem:[%s11265_s18 + $0x90] sm:$0xff] }
 0x5fc   :  { %4464 = vmatprep.mubr.f32.mxu0 %v11736_v35  ;;  %7378 = vmatpush1.bf16.msra.mxu0 %v7377_v37  ;;  %v7385_v54 = vpack.c.bf16 %v3755_v57, %v3723_v59  ;;  %v11765_v57 = vld [vmem:[#allocation97_spill] sm:$0xff] }
 0x5fd   :  { %v2754_v41 = vadd.f32 %v2750_v51, %v2730_v32  ;;  %v2870_v32 = vmul.f32 %v2862_v50, %v11757_v8  ;;  %v11761_v50 = vld [vmem:[#allocation91_spill] sm:$0xff] }
 0x5ff   :  { %v2766_v53 = vpop.permute.xlu1 %2765  ;;  %6732 = vmatmul.mubr.msk.f32.gmra.mrb[96].mxu0 %vm239_vm2, %v9687_v31 }
 0x600   :  { %v2774_v2 = vmul.f32 %v2766_v53, %v11753_v22  ;;  %4470 = vmatprep.mubr.f32.mxu0 %v11736_v35 }
 0x602   :  { %v2778_v18 = vadd.f32 %v2774_v2, %v2754_v41  ;;  %v2934_v2 = vpop.permute.xlu0 %2933 }
 0x603   :  { %6733 = vmatmul.mubr.msk.f32.gmra.mrb[98].mxu0 %vm239_vm2, %v9694_v33 }
 0x604   :  { %v2814_v52 = vpop.permute.xlu1 %2813  ;;  %v2802_v25 = vadd.f32 %v2798_v46, %v2778_v18  ;;  %4476 = vmatprep.mubr.f32.mxu0 %v11736_v35  ;;  %v11759_v46 = vld [vmem:[#allocation37_spill] sm:$0xff] }
 0x605   :  { %v2822_v23 = vmul.f32 %v2814_v52, %v11755_v43  ;;  %v3724_v52 = vld [vmem:[%s11265_s18 + $0x98] sm:$0xff]  ;;  %v2942_v43 = vmul.f32 %v2934_v2, %v11760_v62  ;;  %v11764_v2 = vld [vmem:[#allocation44_spill] sm:$0xff] }
 0x606   :  { %v3727_v62 = vld [vmem:[%s11265_s18 + $0xb0] sm:$0xff] }
 0x607   :  { %v2826_v44 = vadd.f32 %v2822_v23, %v2802_v25  ;;  %6734 = vmatmul.mubr.msk.f32.gmra.mrb[100].mxu0 %vm239_vm2, %v9708_v14  ;;  %v3756_v25 = vld [vmem:[%s11265_s18 + $0x198] sm:$0xff] }
 0x608   :  { %4636 = vmatprep.mubr.f32.mxu0 %v11736_v35  ;;  %v7383_v17 = vpack.c.bf16 %v3756_v25, %v3724_v52  ;;  %v3760_v52 = vld [vmem:[%s11265_s18 + $0x1b8] sm:$0xff] }
 0x609   :  { %v2838_v48 = vpop.permute.xlu1 %2837 }
 0x60a   :  { %v2846_v19 = vmul.f32 %v2838_v48, %v11756_v58  ;;  %7384 = vmatprep.subr.bf16.mxu0 %v7383_v17 }
 0x60b   :  { %6739 = vmatmul.mubr.msk.f32.vlgmr.msra.gmra.mrb[102].mxu0 %vm239_vm2, %v9683_v30 }
 0x60c   :  { %v2850_v10 = vadd.f32 %v2846_v19, %v2826_v44  ;;  %4642 = vmatprep.mubr.f32.mxu0 %v11736_v35  ;;  %7386 = vmatpush1.bf16.msra.mxu0 %v7385_v54  ;;  %v3006_v19 = vpop.permute.xlu0 %3005 }
 0x60e   :  { %v2886_v51 = vpop.permute.xlu1 %2885  ;;  %v2874_v41 = vadd.f32 %v2870_v32, %v2850_v10  ;;  %v11762_v32 = vld [vmem:[#allocation92_spill] sm:$0xff] }
 0x60f   :  { %v2894_v53 = vmul.f32 %v2886_v51, %v11758_v4  ;;  %6740 = vmatmul.mubr.msk.f32.gmra.mrb[104].mxu0 %vm239_vm2, %v9687_v31  ;;  %v11763_v51 = vld [vmem:[#allocation43_spill] sm:$0xff] }
 0x610   :  { %4648 = vmatprep.mubr.f32.mxu0 %v11736_v35 }
 0x611   :  { %v2898_v22 = vadd.f32 %v2894_v53, %v2874_v41  ;;  %v3014_v41 = vmul.f32 %v3006_v19, %v11763_v51  ;;  %v11767_v19 = vld [vmem:[#allocation49_spill] sm:$0xff] }
 0x613   :  { %v2910_v45 = vpop.permute.xlu1 %2909  ;;  %6741 = vmatmul.mubr.msk.f32.gmra.mrb[106].mxu0 %vm239_vm2, %v9694_v33 }
 0x614   :  { %v2918_v18 = vmul.f32 %v2910_v45, %v11759_v46  ;;  %4654 = vmatprep.mubr.f32.mxu0 %v11736_v35  ;;  %v3728_v46 = vld [vmem:[%s11265_s18 + $0xb8] sm:$0xff] }
 0x615   :  { %v7391_v25 = vpack.c.bf16 %v3760_v52, %v3728_v46  ;;  %v3764_v46 = vld [vmem:[%s11265_s18 + $0x1d8] sm:$0xff] }
 0x616   :  { %v2922_v23 = vadd.f32 %v2918_v18, %v2898_v22 }
 0x617   :  { %6742 = vmatmul.mubr.msk.f32.gmra.mrb[108].mxu0 %vm239_vm2, %v9708_v14  ;;  %7392 = vmatprep.subr.bf16.mxu0 %v7391_v25 }
 0x618   :  { %v2958_v44 = vpop.permute.xlu1 %2957  ;;  %v2946_v37 = vadd.f32 %v2942_v43, %v2922_v23  ;;  %4814 = vmatprep.mubr.f32.mxu0 %v11736_v35  ;;  %v3759_v43 = vld [vmem:[%s11265_s18 + $0x1b0] sm:$0xff]  ;;  %v3078_v23 = vpop.permute.xlu0 %3077 }
 0x619   :  { %v2966_v48 = vmul.f32 %v2958_v44, %v11761_v50  ;;  %v7393_v59 = vpack.c.bf16 %v3759_v43, %v3727_v62  ;;  %v11766_v44 = vld [vmem:[#allocation98_spill] sm:$0xff]  ;;  %v3731_v62 = vld [vmem:[%s11265_s18 + $0xd0] sm:$0xff] }
 0x61a   :  { %v3763_v43 = vld [vmem:[%s11265_s18 + $0x1d0] sm:$0xff] }
 0x61b   :  { %v2970_v58 = vadd.f32 %v2966_v48, %v2946_v37  ;;  %6747 = vmatmul.mubr.msk.f32.vlgmr.msra.gmra.mrb[110].mxu0 %vm239_vm2, %v9683_v30  ;;  %v3086_v37 = vmul.f32 %v3078_v23, %v11766_v44  ;;  %v11770_v23 = vld [vmem:[#allocation108_spill] sm:$0xff] }
 0x61c   :  { %4820 = vmatprep.mubr.f32.mxu0 %v11736_v35  ;;  %7394 = vmatpush1.bf16.msra.mxu0 %v7393_v59  ;;  %v7401_v59 = vpack.c.bf16 %v3763_v43, %v3731_v62  ;;  %v11775_v43 = vld [vmem:[#allocation69_spill] sm:$0xff] }
 0x61d   :  { %v2982_v8 = vpop.permute.xlu1 %2981 }
 0x61e   :  { %v2990_v10 = vmul.f32 %v2982_v8, %v11762_v32 }
 0x61f   :  { %6748 = vmatmul.mubr.msk.f32.gmra.mrb[112].mxu0 %vm239_vm2, %v9687_v31 }
 0x620   :  { %v2994_v4 = vadd.f32 %v2990_v10, %v2970_v58  ;;  %4826 = vmatprep.mubr.f32.mxu0 %v11736_v35  ;;  %v3150_v10 = vpop.permute.xlu0 %3149 }
 0x622   :  { %v3030_v53 = vpop.permute.xlu1 %3029  ;;  %v3018_v22 = vadd.f32 %v3014_v41, %v2994_v4  ;;  %v11768_v41 = vld [vmem:[#allocation50_spill] sm:$0xff] }
 0x623   :  { %v3038_v45 = vmul.f32 %v3030_v53, %v11764_v2  ;;  %6749 = vmatmul.mubr.msk.f32.gmra.mrb[114].mxu0 %vm239_vm2, %v9694_v33  ;;  %v11769_v53 = vld [vmem:[#allocation107_spill] sm:$0xff] }
 0x624   :  { %4832 = vmatprep.mubr.f32.mxu0 %v11736_v35 }
 0x625   :  { %v3042_v18 = vadd.f32 %v3038_v45, %v3018_v22  ;;  %v3158_v22 = vmul.f32 %v3150_v10, %v11769_v53  ;;  %v3732_v45 = vld [vmem:[%s11265_s18 + $0xd8] sm:$0xff] }
 0x626   :  { %v7399_v25 = vpack.c.bf16 %v3764_v46, %v3732_v45  ;;  %v11773_v10 = vld [vmem:[#allocation117_spill] sm:$0xff]  ;;  %v11774_v45 = vld [vmem:[#allocation118_spill] sm:$0xff] }
 0x627   :  { %v3054_v17 = vpop.permute.xlu1 %3053  ;;  %6750 = vmatmul.mubr.msk.f32.gmra.mrb[116].mxu0 %vm239_vm2, %v9708_v14 }
 0x628   :  { %v3062_v54 = vmul.f32 %v3054_v17, %v11765_v57  ;;  %4992 = vmatprep.mubr.f32.mxu0 %v11736_v35  ;;  %7400 = vmatprep.subr.bf16.mxu0 %v7399_v25  ;;  %v3767_v25 = vld [vmem:[%s11265_s18 + $0x1f0] sm:$0xff] }
 0x62a   :  { %v3066_v50 = vadd.f32 %v3062_v54, %v3042_v18  ;;  %v3222_v54 = vpop.permute.xlu0 %3221 }
 0x62b   :  { %6755 = vmatmul.mubr.msk.f32.vlgmr.msra.gmra.mrb[118].mxu0 %vm239_vm2, %v9683_v30 }
 0x62c   :  { %v3102_v48 = vpop.permute.xlu1 %3101  ;;  %v3090_v58 = vadd.f32 %v3086_v37, %v3066_v50  ;;  %4998 = vmatprep.mubr.f32.mxu0 %v11736_v35  ;;  %7402 = vmatpush1.bf16.msra.mxu0 %v7401_v59  ;;  %v11771_v37 = vld [vmem:[#allocation59_spill] sm:$0xff] }
 0x62d   :  { %v3110_v8 = vmul.f32 %v3102_v48, %v11767_v19  ;;  %v11772_v48 = vld [vmem:[#allocation60_spill] sm:$0xff] }
 0x62e   :  { %v3294_v53 = vpop.permute.xlu0 %3293 }
 0x62f   :  { %v3114_v32 = vadd.f32 %v3110_v8, %v3090_v58  ;;  %6756 = vmatmul.mubr.msk.f32.gmra.mrb[120].mxu0 %vm239_vm2, %v9687_v31  ;;  %v3230_v58 = vmul.f32 %v3222_v54, %v11772_v48  ;;  %v11776_v54 = vld [vmem:[#allocation70_spill] sm:$0xff] }
 0x630   :  { %5004 = vmatprep.mubr.f32.mxu0 %v11736_v35 }
 0x631   :  { %v3126_v51 = vpop.permute.xlu1 %3125 }
 0x632   :  { %v3134_v4 = vmul.f32 %v3126_v51, %v11768_v41 }
 0x633   :  { %6757 = vmatmul.mubr.msk.f32.gmra.mrb[122].mxu0 %vm239_vm2, %v9694_v33 }
 0x634   :  { %v3138_v2 = vadd.f32 %v3134_v4, %v3114_v32  ;;  %5010 = vmatprep.mubr.f32.mxu0 %v11736_v35  ;;  %v3736_v4 = vld [vmem:[%s11265_s18 + $0xf8] sm:$0xff] }
 0x636   :  { %v3174_v18 = vpop.permute.xlu1 %3173  ;;  %v3162_v52 = vadd.f32 %v3158_v22, %v3138_v2  ;;  %v3768_v2 = vld [vmem:[%s11265_s18 + $0x1f8] sm:$0xff] }
 0x637   :  { %v3182_v17 = vmul.f32 %v3174_v18, %v11770_v23  ;;  %6758 = vmatmul.mubr.msk.f32.gmra.mrb[124].mxu0 %vm239_vm2, %v9708_v14  ;;  %v7407_v18 = vpack.c.bf16 %v3768_v2, %v3736_v4  ;;  %v3302_v23 = vmul.f32 %v3294_v53, %v11775_v43  ;;  %v11779_v53 = vld [vmem:[#allocation79_spill] sm:$0xff]  ;;  %v6226_v2 = vld [vmem:[%s11267_s20] sm:$0xff] }
 0x638   :  { %5170 = vmatprep.mubr.f32.mxu0 %v11736_v35 }
 0x639   :  { %v3186_v57 = vadd.f32 %v3182_v17, %v3162_v52  ;;  %v3735_v52 = vld [vmem:[%s11265_s18 + $0xf0] sm:$0xff]  ;;  %7408 = vmatprep.subr.bf16.mxu0 %v7407_v18 }
 0x63a   :  { %v7409_v62 = vpack.c.bf16 %v3767_v25, %v3735_v52  ;;  %v6229_v52 = vld [vmem:[%s11267_s20 + $0x18] sm:$0xff] }
 0x63b   :  { %v3198_v44 = vpop.permute.xlu1 %3197  ;;  %6763 = vmatmul.mubr.msk.f32.vlgmr.msra.gmra.mrb[126].mxu0 %vm239_vm2, %v9683_v30  ;;  %v11780_v25 = vld [vmem:[#allocation81_spill] sm:$0xff] }
 0x63c   :  { %v3206_v50 = vmul.f32 %v3198_v44, %v11771_v37  ;;  %5176 = vmatprep.mubr.f32.mxu0 %v11736_v35  ;;  %7410 = vmatpush1.bf16.msra.mxu0 %v7409_v62 }
 0x63e   :  { %v3210_v19 = vadd.f32 %v3206_v50, %v3186_v57  ;;  %v3366_v50 = vpop.permute.xlu0 %3365 }
 0x63f   :  { %6764 = vmatmul.mubr.msk.f32.gmra.mrb[128].mxu0 %vm239_vm2, %v9687_v31 }
 0x640   :  { %v3246_v8 = vpop.permute.xlu1 %3245  ;;  %v3234_v32 = vadd.f32 %v3230_v58, %v3210_v19  ;;  %5182 = vmatprep.mubr.f32.mxu0 %v11736_v35  ;;  %v11777_v58 = vld [vmem:[#allocation127_spill] sm:$0xff] }
 0x641   :  { %v3254_v51 = vmul.f32 %v3246_v8, %v11773_v10  ;;  %v11778_v8 = vld [vmem:[#allocation128_spill] sm:$0xff] }
 0x643   :  { %v3258_v41 = vadd.f32 %v3254_v51, %v3234_v32  ;;  %6765 = vmatmul.mubr.msk.f32.gmra.mrb[130].mxu0 %vm239_vm2, %v9694_v33  ;;  %v3374_v32 = vmul.f32 %v3366_v50, %v11778_v8  ;;  %v3414_v51 = vpop.permute.xlu0 %3413  ;;  %v3710_v50 = vld [vmem:[%s11265_s18 + $0x28] sm:$0xff]  ;;  %v6233_v8 = vld [vmem:[%s11267_s20 + $0x38] sm:$0xff] }
 0x644   :  { %5188 = vmatprep.mubr.f32.mxu0 %v11736_v35  ;;  %v3422_v62 = vmul.f32 %v3414_v51, %v11780_v25  ;;  %v3745_v25 = vld [vmem:[%s11265_s18 + $0x140] sm:$0xff] }
 0x645   :  { %v3270_v22 = vpop.permute.xlu1 %3269 }
 0x646   :  { %v3278_v46 = vmul.f32 %v3270_v22, %v11774_v45  ;;  %v6227_v45 = vld [vmem:[%s11267_s20 + $0x8] sm:$0xff] }
 0x647   :  { %6766 = vmatmul.mubr.msk.f32.gmra.mrb[132].mxu0 %vm239_vm2, %v9708_v14  ;;  %v7415_v18 = vpack.c.bf16 %v6227_v45, %v6226_v2  ;;  %v6234_v2 = vld [vmem:[%s11267_s20 + $0x40] sm:$0xff]  ;;  %v6235_v45 = vld [vmem:[%s11267_s20 + $0x48] sm:$0xff] }
 0x648   :  { %v3282_v17 = vadd.f32 %v3278_v46, %v3258_v41  ;;  %5348 = vmatprep.mubr.f32.mxu0 %v11736_v35  ;;  %v6228_v46 = vld [vmem:[%s11267_s20 + $0x10] sm:$0xff] }
 0x649   :  { %7416 = vmatprep.subr.bf16.mxu0 %v7415_v18 }
 0x64a   :  { %v3318_v59 = vpop.permute.xlu1 %3317  ;;  %v3306_v57 = vadd.f32 %v3302_v23, %v3282_v17  ;;  %v7419_v23 = vpack.c.bf16 %v6229_v52, %v6228_v46  ;;  %v6230_v17 = vld [vmem:[%s11267_s20 + $0x20] sm:$0xff] }
 0x64b   :  { %v3326_v44 = vmul.f32 %v3318_v59, %v11776_v54  ;;  %6771 = vmatmul.mubr.msk.f32.vlgmr.msra.gmra.mrb[134].mxu0 %vm239_vm2, %v9683_v30  ;;  %v6231_v59 = vld [vmem:[%s11267_s20 + $0x28] sm:$0xff]  ;;  %v3713_v52 = vld [vmem:[%s11265_s18 + $0x40] sm:$0xff] }
 0x64c   :  { %5354 = vmatprep.mubr.f32.mxu0 %v11736_v35  ;;  %7418 = vmatpush3.bf16.msra.mxu0 %v7415_v18 }
 0x64d   :  { %v3330_v37 = vadd.f32 %v3326_v44, %v3306_v57  ;;  %v11781_v44 = vld [vmem:[#allocation84_spill] sm:$0xff]  ;;  %7420 = vmatprep.subr.bf16.mxu0 %v7419_v23 }
 0x64f   :  { %v3342_v48 = vpop.permute.xlu1 %3341  ;;  %6772 = vmatmul.mubr.msk.f32.gmra.mrb[136].mxu0 %vm239_vm2, %v9687_v31 }
 0x650   :  { %v3350_v19 = vmul.f32 %v3342_v48, %v11777_v58  ;;  %5360 = vmatprep.mubr.f32.mxu0 %v11736_v35  ;;  %v7423_v48 = vpack.c.bf16 %v6231_v59, %v6230_v17  ;;  %v3742_v58 = vld [vmem:[%s11265_s18 + $0x128] sm:$0xff]  ;;  %7422 = vmatpush3.bf16.msra.mxu0 %v7419_v23  ;;  %v7431_v23 = vpack.c.bf16 %v6235_v45, %v6234_v2  ;;  %v6236_v59 = vld [vmem:[%s11267_s20 + $0x50] sm:$0xff] }
 0x651   :  { %v7355_v51 = vpack.c.bf16 %v3742_v58, %v3710_v50  ;;  %v7836_v17 = vld [vmem:[%s11474_s2 + $0x8] sm:$0xff]  ;;  %v6238_v50 = vld [vmem:[%s11267_s20 + $0x60] sm:$0xff] }
 0x652   :  { %v3354_v10 = vadd.f32 %v3350_v19, %v3330_v37  ;;  %v6232_v19 = vld [vmem:[%s11267_s20 + $0x30] sm:$0xff]  ;;  %7424 = vmatprep.subr.bf16.mxu0 %v7423_v48 }
 0x653   :  { %6773 = vmatmul.mubr.msk.f32.gmra.mrb[138].mxu0 %vm239_vm2, %v9694_v33 }
 0x654   :  { %v3390_v41 = vpop.permute.xlu1 %3389  ;;  %v3378_v4 = vadd.f32 %v3374_v32, %v3354_v10  ;;  %5366 = vmatprep.mubr.f32.mxu0 %v11736_v35  ;;  %7426 = vmatpush3.bf16.msra.mxu0 %v7423_v48  ;;  %v6239_v48 = vld [vmem:[%s11267_s20 + $0x68] sm:$0xff] }
 0x655   :  { %v3398_v22 = vmul.f32 %v3390_v41, %v11779_v53  ;;  %v3709_v41 = vld [vmem:[%s11265_s18 + $0x20] sm:$0xff]  ;;  %v7427_v53 = vpack.c.bf16 %v6233_v8, %v6232_v19  ;;  %v7439_v58 = vpack.c.bf16 %v6239_v48, %v6238_v50 }
 0x656   :  { %v3717_v19 = vld [vmem:[%s11265_s18 + $0x60] sm:$0xff] }
 0x657   :  { %v3402_v43 = vadd.f32 %v3398_v22, %v3378_v4  ;;  %6774 = vmatmul.mubr.msk.f32.gmra.mrb[140].mxu0 %vm239_vm2, %v9708_v14  ;;  %v3741_v4 = vld [vmem:[%s11265_s18 + $0x120] sm:$0xff]  ;;  %v3714_v22 = vld [vmem:[%s11265_s18 + $0x48] sm:$0xff]  ;;  %7428 = vmatprep.subr.bf16.mxu0 %v7427_v53 }
 0x658   :  { %v7357_v46 = vpack.c.bf16 %v3741_v4, %v3709_v41  ;;  %7430 = vmatpush3.bf16.msra.mxu0 %v7427_v53  ;;  %v3749_v8 = vld [vmem:[%s11265_s18 + $0x160] sm:$0xff] }
 0x659   :  { %v3426_v57 = vadd.f32 %v3422_v62, %v3402_v43  ;;  %v3418_v54 = vpop.permute.xlu1 %3417  ;;  %v3718_v62 = vld [vmem:[%s11265_s18 + $0x68] sm:$0xff]  ;;  %7432 = vmatprep.subr.bf16.mxu0 %v7431_v23  ;;  %v3721_v4 = vld [vmem:[%s11265_s18 + $0x80] sm:$0xff] }
 0x65a   :  { %v3423_v37 = vmul.f32 %v3418_v54, %v11781_v44  ;;  %v3750_v43 = vld [vmem:[%s11265_s18 + $0x168] sm:$0xff]  ;;  %v7365_v54 = vpack.c.bf16 %v3745_v25, %v3713_v52  ;;  %v3753_v53 = vld [vmem:[%s11265_s18 + $0x180] sm:$0xff] }
 0x65b   :  { %v7371_v44 = vpack.c.bf16 %v3750_v43, %v3718_v62  ;;  %v7381_v2 = vpack.c.bf16 %v3753_v53, %v3721_v4  ;;  %v3730_v52 = vld [vmem:[%s11265_s18 + $0xc8] sm:$0xff]  ;;  %v3765_v50 = vld [vmem:[%s11265_s18 + $0x1e0] sm:$0xff] }
 0x65c   :  { %v3427_v32 = vadd.f32 %v3423_v37, %v9760_v5  ;;  %v3746_v5 = vld [vmem:[%s11265_s18 + $0x148] sm:$0xff]  ;;  %7434 = vmatpush3.bf16.msra.mxu0 %v7431_v23  ;;  %v3729_v23 = vld [vmem:[%s11265_s18 + $0xc0] sm:$0xff] }
 0x65d   :  { %v7363_v18 = vpack.c.bf16 %v3746_v5, %v3714_v22  ;;  %v3726_v22 = vld [vmem:[%s11265_s18 + $0xa8] sm:$0xff]  ;;  %v11784_v4 = vld [vmem:[#allocation2_spill] sm:$0xff] }
 0x65e   :  { %v7343_v10 = vpack.c.bf16 %v3427_v32, %v3426_v57  ;;  %v6237_v57 = vld [vmem:[%s11267_s20 + $0x58] sm:$0xff]  ;;  %v3722_v32 = vld [vmem:[%s11265_s18 + $0x88] sm:$0xff] }
 0x65f   :  { %v7435_v37 = vpack.c.bf16 %v6237_v57, %v6236_v59  ;;  %v3758_v5 = vld [vmem:[%s11265_s18 + $0x1a8] sm:$0xff] }
 0x660   :  { %7344 = vmatprep.subr.bf16.mxu1 %v7343_v10  ;;  %v7387_v45 = vpack.c.bf16 %v3758_v5, %v3726_v22  ;;  %v3762_v25 = vld [vmem:[%s11265_s18 + $0x1c8] sm:$0xff] }
 0x661   :  { %7346 = vmatpush3.bf16.msra.mxu1 %v7343_v10  ;;  %7436 = vmatprep.subr.bf16.mxu0 %v7435_v37  ;;  %v3754_v10 = vld [vmem:[%s11265_s18 + $0x188] sm:$0xff]  ;;  %v7395_v43 = vpack.c.bf16 %v3762_v25, %v3730_v52 }
 0x662   :  { %7356 = vmatprep.subr.bf16.mxu1 %v7355_v51  ;;  %7438 = vmatpush3.bf16.msra.mxu0 %v7435_v37  ;;  %v7373_v51 = vpack.c.bf16 %v3749_v8, %v3717_v19  ;;  %v7379_v41 = vpack.c.bf16 %v3754_v10, %v3722_v32  ;;  %v3734_v59 = vld [vmem:[%s11265_s18 + $0xe8] sm:$0xff]  ;;  %v3733_v37 = vld [vmem:[%s11265_s18 + $0xe0] sm:$0xff]  ;;  %v6241_v19 = vld [vmem:[%s11267_s20 + $0x78] sm:$0xff] }
 0x663   :  { %7440 = vmatprep.subr.bf16.mxu0 %v7439_v58  ;;  %v3766_v57 = vld [vmem:[%s11265_s18 + $0x1e8] sm:$0xff]  ;;  %v7405_v48 = vpack.c.bf16 %v3765_v50, %v3733_v37  ;;  %v10161_v10 = vld [vmem:[%s11268_s19] sm:$0xff]  ;;  %v11793_v37 = vld [vmem:[#allocation5_spill] sm:$0xff] }
 0x664   :  { %7051 = vmatmul.mubr.msk.f32.vlgmr.msra.gmra.mrb[96].mxu1 %vm714_vm3, %v7836_v17  ;;  %v3761_v17 = vld [vmem:[%s11265_s18 + $0x1c0] sm:$0xff]  ;;  %v10170_v53 = vrot.slane %v10161_v10, %v11784_v4  ;;  %v11785_v5 = vld [vmem:[#allocation3_spill] sm:$0xff]  ;;  %v10210_v50 = vrot.slane %v10161_v10, %v11793_v37 }
 0x665   :  { %7358 = vmatpush1.bf16.msra.mxu1 %v7357_v46  ;;  %4191 = vmatprep.mubr.f32.mxu1 %v11736_v35  ;;  %v3725_v46 = vld [vmem:[%s11265_s18 + $0xa0] sm:$0xff] }
 0x666   :  { %7364 = vmatprep.subr.bf16.mxu1 %v7363_v18  ;;  %7442 = vmatpush3.bf16.msra.mxu0 %v7439_v58  ;;  %v3757_v18 = vld [vmem:[%s11265_s18 + $0x1a0] sm:$0xff]  ;;  %v6240_v58 = vld [vmem:[%s11267_s20 + $0x70] sm:$0xff] }
 0x667   :  { %v7389_v62 = vpack.c.bf16 %v3757_v18, %v3725_v46  ;;  %v7443_v8 = vpack.c.bf16 %v6241_v19, %v6240_v58 }
 0x668   :  { %6719 = vmatmul.mubr.msk.f32.vlgmr.msra.gmra.mrb[98].mxu1 %vm239_vm2, %v9683_v30 }
 0x669   :  { %4197 = vmatprep.mubr.f32.mxu1 %v11736_v35  ;;  %7366 = vmatpush1.bf16.msra.mxu1 %v7365_v54  ;;  %v7397_v54 = vpack.c.bf16 %v3761_v17, %v3729_v23 }
 0x66a   :  { %7372 = vmatprep.subr.bf16.mxu1 %v7371_v44  ;;  %v7403_v44 = vpack.c.bf16 %v3766_v57, %v3734_v59  ;;  %7444 = vmatprep.subr.bf16.mxu0 %v7443_v8  ;;  %v11792_v57 = vld [vmem:[#allocation4_spill] sm:$0xff] }
 0x66b   :  { %7446 = vmatpush3.bf16.msra.mxu0 %v7443_v8 }
 0x66c   :  { %6720 = vmatmul.mubr.msk.f32.gmra.mrb[100].mxu1 %vm239_vm2, %v9687_v31 }
 0x66d   :  { %4203 = vmatprep.mubr.f32.mxu1 %v11736_v35 }
 0x670   :  { %6721 = vmatmul.mubr.msk.f32.gmra.mrb[102].mxu1 %vm239_vm2, %v9694_v33 }
 0x671   :  { %4209 = vmatprep.mubr.f32.mxu1 %v11736_v35 }
 0x674   :  { %6722 = vmatmul.mubr.msk.f32.gmra.mrb[104].mxu1 %vm239_vm2, %v9708_v14 }
 0x675   :  { %4369 = vmatprep.mubr.f32.mxu1 %v11736_v35 }
 0x678   :  { %6727 = vmatmul.mubr.msk.f32.vlgmr.msra.gmra.mrb[106].mxu1 %vm239_vm2, %v9683_v30 }
 0x679   :  { %4375 = vmatprep.mubr.f32.mxu1 %v11736_v35  ;;  %7374 = vmatpush1.bf16.msra.mxu1 %v7373_v51 }
 0x67a   :  { %7380 = vmatprep.subr.bf16.mxu1 %v7379_v41 }
 0x67c   :  { %6728 = vmatmul.mubr.msk.f32.gmra.mrb[108].mxu1 %vm239_vm2, %v9687_v31 }
 0x67d   :  { %4381 = vmatprep.mubr.f32.mxu1 %v11736_v35 }
 0x680   :  { %6729 = vmatmul.mubr.msk.f32.gmra.mrb[110].mxu1 %vm239_vm2, %v9694_v33 }
 0x681   :  { %4387 = vmatprep.mubr.f32.mxu1 %v11736_v35 }
 0x684   :  { %6730 = vmatmul.mubr.msk.f32.gmra.mrb[112].mxu1 %vm239_vm2, %v9708_v14 }
 0x685   :  { %4547 = vmatprep.mubr.f32.mxu1 %v11736_v35 }
 0x688   :  { %6735 = vmatmul.mubr.msk.f32.vlgmr.msra.gmra.mrb[114].mxu1 %vm239_vm2, %v9683_v30 }
 0x689   :  { %4553 = vmatprep.mubr.f32.mxu1 %v11736_v35  ;;  %7382 = vmatpush1.bf16.msra.mxu1 %v7381_v2  ;;  %v10176_v2 = vrot.slane %v10161_v10, %v11785_v5 }
 0x68a   :  { %7388 = vmatprep.subr.bf16.mxu1 %v7387_v45 }
 0x68c   :  { %6736 = vmatmul.mubr.msk.f32.gmra.mrb[116].mxu1 %vm239_vm2, %v9687_v31 }
 0x68d   :  { %4559 = vmatprep.mubr.f32.mxu1 %v11736_v35 }
 0x690   :  { %6737 = vmatmul.mubr.msk.f32.gmra.mrb[118].mxu1 %vm239_vm2, %v9694_v33 }
 0x691   :  { %4565 = vmatprep.mubr.f32.mxu1 %v11736_v35  ;;  %v10154_v32 = vpop.f32.mrb[70].mxu0 }
 0x692   :  { %11782 = vst [vmem:[#allocation105_spill] sm:$0xff] %v10154_v32  ;;  %v10163_v51 = vpop.f32.mrb[71].mxu0 }
 0x693   :  { %11783 = vst [vmem:[#allocation103_spill] sm:$0xff] %v10163_v51 }
 0x694   :  { %6738 = vmatmul.mubr.msk.f32.gmra.mrb[120].mxu1 %vm239_vm2, %v9708_v14 }
 0x695   :  { %4725 = vmatprep.mubr.f32.mxu1 %v11736_v35 }
 0x698   :  { %6743 = vmatmul.mubr.msk.f32.vlgmr.msra.gmra.mrb[122].mxu1 %vm239_vm2, %v9683_v30  ;;  %v10166_v41 = vpop.f32.mrb[72].mxu0 }
 0x699   :  { %4731 = vmatprep.mubr.f32.mxu1 %v11736_v35  ;;  %7390 = vmatpush1.bf16.msra.mxu1 %v7389_v62  ;;  %v10172_v22 = vpop.f32.mrb[73].mxu0 }
 0x69a   :  { %7396 = vmatprep.subr.bf16.mxu1 %v7395_v43 }
 0x69c   :  { %6744 = vmatmul.mubr.msk.f32.gmra.mrb[124].mxu1 %vm239_vm2, %v9687_v31 }
 0x69d   :  { %4737 = vmatprep.mubr.f32.mxu1 %v11736_v35 }
 0x6a0   :  { %6745 = vmatmul.mubr.msk.f32.gmra.mrb[126].mxu1 %vm239_vm2, %v9694_v33 }
 0x6a1   :  { %4743 = vmatprep.mubr.f32.mxu1 %v11736_v35  ;;  %v4027_v45 = vpop.f32.mrb[74].mxu0 }
 0x6a2   :  { %v10181_v46 = vadd.f32 %v4027_v45, %v10170_v53  ;;  %v4029_v18 = vpop.f32.mrb[75].mxu0 }
 0x6a3   :  { %v10185_v52 = vadd.f32 %v4029_v18, %v10176_v2 }
 0x6a4   :  { %6746 = vmatmul.mubr.msk.f32.gmra.mrb[128].mxu1 %vm239_vm2, %v9708_v14  ;;  %11786 = vst [vmem:[#allocation106_spill] sm:$0xff] %v10181_v46 }
 0x6a5   :  { %4903 = vmatprep.mubr.f32.mxu1 %v11736_v35  ;;  %11787 = vst [vmem:[#allocation104_spill] sm:$0xff] %v10185_v52  ;;  %v4033_v25 = vpop.f32.mrb[76].mxu0 }
 0x6a6   :  { %v10188_v62 = vadd.f32 %v4033_v25, %v10170_v53  ;;  %v4035_v43 = vpop.f32.mrb[77].mxu0 }
 0x6a7   :  { %v10191_v23 = vadd.f32 %v4035_v43, %v10176_v2 }
 0x6a8   :  { %6751 = vmatmul.mubr.msk.f32.vlgmr.msra.gmra.mrb[130].mxu1 %vm239_vm2, %v9683_v30  ;;  %11788 = vst [vmem:[#allocation57_spill] sm:$0xff] %v10188_v62 }
 0x6a9   :  { %4909 = vmatprep.mubr.f32.mxu1 %v11736_v35  ;;  %7398 = vmatpush1.bf16.msra.mxu1 %v7397_v54  ;;  %11789 = vst [vmem:[#allocation55_spill] sm:$0xff] %v10191_v23  ;;  %v10204_v54 = vrot.slane %v10161_v10, %v11792_v57 }
 0x6aa   :  { %7404 = vmatprep.subr.bf16.mxu1 %v7403_v44 }
 0x6ac   :  { %6752 = vmatmul.mubr.msk.f32.gmra.mrb[132].mxu1 %vm239_vm2, %v9687_v31 }
 0x6ad   :  { %4915 = vmatprep.mubr.f32.mxu1 %v11736_v35 }
 0x6ae   :  { %v10193_v17 = vpop.f32.mrb[78].mxu0 }
 0x6af   :  { %11790 = vst [vmem:[#allocation58_spill] sm:$0xff] %v10193_v17 }
 0x6b0   :  { %6753 = vmatmul.mubr.msk.f32.gmra.mrb[134].mxu1 %vm239_vm2, %v9694_v33 }
 0x6b1   :  { %4921 = vmatprep.mubr.f32.mxu1 %v11736_v35 }
 0x6b4   :  { %6754 = vmatmul.mubr.msk.f32.gmra.mrb[136].mxu1 %vm239_vm2, %v9708_v14 }
 0x6b5   :  { %5081 = vmatprep.mubr.f32.mxu1 %v11736_v35 }
 0x6b8   :  { %6759 = vmatmul.mubr.msk.f32.vlgmr.msra.gmra.mrb[138].mxu1 %vm239_vm2, %v9683_v30 }
 0x6b9   :  { %5087 = vmatprep.mubr.f32.mxu1 %v11736_v35  ;;  %7406 = vmatpush1.bf16.msra.mxu1 %v7405_v48 }
 0x6bc   :  { %6760 = vmatmul.mubr.msk.f32.gmra.mrb[140].mxu1 %vm239_vm2, %v9687_v31 }
 0x6bd   :  { %5093 = vmatprep.mubr.f32.mxu1 %v11736_v35 }
 0x6c0   :  { %6761 = vmatmul.mubr.msk.f32.gmra.mrb[142].mxu1 %vm239_vm2, %v9694_v33 }
 0x6c1   :  { %5099 = vmatprep.mubr.f32.mxu1 %v11736_v35 }
 0x6c4   :  { %6762 = vmatmul.mubr.msk.f32.gmra.mrb[144].mxu1 %vm239_vm2, %v9708_v14 }
 0x6c5   :  { %5259 = vmatprep.mubr.f32.mxu1 %v11736_v35 }
 0x6c8   :  { %6767 = vmatmul.mubr.msk.f32.vlgmr.msra.gmra.mrb[146].mxu1 %vm239_vm2, %v9683_v30  ;;  %v10197_v30 = vpop.f32.mrb[79].mxu0 }
 0x6c9   :  { %5265 = vmatprep.mubr.f32.mxu1 %v11736_v35  ;;  %11791 = vst [vmem:[#allocation56_spill] sm:$0xff] %v10197_v30  ;;  %v10200_v59 = vpop.f32.mrb[80].mxu0 }
 0x6ca   :  { %v10206_v44 = vpop.f32.mrb[81].mxu0 }
 0x6cb   :  { %v4116_v48 = vpop.f32.mrb[82].mxu0 }
 0x6cc   :  { %6768 = vmatmul.mubr.msk.f32.gmra.mrb[148].mxu1 %vm239_vm2, %v9687_v31  ;;  %v10215_v31 = vadd.f32 %v4116_v48, %v10204_v54  ;;  %v4118_v58 = vpop.f32.mrb[83].mxu0 }
 0x6cd   :  { %5271 = vmatprep.mubr.f32.mxu1 %v11736_v35  ;;  %v10219_v19 = vadd.f32 %v4118_v58, %v10210_v50  ;;  %v4122_v8 = vpop.f32.mrb[84].mxu0  ;;  %v11801_v58 = vld [vmem:[#allocation26_spill] sm:$0xff] }
 0x6ce   :  { %11794 = vst [vmem:[#allocation115_spill] sm:$0xff] %v10215_v31  ;;  %v10222_v45 = vadd.f32 %v4122_v8, %v10204_v54  ;;  %v4124_v18 = vpop.f32.mrb[85].mxu0  ;;  %v10241_v8 = vrot.slane %v10161_v10, %v11801_v58 }
 0x6cf   :  { %11795 = vst [vmem:[#allocation113_spill] sm:$0xff] %v10219_v19  ;;  %v10225_v25 = vadd.f32 %v4124_v18, %v10210_v50  ;;  %v10227_v43 = vpop.f32.mrb[86].mxu0  ;;  %v11803_v19 = vld [vmem:[#allocation29_spill] sm:$0xff] }
 0x6d0   :  { %6769 = vmatmul.mubr.msk.f32.gmra.mrb[150].mxu1 %vm239_vm2, %v9694_v33  ;;  %11796 = vst [vmem:[#allocation116_spill] sm:$0xff] %v10222_v45  ;;  %11798 = vst [vmem:[#allocation67_spill] sm:$0xff] %v10227_v43  ;;  %v10231_v33 = vpop.f32.mrb[87].mxu0  ;;  %v10247_v31 = vrot.slane %v10161_v10, %v11803_v19 }
 0x6d1   :  { %5277 = vmatprep.mubr.f32.mxu1 %v11736_v35  ;;  %11797 = vst [vmem:[#allocation114_spill] sm:$0xff] %v10225_v25  ;;  %11799 = vst [vmem:[#allocation65_spill] sm:$0xff] %v10231_v33  ;;  %v7837_v35 = vld [vmem:[%s11470_s27] sm:$0xff]  ;;  %v10237_v48 = vpop.f32.mrb[88].mxu0  ;;  %v10264_v33 = vld [vmem:[%s11268_s19 + $0x8] sm:$0xff] }
 0x6d2   :  { %11800 = vst [vmem:[#allocation66_spill] sm:$0xff] %v10237_v48  ;;  %v10243_v18 = vpop.f32.mrb[89].mxu0  ;;  %11804 = vst [vmem:[#allocation124_spill] sm:$0xff] %v10247_v31 }
 0x6d3   :  { %11802 = vst [vmem:[#allocation123_spill] sm:$0xff] %v10243_v18 }
 0x6d4   :  { %6770 = vmatmul.mubr.msk.f32.gmra.mrb[152].mxu1 %vm239_vm2, %v9708_v14  ;;  %v4294_v14 = vpop.f32.mrb[90].mxu0 }
 0x6d5   :  { %7065 = vmatprep.mubr.msk.f32.mxu1 %vm239_vm2, %v7837_v35  ;;  %v10250_v52 = vadd.f32 %v4294_v14, %v10241_v8  ;;  %v4296_v46 = vpop.f32.mrb[91].mxu0 }
 0x6d6   :  { %v10253_v25 = vadd.f32 %v4296_v46, %v10247_v31  ;;  %v4300_v35 = vpop.f32.mrb[92].mxu0  ;;  %v10274_v46 = vrot.slane %v10264_v33, %v11792_v57 }
 0x6d7   :  { %11805 = vst [vmem:[#allocation75_spill] sm:$0xff] %v10250_v52  ;;  %v10256_v45 = vadd.f32 %v4300_v35, %v10241_v8  ;;  %v4302_v62 = vpop.f32.mrb[93].mxu0 }
 0x6d8   :  { %11806 = vst [vmem:[#allocation78_spill] sm:$0xff] %v10253_v25  ;;  %v10259_v23 = vadd.f32 %v4302_v62, %v10247_v31  ;;  %v10266_v43 = vpop.f32.mrb[94].mxu0  ;;  %11812 = vst [vmem:[#allocation14_spill] sm:$0xff] %v10274_v46  ;;  %v10280_v62 = vrot.slane %v10264_v33, %v11793_v37 }
 0x6d9   :  { %11807 = vst [vmem:[#allocation76_spill] sm:$0xff] %v10256_v45  ;;  %11809 = vst [vmem:[#allocation6_spill] sm:$0xff] %v10266_v43  ;;  %v10268_v14 = vpop.f32.mrb[95].mxu0 }
 0x6da   :  { %11808 = vst [vmem:[#allocation8_spill] sm:$0xff] %v10259_v23  ;;  %11810 = vst [vmem:[#allocation7_spill] sm:$0xff] %v10268_v14  ;;  %v10270_v52 = vpop.f32.mrb[96].mxu0 }
 0x6db   :  { %11811 = vst [vmem:[#allocation13_spill] sm:$0xff] %v10270_v52  ;;  %v10276_v35 = vpop.f32.mrb[97].mxu0  ;;  %11814 = vst [vmem:[#allocation22_spill] sm:$0xff] %v10280_v62 }
 0x6dc   :  { %11813 = vst [vmem:[#allocation20_spill] sm:$0xff] %v10276_v35  ;;  %v4472_v25 = vpop.f32.mrb[98].mxu0 }
 0x6dd   :  { %v10283_v23 = vadd.f32 %v4472_v25, %v10274_v46  ;;  %v4474_v45 = vpop.f32.mrb[99].mxu0 }
 0x6de   :  { %v10286_v43 = vadd.f32 %v4474_v45, %v10280_v62  ;;  %v4478_v14 = vpop.f32.mrb[100].mxu0  ;;  %v10304_v45 = vrot.slane %v10264_v33, %v11801_v58 }
 0x6df   :  { %11815 = vst [vmem:[#allocation28_spill] sm:$0xff] %v10283_v23  ;;  %v10289_v30 = vadd.f32 %v4478_v14, %v10274_v46  ;;  %v4480_v17 = vpop.f32.mrb[101].mxu0  ;;  %v10308_v14 = vrot.slane %v10264_v33, %v11803_v19 }
 0x6e0   :  { %11816 = vst [vmem:[#allocation30_spill] sm:$0xff] %v10286_v43  ;;  %v10292_v51 = vadd.f32 %v4480_v17, %v10280_v62  ;;  %v10294_v32 = vpop.f32.mrb[102].mxu0  ;;  %11823 = vst [vmem:[#allocation41_spill] sm:$0xff] %v10304_v45 }
 0x6e1   :  { %11817 = vst [vmem:[#allocation80_spill] sm:$0xff] %v10289_v30  ;;  %11819 = vst [vmem:[#allocation35_spill] sm:$0xff] %v10294_v32  ;;  %v10296_v35 = vpop.f32.mrb[103].mxu0 }
 0x6e2   :  { %11818 = vst [vmem:[#allocation82_spill] sm:$0xff] %v10292_v51  ;;  %11820 = vst [vmem:[#allocation36_spill] sm:$0xff] %v10296_v35  ;;  %v10298_v52 = vpop.f32.mrb[104].mxu0 }
 0x6e3   :  { %11821 = vst [vmem:[#allocation89_spill] sm:$0xff] %v10298_v52  ;;  %v10300_v25 = vpop.f32.mrb[105].mxu0  ;;  %11824 = vst [vmem:[#allocation42_spill] sm:$0xff] %v10308_v14 }
 0x6e4   :  { %11822 = vst [vmem:[#allocation90_spill] sm:$0xff] %v10300_v25 }
 0x6e6   :  { %v4650_v43 = vpop.f32.mrb[106].mxu0 }
 0x6e7   :  { %v10311_v17 = vadd.f32 %v4650_v43, %v10304_v45  ;;  %v4652_v23 = vpop.f32.mrb[107].mxu0  ;;  %v10329_v43 = vld [vmem:[%s11268_s19 + $0x10] sm:$0xff] }
 0x6e8   :  { %v10314_v51 = vadd.f32 %v4652_v23, %v10308_v14 }
 0x6e9   :  { %11825 = vst [vmem:[#allocation95_spill] sm:$0xff] %v10311_v17 }
 0x6ea   :  { %11826 = vst [vmem:[#allocation96_spill] sm:$0xff] %v10314_v51  ;;  %v4656_v30 = vpop.f32.mrb[108].mxu0 }
 0x6eb   :  { %v10317_v35 = vadd.f32 %v4656_v30, %v10304_v45  ;;  %v4658_v32 = vpop.f32.mrb[109].mxu0  ;;  %v10337_v30 = vrot.slane %v10329_v43, %v11792_v57 }
 0x6ec   :  { %v10320_v25 = vadd.f32 %v4658_v32, %v10308_v14  ;;  %v10341_v32 = vrot.slane %v10329_v43, %v11793_v37 }
 0x6ed   :  { %11827 = vst [vmem:[#allocation47_spill] sm:$0xff] %v10317_v35  ;;  %11833 = vst [vmem:[#allocation111_spill] sm:$0xff] %v10337_v30 }
 0x6ee   :  { %11828 = vst [vmem:[#allocation48_spill] sm:$0xff] %v10320_v25  ;;  %v10322_v52 = vpop.f32.mrb[110].mxu0  ;;  %11834 = vst [vmem:[#allocation112_spill] sm:$0xff] %v10341_v32 }
 0x6ef   :  { %11829 = vst [vmem:[#allocation101_spill] sm:$0xff] %v10322_v52  ;;  %v10324_v62 = vpop.f32.mrb[111].mxu0 }
 0x6f0   :  { %11830 = vst [vmem:[#allocation102_spill] sm:$0xff] %v10324_v62 }
 0x6f2   :  { %v10331_v17 = vpop.f32.mrb[112].mxu0 }
 0x6f3   :  { %11831 = vst [vmem:[#allocation53_spill] sm:$0xff] %v10331_v17  ;;  %v10333_v23 = vpop.f32.mrb[113].mxu0 }
 0x6f4   :  { %11832 = vst [vmem:[#allocation54_spill] sm:$0xff] %v10333_v23 }
 0x6f6   :  { %v4828_v51 = vpop.f32.mrb[114].mxu0 }
 0x6f7   :  { %v10344_v25 = vadd.f32 %v4828_v51, %v10337_v30  ;;  %v4830_v35 = vpop.f32.mrb[115].mxu0 }
 0x6f8   :  { %v10347_v62 = vadd.f32 %v4830_v35, %v10341_v32  ;;  %v10365_v35 = vrot.slane %v10329_v43, %v11801_v58 }
 0x6f9   :  { %11835 = vst [vmem:[#allocation63_spill] sm:$0xff] %v10344_v25 }
 0x6fa   :  { %11836 = vst [vmem:[#allocation131_spill] sm:$0xff] %v10347_v62  ;;  %v4834_v52 = vpop.f32.mrb[116].mxu0  ;;  %11843 = vst [vmem:[#allocation77_spill] sm:$0xff] %v10365_v35 }
 0x6fb   :  { %v10350_v17 = vadd.f32 %v4834_v52, %v10337_v30  ;;  %v4836_v23 = vpop.f32.mrb[117].mxu0  ;;  %v10369_v52 = vrot.slane %v10329_v43, %v11803_v19 }
 0x6fc   :  { %v10353_v14 = vadd.f32 %v4836_v23, %v10341_v32 }
 0x6fd   :  { %11837 = vst [vmem:[#allocation68_spill] sm:$0xff] %v10350_v17  ;;  %11844 = vst [vmem:[#allocation73_spill] sm:$0xff] %v10369_v52 }
 0x6fe   :  { %11838 = vst [vmem:[#allocation64_spill] sm:$0xff] %v10353_v14  ;;  %v10355_v45 = vpop.f32.mrb[118].mxu0 }
 0x6ff   :  { %11839 = vst [vmem:[#allocation125_spill] sm:$0xff] %v10355_v45  ;;  %v10357_v46 = vpop.f32.mrb[119].mxu0 }
 0x700   :  { %11840 = vst [vmem:[#allocation121_spill] sm:$0xff] %v10357_v46 }
 0x702   :  { %v10359_v18 = vpop.f32.mrb[120].mxu0 }
 0x703   :  { %11841 = vst [vmem:[#allocation126_spill] sm:$0xff] %v10359_v18  ;;  %v10361_v51 = vpop.f32.mrb[121].mxu0 }
 0x704   :  { %11842 = vst [vmem:[#allocation122_spill] sm:$0xff] %v10361_v51 }
 0x706   :  { %v5006_v62 = vpop.f32.mrb[122].mxu0 }
 0x707   :  { %v10372_v23 = vadd.f32 %v5006_v62, %v10365_v35  ;;  %v5008_v25 = vpop.f32.mrb[123].mxu0  ;;  %v10390_v62 = vld [vmem:[%s11268_s19 + $0x18] sm:$0xff] }
 0x708   :  { %v10375_v14 = vadd.f32 %v5008_v25, %v10369_v52 }
 0x709   :  { %11845 = vst [vmem:[#allocation74_spill] sm:$0xff] %v10372_v23 }
 0x70a   :  { %11846 = vst [vmem:[#allocation12_spill] sm:$0xff] %v10375_v14  ;;  %v5012_v17 = vpop.f32.mrb[124].mxu0 }
 0x70b   :  { %v10378_v46 = vadd.f32 %v5012_v17, %v10365_v35  ;;  %v5014_v45 = vpop.f32.mrb[125].mxu0  ;;  %v10398_v17 = vrot.slane %v10390_v62, %v11792_v57 }
 0x70c   :  { %v10381_v51 = vadd.f32 %v5014_v45, %v10369_v52  ;;  %v10402_v45 = vrot.slane %v10390_v62, %v11793_v37 }
 0x70d   :  { %11847 = vst [vmem:[#allocation11_spill] sm:$0xff] %v10378_v46  ;;  %11853 = vst [vmem:[#allocation34_spill] sm:$0xff] %v10398_v17 }
 0x70e   :  { %11848 = vst [vmem:[#allocation17_spill] sm:$0xff] %v10381_v51  ;;  %v10383_v18 = vpop.f32.mrb[126].mxu0  ;;  %11854 = vst [vmem:[#allocation87_spill] sm:$0xff] %v10402_v45 }
 0x70f   :  { %11849 = vst [vmem:[#allocation19_spill] sm:$0xff] %v10383_v18  ;;  %v10385_v32 = vpop.f32.mrb[127].mxu0 }
 0x710   :  { %11850 = vst [vmem:[#allocation25_spill] sm:$0xff] %v10385_v32 }
 0x712   :  { %v10392_v23 = vpop.f32.mrb[128].mxu0 }
 0x713   :  { %11851 = vst [vmem:[#allocation27_spill] sm:$0xff] %v10392_v23  ;;  %v10394_v25 = vpop.f32.mrb[129].mxu0 }
 0x714   :  { %11852 = vst [vmem:[#allocation33_spill] sm:$0xff] %v10394_v25 }
 0x716   :  { %v5184_v14 = vpop.f32.mrb[130].mxu0 }
 0x717   :  { %v10405_v51 = vadd.f32 %v5184_v14, %v10398_v17  ;;  %v5186_v46 = vpop.f32.mrb[131].mxu0 }
 0x718   :  { %v10408_v32 = vadd.f32 %v5186_v46, %v10402_v45  ;;  %v10426_v46 = vrot.slane %v10390_v62, %v11801_v58 }
 0x719   :  { %11855 = vst [vmem:[#allocation88_spill] sm:$0xff] %v10405_v51 }
 0x71a   :  { %11856 = vst [vmem:[#allocation39_spill] sm:$0xff] %v10408_v32  ;;  %v5190_v18 = vpop.f32.mrb[132].mxu0  ;;  %11863 = vst [vmem:[#allocation100_spill] sm:$0xff] %v10426_v46 }
 0x71b   :  { %v10411_v23 = vadd.f32 %v5190_v18, %v10398_v17  ;;  %v5192_v25 = vpop.f32.mrb[133].mxu0  ;;  %v10430_v18 = vrot.slane %v10390_v62, %v11803_v19  ;;  %v6704_v19 = vld [vmem:[%s11269_s15] ss:$0 sm:$0xff] }
 0x71c   :  { %v10414_v57 = vadd.f32 %v5192_v25, %v10402_v45 }
 0x71d   :  { %11857 = vst [vmem:[#allocation40_spill] sm:$0xff] %v10411_v23  ;;  %11864 = vst [vmem:[#allocation51_spill] sm:$0xff] %v10430_v18 }
 0x71e   :  { %11858 = vst [vmem:[#allocation93_spill] sm:$0xff] %v10414_v57  ;;  %v10416_v52 = vpop.f32.mrb[134].mxu0 }
 0x71f   :  { %11859 = vst [vmem:[#allocation94_spill] sm:$0xff] %v10416_v52  ;;  %v10418_v37 = vpop.f32.mrb[135].mxu0 }
 0x720   :  { %11860 = vst [vmem:[#allocation45_spill] sm:$0xff] %v10418_v37 }
 0x722   :  { %v10420_v35 = vpop.f32.mrb[136].mxu0 }
 0x723   :  { %11861 = vst [vmem:[#allocation46_spill] sm:$0xff] %v10420_v35  ;;  %v10422_v14 = vpop.f32.mrb[137].mxu0 }
 0x724   :  { %11862 = vst [vmem:[#allocation99_spill] sm:$0xff] %v10422_v14  ;;  %v10501_v14 = vrot.slane %v10264_v33, %v11784_v4 }
 0x726   :  { %v5362_v32 = vpop.f32.mrb[138].mxu0  ;;  %11881 = vst [vmem:[#allocation15_spill] sm:$0xff] %v10501_v14 }
 0x727   :  { %v10433_v25 = vadd.f32 %v5362_v32, %v10426_v46  ;;  %v5364_v51 = vpop.f32.mrb[139].mxu0 }
 0x728   :  { %v10436_v57 = vadd.f32 %v5364_v51, %v10430_v18 }
 0x729   :  { %11865 = vst [vmem:[#allocation52_spill] sm:$0xff] %v10433_v25 }
 0x72a   :  { %11866 = vst [vmem:[#allocation109_spill] sm:$0xff] %v10436_v57  ;;  %v5368_v23 = vpop.f32.mrb[140].mxu0 }
 0x72b   :  { %v10439_v37 = vadd.f32 %v5368_v23, %v10426_v46  ;;  %v5370_v52 = vpop.f32.mrb[141].mxu0 }
 0x72c   :  { %v10442_v58 = vadd.f32 %v5370_v52, %v10430_v18 }
 0x72d   :  { %11867 = vst [vmem:[#allocation110_spill] sm:$0xff] %v10439_v37  ;;  %v7840_v37 = vld [vmem:[%s11470_s27 + $0x10] sm:$0xff] }
 0x72e   :  { %11868 = vst [vmem:[#allocation61_spill] sm:$0xff] %v10442_v58  ;;  %v7838_v58 = vld [vmem:[%s11474_s2] sm:$0xff] }
 0x737   :  { %v7052_v35 = vpop.f32.mrb[96].mxu1 }
 0x738   :  { %v3602_v45 = vadd.f32 %v7052_v35, %v6704_v19  ;;  %v3585_v32 = vpop.f32.mrb[97].mxu1 }
 0x739   :  { %v3601_v25 = vadd.f32 %v6704_v19, %v3585_v32 }
 0x73a   :  { %v3604_v17 = vmax.f32 %v3602_v45, 0.0  ;;  %v11871_v45 = vld [vmem:[#allocation18_spill] sm:$0xff] }
 0x73b   :  { %v3603_v30 = vmax.f32 %v3601_v25, 0.0  ;;  %v10447_v51 = vpop.f32.mrb[98].mxu1  ;;  %v10461_v25 = vrot.slane %v10161_v10, %v11871_v45 }
 0x73c   :  { %11869 = vst [vmem:[#allocation62_spill] sm:$0xff] %v10447_v51  ;;  %v10449_v57 = vpop.f32.mrb[99].mxu1 }
 0x73d   :  { %11870 = vst [vmem:[#allocation119_spill] sm:$0xff] %v10449_v57  ;;  %v7411_v23 = vpack.c.bf16 %v3604_v17, %v3603_v30  ;;  %7103 = vmatprep.mubr.f32.mxu0 %v3603_v30  ;;  %v7839_v30 = vld [vmem:[%s11470_s27 + $0x8] sm:$0xff] }
 0x73e   :  { %7104 = vmatmul.mubr.f32.vlgmr.msra.gmra.mrb[142].mxu0 %v3604_v17  ;;  %v11872_v17 = vld [vmem:[#allocation21_spill] sm:$0xff] }
 0x73f   :  { %7412 = vmatprep.subr.bf16.mxu1 %v7411_v23  ;;  %v10451_v52 = vpop.f32.mrb[100].mxu1  ;;  %7114 = vmatprep.mubr.msk.f32.mxu0 %vm714_vm3, %v7838_v58  ;;  %v10469_v19 = vrot.slane %v10161_v10, %v11872_v17  ;;  %v7841_v10 = vld [vmem:[%s11470_s27 + $0x18] sm:$0xff] }
 0x740   :  { %7414 = vmatpush3.bf16.msra.mxu1 %v7411_v23  ;;  %v10457_v35 = vpop.f32.mrb[101].mxu1 }
 0x743   :  { %7066 = vmatmul.mubr.msk.f32.vlgmr.msra.gmra.mrb[154].mxu1 %vm239_vm2, %v7839_v30  ;;  %v4205_v32 = vpop.f32.mrb[102].mxu1 }
 0x744   :  { %v10472_v58 = vadd.f32 %v4205_v32, %v10461_v25  ;;  %v4207_v23 = vpop.f32.mrb[103].mxu1  ;;  %7068 = vmatprep.mubr.msk.f32.mxu1 %vm239_vm2, %v7840_v37 }
 0x745   :  { %v10479_v57 = vadd.f32 %v4207_v23, %v10469_v19 }
 0x746   :  { %11873 = vst [vmem:[#allocation120_spill] sm:$0xff] %v10472_v58 }
 0x747   :  { %11874 = vst [vmem:[#allocation71_spill] sm:$0xff] %v10479_v57  ;;  %v4211_v51 = vpop.f32.mrb[104].mxu1  ;;  %7069 = vmatmul.mubr.msk.f32.gmra.mrb[156].mxu1 %vm239_vm2, %v7841_v10 }
 0x748   :  { %v10486_v30 = vadd.f32 %v4211_v51, %v10461_v25  ;;  %v4213_v32 = vpop.f32.mrb[105].mxu1  ;;  %v10505_v51 = vrot.slane %v10264_v33, %v11785_v5 }
 0x749   :  { %v10489_v58 = vadd.f32 %v4213_v32, %v10469_v19 }
 0x74a   :  { %11875 = vst [vmem:[#allocation72_spill] sm:$0xff] %v10486_v30  ;;  %11882 = vst [vmem:[#allocation16_spill] sm:$0xff] %v10505_v51 }
 0x74b   :  { %11876 = vst [vmem:[#allocation129_spill] sm:$0xff] %v10489_v58  ;;  %v10491_v46 = vpop.f32.mrb[106].mxu1 }
 0x74c   :  { %11877 = vst [vmem:[#allocation130_spill] sm:$0xff] %v10491_v46  ;;  %v10493_v37 = vpop.f32.mrb[107].mxu1 }
 0x74d   :  { %11878 = vst [vmem:[#allocation83_spill] sm:$0xff] %v10493_v37 }
 0x74f   :  { %v10495_v23 = vpop.f32.mrb[108].mxu1 }
 0x750   :  { %11879 = vst [vmem:[#allocation9_spill] sm:$0xff] %v10495_v23  ;;  %v10497_v57 = vpop.f32.mrb[109].mxu1 }
 0x751   :  { %11880 = vst [vmem:[#allocation10_spill] sm:$0xff] %v10497_v57 }
 0x753   :  { %v4383_v10 = vpop.f32.mrb[110].mxu1 }
 0x754   :  { %v10508_v32 = vadd.f32 %v4383_v10, %v10501_v14  ;;  %v4385_v58 = vpop.f32.mrb[111].mxu1 }
 0x755   :  { %v10511_v30 = vadd.f32 %v4385_v58, %v10505_v51  ;;  %v10529_v58 = vrot.slane %v10264_v33, %v11871_v45 }
 0x756   :  { %11883 = vst [vmem:[#allocation23_spill] sm:$0xff] %v10508_v32 }
 0x757   :  { %11884 = vst [vmem:[#allocation24_spill] sm:$0xff] %v10511_v30  ;;  %v4389_v37 = vpop.f32.mrb[112].mxu1  ;;  %11891 = vst [vmem:[#allocation91_spill] sm:$0xff] %v10529_v58 }
 0x758   :  { %v10514_v46 = vadd.f32 %v4389_v37, %v10501_v14  ;;  %v4391_v18 = vpop.f32.mrb[113].mxu1  ;;  %v10533_v37 = vrot.slane %v10264_v33, %v11872_v17 }
 0x759   :  { %v10517_v57 = vadd.f32 %v4391_v18, %v10505_v51 }
 0x75a   :  { %11885 = vst [vmem:[#allocation31_spill] sm:$0xff] %v10514_v46  ;;  %11892 = vst [vmem:[#allocation92_spill] sm:$0xff] %v10533_v37 }
 0x75b   :  { %11886 = vst [vmem:[#allocation32_spill] sm:$0xff] %v10517_v57  ;;  %v10519_v23 = vpop.f32.mrb[114].mxu1 }
 0x75c   :  { %11887 = vst [vmem:[#allocation85_spill] sm:$0xff] %v10519_v23  ;;  %v10521_v31 = vpop.f32.mrb[115].mxu1 }
 0x75d   :  { %11888 = vst [vmem:[#allocation86_spill] sm:$0xff] %v10521_v31 }
 0x75f   :  { %v10523_v48 = vpop.f32.mrb[116].mxu1 }
 0x760   :  { %11889 = vst [vmem:[#allocation37_spill] sm:$0xff] %v10523_v48  ;;  %v10525_v10 = vpop.f32.mrb[117].mxu1 }
 0x761   :  { %11890 = vst [vmem:[#allocation38_spill] sm:$0xff] %v10525_v10 }
 0x763   :  { %v4561_v30 = vpop.f32.mrb[118].mxu1 }
 0x764   :  { %v10536_v18 = vadd.f32 %v4561_v30, %v10529_v58  ;;  %v4563_v32 = vpop.f32.mrb[119].mxu1 }
 0x765   :  { %v10539_v57 = vadd.f32 %v4563_v32, %v10533_v37  ;;  %v10557_v32 = vrot.slane %v10329_v43, %v11784_v4 }
 0x766   :  { %11893 = vst [vmem:[#allocation43_spill] sm:$0xff] %v10536_v18 }
 0x767   :  { %11894 = vst [vmem:[#allocation44_spill] sm:$0xff] %v10539_v57  ;;  %v4567_v46 = vpop.f32.mrb[120].mxu1 }
 0x768   :  { %v10542_v31 = vadd.f32 %v4567_v46, %v10529_v58  ;;  %v4569_v23 = vpop.f32.mrb[121].mxu1  ;;  %v10561_v46 = vrot.slane %v10329_v43, %v11785_v5 }
 0x769   :  { %v10545_v10 = vadd.f32 %v4569_v23, %v10533_v37 }
 0x76a   :  { %11895 = vst [vmem:[#allocation97_spill] sm:$0xff] %v10542_v31  ;;  %11901 = vst [vmem:[#allocation59_spill] sm:$0xff] %v10561_v46 }
 0x76b   :  { %11896 = vst [vmem:[#allocation98_spill] sm:$0xff] %v10545_v10  ;;  %v10547_v48 = vpop.f32.mrb[122].mxu1 }
 0x76c   :  { %11897 = vst [vmem:[#allocation49_spill] sm:$0xff] %v10547_v48  ;;  %v10549_v33 = vpop.f32.mrb[123].mxu1 }
 0x76d   :  { %11898 = vst [vmem:[#allocation50_spill] sm:$0xff] %v10549_v33 }
 0x76f   :  { %v10551_v51 = vpop.f32.mrb[124].mxu1 }
 0x770   :  { %11899 = vst [vmem:[#allocation107_spill] sm:$0xff] %v10551_v51  ;;  %v10553_v30 = vpop.f32.mrb[125].mxu1 }
 0x771   :  { %11900 = vst [vmem:[#allocation108_spill] sm:$0xff] %v10553_v30 }
 0x773   :  { %v4739_v57 = vpop.f32.mrb[126].mxu1 }
 0x774   :  { %v10564_v23 = vadd.f32 %v4739_v57, %v10557_v32  ;;  %v4741_v18 = vpop.f32.mrb[127].mxu1 }
 0x775   :  { %v10567_v10 = vadd.f32 %v4741_v18, %v10561_v46  ;;  %v10585_v18 = vrot.slane %v10329_v43, %v11871_v45 }
 0x776   :  { %11902 = vst [vmem:[#allocation60_spill] sm:$0xff] %v10564_v23 }
 0x777   :  { %11903 = vst [vmem:[#allocation117_spill] sm:$0xff] %v10567_v10  ;;  %v4745_v31 = vpop.f32.mrb[128].mxu1 }
 0x778   :  { %v10570_v33 = vadd.f32 %v4745_v31, %v10557_v32  ;;  %v4747_v48 = vpop.f32.mrb[129].mxu1  ;;  %v10589_v31 = vrot.slane %v10329_v43, %v11872_v17 }
 0x779   :  { %v10573_v30 = vadd.f32 %v4747_v48, %v10561_v46 }
 0x77a   :  { %11904 = vst [vmem:[#allocation118_spill] sm:$0xff] %v10570_v33 }
 0x77b   :  { %11905 = vst [vmem:[#allocation69_spill] sm:$0xff] %v10573_v30  ;;  %v10575_v51 = vpop.f32.mrb[130].mxu1 }
 0x77c   :  { %11906 = vst [vmem:[#allocation70_spill] sm:$0xff] %v10575_v51  ;;  %v10577_v37 = vpop.f32.mrb[131].mxu1 }
 0x77d   :  { %11907 = vst [vmem:[#allocation127_spill] sm:$0xff] %v10577_v37 }
 0x77f   :  { %v10579_v58 = vpop.f32.mrb[132].mxu1 }
 0x780   :  { %11908 = vst [vmem:[#allocation128_spill] sm:$0xff] %v10579_v58  ;;  %v10581_v57 = vpop.f32.mrb[133].mxu1 }
 0x781   :  { %11909 = vst [vmem:[#allocation79_spill] sm:$0xff] %v10581_v57 }
 0x783   :  { %v4917_v10 = vpop.f32.mrb[134].mxu1 }
 0x784   :  { %v10592_v48 = vadd.f32 %v4917_v10, %v10585_v18  ;;  %v4919_v23 = vpop.f32.mrb[135].mxu1 }
 0x785   :  { %v10595_v30 = vadd.f32 %v4919_v23, %v10589_v31  ;;  %v10613_v23 = vrot.slane %v10390_v62, %v11784_v4 }
 0x786   :  { %11910 = vst [vmem:[#allocation81_spill] sm:$0xff] %v10592_v48 }
 0x787   :  { %11911 = vst [vmem:[#allocation84_spill] sm:$0xff] %v10595_v30  ;;  %v4923_v33 = vpop.f32.mrb[136].mxu1 }
 0x788   :  { %v10598_v37 = vadd.f32 %v4923_v33, %v10585_v18  ;;  %v4925_v51 = vpop.f32.mrb[137].mxu1  ;;  %v10617_v33 = vrot.slane %v10390_v62, %v11785_v5 }
 0x789   :  { %v10601_v57 = vadd.f32 %v4925_v51, %v10589_v31 }
 0x78a   :  { %11912 = vst [vmem:[#allocation2_spill] sm:$0xff] %v10598_v37 }
 0x78b   :  { %11913 = vst [vmem:[#allocation3_spill] sm:$0xff] %v10601_v57  ;;  %v10603_v58 = vpop.f32.mrb[138].mxu1 }
 0x78c   :  { %11914 = vst [vmem:[#allocation4_spill] sm:$0xff] %v10603_v58  ;;  %v10605_v43 = vpop.f32.mrb[139].mxu1 }
 0x78d   :  { %11915 = vst [vmem:[#allocation5_spill] sm:$0xff] %v10605_v43 }
 0x78f   :  { %v10607_v46 = vpop.f32.mrb[140].mxu1 }
 0x790   :  { %11916 = vst [vmem:[#allocation26_spill] sm:$0xff] %v10607_v46  ;;  %v10609_v10 = vpop.f32.mrb[141].mxu1 }
 0x791   :  { %11917 = vst [vmem:[#allocation29_spill] sm:$0xff] %v10609_v10 }
 0x793   :  { %v5095_v30 = vpop.f32.mrb[142].mxu1 }
 0x794   :  { %v10620_v51 = vadd.f32 %v5095_v30, %v10613_v23  ;;  %v5097_v48 = vpop.f32.mrb[143].mxu1 }
 0x795   :  { %v10623_v57 = vadd.f32 %v5097_v48, %v10617_v33  ;;  %v10641_v48 = vrot.slane %v10390_v62, %v11871_v45 }
 0x796   :  { %11918 = vst [vmem:[#allocation18_spill] sm:$0xff] %v10620_v51 }
 0x797   :  { %11919 = vst [vmem:[#allocation21_spill] sm:$0xff] %v10623_v57  ;;  %v5101_v37 = vpop.f32.mrb[144].mxu1 }
 0x798   :  { %v10626_v43 = vadd.f32 %v5101_v37, %v10613_v23  ;;  %v5103_v58 = vpop.f32.mrb[145].mxu1  ;;  %v10645_v37 = vrot.slane %v10390_v62, %v11872_v17 }
 0x799   :  { %v10629_v4 = vadd.f32 %v5103_v58, %v10617_v33 }
 0x79a   :  { %11920 = vst [vmem:[#allocation132_spill] sm:$0xff] %v10626_v43 }
 0x79b   :  { %11921 = vst [vmem:[#allocation133_spill] sm:$0xff] %v10629_v4  ;;  %v10631_v10 = vpop.f32.mrb[146].mxu1 }
 0x79c   :  { %11922 = vst [vmem:[#allocation134_spill] sm:$0xff] %v10631_v10  ;;  %v10633_v5 = vpop.f32.mrb[147].mxu1 }
 0x79d   :  { %11923 = vst [vmem:[#allocation135_spill] sm:$0xff] %v10633_v5 }
 0x79f   :  { %v10635_v46 = vpop.f32.mrb[148].mxu1 }
 0x7a0   :  { %v10637_v30 = vpop.f32.mrb[149].mxu1 }
 0x7a1   :  { %11924 = vst [vmem:[#allocation136_spill] sm:$0xff] %v10637_v30 }
 0x7a3   :  { %v5273_v57 = vpop.f32.mrb[150].mxu1 }
 0x7a4   :  { %v10648_v58 = vadd.f32 %v5273_v57, %v10641_v48  ;;  %v5275_v51 = vpop.f32.mrb[151].mxu1  ;;  %v11929_v57 = vmov 2  }
 0x7a5   :  { %v10651_v4 = vadd.f32 %v5275_v51, %v10645_v37  ;;  %v4024_v51 = vadd.f32 %v10172_v22, %v10176_v2 }
 0x7a6   :  { %11925 = vst [vmem:[#allocation137_spill] sm:$0xff] %v10648_v58 }
 0x7a7   :  { %11926 = vst [vmem:[#allocation138_spill] sm:$0xff] %v10651_v4  ;;  %v5279_v43 = vpop.f32.mrb[152].mxu1 }
 0x7a8   :  { %v10654_v5 = vadd.f32 %v5279_v43, %v10641_v48  ;;  %v5281_v10 = vpop.f32.mrb[153].mxu1 }
 0x7a9   :  { %v10657_v45 = vadd.f32 %v5281_v10, %v10645_v37  ;;  %v4022_v10 = vadd.f32 %v10166_v41, %v10170_v53 }
 0x7aa   :  { %11927 = vst [vmem:[#allocation139_spill] sm:$0xff] %v10654_v5 }
 0x7ab   :  { %11928 = vst [vmem:[#allocation140_spill] sm:$0xff] %v10657_v45 }
 0x816   :  { %v10659_v30 = vpop.f32.mrb[154].mxu1 }
 0x817   :  { %5487 = vperm.xlu0 %7700, %v10659_v30   ;;  %5465 = vperm.xlu1 %7699, %v10659_v30   ;;  %v10663_v62 = vpop.f32.mrb[155].mxu1 }
 0x81a   :  { %v10665_v17 = vpop.f32.mrb[156].mxu1 }
 0x81b   :  { %7703 = vset.pattern.permute.xlu0 %v11703_v40  ;;  %7701 = vset.pattern.permute.xlu1 %v11929_v57  ;;  %v10687_v43 = vpop.f32.mrb[157].mxu1 }
 0x81c   :  { %5559 = vperm.xlu0 %7703, %v10659_v30   ;;  %5511 = vperm.xlu1 %7701, %v10659_v30  }
 0x820   :  { %7706 = vset.pattern.permute.xlu0 %v11707_v21  ;;  %7702 = vset.pattern.permute.xlu1 %v11698_v55 }
 0x821   :  { %5631 = vperm.xlu0 %7706, %v10659_v30   ;;  %5535 = vperm.xlu1 %7702, %v10659_v30  }
 0x825   :  { %7709 = vset.pattern.permute.xlu0 %v11711_v42  ;;  %7704 = vset.pattern.permute.xlu1 %v11608_v0 }
 0x826   :  { %5703 = vperm.xlu0 %7709, %v10659_v30   ;;  %5583 = vperm.xlu1 %7704, %v10659_v30  }
 0x82a   :  { %7712 = vset.pattern.permute.xlu0 %v11715_v11  ;;  %7705 = vset.pattern.permute.xlu1 %v11668_v1 }
 0x82b   :  { %5775 = vperm.xlu0 %7712, %v10659_v30   ;;  %5607 = vperm.xlu1 %7705, %v10659_v30  }
 0x82f   :  { %7715 = vset.pattern.permute.xlu0 %v11719_v39  ;;  %7707 = vset.pattern.permute.xlu1 %v11609_v63 }
 0x830   :  { %5847 = vperm.xlu0 %7715, %v10659_v30   ;;  %5655 = vperm.xlu1 %7707, %v10659_v30  }
 0x834   :  { %7718 = vset.pattern.permute.xlu0 %v11723_v56  ;;  %7708 = vset.pattern.permute.xlu1 %v11671_v12 }
 0x835   :  { %5919 = vperm.xlu0 %7718, %v10659_v30   ;;  %5679 = vperm.xlu1 %7708, %v10659_v30  }
 0x839   :  { %7721 = vset.pattern.permute.xlu0 %v11727_v26  ;;  %7710 = vset.pattern.permute.xlu1 %v11610_v20 }
 0x83a   :  { %5991 = vperm.xlu0 %7721, %v10659_v30   ;;  %5727 = vperm.xlu1 %7710, %v10659_v30  }
 0x83e   :  { %7724 = vset.pattern.permute.xlu0 %v11731_v15  ;;  %7711 = vset.pattern.permute.xlu1 %v11625_v27 }
 0x83f   :  { %6063 = vperm.xlu0 %7724, %v10659_v30   ;;  %5751 = vperm.xlu1 %7711, %v10659_v30  }
 0x843   :  { %7727 = vset.pattern.permute.xlu0 %v11735_v47  ;;  %7713 = vset.pattern.permute.xlu1 %v11611_v49 }
 0x844   :  { %6135 = vperm.xlu0 %7727, %v10659_v30   ;;  %5799 = vperm.xlu1 %7713, %v10659_v30  }
 0x848   :  { %7730 = vset.pattern.permute.xlu0 %v11740_v38  ;;  %7714 = vset.pattern.permute.xlu1 %v11628_v28 }
 0x849   :  { %6207 = vperm.xlu0 %7730, %v10659_v30   ;;  %5823 = vperm.xlu1 %7714, %v10659_v30  }
 0x84d   :  { %7731 = vset.pattern.permute.xlu0 %v11742_v16  ;;  %7716 = vset.pattern.permute.xlu1 %v11612_v36 }
 0x84e   :  { %5871 = vperm.xlu1 %7716, %v10659_v30   ;;  %5460 = vperm.xlu0 %7731, %v10663_v62  }
 0x852   :  { %7717 = vset.pattern.permute.xlu1 %v11629_v3  ;;  %7736 = vset.pattern.permute.xlu0 %v11608_v0 }
 0x853   :  { %5895 = vperm.xlu1 %7717, %v10659_v30   ;;  %5579 = vperm.xlu0 %7736, %v10663_v62  }
 0x857   :  { %7719 = vset.pattern.permute.xlu1 %v11613_v61  ;;  %7739 = vset.pattern.permute.xlu0 %v11609_v63 }
 0x858   :  { %5943 = vperm.xlu1 %7719, %v10659_v30   ;;  %5651 = vperm.xlu0 %7739, %v10663_v62  }
 0x85c   :  { %7720 = vset.pattern.permute.xlu1 %v11630_v60  ;;  %7742 = vset.pattern.permute.xlu0 %v11610_v20 }
 0x85d   :  { %5967 = vperm.xlu1 %7720, %v10659_v30   ;;  %5723 = vperm.xlu0 %7742, %v10663_v62  }
 0x861   :  { %7722 = vset.pattern.permute.xlu1 %v11635_v24  ;;  %7745 = vset.pattern.permute.xlu0 %v11611_v49 }
 0x862   :  { %6015 = vperm.xlu1 %7722, %v10659_v30   ;;  %5795 = vperm.xlu0 %7745, %v10663_v62  }
 0x866   :  { %7723 = vset.pattern.permute.xlu1 %v11631_v29  ;;  %7748 = vset.pattern.permute.xlu0 %v11612_v36 }
 0x867   :  { %6039 = vperm.xlu1 %7723, %v10659_v30   ;;  %5867 = vperm.xlu0 %7748, %v10663_v62  }
 0x86b   :  { %7725 = vset.pattern.permute.xlu1 %v11641_v6  ;;  %7751 = vset.pattern.permute.xlu0 %v11613_v61 }
 0x86c   :  { %6087 = vperm.xlu1 %7725, %v10659_v30   ;;  %5939 = vperm.xlu0 %7751, %v10663_v62  }
 0x870   :  { %7726 = vset.pattern.permute.xlu1 %v11634_v7  ;;  %7754 = vset.pattern.permute.xlu0 %v11635_v24 }
 0x871   :  { %6111 = vperm.xlu1 %7726, %v10659_v30   ;;  %6011 = vperm.xlu0 %7754, %v10663_v62  }
 0x875   :  { %7728 = vset.pattern.permute.xlu1 %v11645_v34  ;;  %7757 = vset.pattern.permute.xlu0 %v11641_v6 }
 0x876   :  { %6159 = vperm.xlu1 %7728, %v10659_v30   ;;  %6083 = vperm.xlu0 %7757, %v10663_v62  }
 0x87a   :  { %7729 = vset.pattern.permute.xlu1 %v11644_v13  ;;  %7760 = vset.pattern.permute.xlu0 %v11645_v34 }
 0x87b   :  { %6183 = vperm.xlu1 %7729, %v10659_v30   ;;  %6155 = vperm.xlu0 %7760, %v10663_v62  }
 0x87f   :  { %7732 = vset.pattern.permute.xlu1 %v11653_v9  ;;  %7764 = vset.pattern.permute.xlu0 %v11653_v9 }
 0x880   :  { %5483 = vperm.xlu1 %7732, %v10663_v62   ;;  %5495 = vperm.xlu0 %7764, %v10665_v17  }
 0x884   :  { %7733 = vset.pattern.permute.xlu1 %v11929_v57  ;;  %7767 = vset.pattern.permute.xlu0 %v11703_v40 }
 0x885   :  { %5507 = vperm.xlu1 %7733, %v10663_v62   ;;  %5567 = vperm.xlu0 %7767, %v10665_v17  }
 0x889   :  { %7734 = vset.pattern.permute.xlu1 %v11698_v55  ;;  %7770 = vset.pattern.permute.xlu0 %v11707_v21 }
 0x88a   :  { %5531 = vperm.xlu1 %7734, %v10663_v62   ;;  %5639 = vperm.xlu0 %7770, %v10665_v17  }
 0x88e   :  { %7735 = vset.pattern.permute.xlu1 %v11703_v40  ;;  %7773 = vset.pattern.permute.xlu0 %v11711_v42  ;;  %v4111_v40 = vadd.f32 %v10200_v59, %v10204_v54  ;;  %v4200_v59 = vadd.f32 %v10451_v52, %v10461_v25 }
 0x88f   :  { %5555 = vperm.xlu1 %7735, %v10663_v62   ;;  %5711 = vperm.xlu0 %7773, %v10665_v17  }
 0x893   :  { %7737 = vset.pattern.permute.xlu1 %v11668_v1  ;;  %7776 = vset.pattern.permute.xlu0 %v11715_v11 }
 0x894   :  { %5603 = vperm.xlu1 %7737, %v10663_v62   ;;  %5783 = vperm.xlu0 %7776, %v10665_v17  }
 0x896   :  { %v5488_v30 = vpop.permute.xlu0 %5487  ;;  %v5466_v4 = vpop.permute.xlu1 %5465 }
 0x897   :  { %v5499_v58 = vmul.f32 %v5488_v30, %v4024_v51  ;;  %v5479_v45 = vmul.f32 %v5466_v4, %v4022_v10  ;;  %v4113_v4 = vadd.f32 %v10206_v44, %v10210_v50 }
 0x898   :  { %7738 = vset.pattern.permute.xlu1 %v11707_v21  ;;  %7779 = vset.pattern.permute.xlu0 %v11719_v39 }
 0x899   :  { %v5503_v5 = vadd.f32 %v5499_v58, %v5479_v45  ;;  %5627 = vperm.xlu1 %7738, %v10663_v62   ;;  %5855 = vperm.xlu0 %7779, %v10665_v17  }
 0x89b   :  { %v5560_v41 = vpop.permute.xlu0 %5559  ;;  %v5512_v9 = vpop.permute.xlu1 %5511 }
 0x89c   :  { %v5523_v1 = vmul.f32 %v5512_v9, %v4111_v40  ;;  %v5571_v9 = vmul.f32 %v5560_v41, %v4200_v59  ;;  %v11930_v41 = vld [vmem:[#allocation66_spill] sm:$0xff]  ;;  %v11931_v59 = vld [vmem:[#allocation124_spill] sm:$0xff] }
 0x89d   :  { %7740 = vset.pattern.permute.xlu1 %v11671_v12  ;;  %7782 = vset.pattern.permute.xlu0 %v11723_v56 }
 0x89e   :  { %v5527_v22 = vadd.f32 %v5523_v1, %v5503_v5  ;;  %5675 = vperm.xlu1 %7740, %v10663_v62   ;;  %5927 = vperm.xlu0 %7782, %v10665_v17   ;;  %v4202_v1 = vadd.f32 %v10457_v35, %v10469_v19  ;;  %v11932_v35 = vld [vmem:[#allocation123_spill] sm:$0xff] }
 0x8a0   :  { %v5632_v58 = vpop.permute.xlu0 %5631  ;;  %v5536_v45 = vpop.permute.xlu1 %5535 }
 0x8a1   :  { %v5547_v10 = vmul.f32 %v5536_v45, %v4113_v4 }
 0x8a2   :  { %7741 = vset.pattern.permute.xlu1 %v11711_v42  ;;  %7785 = vset.pattern.permute.xlu0 %v11727_v26 }
 0x8a3   :  { %v5551_v40 = vadd.f32 %v5547_v10, %v5527_v22  ;;  %5699 = vperm.xlu1 %7741, %v10663_v62   ;;  %5999 = vperm.xlu0 %7785, %v10665_v17   ;;  %v4289_v22 = vadd.f32 %v11930_v41, %v10241_v8  ;;  %v4291_v10 = vadd.f32 %v11932_v35, %v11931_v59 }
 0x8a5   :  { %v5704_v44 = vpop.permute.xlu0 %5703  ;;  %v5575_v5 = vadd.f32 %v5571_v9, %v5551_v40  ;;  %v5584_v51 = vpop.permute.xlu1 %5583  ;;  %v5643_v40 = vmul.f32 %v5632_v58, %v4291_v10  ;;  %v11934_v58 = vld [vmem:[#allocation16_spill] sm:$0xff] }
 0x8a6   :  { %v5595_v30 = vmul.f32 %v5584_v51, %v4202_v1 }
 0x8a7   :  { %7743 = vset.pattern.permute.xlu1 %v11625_v27  ;;  %7788 = vset.pattern.permute.xlu0 %v11731_v15 }
 0x8a8   :  { %v5599_v52 = vadd.f32 %v5595_v30, %v5575_v5  ;;  %5747 = vperm.xlu1 %7743, %v10663_v62   ;;  %6071 = vperm.xlu0 %7788, %v10665_v17   ;;  %v11933_v5 = vld [vmem:[#allocation9_spill] sm:$0xff] }
 0x8a9   :  { %v4378_v51 = vadd.f32 %v11933_v5, %v10501_v14  ;;  %v11937_v5 = vld [vmem:[#allocation13_spill] sm:$0xff] }
 0x8aa   :  { %v5776_v4 = vpop.permute.xlu0 %5775  ;;  %v5608_v45 = vpop.permute.xlu1 %5607 }
 0x8ab   :  { %v5619_v9 = vmul.f32 %v5608_v45, %v4289_v22 }
 0x8ac   :  { %7744 = vset.pattern.permute.xlu1 %v11715_v11  ;;  %7791 = vset.pattern.permute.xlu0 %v11735_v47 }
 0x8ad   :  { %v5623_v1 = vadd.f32 %v5619_v9, %v5599_v52  ;;  %5771 = vperm.xlu1 %7744, %v10663_v62   ;;  %6143 = vperm.xlu0 %7791, %v10665_v17   ;;  %v11935_v52 = vld [vmem:[#allocation10_spill] sm:$0xff] }
 0x8ae   :  { %v4380_v45 = vadd.f32 %v11935_v52, %v11934_v58  ;;  %v11936_v9 = vld [vmem:[#allocation14_spill] sm:$0xff] }
 0x8af   :  { %v5848_v30 = vpop.permute.xlu0 %5847  ;;  %v5647_v41 = vadd.f32 %v5643_v40, %v5623_v1  ;;  %v5656_v42 = vpop.permute.xlu1 %5655  ;;  %v4467_v40 = vadd.f32 %v11937_v5, %v11936_v9 }
 0x8b0   :  { %v5667_v21 = vmul.f32 %v5656_v42, %v4378_v51  ;;  %v11938_v51 = vld [vmem:[#allocation22_spill] sm:$0xff] }
 0x8b1   :  { %7746 = vset.pattern.permute.xlu1 %v11628_v28  ;;  %7794 = vset.pattern.permute.xlu0 %v11742_v16  ;;  %v5715_v42 = vmul.f32 %v5704_v44, %v4467_v40  ;;  %v11940_v44 = vld [vmem:[#allocation91_spill] sm:$0xff] }
 0x8b2   :  { %v5671_v22 = vadd.f32 %v5667_v21, %v5647_v41  ;;  %5819 = vperm.xlu1 %7746, %v10663_v62   ;;  %5470 = vperm.xlu0 %7794, %v10687_v43   ;;  %v11939_v41 = vld [vmem:[#allocation20_spill] sm:$0xff] }
 0x8b3   :  { %v4469_v52 = vadd.f32 %v11939_v41, %v11938_v51  ;;  %v11943_v41 = vld [vmem:[#allocation38_spill] sm:$0xff] }
 0x8b4   :  { %v10813_v35 = vpop.permute.xlu0 %5919  ;;  %v5680_v10 = vpop.permute.xlu1 %5679 }
 0x8b5   :  { %v5691_v1 = vmul.f32 %v5680_v10, %v4380_v45 }
 0x8b6   :  { %7747 = vset.pattern.permute.xlu1 %v11719_v39  ;;  %7796 = vset.pattern.permute.xlu0 %v11929_v57 }
 0x8b7   :  { %v5695_v21 = vadd.f32 %v5691_v1, %v5671_v22  ;;  %5843 = vperm.xlu1 %7747, %v10663_v62   ;;  %5515 = vperm.xlu0 %7796, %v10687_v43   ;;  %v11941_v22 = vld [vmem:[#allocation37_spill] sm:$0xff]  ;;  %v11942_v1 = vld [vmem:[#allocation92_spill] sm:$0xff] }
 0x8b8   :  { %v4556_v10 = vadd.f32 %v11941_v22, %v11940_v44 }
 0x8b9   :  { %v10823_v11 = vpop.permute.xlu0 %5991  ;;  %v5719_v28 = vadd.f32 %v5715_v42, %v5695_v21  ;;  %v5728_v58 = vpop.permute.xlu1 %5727  ;;  %v4558_v42 = vadd.f32 %v11943_v41, %v11942_v1  ;;  %v11948_v41 = vld [vmem:[#allocation51_spill] sm:$0xff] }
 0x8ba   :  { %v5739_v14 = vmul.f32 %v5728_v58, %v4469_v52  ;;  %v11945_v52 = vld [vmem:[#allocation89_spill] sm:$0xff] }
 0x8bb   :  { %7749 = vset.pattern.permute.xlu1 %v11629_v3  ;;  %7799 = vset.pattern.permute.xlu0 %v11608_v0  ;;  %v5787_v58 = vmul.f32 %v5776_v4, %v4558_v42  ;;  %v11946_v4 = vld [vmem:[#allocation42_spill] sm:$0xff]  ;;  %v11949_v42 = vld [vmem:[#allocation99_spill] sm:$0xff] }
 0x8bc   :  { %v5743_v45 = vadd.f32 %v5739_v14, %v5719_v28  ;;  %5891 = vperm.xlu1 %7749, %v10663_v62   ;;  %5587 = vperm.xlu0 %7799, %v10687_v43   ;;  %v11944_v14 = vld [vmem:[#allocation41_spill] sm:$0xff] }
 0x8bd   :  { %v4645_v22 = vadd.f32 %v11945_v52, %v11944_v14 }
 0x8be   :  { %v10831_v5 = vpop.permute.xlu0 %6063  ;;  %v5752_v40 = vpop.permute.xlu1 %5751 }
 0x8bf   :  { %v5763_v21 = vmul.f32 %v5752_v40, %v4556_v10 }
 0x8c0   :  { %7750 = vset.pattern.permute.xlu1 %v11723_v56  ;;  %7802 = vset.pattern.permute.xlu0 %v11609_v63 }
 0x8c1   :  { %v5767_v28 = vadd.f32 %v5763_v21, %v5743_v45  ;;  %5915 = vperm.xlu1 %7750, %v10663_v62   ;;  %5659 = vperm.xlu0 %7802, %v10687_v43   ;;  %v11947_v45 = vld [vmem:[#allocation90_spill] sm:$0xff]  ;;  %v5359_v21 = vadd.f32 %v11949_v42, %v11948_v41  ;;  %v11952_v42 = vld [vmem:[#allocation108_spill] sm:$0xff] }
 0x8c2   :  { %v4647_v40 = vadd.f32 %v11947_v45, %v11946_v4  ;;  %v11951_v45 = vld [vmem:[#allocation59_spill] sm:$0xff] }
 0x8c3   :  { %v10841_v39 = vpop.permute.xlu0 %6135  ;;  %v5791_v3 = vadd.f32 %v5787_v58, %v5767_v28  ;;  %v5800_v44 = vpop.permute.xlu1 %5799  ;;  %v11950_v58 = vld [vmem:[#allocation107_spill] sm:$0xff]  ;;  %v4736_v41 = vadd.f32 %v11952_v42, %v11951_v45 }
 0x8c4   :  { %v5811_v51 = vmul.f32 %v5800_v44, %v4645_v22  ;;  %v4734_v44 = vadd.f32 %v11950_v58, %v10557_v32  ;;  %v11956_v58 = vld [vmem:[#allocation54_spill] sm:$0xff] }
 0x8c5   :  { %7752 = vset.pattern.permute.xlu1 %v11630_v60  ;;  %7805 = vset.pattern.permute.xlu0 %v11610_v20 }
 0x8c6   :  { %v5815_v10 = vadd.f32 %v5811_v51, %v5791_v3  ;;  %5963 = vperm.xlu1 %7752, %v10663_v62   ;;  %5731 = vperm.xlu0 %7805, %v10687_v43   ;;  %v5859_v3 = vmul.f32 %v5848_v30, %v4734_v44  ;;  %v11953_v30 = vld [vmem:[#allocation111_spill] sm:$0xff] }
 0x8c8   :  { %v6208_v52 = vpop.permute.xlu0 %6207  ;;  %v5824_v56 = vpop.permute.xlu1 %5823 }
 0x8c9   :  { %v10853_v28 = vmul.f32 %v6208_v52, %v5359_v21  ;;  %v5835_v22 = vmul.f32 %v5824_v56, %v4647_v40  ;;  %v11955_v52 = vld [vmem:[#allocation112_spill] sm:$0xff] }
 0x8ca   :  { %7753 = vset.pattern.permute.xlu1 %v11727_v26  ;;  %7808 = vset.pattern.permute.xlu0 %v11611_v49  ;;  %v4825_v44 = vadd.f32 %v11956_v58, %v11955_v52  ;;  %v11960_v58 = vld [vmem:[#allocation126_spill] sm:$0xff] }
 0x8cb   :  { %v5839_v51 = vadd.f32 %v5835_v22, %v5815_v10  ;;  %5987 = vperm.xlu1 %7753, %v10663_v62   ;;  %5803 = vperm.xlu0 %7808, %v10687_v43   ;;  %v11954_v10 = vld [vmem:[#allocation53_spill] sm:$0xff] }
 0x8cc   :  { %v4823_v40 = vadd.f32 %v11954_v10, %v11953_v30 }
 0x8cd   :  { %v5863_v60 = vadd.f32 %v5859_v3, %v5839_v51  ;;  %v5872_v4 = vpop.permute.xlu1 %5871 }
 0x8ce   :  { %v5883_v14 = vmul.f32 %v5872_v4, %v4736_v41  ;;  %v5931_v4 = vmul.f32 %v10813_v35, %v4825_v44  ;;  %v11958_v35 = vld [vmem:[#allocation79_spill] sm:$0xff] }
 0x8cf   :  { %7755 = vset.pattern.permute.xlu1 %v11631_v29  ;;  %7811 = vset.pattern.permute.xlu0 %v11612_v36 }
 0x8d0   :  { %v5887_v56 = vadd.f32 %v5883_v14, %v5863_v60  ;;  %6035 = vperm.xlu1 %7755, %v10663_v62   ;;  %5875 = vperm.xlu0 %7811, %v10687_v43   ;;  %v11957_v60 = vld [vmem:[#allocation128_spill] sm:$0xff] }
 0x8d1   :  { %v4912_v14 = vadd.f32 %v11957_v60, %v10585_v18  ;;  %v11961_v60 = vld [vmem:[#allocation73_spill] sm:$0xff] }
 0x8d2   :  { %v5896_v21 = vpop.permute.xlu1 %5895 }
 0x8d3   :  { %v5907_v22 = vmul.f32 %v5896_v21, %v4823_v40  ;;  %v11959_v21 = vld [vmem:[#allocation77_spill] sm:$0xff] }
 0x8d4   :  { %7756 = vset.pattern.permute.xlu1 %v11731_v15  ;;  %7814 = vset.pattern.permute.xlu0 %v11613_v61  ;;  %v5001_v44 = vadd.f32 %v11960_v58, %v11959_v21  ;;  %v11964_v58 = vld [vmem:[#allocation29_spill] sm:$0xff] }
 0x8d5   :  { %v5911_v41 = vadd.f32 %v5907_v22, %v5887_v56  ;;  %6059 = vperm.xlu1 %7756, %v10663_v62   ;;  %5947 = vperm.xlu0 %7814, %v10687_v43   ;;  %v4914_v56 = vadd.f32 %v11958_v35, %v10589_v31 }
 0x8d7   :  { %v5935_v3 = vadd.f32 %v5931_v4, %v5911_v41  ;;  %v5944_v51 = vpop.permute.xlu1 %5943  ;;  %v6003_v4 = vmul.f32 %v10823_v11, %v5001_v44  ;;  %v11963_v11 = vld [vmem:[#allocation26_spill] sm:$0xff]  ;;  %v5092_v44 = vadd.f32 %v11964_v58, %v10617_v33  ;;  %v11968_v58 = vld [vmem:[#allocation33_spill] sm:$0xff] }
 0x8d8   :  { %v5955_v42 = vmul.f32 %v5944_v51, %v4912_v14  ;;  %v11962_v14 = vld [vmem:[#allocation122_spill] sm:$0xff] }
 0x8d9   :  { %7758 = vset.pattern.permute.xlu1 %v11634_v7  ;;  %7817 = vset.pattern.permute.xlu0 %v11635_v24 }
 0x8da   :  { %v5959_v10 = vadd.f32 %v5955_v42, %v5935_v3  ;;  %6107 = vperm.xlu1 %7758, %v10663_v62   ;;  %6019 = vperm.xlu0 %7817, %v10687_v43   ;;  %v5003_v3 = vadd.f32 %v11962_v14, %v11961_v60  ;;  %v11965_v14 = vld [vmem:[#allocation34_spill] sm:$0xff] }
 0x8dc   :  { %v5968_v40 = vpop.permute.xlu1 %5967 }
 0x8dd   :  { %v5979_v22 = vmul.f32 %v5968_v40, %v4914_v56 }
 0x8de   :  { %7759 = vset.pattern.permute.xlu1 %v11735_v47  ;;  %7820 = vset.pattern.permute.xlu0 %v11641_v6 }
 0x8df   :  { %v5983_v41 = vadd.f32 %v5979_v22, %v5959_v10  ;;  %6131 = vperm.xlu1 %7759, %v10663_v62   ;;  %6091 = vperm.xlu0 %7820, %v10687_v43   ;;  %v5090_v10 = vadd.f32 %v11963_v11, %v10613_v23 }
 0x8e1   :  { %v6007_v51 = vadd.f32 %v6003_v4, %v5983_v41  ;;  %v6016_v42 = vpop.permute.xlu1 %6015  ;;  %v6075_v4 = vmul.f32 %v10831_v5, %v5092_v44 }
 0x8e2   :  { %v6027_v35 = vmul.f32 %v6016_v42, %v5003_v3  ;;  %v11966_v3 = vld [vmem:[#allocation27_spill] sm:$0xff] }
 0x8e3   :  { %7761 = vset.pattern.permute.xlu1 %v11644_v13  ;;  %7823 = vset.pattern.permute.xlu0 %v11645_v34 }
 0x8e4   :  { %v6031_v56 = vadd.f32 %v6027_v35, %v6007_v51  ;;  %6179 = vperm.xlu1 %7761, %v10663_v62   ;;  %6163 = vperm.xlu0 %7823, %v10687_v43   ;;  %v5179_v51 = vadd.f32 %v11966_v3, %v11965_v14 }
 0x8e6   :  { %v6040_v40 = vpop.permute.xlu1 %6039 }
 0x8e7   :  { %v6051_v22 = vmul.f32 %v6040_v40, %v5090_v10  ;;  %v11967_v40 = vld [vmem:[#allocation87_spill] sm:$0xff] }
 0x8e8   :  { %7762 = vset.pattern.permute.xlu1 %v11740_v38  ;;  %7825 = vset.pattern.permute.xlu0 %v11740_v38  ;;  %v5181_v38 = vadd.f32 %v11968_v58, %v11967_v40  ;;  %v11972_v58 = vld [vmem:[#allocation105_spill] sm:$0xff] }
 0x8e9   :  { %v6055_v41 = vadd.f32 %v6051_v22, %v6031_v56  ;;  %6203 = vperm.xlu1 %7762, %v10663_v62   ;;  %6211 = vperm.xlu0 %7825, %v10687_v43   ;;  %v5268_v62 = vadd.f32 %v10635_v46, %v10641_v48  ;;  %v11970_v46 = vld [vmem:[#allocation100_spill] sm:$0xff] }
 0x8eb   :  { %v6079_v42 = vadd.f32 %v6075_v4, %v6055_v41  ;;  %v6088_v35 = vpop.permute.xlu1 %6087  ;;  %v6147_v44 = vmul.f32 %v10841_v39, %v5268_v62  ;;  %v5461_v39 = vpop.permute.xlu0 %5460  ;;  %v11973_v62 = vld [vmem:[#allocation103_spill] sm:$0xff] }
 0x8ec   :  { %v6099_v11 = vmul.f32 %v6088_v35, %v5179_v51 }
 0x8ed   :  { %7763 = vset.pattern.permute.xlu1 %v11742_v16  ;;  %v11969_v16 = vld [vmem:[#allocation136_spill] sm:$0xff] }
 0x8ee   :  { %v6103_v10 = vadd.f32 %v6099_v11, %v6079_v42  ;;  %5475 = vperm.xlu1 %7763, %v10665_v17   ;;  %v5270_v4 = vadd.f32 %v11969_v16, %v10645_v37 }
 0x8f0   :  { %v6112_v5 = vpop.permute.xlu1 %6111 }
 0x8f1   :  { %v6123_v56 = vmul.f32 %v6112_v5, %v5181_v38  ;;  %v11971_v38 = vld [vmem:[#allocation46_spill] sm:$0xff]  ;;  %v4016_v5 = vadd.f32 %v11972_v58, %v10170_v53 }
 0x8f2   :  { %7765 = vset.pattern.permute.xlu1 %v11929_v57  ;;  %v5357_v35 = vadd.f32 %v11971_v38, %v11970_v46 }
 0x8f3   :  { %v6127_v22 = vadd.f32 %v6123_v56, %v6103_v10  ;;  %5519 = vperm.xlu1 %7765, %v10665_v17   ;;  %v4018_v56 = vadd.f32 %v11973_v62, %v10176_v2  ;;  %v5478_v16 = vmul.f32 %v5461_v39, %v4016_v5  ;;  %v11976_v2 = vld [vmem:[#allocation56_spill] sm:$0xff]  ;;  %v11977_v39 = vld [vmem:[#allocation62_spill] sm:$0xff] }
 0x8f5   :  { %v6151_v41 = vadd.f32 %v6147_v44, %v6127_v22  ;;  %v6160_v3 = vpop.permute.xlu1 %6159 }
 0x8f6   :  { %v6171_v51 = vmul.f32 %v6160_v3, %v5270_v4 }
 0x8f7   :  { %7766 = vset.pattern.permute.xlu1 %v11698_v55 }
 0x8f8   :  { %v6175_v42 = vadd.f32 %v6171_v51, %v6151_v41  ;;  %5543 = vperm.xlu1 %7766, %v10665_v17   ;;  %v11974_v41 = vmov 6  }
 0x8fa   :  { %v6184_v57 = vpop.permute.xlu1 %6183 }
 0x8fb   :  { %v6195_v11 = vmul.f32 %v6184_v57, %v5357_v35 }
 0x8fc   :  { %7768 = vset.pattern.permute.xlu1 %v11608_v0  ;;  %v11975_v0 = vld [vmem:[#allocation58_spill] sm:$0xff] }
 0x8fd   :  { %v6199_v10 = vadd.f32 %v6195_v11, %v6175_v42  ;;  %5591 = vperm.xlu1 %7768, %v10665_v17   ;;  %v4105_v51 = vadd.f32 %v11975_v0, %v10204_v54  ;;  %v4194_v54 = vadd.f32 %v11977_v39, %v10461_v25 }
 0x8ff   :  { %v10928_v44 = vadd.f32 %v10853_v28, %v6199_v10  ;;  %v5484_v22 = vpop.permute.xlu1 %5483  ;;  %v4107_v28 = vadd.f32 %v11976_v2, %v10210_v50  ;;  %v5580_v10 = vpop.permute.xlu0 %5579 }
 0x900   :  { %v5498_v4 = vmul.f32 %v5484_v22, %v4018_v56  ;;  %v11979_v22 = vld [vmem:[#allocation67_spill] sm:$0xff] }
 0x901   :  { %7769 = vset.pattern.permute.xlu1 %v11974_v41 }
 0x902   :  { %v5502_v3 = vadd.f32 %v5498_v4, %v5478_v16  ;;  %5615 = vperm.xlu1 %7769, %v10665_v17   ;;  %v4283_v16 = vadd.f32 %v11979_v22, %v10241_v8  ;;  %v11988_v22 = vld [vmem:[#allocation7_spill] sm:$0xff] }
 0x904   :  { %v5508_v42 = vpop.permute.xlu1 %5507 }
 0x905   :  { %v5522_v38 = vmul.f32 %v5508_v42, %v4105_v51  ;;  %v5652_v42 = vpop.permute.xlu0 %5651 }
 0x906   :  { %7771 = vset.pattern.permute.xlu1 %v11609_v63  ;;  %v11978_v63 = vld [vmem:[#allocation119_spill] sm:$0xff] }
 0x907   :  { %v5526_v53 = vadd.f32 %v5522_v38, %v5502_v3  ;;  %5663 = vperm.xlu1 %7771, %v10665_v17   ;;  %v4196_v5 = vadd.f32 %v11978_v63, %v10469_v19  ;;  %v11980_v19 = vld [vmem:[#allocation65_spill] sm:$0xff]  ;;  %v11981_v38 = vld [vmem:[#allocation15_spill] sm:$0xff]  ;;  %v11985_v63 = vmov 15  }
 0x908   :  { %v4285_v51 = vadd.f32 %v11980_v19, %v11931_v59  ;;  %v11990_v19 = vld [vmem:[#allocation85_spill] sm:$0xff] }
 0x909   :  { %v5532_v35 = vpop.permute.xlu1 %5531  ;;  %v5594_v56 = vmul.f32 %v5580_v10, %v4196_v5  ;;  %v11986_v5 = vld [vmem:[#allocation6_spill] sm:$0xff] }
 0x90a   :  { %v5546_v57 = vmul.f32 %v5532_v35, %v4107_v28 }
 0x90b   :  { %7772 = vset.pattern.permute.xlu1 %v11671_v12 }
 0x90c   :  { %v5550_v11 = vadd.f32 %v5546_v57, %v5526_v53  ;;  %5687 = vperm.xlu1 %7772, %v10665_v17   ;;  %v11982_v53 = vld [vmem:[#allocation130_spill] sm:$0xff]  ;;  %v11983_v57 = vld [vmem:[#allocation16_spill] sm:$0xff] }
 0x90d   :  { %v4372_v2 = vadd.f32 %v11982_v53, %v11981_v38  ;;  %v11991_v53 = vmov 18  }
 0x90e   :  { %v5556_v58 = vpop.permute.xlu1 %5555 }
 0x90f   :  { %v5570_v62 = vmul.f32 %v5556_v58, %v4194_v54  ;;  %v5666_v8 = vmul.f32 %v5652_v42, %v4372_v2  ;;  %v11992_v2 = vld [vmem:[#allocation86_spill] sm:$0xff] }
 0x910   :  { %7774 = vset.pattern.permute.xlu1 %v11610_v20 }
 0x911   :  { %v5574_v50 = vadd.f32 %v5570_v62, %v5550_v11  ;;  %5735 = vperm.xlu1 %7774, %v10665_v17   ;;  %v11984_v11 = vld [vmem:[#allocation83_spill] sm:$0xff]  ;;  %v4461_v62 = vadd.f32 %v11986_v5, %v11936_v9 }
 0x912   :  { %v4374_v39 = vadd.f32 %v11984_v11, %v11983_v57  ;;  %v11994_v57 = vld [vmem:[#allocation35_spill] sm:$0xff] }
 0x913   :  { %v5604_v4 = vpop.permute.xlu1 %5603  ;;  %v5598_v3 = vadd.f32 %v5594_v56, %v5574_v50  ;;  %v5724_v56 = vpop.permute.xlu0 %5723  ;;  %v11987_v50 = vld [vmem:[#allocation22_spill] sm:$0xff] }
 0x914   :  { %v5618_v0 = vmul.f32 %v5604_v4, %v4283_v16  ;;  %v4463_v16 = vadd.f32 %v11988_v22, %v11987_v50  ;;  %v11997_v50 = vmov 21   ;;  %v11998_v22 = vld [vmem:[#allocation49_spill] sm:$0xff] }
 0x915   :  { %7775 = vset.pattern.permute.xlu1 %v11625_v27 }
 0x916   :  { %v5622_v25 = vadd.f32 %v5618_v0, %v5598_v3  ;;  %5759 = vperm.xlu1 %7775, %v10665_v17   ;;  %v5738_v3 = vmul.f32 %v5724_v56, %v4463_v16  ;;  %v4728_v16 = vadd.f32 %v11998_v22, %v10557_v32 }
 0x918   :  { %v5628_v20 = vpop.permute.xlu1 %5627 }
 0x919   :  { %v5642_v28 = vmul.f32 %v5628_v20, %v4285_v51 }
 0x91a   :  { %7777 = vset.pattern.permute.xlu1 %v11611_v49 }
 0x91b   :  { %v5646_v35 = vadd.f32 %v5642_v28, %v5622_v25  ;;  %5807 = vperm.xlu1 %7777, %v10665_v17   ;;  %v11989_v25 = vld [vmem:[#allocation91_spill] sm:$0xff]  ;;  %v4552_v28 = vadd.f32 %v11992_v2, %v11942_v1 }
 0x91c   :  { %v4550_v51 = vadd.f32 %v11990_v19, %v11989_v25 }
 0x91d   :  { %v5676_v54 = vpop.permute.xlu1 %5675  ;;  %v5670_v10 = vadd.f32 %v5666_v8, %v5646_v35  ;;  %v5796_v8 = vpop.permute.xlu0 %5795  ;;  %v11993_v35 = vld [vmem:[#allocation41_spill] sm:$0xff] }
 0x91e   :  { %v5690_v58 = vmul.f32 %v5676_v54, %v4374_v39  ;;  %v4639_v11 = vadd.f32 %v11994_v57, %v11993_v35 }
 0x91f   :  { %7778 = vset.pattern.permute.xlu1 %v11985_v63 }
 0x920   :  { %v5694_v59 = vadd.f32 %v5690_v58, %v5670_v10  ;;  %5831 = vperm.xlu1 %7778, %v10665_v17   ;;  %v5810_v54 = vmul.f32 %v5796_v8, %v4639_v11  ;;  %v11995_v58 = vld [vmem:[#allocation42_spill] sm:$0xff] }
 0x922   :  { %v5700_v49 = vpop.permute.xlu1 %5699 }
 0x923   :  { %v5714_v4 = vmul.f32 %v5700_v49, %v4461_v62 }
 0x924   :  { %7780 = vset.pattern.permute.xlu1 %v11612_v36 }
 0x925   :  { %v5718_v0 = vadd.f32 %v5714_v4, %v5694_v59  ;;  %5879 = vperm.xlu1 %7780, %v10665_v17   ;;  %v11996_v59 = vld [vmem:[#allocation36_spill] sm:$0xff]  ;;  %v5868_v4 = vpop.permute.xlu0 %5867 }
 0x926   :  { %v4641_v5 = vadd.f32 %v11996_v59, %v11995_v58 }
 0x927   :  { %v5748_v42 = vpop.permute.xlu1 %5747  ;;  %v5742_v20 = vadd.f32 %v5738_v3, %v5718_v0  ;;  %v11999_v3 = vld [vmem:[#allocation50_spill] sm:$0xff] }
 0x928   :  { %v5762_v38 = vmul.f32 %v5748_v42, %v4550_v51  ;;  %v4730_v0 = vadd.f32 %v11999_v3, %v11951_v45  ;;  %v12000_v42 = vld [vmem:[#allocation101_spill] sm:$0xff]  ;;  %v12001_v45 = vld [vmem:[#allocation102_spill] sm:$0xff] }
 0x929   :  { %7781 = vset.pattern.permute.xlu1 %v11991_v53  ;;  %v5940_v8 = vpop.permute.xlu0 %5939 }
 0x92a   :  { %v5766_v9 = vadd.f32 %v5762_v38, %v5742_v20  ;;  %5903 = vperm.xlu1 %7781, %v10665_v17   ;;  %v5882_v19 = vmul.f32 %v5868_v4, %v4730_v0  ;;  %v4817_v20 = vadd.f32 %v12000_v42, %v11953_v30 }
 0x92c   :  { %v5772_v36 = vpop.permute.xlu1 %5771 }
 0x92d   :  { %v5786_v39 = vmul.f32 %v5772_v36, %v4552_v28  ;;  %v4819_v28 = vadd.f32 %v12001_v45, %v11955_v52  ;;  %v12002_v36 = vld [vmem:[#allocation70_spill] sm:$0xff] }
 0x92e   :  { %7783 = vset.pattern.permute.xlu1 %v11613_v61  ;;  %v4906_v35 = vadd.f32 %v12002_v36, %v10585_v18  ;;  %v12004_v18 = vld [vmem:[#allocation125_spill] sm:$0xff] }
 0x92f   :  { %v5790_v10 = vadd.f32 %v5786_v39, %v5766_v9  ;;  %5951 = vperm.xlu1 %7783, %v10665_v17   ;;  %v12003_v39 = vld [vmem:[#allocation127_spill] sm:$0xff] }
 0x930   :  { %v5954_v30 = vmul.f32 %v5940_v8, %v4906_v35 }
 0x931   :  { %v5820_v62 = vpop.permute.xlu1 %5819  ;;  %v5814_v56 = vadd.f32 %v5810_v54, %v5790_v10  ;;  %v4908_v54 = vadd.f32 %v12003_v39, %v10589_v31  ;;  %v12013_v39 = vmov 4  }
 0x932   :  { %v5834_v49 = vmul.f32 %v5820_v62, %v4641_v5  ;;  %v4995_v5 = vadd.f32 %v12004_v18, %v11959_v21  ;;  %v6012_v62 = vpop.permute.xlu0 %6011  ;;  %v12015_v18 = vld [vmem:[#allocation51_spill] sm:$0xff] }
 0x933   :  { %7784 = vset.pattern.permute.xlu1 %v11997_v50 }
 0x934   :  { %v5838_v1 = vadd.f32 %v5834_v49, %v5814_v56  ;;  %5975 = vperm.xlu1 %7784, %v10665_v17   ;;  %v12005_v56 = vld [vmem:[#allocation121_spill] sm:$0xff] }
 0x935   :  { %v4997_v49 = vadd.f32 %v12005_v56, %v11961_v60  ;;  %v12007_v60 = vld [vmem:[#allocation5_spill] sm:$0xff]  ;;  %v12017_v56 = vmov 7  }
 0x936   :  { %v5844_v61 = vpop.permute.xlu1 %5843 }
 0x937   :  { %v5858_v25 = vmul.f32 %v5844_v61, %v4728_v16  ;;  %v6026_v31 = vmul.f32 %v6012_v62, %v4997_v49  ;;  %v12006_v16 = vld [vmem:[#allocation4_spill] sm:$0xff] }
 0x938   :  { %7786 = vset.pattern.permute.xlu1 %v11635_v24  ;;  %v5084_v4 = vadd.f32 %v12006_v16, %v10613_v23 }
 0x939   :  { %v5862_v51 = vadd.f32 %v5858_v25, %v5838_v1  ;;  %6023 = vperm.xlu1 %7786, %v10665_v17   ;;  %v5086_v25 = vadd.f32 %v12007_v60, %v10617_v33  ;;  %v12021_v60 = vmov 10  }
 0x93b   :  { %v5892_v38 = vpop.permute.xlu1 %5891  ;;  %v5886_v9 = vadd.f32 %v5882_v19, %v5862_v51  ;;  %v6084_v19 = vpop.permute.xlu0 %6083  ;;  %v12008_v51 = vld [vmem:[#allocation19_spill] sm:$0xff] }
 0x93c   :  { %v5906_v2 = vmul.f32 %v5892_v38, %v4817_v20  ;;  %v5173_v42 = vadd.f32 %v12008_v51, %v11965_v14  ;;  %v12009_v38 = vmov 1   ;;  %v12011_v14 = vld [vmem:[#allocation134_spill] sm:$0xff] }
 0x93d   :  { %7787 = vset.pattern.permute.xlu1 %v11631_v29 }
 0x93e   :  { %v5910_v32 = vadd.f32 %v5906_v2, %v5886_v9  ;;  %6047 = vperm.xlu1 %7787, %v10665_v17   ;;  %v6098_v23 = vmul.f32 %v6084_v19, %v5173_v42  ;;  %v12010_v2 = vld [vmem:[#allocation25_spill] sm:$0xff]  ;;  %v12023_v42 = vld [vmem:[#allocation72_spill] sm:$0xff] }
 0x93f   :  { %v6156_v36 = vpop.permute.xlu0 %6155 }
 0x940   :  { %v5916_v24 = vpop.permute.xlu1 %5915 }
 0x941   :  { %v5930_v57 = vmul.f32 %v5916_v24, %v4819_v28  ;;  %v5262_v24 = vadd.f32 %v12011_v14, %v10641_v48 }
 0x942   :  { %7789 = vset.pattern.permute.xlu1 %v11641_v6 }
 0x943   :  { %v5934_v11 = vadd.f32 %v5930_v57, %v5910_v32  ;;  %6095 = vperm.xlu1 %7789, %v10665_v17   ;;  %v5175_v32 = vadd.f32 %v12010_v2, %v11967_v40  ;;  %v12012_v57 = vld [vmem:[#allocation135_spill] sm:$0xff]  ;;  %v5496_v49 = vpop.permute.xlu0 %5495 }
 0x945   :  { %v5964_v10 = vpop.permute.xlu1 %5963  ;;  %v5958_v58 = vadd.f32 %v5954_v30, %v5934_v11  ;;  %v5264_v30 = vadd.f32 %v12012_v57, %v10645_v37  ;;  %v12016_v37 = vld [vmem:[#allocation45_spill] sm:$0xff] }
 0x946   :  { %v5978_v59 = vmul.f32 %v5964_v10, %v4908_v54 }
 0x947   :  { %7790 = vset.pattern.permute.xlu1 %v11634_v7  ;;  %v6170_v40 = vmul.f32 %v6156_v36, %v5264_v30  ;;  %v12028_v30 = vld [vmem:[#allocation31_spill] sm:$0xff] }
 0x948   :  { %v5982_v52 = vadd.f32 %v5978_v59, %v5958_v58  ;;  %6119 = vperm.xlu1 %7790, %v10665_v17  }
 0x94a   :  { %v5988_v6 = vpop.permute.xlu1 %5987 }
 0x94b   :  { %v6002_v1 = vmul.f32 %v5988_v6, %v4995_v5  ;;  %v5353_v5 = vadd.f32 %v12016_v37, %v12015_v18  ;;  %v12032_v37 = vld [vmem:[#allocation82_spill] sm:$0xff] }
 0x94c   :  { %7792 = vset.pattern.permute.xlu1 %v11645_v34 }
 0x94d   :  { %v6006_v22 = vadd.f32 %v6002_v1, %v5982_v52  ;;  %6167 = vperm.xlu1 %7792, %v10665_v17  }
 0x94f   :  { %v6036_v61 = vpop.permute.xlu1 %6035  ;;  %v6030_v3 = vadd.f32 %v6026_v31, %v6006_v22  ;;  %v12018_v22 = vld [vmem:[#allocation55_spill] sm:$0xff] }
 0x950   :  { %v6050_v0 = vmul.f32 %v6036_v61, %v5084_v4  ;;  %v5501_v16 = vmul.f32 %v5496_v49, %v12018_v22 }
 0x951   :  { %7793 = vset.pattern.permute.xlu1 %v11644_v13 }
 0x952   :  { %v6054_v21 = vadd.f32 %v6050_v0, %v6030_v3  ;;  %6191 = vperm.xlu1 %7793, %v10665_v17   ;;  %v12020_v0 = vld [vmem:[#allocation116_spill] sm:$0xff] }
 0x954   :  { %v6060_v34 = vpop.permute.xlu1 %6059 }
 0x955   :  { %v6074_v20 = vmul.f32 %v6060_v34, %v5086_v25  ;;  %v12022_v34 = vld [vmem:[#allocation114_spill] sm:$0xff] }
 0x956   :  { %7795 = vset.pattern.permute.xlu1 %v12009_v38 }
 0x957   :  { %v6078_v9 = vadd.f32 %v6074_v20, %v6054_v21  ;;  %5491 = vperm.xlu1 %7795, %v10687_v43  }
 0x959   :  { %v6108_v45 = vpop.permute.xlu1 %6107  ;;  %v6102_v28 = vadd.f32 %v6098_v23, %v6078_v9  ;;  %v12024_v9 = vld [vmem:[#allocation129_spill] sm:$0xff] }
 0x95a   :  { %v6122_v8 = vmul.f32 %v6108_v45, %v5175_v32  ;;  %v12025_v32 = vmov 13  }
 0x95b   :  { %7797 = vset.pattern.permute.xlu1 %v11698_v55  ;;  %v12014_v55 = vld [vmem:[#allocation94_spill] sm:$0xff] }
 0x95c   :  { %v6126_v33 = vadd.f32 %v6122_v8, %v6102_v28  ;;  %5539 = vperm.xlu1 %7797, %v10687_v43   ;;  %v5351_v10 = vadd.f32 %v12014_v55, %v11970_v46 }
 0x95e   :  { %v6132_v35 = vpop.permute.xlu1 %6131 }
 0x95f   :  { %v6146_v11 = vmul.f32 %v6132_v35, %v5262_v24 }
 0x960   :  { %7798 = vset.pattern.permute.xlu1 %v12013_v39  ;;  %v12029_v39 = vmov 16  }
 0x961   :  { %v6150_v54 = vadd.f32 %v6146_v11, %v6126_v33  ;;  %5563 = vperm.xlu1 %7798, %v10687_v43   ;;  %v12026_v33 = vld [vmem:[#allocation76_spill] sm:$0xff] }
 0x963   :  { %v6180_v58 = vpop.permute.xlu1 %6179  ;;  %v6174_v59 = vadd.f32 %v6170_v40, %v6150_v54 }
 0x964   :  { %v6194_v52 = vmul.f32 %v6180_v58, %v5351_v10  ;;  %v12030_v10 = vld [vmem:[#allocation32_spill] sm:$0xff] }
 0x965   :  { %7800 = vset.pattern.permute.xlu1 %v11974_v41  ;;  %v12019_v41 = vld [vmem:[#allocation57_spill] sm:$0xff] }
 0x966   :  { %v6198_v48 = vadd.f32 %v6194_v52, %v6174_v59  ;;  %5611 = vperm.xlu1 %7800, %v10687_v43  }
 0x968   :  { %v6204_v62 = vpop.permute.xlu1 %6203 }
 0x969   :  { %v6218_v6 = vmul.f32 %v6204_v62, %v5353_v5  ;;  %v12033_v62 = vmov 19  }
 0x96a   :  { %7801 = vset.pattern.permute.xlu1 %v12017_v56 }
 0x96b   :  { %v6222_v1 = vadd.f32 %v6218_v6, %v6198_v48  ;;  %5635 = vperm.xlu1 %7801, %v10687_v43  }
 0x96d   :  { %v5476_v46 = vpop.permute.xlu1 %5475  ;;  %v7447_v31 = vpack.c.bf16 %v10928_v44, %v6222_v1  ;;  %v5568_v44 = vpop.permute.xlu0 %5567  ;;  %v12034_v1 = vld [vmem:[#allocation97_spill] sm:$0xff] }
 0x96e   :  { %v5481_v4 = vmul.f32 %v5476_v46, %v12019_v41 }
 0x96f   :  { %7448 = vmatprep.subr.bf16.mxu0 %v7447_v31  ;;  %7803 = vset.pattern.permute.xlu1 %v11671_v12  ;;  %v5573_v12 = vmul.f32 %v5568_v44, %v12023_v42  ;;  %v12039_v42 = vld [vmem:[#allocation69_spill] sm:$0xff] }
 0x970   :  { %v5505_v61 = vadd.f32 %v5501_v16, %v5481_v4  ;;  %7450 = vmatpush3.bf16.msra.mxu0 %v7447_v31  ;;  %5683 = vperm.xlu1 %7803, %v10687_v43   ;;  %v12036_v4 = vld [vmem:[#allocation47_spill] sm:$0xff] }
 0x971   :  { %v5640_v28 = vpop.permute.xlu0 %5639 }
 0x972   :  { %v5520_v3 = vpop.permute.xlu1 %5519 }
 0x973   :  { %v5525_v21 = vmul.f32 %v5520_v3, %v12020_v0 }
 0x974   :  { %7804 = vset.pattern.permute.xlu1 %v12021_v60  ;;  %v12037_v60 = vld [vmem:[#allocation48_spill] sm:$0xff] }
 0x975   :  { %v5529_v25 = vadd.f32 %v5525_v21, %v5505_v61  ;;  %5707 = vperm.xlu1 %7804, %v10687_v43   ;;  %v5712_v54 = vpop.permute.xlu0 %5711 }
 0x977   :  { %v5544_v19 = vpop.permute.xlu1 %5543 }
 0x978   :  { %v5549_v51 = vmul.f32 %v5544_v19, %v12022_v34 }
 0x979   :  { %7806 = vset.pattern.permute.xlu1 %v11625_v27  ;;  %v12027_v27 = vld [vmem:[#allocation8_spill] sm:$0xff]  ;;  %v5784_v56 = vpop.permute.xlu0 %5783 }
 0x97a   :  { %v5553_v20 = vadd.f32 %v5549_v51, %v5529_v25  ;;  %5755 = vperm.xlu1 %7806, %v10687_v43   ;;  %v5645_v24 = vmul.f32 %v5640_v28, %v12027_v27 }
 0x97c   :  { %v5577_v38 = vadd.f32 %v5573_v12, %v5553_v20  ;;  %v5592_v23 = vpop.permute.xlu1 %5591 }
 0x97d   :  { %v5597_v2 = vmul.f32 %v5592_v23, %v12024_v9  ;;  %v5856_v0 = vpop.permute.xlu0 %5855  ;;  %v12040_v23 = vld [vmem:[#allocation68_spill] sm:$0xff] }
 0x97e   :  { %7807 = vset.pattern.permute.xlu1 %v12025_v32 }
 0x97f   :  { %v5601_v45 = vadd.f32 %v5597_v2, %v5577_v38  ;;  %5779 = vperm.xlu1 %7807, %v10687_v43  }
 0x981   :  { %v5616_v8 = vpop.permute.xlu1 %5615  ;;  %v5928_v20 = vpop.permute.xlu0 %5927 }
 0x982   :  { %v5621_v14 = vmul.f32 %v5616_v8, %v12026_v33  ;;  %v12042_v8 = vld [vmem:[#allocation2_spill] sm:$0xff] }
 0x983   :  { %7809 = vset.pattern.permute.xlu1 %v11985_v63  ;;  %v12031_v63 = vld [vmem:[#allocation80_spill] sm:$0xff] }
 0x984   :  { %v5625_v36 = vadd.f32 %v5621_v14, %v5601_v45  ;;  %5827 = vperm.xlu1 %7809, %v10687_v43   ;;  %v5717_v59 = vmul.f32 %v5712_v54, %v12031_v63  ;;  %v12046_v54 = vmov 31  }
 0x985   :  { %v6000_v14 = vpop.permute.xlu0 %5999 }
 0x986   :  { %v5649_v35 = vadd.f32 %v5645_v24, %v5625_v36  ;;  %v5664_v57 = vpop.permute.xlu1 %5663  ;;  %v12043_v24 = vld [vmem:[#allocation3_spill] sm:$0xff] }
 0x987   :  { %v5669_v11 = vmul.f32 %v5664_v57, %v12028_v30 }
 0x988   :  { %7810 = vset.pattern.permute.xlu1 %v12029_v39  ;;  %v12045_v39 = vld [vmem:[#allocation17_spill] sm:$0xff] }
 0x989   :  { %v5673_v40 = vadd.f32 %v5669_v11, %v5649_v35  ;;  %5851 = vperm.xlu1 %7810, %v10687_v43  }
 0x98b   :  { %v5688_v55 = vpop.permute.xlu1 %5687 }
 0x98c   :  { %v5693_v58 = vmul.f32 %v5688_v55, %v12030_v10  ;;  %v6072_v55 = vpop.permute.xlu0 %6071 }
 0x98d   :  { %7812 = vset.pattern.permute.xlu1 %v11991_v53  ;;  %v12035_v53 = vld [vmem:[#allocation98_spill] sm:$0xff] }
 0x98e   :  { %v5697_v52 = vadd.f32 %v5693_v58, %v5673_v40  ;;  %5899 = vperm.xlu1 %7812, %v10687_v43   ;;  %v5789_v31 = vmul.f32 %v5784_v56, %v12035_v53  ;;  %v12047_v58 = vld [vmem:[#allocation132_spill] sm:$0xff]  ;;  %v12050_v53 = vld [vmem:[#allocation93_spill] sm:$0xff] }
 0x990   :  { %v5721_v48 = vadd.f32 %v5717_v59, %v5697_v52  ;;  %v5736_v18 = vpop.permute.xlu1 %5735  ;;  %v12048_v59 = vld [vmem:[#allocation133_spill] sm:$0xff]  ;;  %v6144_v56 = vpop.permute.xlu0 %6143 }
 0x991   :  { %v5741_v5 = vmul.f32 %v5736_v18, %v12032_v37  ;;  %v12049_v37 = vld [vmem:[#allocation40_spill] sm:$0xff] }
 0x992   :  { %7813 = vset.pattern.permute.xlu1 %v12033_v62  ;;  %v6403_v62 = vld [vmem:[%s11270_s22] sm:$0xff] }
 0x993   :  { %v5745_v6 = vadd.f32 %v5741_v5, %v5721_v48  ;;  %5923 = vperm.xlu1 %7813, %v10687_v43  }
 0x995   :  { %v5760_v49 = vpop.permute.xlu1 %5759 }
 0x996   :  { %v5765_v46 = vmul.f32 %v5760_v49, %v12034_v1 }
 0x997   :  { %7815 = vset.pattern.permute.xlu1 %v11997_v50  ;;  %v12038_v50 = vld [vmem:[#allocation118_spill] sm:$0xff] }
 0x998   :  { %v5769_v22 = vadd.f32 %v5765_v46, %v5745_v6  ;;  %5971 = vperm.xlu1 %7815, %v10687_v43   ;;  %v5861_v44 = vmul.f32 %v5856_v0, %v12038_v50  ;;  %v6405_v6 = vld [vmem:[%s11270_s22 + $0x10] sm:$0xff]  ;;  %v6406_v46 = vld [vmem:[%s11270_s22 + $0x18] sm:$0xff] }
 0x999   :  { %v6410_v50 = vld [vmem:[%s11270_s22 + $0x38] sm:$0xff] }
 0x99a   :  { %v5793_v16 = vadd.f32 %v5789_v31, %v5769_v22  ;;  %v5808_v41 = vpop.permute.xlu1 %5807  ;;  %v7459_v22 = vpack.c.bf16 %v6406_v46, %v6405_v6  ;;  %v12061_v6 = vld [vmem:[#allocation78_spill] sm:$0xff] }
 0x99b   :  { %v5813_v61 = vmul.f32 %v5808_v41, %v12036_v4  ;;  %v6408_v41 = vld [vmem:[%s11270_s22 + $0x28] sm:$0xff] }
 0x99c   :  { %7816 = vset.pattern.permute.xlu1 %v11727_v26  ;;  %v12051_v4 = vld [vmem:[#allocation139_spill] sm:$0xff] }
 0x99d   :  { %v5817_v3 = vadd.f32 %v5813_v61, %v5793_v16  ;;  %5995 = vperm.xlu1 %7816, %v10687_v43   ;;  %v6407_v16 = vld [vmem:[%s11270_s22 + $0x20] sm:$0xff]  ;;  %v6149_v61 = vmul.f32 %v6144_v56, %v12051_v4 }
 0x99e   :  { %v7463_v0 = vpack.c.bf16 %v6408_v41, %v6407_v16 }
 0x99f   :  { %v5832_v21 = vpop.permute.xlu1 %5831 }
 0x9a0   :  { %v5837_v25 = vmul.f32 %v5832_v21, %v12037_v60 }
 0x9a1   :  { %7818 = vset.pattern.permute.xlu1 %v11631_v29  ;;  %v12041_v29 = vld [vmem:[#allocation64_spill] sm:$0xff] }
 0x9a2   :  { %v5841_v19 = vadd.f32 %v5837_v25, %v5817_v3  ;;  %6043 = vperm.xlu1 %7818, %v10687_v43   ;;  %v5933_v2 = vmul.f32 %v5928_v20, %v12041_v29  ;;  %v6409_v25 = vld [vmem:[%s11270_s22 + $0x30] sm:$0xff] }
 0x9a4   :  { %v5865_v34 = vadd.f32 %v5861_v44, %v5841_v19  ;;  %v5880_v51 = vpop.permute.xlu1 %5879  ;;  %v12052_v44 = vld [vmem:[#allocation140_spill] sm:$0xff] }
 0x9a5   :  { %v5885_v12 = vmul.f32 %v5880_v51, %v12039_v42  ;;  %v7467_v51 = vpack.c.bf16 %v6410_v50, %v6409_v25  ;;  %v5471_v42 = vpop.permute.xlu0 %5470 }
 0x9a6   :  { %7819 = vset.pattern.permute.xlu1 %v11731_v15 }
 0x9a7   :  { %v5889_v26 = vadd.f32 %v5885_v12, %v5865_v34  ;;  %6067 = vperm.xlu1 %7819, %v10687_v43   ;;  %v6411_v12 = vld [vmem:[%s11270_s22 + $0x40] sm:$0xff] }
 0x9a9   :  { %v5904_v38 = vpop.permute.xlu1 %5903 }
 0x9aa   :  { %v5909_v9 = vmul.f32 %v5904_v38, %v12040_v23  ;;  %v12053_v38 = vld [vmem:[#allocation110_spill] sm:$0xff] }
 0x9ab   :  { %7821 = vset.pattern.permute.xlu1 %v11634_v7  ;;  %v12044_v7 = vld [vmem:[#allocation11_spill] sm:$0xff] }
 0x9ac   :  { %v5913_v32 = vadd.f32 %v5909_v9, %v5889_v26  ;;  %6115 = vperm.xlu1 %7821, %v10687_v43   ;;  %v6005_v35 = vmul.f32 %v6000_v14, %v12044_v7  ;;  %v6412_v26 = vld [vmem:[%s11270_s22 + $0x48] sm:$0xff] }
 0x9ad   :  { %v7471_v9 = vpack.c.bf16 %v6412_v26, %v6411_v12  ;;  %v12056_v7 = vld [vmem:[#allocation115_spill] sm:$0xff]  ;;  %v12067_v26 = vld [vmem:[#allocation44_spill] sm:$0xff] }
 0x9ae   :  { %v5937_v45 = vadd.f32 %v5933_v2, %v5913_v32  ;;  %v5952_v28 = vpop.permute.xlu1 %5951  ;;  %v6413_v2 = vld [vmem:[%s11270_s22 + $0x50] sm:$0xff]  ;;  %v6414_v32 = vld [vmem:[%s11270_s22 + $0x58] sm:$0xff] }
 0x9af   :  { %v5957_v33 = vmul.f32 %v5952_v28, %v12042_v8  ;;  %v12054_v8 = vld [vmem:[#allocation106_spill] sm:$0xff] }
 0x9b0   :  { %7822 = vset.pattern.permute.xlu1 %v11735_v47 }
 0x9b1   :  { %v5961_v15 = vadd.f32 %v5957_v33, %v5937_v45  ;;  %6139 = vperm.xlu1 %7822, %v10687_v43   ;;  %v5516_v45 = vpop.permute.xlu0 %5515  ;;  %v5480_v33 = vmul.f32 %v5471_v42, %v12054_v8 }
 0x9b3   :  { %v5976_v27 = vpop.permute.xlu1 %5975 }
 0x9b4   :  { %v5981_v36 = vmul.f32 %v5976_v27, %v12043_v24  ;;  %v7475_v27 = vpack.c.bf16 %v6414_v32, %v6413_v2  ;;  %v6415_v24 = vld [vmem:[%s11270_s22 + $0x60] sm:$0xff] }
 0x9b5   :  { %7824 = vset.pattern.permute.xlu1 %v11644_v13  ;;  %v6077_v13 = vmul.f32 %v6072_v55, %v12048_v59  ;;  %v5588_v55 = vpop.permute.xlu0 %5587  ;;  %v12059_v59 = vld [vmem:[#allocation71_spill] sm:$0xff] }
 0x9b6   :  { %v5985_v57 = vadd.f32 %v5981_v36, %v5961_v15  ;;  %6187 = vperm.xlu1 %7824, %v10687_v43   ;;  %v12055_v15 = vld [vmem:[#allocation104_spill] sm:$0xff]  ;;  %v6416_v36 = vld [vmem:[%s11270_s22 + $0x68] sm:$0xff] }
 0x9b8   :  { %v6009_v30 = vadd.f32 %v6005_v35, %v5985_v57  ;;  %v6024_v11 = vpop.permute.xlu1 %6023  ;;  %v5524_v35 = vmul.f32 %v5516_v45, %v12056_v7  ;;  %v12069_v45 = vld [vmem:[#allocation96_spill] sm:$0xff] }
 0x9b9   :  { %v6029_v40 = vmul.f32 %v6024_v11, %v12045_v39  ;;  %v7479_v39 = vpack.c.bf16 %v6416_v36, %v6415_v24  ;;  %v12071_v24 = vld [vmem:[#allocation117_spill] sm:$0xff] }
 0x9ba   :  { %7826 = vset.pattern.permute.xlu1 %v12046_v54 }
 0x9bb   :  { %v6033_v47 = vadd.f32 %v6029_v40, %v6009_v30  ;;  %6215 = vperm.xlu1 %7826, %v10665_v17   ;;  %v6404_v17 = vld [vmem:[%s11270_s22 + $0x8] sm:$0xff]  ;;  %v12057_v40 = vld [vmem:[#allocation113_spill] sm:$0xff] }
 0x9bc   :  { %v7455_v1 = vpack.c.bf16 %v6404_v17, %v6403_v62  ;;  %v5660_v62 = vpop.permute.xlu0 %5659 }
 0x9bd   :  { %v6048_v10 = vpop.permute.xlu1 %6047 }
 0x9be   :  { %v6053_v63 = vmul.f32 %v6048_v10, %v12047_v58  ;;  %7456 = vmatprep.subr.bf16.mxu1 %v7455_v1  ;;  %v12058_v58 = vld [vmem:[#allocation120_spill] sm:$0xff] }
 0x9bf   :  { %7458 = vmatpush3.bf16.msra.mxu1 %v7455_v1 }
 0x9c0   :  { %v6057_v52 = vadd.f32 %v6053_v63, %v6033_v47  ;;  %7460 = vmatprep.subr.bf16.mxu1 %v7459_v22  ;;  %v5732_v4 = vpop.permute.xlu0 %5731 }
 0x9c2   :  { %v6081_v48 = vadd.f32 %v6077_v13, %v6057_v52  ;;  %v6096_v18 = vpop.permute.xlu1 %6095  ;;  %v5596_v13 = vmul.f32 %v5588_v55, %v12059_v59 }
 0x9c3   :  { %v6101_v43 = vmul.f32 %v6096_v18, %v12049_v37  ;;  %7462 = vmatpush3.bf16.msra.mxu1 %v7459_v22  ;;  %v12060_v37 = vld [vmem:[#allocation75_spill] sm:$0xff]  ;;  %v12063_v22 = vld [vmem:[#allocation24_spill] sm:$0xff] }
 0x9c4   :  { %7464 = vmatprep.subr.bf16.mxu1 %v7463_v0  ;;  %v5804_v42 = vpop.permute.xlu0 %5803 }
 0x9c5   :  { %v6105_v5 = vadd.f32 %v6101_v43, %v6081_v48 }
 0x9c7   :  { %v6120_v49 = vpop.permute.xlu1 %6119  ;;  %7466 = vmatpush3.bf16.msra.mxu1 %v7463_v0 }
 0x9c8   :  { %v6125_v31 = vmul.f32 %v6120_v49, %v12050_v53  ;;  %7468 = vmatprep.subr.bf16.mxu1 %v7467_v51  ;;  %v12062_v49 = vld [vmem:[#allocation23_spill] sm:$0xff] }
 0x9c9   :  { %v5668_v1 = vmul.f32 %v5660_v62, %v12062_v49 }
 0x9ca   :  { %v6129_v3 = vadd.f32 %v6125_v31, %v6105_v5 }
 0x9cb   :  { %7470 = vmatpush3.bf16.msra.mxu1 %v7467_v51 }
 0x9cc   :  { %v6153_v21 = vadd.f32 %v6149_v61, %v6129_v3  ;;  %v6168_v60 = vpop.permute.xlu1 %6167  ;;  %7472 = vmatprep.subr.bf16.mxu1 %v7471_v9  ;;  %v12064_v3 = vld [vmem:[#allocation28_spill] sm:$0xff] }
 0x9cd   :  { %v6173_v19 = vmul.f32 %v6168_v60, %v12052_v44 }
 0x9cf   :  { %v6177_v34 = vadd.f32 %v6173_v19, %v6153_v21  ;;  %7474 = vmatpush3.bf16.msra.mxu1 %v7471_v9  ;;  %v12065_v21 = vld [vmem:[#allocation30_spill] sm:$0xff]  ;;  %v12066_v19 = vld [vmem:[#allocation43_spill] sm:$0xff] }
 0x9d0   :  { %7476 = vmatprep.subr.bf16.mxu1 %v7475_v27  ;;  %v5740_v60 = vmul.f32 %v5732_v4, %v12065_v21 }
 0x9d1   :  { %v6192_v20 = vpop.permute.xlu1 %6191 }
 0x9d2   :  { %v6197_v23 = vmul.f32 %v6192_v20, %v12053_v38  ;;  %v12068_v38 = vld [vmem:[#allocation95_spill] sm:$0xff] }
 0x9d3   :  { %7478 = vmatpush3.bf16.msra.mxu1 %v7475_v27 }
 0x9d4   :  { %v11128_v29 = vadd.f32 %v6197_v23, %v6177_v34  ;;  %7480 = vmatprep.subr.bf16.mxu1 %v7479_v39  ;;  %v5812_v23 = vmul.f32 %v5804_v42, %v12068_v38 }
 0x9d6   :  { %v5492_v28 = vpop.permute.xlu1 %5491 }
 0x9d7   :  { %v5500_v14 = vmul.f32 %v5492_v28, %v12055_v15  ;;  %7482 = vmatpush3.bf16.msra.mxu1 %v7479_v39 }
 0x9d9   :  { %v5504_v57 = vadd.f32 %v5500_v14, %v5480_v33  ;;  %v5876_v33 = vpop.permute.xlu0 %5875  ;;  %v12070_v14 = vld [vmem:[#allocation60_spill] sm:$0xff] }
 0x9da   :  { %v5884_v36 = vmul.f32 %v5876_v33, %v12071_v24 }
 0x9db   :  { %v5540_v30 = vpop.permute.xlu1 %5539  ;;  %v5528_v11 = vadd.f32 %v5524_v35, %v5504_v57 }
 0x9dc   :  { %v5548_v54 = vmul.f32 %v5540_v30, %v12057_v40  ;;  %v12072_v30 = vld [vmem:[#allocation63_spill] sm:$0xff] }
 0x9dd   :  { %v5948_v40 = vpop.permute.xlu0 %5947 }
 0x9de   :  { %v5552_v47 = vadd.f32 %v5548_v54, %v5528_v11 }
 0x9e0   :  { %v5564_v10 = vpop.permute.xlu1 %5563 }
 0x9e1   :  { %v5572_v63 = vmul.f32 %v5564_v10, %v12058_v58  ;;  %v12074_v10 = vld [vmem:[#allocation81_spill] sm:$0xff] }
 0x9e2   :  { %v5956_v58 = vmul.f32 %v5948_v40, %v12074_v10  ;;  %v6508_v10 = vld [vmem:[%s11271_s24 + $0x28] sm:$0xff] }
 0x9e3   :  { %v5576_v52 = vadd.f32 %v5572_v63, %v5552_v47  ;;  %v12073_v47 = vld [vmem:[#allocation131_spill] sm:$0xff] }
 0x9e5   :  { %v5612_v48 = vpop.permute.xlu1 %5611  ;;  %v5600_v18 = vadd.f32 %v5596_v13, %v5576_v52  ;;  %v12075_v52 = vld [vmem:[#allocation84_spill] sm:$0xff] }
 0x9e6   :  { %v5620_v43 = vmul.f32 %v5612_v48, %v12060_v37  ;;  %v6020_v37 = vpop.permute.xlu0 %6019 }
 0x9e8   :  { %v5624_v5 = vadd.f32 %v5620_v43, %v5600_v18 }
 0x9ea   :  { %v5636_v17 = vpop.permute.xlu1 %5635 }
 0x9eb   :  { %v5644_v56 = vmul.f32 %v5636_v17, %v12061_v6  ;;  %v12077_v17 = vld [vmem:[#allocation12_spill] sm:$0xff] }
 0x9ec   :  { %v6028_v6 = vmul.f32 %v6020_v37, %v12077_v17  ;;  %v6513_v37 = vld [vmem:[%s11271_s24 + $0x50] sm:$0xff]  ;;  %v6516_v17 = vld [vmem:[%s11271_s24 + $0x68] sm:$0xff] }
 0x9ed   :  { %v5648_v46 = vadd.f32 %v5644_v56, %v5624_v5  ;;  %v12076_v5 = vld [vmem:[#allocation74_spill] sm:$0xff] }
 0x9ef   :  { %v5684_v53 = vpop.permute.xlu1 %5683  ;;  %v5672_v31 = vadd.f32 %v5668_v1, %v5648_v46  ;;  %v12078_v46 = vld [vmem:[#allocation18_spill] sm:$0xff] }
 0x9f0   :  { %v5692_v16 = vmul.f32 %v5684_v53, %v12063_v22  ;;  %v6092_v22 = vpop.permute.xlu0 %6091 }
 0x9f2   :  { %v5696_v41 = vadd.f32 %v5692_v16, %v5672_v31 }
 0x9f4   :  { %v5708_v61 = vpop.permute.xlu1 %5707 }
 0x9f5   :  { %v5716_v0 = vmul.f32 %v5708_v61, %v12064_v3  ;;  %v12080_v61 = vld [vmem:[#allocation88_spill] sm:$0xff] }
 0x9f6   :  { %v6100_v3 = vmul.f32 %v6092_v22, %v12080_v61  ;;  %v6782_v61 = vld [vmem:[%s11273_s23] ss:$0 sm:$0xff] }
 0x9f7   :  { %v5720_v25 = vadd.f32 %v5716_v0, %v5696_v41  ;;  %v12079_v41 = vld [vmem:[#allocation21_spill] sm:$0xff] }
 0x9f9   :  { %v5756_v50 = vpop.permute.xlu1 %5755  ;;  %v5744_v44 = vadd.f32 %v5740_v60, %v5720_v25  ;;  %v12081_v25 = vld [vmem:[#allocation39_spill] sm:$0xff] }
 0x9fa   :  { %v5764_v34 = vmul.f32 %v5756_v50, %v12066_v19  ;;  %v6164_v19 = vpop.permute.xlu0 %6163 }
 0x9fc   :  { %v5768_v51 = vadd.f32 %v5764_v34, %v5744_v44 }
 0x9fe   :  { %v5780_v12 = vpop.permute.xlu1 %5779  ;;  %v6212_v38 = vpop.permute.xlu0 %6211 }
 0x9ff   :  { %v5788_v20 = vmul.f32 %v5780_v12, %v12067_v26  ;;  %v12083_v12 = vld [vmem:[#allocation138_spill] sm:$0xff] }
 0xa00   :  { %v6172_v26 = vmul.f32 %v6164_v19, %v12083_v12 }
 0xa01   :  { %v5792_v9 = vadd.f32 %v5788_v20, %v5768_v51  ;;  %v12082_v51 = vld [vmem:[#allocation137_spill] sm:$0xff] }
 0xa03   :  { %v5828_v2 = vpop.permute.xlu1 %5827  ;;  %v5816_v32 = vadd.f32 %v5812_v23, %v5792_v9 }
 0xa04   :  { %v5836_v28 = vmul.f32 %v5828_v2, %v12069_v45  ;;  %v12084_v2 = vld [vmem:[#allocation52_spill] sm:$0xff]  ;;  %v12085_v45 = vld [vmem:[#allocation109_spill] sm:$0xff] }
 0xa06   :  { %v5840_v8 = vadd.f32 %v5836_v28, %v5816_v32  ;;  %v6220_v28 = vmul.f32 %v6212_v38, %v12085_v45 }
 0xa08   :  { %v5852_v15 = vpop.permute.xlu1 %5851 }
 0xa09   :  { %v5860_v27 = vmul.f32 %v5852_v15, %v12070_v14  ;;  %v12086_v14 = vld [vmem:[#allocation61_spill] sm:$0xff] }
 0xa0b   :  { %v5864_v7 = vadd.f32 %v5860_v27, %v5840_v8 }
 0xa0d   :  { %v5900_v35 = vpop.permute.xlu1 %5899  ;;  %v5888_v57 = vadd.f32 %v5884_v36, %v5864_v7  ;;  %v7842_v7 = vld [vmem:[%s11474_s2 + $0x8] sm:$0xff] }
 0xa0e   :  { %v5908_v11 = vmul.f32 %v5900_v35, %v12072_v30  ;;  %v6417_v35 = vld [vmem:[%s11270_s22 + $0x70] sm:$0xff] }
 0xa10   :  { %v5912_v39 = vadd.f32 %v5908_v11, %v5888_v57  ;;  %v6418_v57 = vld [vmem:[%s11270_s22 + $0x78] sm:$0xff]  ;;  %v6504_v11 = vld [vmem:[%s11271_s24 + $0x8] sm:$0xff] }
 0xa11   :  { %v7483_v30 = vpack.c.bf16 %v6418_v57, %v6417_v35 }
 0xa12   :  { %v5924_v54 = vpop.permute.xlu1 %5923 }
 0xa13   :  { %v5932_v55 = vmul.f32 %v5924_v54, %v12073_v47  ;;  %7484 = vmatprep.subr.bf16.mxu1 %v7483_v30  ;;  %v6506_v54 = vld [vmem:[%s11271_s24 + $0x18] sm:$0xff] }
 0xa14   :  { %7486 = vmatpush3.bf16.msra.mxu1 %v7483_v30 }
 0xa15   :  { %v5936_v63 = vadd.f32 %v5932_v55, %v5912_v39  ;;  %v6505_v39 = vld [vmem:[%s11271_s24 + $0x10] sm:$0xff]  ;;  %v6507_v55 = vld [vmem:[%s11271_s24 + $0x20] sm:$0xff] }
 0xa16   :  { %v7491_v47 = vpack.c.bf16 %v6506_v54, %v6505_v39 }
 0xa17   :  { %v5972_v59 = vpop.permute.xlu1 %5971  ;;  %v5960_v13 = vadd.f32 %v5956_v58, %v5936_v63  ;;  %v7495_v58 = vpack.c.bf16 %v6508_v10, %v6507_v55  ;;  %v6509_v63 = vld [vmem:[%s11271_s24 + $0x30] sm:$0xff] }
 0xa18   :  { %v5980_v48 = vmul.f32 %v5972_v59, %v12075_v52  ;;  %v6510_v59 = vld [vmem:[%s11271_s24 + $0x38] sm:$0xff]  ;;  %v6511_v52 = vld [vmem:[%s11271_s24 + $0x40] sm:$0xff] }
 0xa1a   :  { %v5984_v18 = vadd.f32 %v5980_v48, %v5960_v13  ;;  %v7499_v13 = vpack.c.bf16 %v6510_v59, %v6509_v63  ;;  %v6512_v48 = vld [vmem:[%s11271_s24 + $0x48] sm:$0xff] }
 0xa1c   :  { %v5996_v43 = vpop.permute.xlu1 %5995 }
 0xa1d   :  { %v6004_v62 = vmul.f32 %v5996_v43, %v12076_v5  ;;  %v6514_v43 = vld [vmem:[%s11271_s24 + $0x58] sm:$0xff] }
 0xa1e   :  { %v7507_v5 = vpack.c.bf16 %v6514_v43, %v6513_v37 }
 0xa1f   :  { %v6008_v56 = vadd.f32 %v6004_v62, %v5984_v18  ;;  %v7503_v18 = vpack.c.bf16 %v6512_v48, %v6511_v52  ;;  %v6515_v62 = vld [vmem:[%s11271_s24 + $0x60] sm:$0xff] }
 0xa21   :  { %v6044_v49 = vpop.permute.xlu1 %6043  ;;  %v6032_v1 = vadd.f32 %v6028_v6, %v6008_v56  ;;  %v7511_v6 = vpack.c.bf16 %v6516_v17, %v6515_v62  ;;  %v6781_v56 = vld [vmem:[%s11272_s21] ss:$0 sm:$0xff] }
 0xa22   :  { %v6052_v53 = vmul.f32 %v6044_v49, %v12078_v46 }
 0xa24   :  { %v6056_v31 = vadd.f32 %v6052_v53, %v6032_v1 }
 0xa26   :  { %v6068_v16 = vpop.permute.xlu1 %6067 }
 0xa27   :  { %v6076_v4 = vmul.f32 %v6068_v16, %v12079_v41  ;;  %v6517_v16 = vld [vmem:[%s11271_s24 + $0x70] sm:$0xff]  ;;  %v6518_v41 = vld [vmem:[%s11271_s24 + $0x78] sm:$0xff] }
 0xa29   :  { %v6080_v0 = vadd.f32 %v6076_v4, %v6056_v31  ;;  %v7515_v4 = vpack.c.bf16 %v6518_v41, %v6517_v16 }
 0xa2b   :  { %v6116_v21 = vpop.permute.xlu1 %6115  ;;  %v6104_v60 = vadd.f32 %v6100_v3, %v6080_v0 }
 0xa2c   :  { %v6124_v50 = vmul.f32 %v6116_v21, %v12081_v25 }
 0xa2e   :  { %v6128_v44 = vadd.f32 %v6124_v50, %v6104_v60 }
 0xa30   :  { %v6140_v34 = vpop.permute.xlu1 %6139 }
 0xa31   :  { %v6148_v42 = vmul.f32 %v6140_v34, %v12082_v51 }
 0xa33   :  { %v6152_v20 = vadd.f32 %v6148_v42, %v6128_v44  ;;  %v6783_v44 = vld [vmem:[%s11274_s25] ss:$0 sm:$0xff] }
 0xa35   :  { %v6188_v23 = vpop.permute.xlu1 %6187  ;;  %v6176_v9 = vadd.f32 %v6172_v26, %v6152_v20 }
 0xa36   :  { %v6196_v32 = vmul.f32 %v6188_v23, %v12084_v2 }
 0xa38   :  { %v6200_v8 = vadd.f32 %v6196_v32, %v6176_v9 }
 0xa3a   :  { %v6224_v33 = vadd.f32 %v6220_v28, %v6200_v8  ;;  %v6216_v15 = vpop.permute.xlu1 %6215 }
 0xa3b   :  { %v6221_v27 = vmul.f32 %v6216_v15, %v12086_v14 }
 0xa3d   :  { %v6225_v24 = vadd.f32 %v6221_v27, %v11128_v29  ;;  %v6503_v29 = vld [vmem:[%s11271_s24] sm:$0xff] }
 0xa3e   :  { %v7487_v40 = vpack.c.bf16 %v6504_v11, %v6503_v29 }
 0xa3f   :  { %v7451_v36 = vpack.c.bf16 %v6225_v24, %v6224_v33 }
 0xa41   :  { %7452 = vmatprep.subr.bf16.mxu0 %v7451_v36 }
 0xa42   :  { %7454 = vmatpush3.bf16.msra.mxu0 %v7451_v36 }
 0xa43   :  { %7488 = vmatprep.subr.bf16.mxu0 %v7487_v40 }
 0xa45   :  { %7115 = vmatmul.mubr.msk.f32.vlgmr.msra.gmra.mrb[142].mxu0 %vm714_vm3, %v7842_v7 }
 0xa46   :  { %7490 = vmatpush3.bf16.msra.mxu0 %v7487_v40 }
 0xa47   :  { %7492 = vmatprep.subr.bf16.mxu0 %v7491_v47 }
 0xa4a   :  { %7494 = vmatpush3.bf16.msra.mxu0 %v7491_v47 }
 0xa4b   :  { %7496 = vmatprep.subr.bf16.mxu0 %v7495_v58 }
 0xa4e   :  { %7498 = vmatpush3.bf16.msra.mxu0 %v7495_v58 }
 0xa4f   :  { %7500 = vmatprep.subr.bf16.mxu0 %v7499_v13 }
 0xa52   :  { %7502 = vmatpush3.bf16.msra.mxu0 %v7499_v13 }
 0xa53   :  { %7504 = vmatprep.subr.bf16.mxu0 %v7503_v18 }
 0xa56   :  { %7506 = vmatpush3.bf16.msra.mxu0 %v7503_v18 }
 0xa57   :  { %7508 = vmatprep.subr.bf16.mxu0 %v7507_v5 }
 0xa5a   :  { %7510 = vmatpush3.bf16.msra.mxu0 %v7507_v5 }
 0xa5b   :  { %7512 = vmatprep.subr.bf16.mxu0 %v7511_v6 }
 0xa5e   :  { %7514 = vmatpush3.bf16.msra.mxu0 %v7511_v6 }
 0xa5f   :  { %7516 = vmatprep.subr.bf16.mxu0 %v7515_v4 }
 0xa62   :  { %7518 = vmatpush3.bf16.msra.mxu0 %v7515_v4 }
 0xb18   :  { %v7116_v49 = vpop.f32.mrb[142].mxu0 }
 0xb19   :  { %v6400_v1 = vadd.f32 %v7116_v49, %v6781_v56  ;;  %v6383_v46 = vpop.f32.mrb[143].mxu0 }
 0xb1a   :  { %v6399_v53 = vadd.f32 %v6781_v56, %v6383_v46 }
 0xb1b   :  { %v6402_v22 = vmax.f32 %v6400_v1, 0.0 }
 0xb1c   :  { %v6401_v31 = vmax.f32 %v6399_v53, 0.0 }
 0xb1e   :  { %7149 = vmatprep.mubr.f32.mxu1 %v6401_v31 }
 0xb1f   :  { %7150 = vmatmul.mubr.f32.vlgmr.msra.gmra.mrb[158].mxu1 %v6402_v22 }
 0xbf2   :  { %v7151_v3 = vpop.f32.mrb[158].mxu1 }
 0xbf3   :  { %v6498_v0 = vadd.f32 %v7151_v3, %v6782_v61  ;;  %v6492_v21 = vpop.f32.mrb[159].mxu1 }
 0xbf4   :  { %v6493_v60 = vadd.f32 %v6782_v61, %v6492_v21 }
 0xbf5   :  { %v6502_v50 = vmax.f32 %v6498_v0, 0.0 }
 0xbf6   :  { %v6501_v25 = vmax.f32 %v6493_v60, 0.0 }
 0xbf8   :  { %7184 = vmatprep.mubr.f32.mxu0 %v6501_v25 }
 0xbf9   :  { %7185 = vmatmul.mubr.f32.vlgmr.msra.gmra.mrb[144].mxu0 %v6502_v50 }
 0xccc   :  { %v7186_v19 = vpop.f32.mrb[144].mxu0 }
 0xccd   :  { %v6598_v34 = vadd.f32 %v7186_v19, %v6783_v44  ;;  %v6592_v51 = vpop.f32.mrb[145].mxu0 }
 0xcce   :  { %v6593_v42 = vadd.f32 %v6783_v44, %v6592_v51 }
 0xccf   :  { %6602 = vst [vmem:[%s11275_s26 + $0x8] sm:$0xff] %v6598_v34 }
 0xcd0   :  { %6601 = vst [vmem:[%s11275_s26] sm:$0xff] %v6593_v42 }

</bundles_post_ra>
